<compile_context>
chip_gen: v7x
topology: tpu7x:2x2x1
jax: 0.10.0
libtpu: 0.0.40
codegen_flags: <defaults>
</compile_context>

<pallas_src>
import jax
import jax.numpy as jnp
from jax import lax
from jax.experimental import pallas as pl
from jax.experimental.pallas import tpu as pltpu

K = 7        # kernel size
DIL = 3      # dilation
PAD = 9      # padding  -> "same" output since 2*9 == (7-1)*3
TOP = 16     # 8-aligned top row pad (>= PAD) inside the stacked scratch buffer


def _round_up(x, m):
    return (x + m - 1) // m * m


def _attend_one(x_ref, o_ref, pad_ref, n, w, b):
    """x_ref: (Nb, C, H, W) VMEM block, o_ref: (Nb, 1, H, W) VMEM block,
    pad_ref: (2*HP, W+2*PAD) VMEM scratch (padding rows/cols already zero),
    n: static batch index within the block, w: 98 scalar weights
    (index = ic*49 + kh*7 + kw), b: scalar bias."""
    C, H, W = x_ref.shape[1], x_ref.shape[2], x_ref.shape[3]
    HP = pad_ref.shape[0] // 2          # 8-aligned per-channel block height

    # ---- channel sum & max: 4 interleaved partial accumulators (one load per
    #      channel, chain depth ~C/4 instead of C-1) --------------------------
    P = min(4, C)
    first = [x_ref[n, c, :, :].astype(jnp.float32) for c in range(P)]
    sums = list(first)
    maxs = list(first)
    for c in range(P, C):
        xc = x_ref[n, c, :, :].astype(jnp.float32)
        k = c % P
        sums[k] = sums[k] + xc
        maxs[k] = jnp.maximum(maxs[k], xc)
    s, m = sums[0], maxs[0]
    for k in range(1, P):
        s = s + sums[k]
        m = jnp.maximum(m, maxs[k])
    # exact for power-of-two C (true here); ~1 ulp off true division otherwise
    avg = s * (1.0 / C)

    # ---- aligned stores of both conv input channels into the zero-padded
    #      scratch: avg at rows [TOP, TOP+H), max at rows [HP+TOP, HP+TOP+H) --
    pad_ref[TOP:TOP + H, PAD:PAD + W] = avg
    pad_ref[HP + TOP:HP + TOP + H, PAD:PAD + W] = m

    # taps whose dilated offset never reaches valid data (8x8 maps) are skipped
    live_r = [i for i in range(K) if abs(i * DIL - PAD) < H]
    live_c = [j for j in range(K) if abs(j * DIL - PAD) < W]

    # ---- factorized stencil, j-OUTER so only one column slice is live -------
    accs = [jnp.full((H, W), b, jnp.float32),
            jnp.zeros((H, W), jnp.float32),
            jnp.zeros((H, W), jnp.float32),
            jnp.zeros((H, W), jnp.float32)]
    t = 0
    for j in live_c:
        c0 = j * DIL
        col = pad_ref[:, c0:c0 + W]          # (2*HP, W); one lane shift per j
        for i in live_r:
            r0 = i * DIL + (TOP - PAD)       # sublane offset within the block
            term = (w[i * K + j] * col[r0:r0 + H, :]                     # avg
                    + w[K * K + i * K + j] * col[HP + r0:HP + r0 + H, :])  # max
            accs[t % 4] = accs[t % 4] + term
            t += 1

    out = (accs[0] + accs[1]) + (accs[2] + accs[3])
    o_ref[n, 0, :, :] = jax.nn.sigmoid(out).astype(o_ref.dtype)


def _spatial_att_fused_kernel(w_ref, b_ref,
                              x1, x2, x3, x4, x5,
                              o1, o2, o3, o4, o5,
                              p1, p2, p3, p4, p5):
    # read the 98 shared conv weights + bias from SMEM once, reuse everywhere
    w = [w_ref[i] for i in range(2 * K * K)]
    b = b_ref[0]
    for x_ref, o_ref, pad_ref in ((x1, o1, p1), (x2, o2, p2), (x3, o3, p3),
                                  (x4, o4, p4), (x5, o5, p5)):
        # (re)write the padding zeros every grid step: cheap, and correct no
        # matter which TensorCore executes which grid index under megacore.
        pad_ref[...] = jnp.zeros_like(pad_ref)
        for n in range(x_ref.shape[0]):          # batch elements in this block
            _attend_one(x_ref, o_ref, pad_ref, n, w, b)


def _single_core_tpu() -> bool:
    """True for chips with one TensorCore (v5e / v6e) -> collapse the grid."""
    try:
        kind = jax.devices()[0].device_kind.lower()
    except Exception:
        return False
    return any(s in kind for s in ("v5e", "v5 lite", "v5litepod",
                                   "v6e", "v6 lite"))


def spatial_att_bridge(t1, t2, t3, t4, t5, weight, bias, *, batch_grid=None):
    """Forward pass of Spatial_Att_Bridge.
    t*: (N, C_i, H_i, W_i) f32, weight: (1, 2, 7, 7), bias: (1,).
    Returns 5 attention maps of shape (N, 1, H_i, W_i)."""
    ts = (t1, t2, t3, t4, t5)
    N = ts[0].shape[0]
    assert all(t.shape[0] == N for t in ts)

    # v7x (2 TCs): per-batch parallel grid.  v5e/v6e (1 TC): single grid step
    # with the batch loop inside the kernel (cuts per-step + DMA fixed costs).
    if batch_grid is None:
        batch_grid = not _single_core_tpu()
    nb = 1 if batch_grid else N
    grid = (N // nb,)

    w_flat = weight.reshape(-1).astype(jnp.float32)   # idx = ic*49 + kh*7 + kw
    b = bias.reshape(-1).astype(jnp.float32)

    in_specs = [pl.BlockSpec(memory_space=pltpu.SMEM),          # conv weights
                pl.BlockSpec(memory_space=pltpu.SMEM)]          # conv bias
    in_specs += [pl.BlockSpec((nb,) + t.shape[1:], lambda n: (n, 0, 0, 0))
                 for t in ts]

    out_shape = tuple(jax.ShapeDtypeStruct((N, 1, t.shape[2], t.shape[3]),
                                           jnp.float32) for t in ts)
    out_specs = tuple(pl.BlockSpec((nb, 1, t.shape[2], t.shape[3]),
                                   lambda n: (n, 0, 0, 0)) for t in ts)

    # one stacked, 8-aligned, zero-padded scratch buffer per pyramid level
    scratch_shapes = []
    for t in ts:
        H, W = t.shape[2], t.shape[3]
        hp = _round_up(TOP + H + PAD, 8)
        scratch_shapes.append(pltpu.VMEM((2 * hp, W + 2 * PAD), jnp.float32))

    return pl.pallas_call(
        _spatial_att_fused_kernel,
        out_shape=out_shape,
        grid=grid,
        in_specs=in_specs,
        out_specs=out_specs,
        scratch_shapes=scratch_shapes,
        compiler_params=pltpu.CompilerParams(
            dimension_semantics=("parallel",),    # shards batch on v7x 2xTC
            vmem_limit_bytes=32 * 1024 * 1024),
    )(w_flat, b, *ts)


def _reference_single(t, weight, bias):
    """Pure-JAX reference (mirrors the PyTorch forward)."""
    avg = jnp.mean(t, axis=1, keepdims=True)
    mx = jnp.max(t, axis=1, keepdims=True)
    att = jnp.concatenate([avg, mx], axis=1)          # (N, 2, H, W)
    out = lax.conv_general_dilated(
        att, weight, window_strides=(1, 1),
        padding=[(PAD, PAD), (PAD, PAD)],
        rhs_dilation=(DIL, DIL),
        dimension_numbers=("NCHW", "OIHW", "NCHW"))
    return jax.nn.sigmoid(out + bias.reshape(1, 1, 1, 1))


if __name__ == "__main__":
    key = jax.random.PRNGKey(0)
    k_w, k_b, k1, k2, k3, k4, k5 = jax.random.split(key, 7)

    # Conv2d(2, 1, 7) parameters: weight (1, 2, 7, 7), bias (1,)
    fan_in = 2 * K * K
    bound = 1.0 / jnp.sqrt(fan_in)
    weight = jax.random.uniform(k_w, (1, 2, K, K), jnp.float32, -bound, bound)
    bias = jax.random.uniform(k_b, (1,), jnp.float32, -bound, bound)

    # Five pyramid-like inputs (NCHW), small shapes
    t1 = jax.random.normal(k1, (2, 4, 16, 16), jnp.float32)
    t2 = jax.random.normal(k2, (2, 8, 16, 16), jnp.float32)
    t3 = jax.random.normal(k3, (2, 8, 8, 8), jnp.float32)
    t4 = jax.random.normal(k4, (2, 16, 8, 8), jnp.float32)
    t5 = jax.random.normal(k5, (2, 16, 8, 8), jnp.float32)

    outs = spatial_att_bridge(t1, t2, t3, t4, t5, weight, bias)
    outs = jax.block_until_ready(outs)

    # correctness check against pure-JAX reference
    for t, o in zip((t1, t2, t3, t4, t5), outs):
        ref = _reference_single(t, weight, bias)
        assert o.shape == ref.shape, (o.shape, ref.shape)
        assert jnp.allclose(o, ref, rtol=1e-4, atol=1e-5), \
            float(jnp.max(jnp.abs(o - ref)))

    print("KERNEL_OK")
</pallas_src>

<mosaic_0001>
module attributes {stable_mosaic.version = 11 : i64} {
  func.func @_spatial_att_fused_kernel(%arg0: i32, %arg1: memref<98xf32, #tpu.memory_space<smem>>, %arg2: memref<1xf32, #tpu.memory_space<smem>>, %arg3: memref<1x4x16x16xf32, #tpu.memory_space<vmem>>, %arg4: memref<1x8x16x16xf32, #tpu.memory_space<vmem>>, %arg5: memref<1x8x8x8xf32, #tpu.memory_space<vmem>>, %arg6: memref<1x16x8x8xf32, #tpu.memory_space<vmem>>, %arg7: memref<1x16x8x8xf32, #tpu.memory_space<vmem>>, %arg8: memref<1x1x16x16xf32, #tpu.memory_space<vmem>>, %arg9: memref<1x1x16x16xf32, #tpu.memory_space<vmem>>, %arg10: memref<1x1x8x8xf32, #tpu.memory_space<vmem>>, %arg11: memref<1x1x8x8xf32, #tpu.memory_space<vmem>>, %arg12: memref<1x1x8x8xf32, #tpu.memory_space<vmem>>, %arg13: memref<96x34xf32, #tpu.memory_space<vmem>>, %arg14: memref<96x34xf32, #tpu.memory_space<vmem>>, %arg15: memref<80x26xf32, #tpu.memory_space<vmem>>, %arg16: memref<80x26xf32, #tpu.memory_space<vmem>>, %arg17: memref<80x26xf32, #tpu.memory_space<vmem>>) attributes {dimension_semantics = [#tpu.dimension_semantics<parallel>], iteration_bounds = array<i64: 2>, scalar_prefetch = 0 : i64, scratch_operands = 5 : i64, tpu.core_type = #tpu.core_type<tc>, window_params = [{transform_indices = @transform_0, window_bounds = array<i64: 98>}, {transform_indices = @transform_1, window_bounds = array<i64: 1>}, {transform_indices = @transform_2, window_bounds = array<i64: 1, 4, 16, 16>}, {transform_indices = @transform_3, window_bounds = array<i64: 1, 8, 16, 16>}, {transform_indices = @transform_4, window_bounds = array<i64: 1, 8, 8, 8>}, {transform_indices = @transform_5, window_bounds = array<i64: 1, 16, 8, 8>}, {transform_indices = @transform_6, window_bounds = array<i64: 1, 16, 8, 8>}, {transform_indices = @transform_7, window_bounds = array<i64: 1, 1, 16, 16>}, {transform_indices = @transform_8, window_bounds = array<i64: 1, 1, 16, 16>}, {transform_indices = @transform_9, window_bounds = array<i64: 1, 1, 8, 8>}, {transform_indices = @transform_10, window_bounds = array<i64: 1, 1, 8, 8>}, {transform_indices = @transform_11, window_bounds = array<i64: 1, 1, 8, 8>}]} {
    %c0 = arith.constant 0 : index
    %0 = memref.load %arg1[%c0] : memref<98xf32, #tpu.memory_space<smem>>
    %c1 = arith.constant 1 : index
    %1 = memref.load %arg1[%c1] : memref<98xf32, #tpu.memory_space<smem>>
    %c2 = arith.constant 2 : index
    %2 = memref.load %arg1[%c2] : memref<98xf32, #tpu.memory_space<smem>>
    %c3 = arith.constant 3 : index
    %3 = memref.load %arg1[%c3] : memref<98xf32, #tpu.memory_space<smem>>
    %c4 = arith.constant 4 : index
    %4 = memref.load %arg1[%c4] : memref<98xf32, #tpu.memory_space<smem>>
    %c5 = arith.constant 5 : index
    %5 = memref.load %arg1[%c5] : memref<98xf32, #tpu.memory_space<smem>>
    %c6 = arith.constant 6 : index
    %6 = memref.load %arg1[%c6] : memref<98xf32, #tpu.memory_space<smem>>
    %c7 = arith.constant 7 : index
    %7 = memref.load %arg1[%c7] : memref<98xf32, #tpu.memory_space<smem>>
    %c8 = arith.constant 8 : index
    %8 = memref.load %arg1[%c8] : memref<98xf32, #tpu.memory_space<smem>>
    %c9 = arith.constant 9 : index
    %9 = memref.load %arg1[%c9] : memref<98xf32, #tpu.memory_space<smem>>
    %c10 = arith.constant 10 : index
    %10 = memref.load %arg1[%c10] : memref<98xf32, #tpu.memory_space<smem>>
    %c11 = arith.constant 11 : index
    %11 = memref.load %arg1[%c11] : memref<98xf32, #tpu.memory_space<smem>>
    %c12 = arith.constant 12 : index
    %12 = memref.load %arg1[%c12] : memref<98xf32, #tpu.memory_space<smem>>
    %c13 = arith.constant 13 : index
    %13 = memref.load %arg1[%c13] : memref<98xf32, #tpu.memory_space<smem>>
    %c14 = arith.constant 14 : index
    %14 = memref.load %arg1[%c14] : memref<98xf32, #tpu.memory_space<smem>>
    %c15 = arith.constant 15 : index
    %15 = memref.load %arg1[%c15] : memref<98xf32, #tpu.memory_space<smem>>
    %c16 = arith.constant 16 : index
    %16 = memref.load %arg1[%c16] : memref<98xf32, #tpu.memory_space<smem>>
    %c17 = arith.constant 17 : index
    %17 = memref.load %arg1[%c17] : memref<98xf32, #tpu.memory_space<smem>>
    %c18 = arith.constant 18 : index
    %18 = memref.load %arg1[%c18] : memref<98xf32, #tpu.memory_space<smem>>
    %c19 = arith.constant 19 : index
    %19 = memref.load %arg1[%c19] : memref<98xf32, #tpu.memory_space<smem>>
    %c20 = arith.constant 20 : index
    %20 = memref.load %arg1[%c20] : memref<98xf32, #tpu.memory_space<smem>>
    %c21 = arith.constant 21 : index
    %21 = memref.load %arg1[%c21] : memref<98xf32, #tpu.memory_space<smem>>
    %c22 = arith.constant 22 : index
    %22 = memref.load %arg1[%c22] : memref<98xf32, #tpu.memory_space<smem>>
    %c23 = arith.constant 23 : index
    %23 = memref.load %arg1[%c23] : memref<98xf32, #tpu.memory_space<smem>>
    %c24 = arith.constant 24 : index
    %24 = memref.load %arg1[%c24] : memref<98xf32, #tpu.memory_space<smem>>
    %c25 = arith.constant 25 : index
    %25 = memref.load %arg1[%c25] : memref<98xf32, #tpu.memory_space<smem>>
    %c26 = arith.constant 26 : index
    %26 = memref.load %arg1[%c26] : memref<98xf32, #tpu.memory_space<smem>>
    %c27 = arith.constant 27 : index
    %27 = memref.load %arg1[%c27] : memref<98xf32, #tpu.memory_space<smem>>
    %c28 = arith.constant 28 : index
    %28 = memref.load %arg1[%c28] : memref<98xf32, #tpu.memory_space<smem>>
    %c29 = arith.constant 29 : index
    %29 = memref.load %arg1[%c29] : memref<98xf32, #tpu.memory_space<smem>>
    %c30 = arith.constant 30 : index
    %30 = memref.load %arg1[%c30] : memref<98xf32, #tpu.memory_space<smem>>
    %c31 = arith.constant 31 : index
    %31 = memref.load %arg1[%c31] : memref<98xf32, #tpu.memory_space<smem>>
    %c32 = arith.constant 32 : index
    %32 = memref.load %arg1[%c32] : memref<98xf32, #tpu.memory_space<smem>>
    %c33 = arith.constant 33 : index
    %33 = memref.load %arg1[%c33] : memref<98xf32, #tpu.memory_space<smem>>
    %c34 = arith.constant 34 : index
    %34 = memref.load %arg1[%c34] : memref<98xf32, #tpu.memory_space<smem>>
    %c35 = arith.constant 35 : index
    %35 = memref.load %arg1[%c35] : memref<98xf32, #tpu.memory_space<smem>>
    %c36 = arith.constant 36 : index
    %36 = memref.load %arg1[%c36] : memref<98xf32, #tpu.memory_space<smem>>
    %c37 = arith.constant 37 : index
    %37 = memref.load %arg1[%c37] : memref<98xf32, #tpu.memory_space<smem>>
    %c38 = arith.constant 38 : index
    %38 = memref.load %arg1[%c38] : memref<98xf32, #tpu.memory_space<smem>>
    %c39 = arith.constant 39 : index
    %39 = memref.load %arg1[%c39] : memref<98xf32, #tpu.memory_space<smem>>
    %c40 = arith.constant 40 : index
    %40 = memref.load %arg1[%c40] : memref<98xf32, #tpu.memory_space<smem>>
    %c41 = arith.constant 41 : index
    %41 = memref.load %arg1[%c41] : memref<98xf32, #tpu.memory_space<smem>>
    %c42 = arith.constant 42 : index
    %42 = memref.load %arg1[%c42] : memref<98xf32, #tpu.memory_space<smem>>
    %c43 = arith.constant 43 : index
    %43 = memref.load %arg1[%c43] : memref<98xf32, #tpu.memory_space<smem>>
    %c44 = arith.constant 44 : index
    %44 = memref.load %arg1[%c44] : memref<98xf32, #tpu.memory_space<smem>>
    %c45 = arith.constant 45 : index
    %45 = memref.load %arg1[%c45] : memref<98xf32, #tpu.memory_space<smem>>
    %c46 = arith.constant 46 : index
    %46 = memref.load %arg1[%c46] : memref<98xf32, #tpu.memory_space<smem>>
    %c47 = arith.constant 47 : index
    %47 = memref.load %arg1[%c47] : memref<98xf32, #tpu.memory_space<smem>>
    %c48 = arith.constant 48 : index
    %48 = memref.load %arg1[%c48] : memref<98xf32, #tpu.memory_space<smem>>
    %c49 = arith.constant 49 : index
    %49 = memref.load %arg1[%c49] : memref<98xf32, #tpu.memory_space<smem>>
    %c50 = arith.constant 50 : index
    %50 = memref.load %arg1[%c50] : memref<98xf32, #tpu.memory_space<smem>>
    %c51 = arith.constant 51 : index
    %51 = memref.load %arg1[%c51] : memref<98xf32, #tpu.memory_space<smem>>
    %c52 = arith.constant 52 : index
    %52 = memref.load %arg1[%c52] : memref<98xf32, #tpu.memory_space<smem>>
    %c53 = arith.constant 53 : index
    %53 = memref.load %arg1[%c53] : memref<98xf32, #tpu.memory_space<smem>>
    %c54 = arith.constant 54 : index
    %54 = memref.load %arg1[%c54] : memref<98xf32, #tpu.memory_space<smem>>
    %c55 = arith.constant 55 : index
    %55 = memref.load %arg1[%c55] : memref<98xf32, #tpu.memory_space<smem>>
    %c56 = arith.constant 56 : index
    %56 = memref.load %arg1[%c56] : memref<98xf32, #tpu.memory_space<smem>>
    %c57 = arith.constant 57 : index
    %57 = memref.load %arg1[%c57] : memref<98xf32, #tpu.memory_space<smem>>
    %c58 = arith.constant 58 : index
    %58 = memref.load %arg1[%c58] : memref<98xf32, #tpu.memory_space<smem>>
    %c59 = arith.constant 59 : index
    %59 = memref.load %arg1[%c59] : memref<98xf32, #tpu.memory_space<smem>>
    %c60 = arith.constant 60 : index
    %60 = memref.load %arg1[%c60] : memref<98xf32, #tpu.memory_space<smem>>
    %c61 = arith.constant 61 : index
    %61 = memref.load %arg1[%c61] : memref<98xf32, #tpu.memory_space<smem>>
    %c62 = arith.constant 62 : index
    %62 = memref.load %arg1[%c62] : memref<98xf32, #tpu.memory_space<smem>>
    %c63 = arith.constant 63 : index
    %63 = memref.load %arg1[%c63] : memref<98xf32, #tpu.memory_space<smem>>
    %c64 = arith.constant 64 : index
    %64 = memref.load %arg1[%c64] : memref<98xf32, #tpu.memory_space<smem>>
    %c65 = arith.constant 65 : index
    %65 = memref.load %arg1[%c65] : memref<98xf32, #tpu.memory_space<smem>>
    %c66 = arith.constant 66 : index
    %66 = memref.load %arg1[%c66] : memref<98xf32, #tpu.memory_space<smem>>
    %c67 = arith.constant 67 : index
    %67 = memref.load %arg1[%c67] : memref<98xf32, #tpu.memory_space<smem>>
    %c68 = arith.constant 68 : index
    %68 = memref.load %arg1[%c68] : memref<98xf32, #tpu.memory_space<smem>>
    %c69 = arith.constant 69 : index
    %69 = memref.load %arg1[%c69] : memref<98xf32, #tpu.memory_space<smem>>
    %c70 = arith.constant 70 : index
    %70 = memref.load %arg1[%c70] : memref<98xf32, #tpu.memory_space<smem>>
    %c71 = arith.constant 71 : index
    %71 = memref.load %arg1[%c71] : memref<98xf32, #tpu.memory_space<smem>>
    %c72 = arith.constant 72 : index
    %72 = memref.load %arg1[%c72] : memref<98xf32, #tpu.memory_space<smem>>
    %c73 = arith.constant 73 : index
    %73 = memref.load %arg1[%c73] : memref<98xf32, #tpu.memory_space<smem>>
    %c74 = arith.constant 74 : index
    %74 = memref.load %arg1[%c74] : memref<98xf32, #tpu.memory_space<smem>>
    %c75 = arith.constant 75 : index
    %75 = memref.load %arg1[%c75] : memref<98xf32, #tpu.memory_space<smem>>
    %c76 = arith.constant 76 : index
    %76 = memref.load %arg1[%c76] : memref<98xf32, #tpu.memory_space<smem>>
    %c77 = arith.constant 77 : index
    %77 = memref.load %arg1[%c77] : memref<98xf32, #tpu.memory_space<smem>>
    %c78 = arith.constant 78 : index
    %78 = memref.load %arg1[%c78] : memref<98xf32, #tpu.memory_space<smem>>
    %c79 = arith.constant 79 : index
    %79 = memref.load %arg1[%c79] : memref<98xf32, #tpu.memory_space<smem>>
    %c80 = arith.constant 80 : index
    %80 = memref.load %arg1[%c80] : memref<98xf32, #tpu.memory_space<smem>>
    %c81 = arith.constant 81 : index
    %81 = memref.load %arg1[%c81] : memref<98xf32, #tpu.memory_space<smem>>
    %c82 = arith.constant 82 : index
    %82 = memref.load %arg1[%c82] : memref<98xf32, #tpu.memory_space<smem>>
    %c83 = arith.constant 83 : index
    %83 = memref.load %arg1[%c83] : memref<98xf32, #tpu.memory_space<smem>>
    %c84 = arith.constant 84 : index
    %84 = memref.load %arg1[%c84] : memref<98xf32, #tpu.memory_space<smem>>
    %c85 = arith.constant 85 : index
    %85 = memref.load %arg1[%c85] : memref<98xf32, #tpu.memory_space<smem>>
    %c86 = arith.constant 86 : index
    %86 = memref.load %arg1[%c86] : memref<98xf32, #tpu.memory_space<smem>>
    %c87 = arith.constant 87 : index
    %87 = memref.load %arg1[%c87] : memref<98xf32, #tpu.memory_space<smem>>
    %c88 = arith.constant 88 : index
    %88 = memref.load %arg1[%c88] : memref<98xf32, #tpu.memory_space<smem>>
    %c89 = arith.constant 89 : index
    %89 = memref.load %arg1[%c89] : memref<98xf32, #tpu.memory_space<smem>>
    %c90 = arith.constant 90 : index
    %90 = memref.load %arg1[%c90] : memref<98xf32, #tpu.memory_space<smem>>
    %c91 = arith.constant 91 : index
    %91 = memref.load %arg1[%c91] : memref<98xf32, #tpu.memory_space<smem>>
    %c92 = arith.constant 92 : index
    %92 = memref.load %arg1[%c92] : memref<98xf32, #tpu.memory_space<smem>>
    %c93 = arith.constant 93 : index
    %93 = memref.load %arg1[%c93] : memref<98xf32, #tpu.memory_space<smem>>
    %c94 = arith.constant 94 : index
    %94 = memref.load %arg1[%c94] : memref<98xf32, #tpu.memory_space<smem>>
    %c95 = arith.constant 95 : index
    %95 = memref.load %arg1[%c95] : memref<98xf32, #tpu.memory_space<smem>>
    %c96 = arith.constant 96 : index
    %96 = memref.load %arg1[%c96] : memref<98xf32, #tpu.memory_space<smem>>
    %c97 = arith.constant 97 : index
    %97 = memref.load %arg1[%c97] : memref<98xf32, #tpu.memory_space<smem>>
    %c0_0 = arith.constant 0 : index
    %98 = memref.load %arg2[%c0_0] : memref<1xf32, #tpu.memory_space<smem>>
    %cst = arith.constant 0.000000e+00 : f32
    %99 = vector.broadcast %cst : f32 to vector<96x34xf32>
    %c0_1 = arith.constant 0 : index
    %c0_2 = arith.constant 0 : index
    %100 = vector.load %arg13[%c0_1, %c0_2] : memref<96x34xf32, #tpu.memory_space<vmem>>, vector<96x34xf32>
    tpu.vector_store %arg13[%c0_1, %c0_2], %99 {strides = array<i32>} : memref<96x34xf32, #tpu.memory_space<vmem>>, vector<96x34xf32>,
    %c0_3 = arith.constant 0 : index
    %c0_4 = arith.constant 0 : index
    %c0_5 = arith.constant 0 : index
    %c0_6 = arith.constant 0 : index
    %101 = vector.load %arg3[%c0_3, %c0_4, %c0_5, %c0_6] : memref<1x4x16x16xf32, #tpu.memory_space<vmem>>, vector<1x1x16x16xf32>
    %102 = vector.shape_cast %101 : vector<1x1x16x16xf32> to vector<16x16xf32>
    %c0_7 = arith.constant 0 : index
    %c1_8 = arith.constant 1 : index
    %c0_9 = arith.constant 0 : index
    %c0_10 = arith.constant 0 : index
    %103 = vector.load %arg3[%c0_7, %c1_8, %c0_9, %c0_10] : memref<1x4x16x16xf32, #tpu.memory_space<vmem>>, vector<1x1x16x16xf32>
    %104 = vector.shape_cast %103 : vector<1x1x16x16xf32> to vector<16x16xf32>
    %c0_11 = arith.constant 0 : index
    %c2_12 = arith.constant 2 : index
    %c0_13 = arith.constant 0 : index
    %c0_14 = arith.constant 0 : index
    %105 = vector.load %arg3[%c0_11, %c2_12, %c0_13, %c0_14] : memref<1x4x16x16xf32, #tpu.memory_space<vmem>>, vector<1x1x16x16xf32>
    %106 = vector.shape_cast %105 : vector<1x1x16x16xf32> to vector<16x16xf32>
    %c0_15 = arith.constant 0 : index
    %c3_16 = arith.constant 3 : index
    %c0_17 = arith.constant 0 : index
    %c0_18 = arith.constant 0 : index
    %107 = vector.load %arg3[%c0_15, %c3_16, %c0_17, %c0_18] : memref<1x4x16x16xf32, #tpu.memory_space<vmem>>, vector<1x1x16x16xf32>
    %108 = vector.shape_cast %107 : vector<1x1x16x16xf32> to vector<16x16xf32>
    %109 = arith.addf %102, %104 : vector<16x16xf32>
    %110 = arith.maximumf %102, %104 : vector<16x16xf32>
    %111 = arith.addf %109, %106 : vector<16x16xf32>
    %112 = arith.maximumf %110, %106 : vector<16x16xf32>
    %113 = arith.addf %111, %108 : vector<16x16xf32>
    %114 = arith.maximumf %112, %108 : vector<16x16xf32>
    %cst_19 = arith.constant 2.500000e-01 : f32
    %115 = vector.broadcast %cst_19 : f32 to vector<16x16xf32>
    %116 = arith.mulf %113, %115 : vector<16x16xf32>
    %c16_20 = arith.constant 16 : index
    %c9_21 = arith.constant 9 : index
    %117 = vector.load %arg13[%c16_20, %c9_21] : memref<96x34xf32, #tpu.memory_space<vmem>>, vector<16x16xf32>
    tpu.vector_store %arg13[%c16_20, %c9_21], %116 {strides = array<i32>} : memref<96x34xf32, #tpu.memory_space<vmem>>, vector<16x16xf32>,
    %c64_22 = arith.constant 64 : index
    %c9_23 = arith.constant 9 : index
    %118 = vector.load %arg13[%c64_22, %c9_23] : memref<96x34xf32, #tpu.memory_space<vmem>>, vector<16x16xf32>
    tpu.vector_store %arg13[%c64_22, %c9_23], %114 {strides = array<i32>} : memref<96x34xf32, #tpu.memory_space<vmem>>, vector<16x16xf32>,
    %119 = vector.broadcast %98 : f32 to vector<16x16xf32>
    %cst_24 = arith.constant 0.000000e+00 : f32
    %120 = vector.broadcast %cst_24 : f32 to vector<16x16xf32>
    %cst_25 = arith.constant 0.000000e+00 : f32
    %121 = vector.broadcast %cst_25 : f32 to vector<16x16xf32>
    %cst_26 = arith.constant 0.000000e+00 : f32
    %122 = vector.broadcast %cst_26 : f32 to vector<16x16xf32>
    %c0_27 = arith.constant 0 : index
    %c0_28 = arith.constant 0 : index
    %123 = vector.load %arg13[%c0_27, %c0_28] : memref<96x34xf32, #tpu.memory_space<vmem>>, vector<96x16xf32>
    %124 = vector.extract_strided_slice %123 {offsets = [7, 0], sizes = [16, 16], strides = [1, 1]} : vector<96x16xf32> to vector<16x16xf32>
    %125 = vector.broadcast %0 : f32 to vector<16x16xf32>
    %126 = arith.mulf %125, %124 : vector<16x16xf32>
    %127 = vector.extract_strided_slice %123 {offsets = [55, 0], sizes = [16, 16], strides = [1, 1]} : vector<96x16xf32> to vector<16x16xf32>
    %128 = vector.broadcast %49 : f32 to vector<16x16xf32>
    %129 = arith.mulf %128, %127 : vector<16x16xf32>
    %130 = arith.addf %126, %129 : vector<16x16xf32>
    %131 = arith.addf %119, %130 : vector<16x16xf32>
    %132 = vector.extract_strided_slice %123 {offsets = [10, 0], sizes = [16, 16], strides = [1, 1]} : vector<96x16xf32> to vector<16x16xf32>
    %133 = vector.broadcast %7 : f32 to vector<16x16xf32>
    %134 = arith.mulf %133, %132 : vector<16x16xf32>
    %135 = vector.extract_strided_slice %123 {offsets = [58, 0], sizes = [16, 16], strides = [1, 1]} : vector<96x16xf32> to vector<16x16xf32>
    %136 = vector.broadcast %56 : f32 to vector<16x16xf32>
    %137 = arith.mulf %136, %135 : vector<16x16xf32>
    %138 = arith.addf %134, %137 : vector<16x16xf32>
    %139 = arith.addf %120, %138 : vector<16x16xf32>
    %140 = vector.extract_strided_slice %123 {offsets = [13, 0], sizes = [16, 16], strides = [1, 1]} : vector<96x16xf32> to vector<16x16xf32>
    %141 = vector.broadcast %14 : f32 to vector<16x16xf32>
    %142 = arith.mulf %141, %140 : vector<16x16xf32>
    %143 = vector.extract_strided_slice %123 {offsets = [61, 0], sizes = [16, 16], strides = [1, 1]} : vector<96x16xf32> to vector<16x16xf32>
    %144 = vector.broadcast %63 : f32 to vector<16x16xf32>
    %145 = arith.mulf %144, %143 : vector<16x16xf32>
    %146 = arith.addf %142, %145 : vector<16x16xf32>
    %147 = arith.addf %121, %146 : vector<16x16xf32>
    %148 = vector.extract_strided_slice %123 {offsets = [16, 0], sizes = [16, 16], strides = [1, 1]} : vector<96x16xf32> to vector<16x16xf32>
    %149 = vector.broadcast %21 : f32 to vector<16x16xf32>
    %150 = arith.mulf %149, %148 : vector<16x16xf32>
    %151 = vector.extract_strided_slice %123 {offsets = [64, 0], sizes = [16, 16], strides = [1, 1]} : vector<96x16xf32> to vector<16x16xf32>
    %152 = vector.broadcast %70 : f32 to vector<16x16xf32>
    %153 = arith.mulf %152, %151 : vector<16x16xf32>
    %154 = arith.addf %150, %153 : vector<16x16xf32>
    %155 = arith.addf %122, %154 : vector<16x16xf32>
    %156 = vector.extract_strided_slice %123 {offsets = [19, 0], sizes = [16, 16], strides = [1, 1]} : vector<96x16xf32> to vector<16x16xf32>
    %157 = vector.broadcast %28 : f32 to vector<16x16xf32>
    %158 = arith.mulf %157, %156 : vector<16x16xf32>
    %159 = vector.extract_strided_slice %123 {offsets = [67, 0], sizes = [16, 16], strides = [1, 1]} : vector<96x16xf32> to vector<16x16xf32>
    %160 = vector.broadcast %77 : f32 to vector<16x16xf32>
    %161 = arith.mulf %160, %159 : vector<16x16xf32>
    %162 = arith.addf %158, %161 : vector<16x16xf32>
    %163 = arith.addf %131, %162 : vector<16x16xf32>
    %164 = vector.extract_strided_slice %123 {offsets = [22, 0], sizes = [16, 16], strides = [1, 1]} : vector<96x16xf32> to vector<16x16xf32>
    %165 = vector.broadcast %35 : f32 to vector<16x16xf32>
    %166 = arith.mulf %165, %164 : vector<16x16xf32>
    %167 = vector.extract_strided_slice %123 {offsets = [70, 0], sizes = [16, 16], strides = [1, 1]} : vector<96x16xf32> to vector<16x16xf32>
    %168 = vector.broadcast %84 : f32 to vector<16x16xf32>
    %169 = arith.mulf %168, %167 : vector<16x16xf32>
    %170 = arith.addf %166, %169 : vector<16x16xf32>
    %171 = arith.addf %139, %170 : vector<16x16xf32>
    %172 = vector.extract_strided_slice %123 {offsets = [25, 0], sizes = [16, 16], strides = [1, 1]} : vector<96x16xf32> to vector<16x16xf32>
    %173 = vector.broadcast %42 : f32 to vector<16x16xf32>
    %174 = arith.mulf %173, %172 : vector<16x16xf32>
    %175 = vector.extract_strided_slice %123 {offsets = [73, 0], sizes = [16, 16], strides = [1, 1]} : vector<96x16xf32> to vector<16x16xf32>
    %176 = vector.broadcast %91 : f32 to vector<16x16xf32>
    %177 = arith.mulf %176, %175 : vector<16x16xf32>
    %178 = arith.addf %174, %177 : vector<16x16xf32>
    %179 = arith.addf %147, %178 : vector<16x16xf32>
    %c0_29 = arith.constant 0 : index
    %c3_30 = arith.constant 3 : index
    %180 = vector.load %arg13[%c0_29, %c3_30] : memref<96x34xf32, #tpu.memory_space<vmem>>, vector<96x16xf32>
    %181 = vector.extract_strided_slice %180 {offsets = [7, 0], sizes = [16, 16], strides = [1, 1]} : vector<96x16xf32> to vector<16x16xf32>
    %182 = vector.broadcast %1 : f32 to vector<16x16xf32>
    %183 = arith.mulf %182, %181 : vector<16x16xf32>
    %184 = vector.extract_strided_slice %180 {offsets = [55, 0], sizes = [16, 16], strides = [1, 1]} : vector<96x16xf32> to vector<16x16xf32>
    %185 = vector.broadcast %50 : f32 to vector<16x16xf32>
    %186 = arith.mulf %185, %184 : vector<16x16xf32>
    %187 = arith.addf %183, %186 : vector<16x16xf32>
    %188 = arith.addf %155, %187 : vector<16x16xf32>
    %189 = vector.extract_strided_slice %180 {offsets = [10, 0], sizes = [16, 16], strides = [1, 1]} : vector<96x16xf32> to vector<16x16xf32>
    %190 = vector.broadcast %8 : f32 to vector<16x16xf32>
    %191 = arith.mulf %190, %189 : vector<16x16xf32>
    %192 = vector.extract_strided_slice %180 {offsets = [58, 0], sizes = [16, 16], strides = [1, 1]} : vector<96x16xf32> to vector<16x16xf32>
    %193 = vector.broadcast %57 : f32 to vector<16x16xf32>
    %194 = arith.mulf %193, %192 : vector<16x16xf32>
    %195 = arith.addf %191, %194 : vector<16x16xf32>
    %196 = arith.addf %163, %195 : vector<16x16xf32>
    %197 = vector.extract_strided_slice %180 {offsets = [13, 0], sizes = [16, 16], strides = [1, 1]} : vector<96x16xf32> to vector<16x16xf32>
    %198 = vector.broadcast %15 : f32 to vector<16x16xf32>
    %199 = arith.mulf %198, %197 : vector<16x16xf32>
    %200 = vector.extract_strided_slice %180 {offsets = [61, 0], sizes = [16, 16], strides = [1, 1]} : vector<96x16xf32> to vector<16x16xf32>
    %201 = vector.broadcast %64 : f32 to vector<16x16xf32>
    %202 = arith.mulf %201, %200 : vector<16x16xf32>
    %203 = arith.addf %199, %202 : vector<16x16xf32>
    %204 = arith.addf %171, %203 : vector<16x16xf32>
    %205 = vector.extract_strided_slice %180 {offsets = [16, 0], sizes = [16, 16], strides = [1, 1]} : vector<96x16xf32> to vector<16x16xf32>
    %206 = vector.broadcast %22 : f32 to vector<16x16xf32>
    %207 = arith.mulf %206, %205 : vector<16x16xf32>
    %208 = vector.extract_strided_slice %180 {offsets = [64, 0], sizes = [16, 16], strides = [1, 1]} : vector<96x16xf32> to vector<16x16xf32>
    %209 = vector.broadcast %71 : f32 to vector<16x16xf32>
    %210 = arith.mulf %209, %208 : vector<16x16xf32>
    %211 = arith.addf %207, %210 : vector<16x16xf32>
    %212 = arith.addf %179, %211 : vector<16x16xf32>
    %213 = vector.extract_strided_slice %180 {offsets = [19, 0], sizes = [16, 16], strides = [1, 1]} : vector<96x16xf32> to vector<16x16xf32>
    %214 = vector.broadcast %29 : f32 to vector<16x16xf32>
    %215 = arith.mulf %214, %213 : vector<16x16xf32>
    %216 = vector.extract_strided_slice %180 {offsets = [67, 0], sizes = [16, 16], strides = [1, 1]} : vector<96x16xf32> to vector<16x16xf32>
    %217 = vector.broadcast %78 : f32 to vector<16x16xf32>
    %218 = arith.mulf %217, %216 : vector<16x16xf32>
    %219 = arith.addf %215, %218 : vector<16x16xf32>
    %220 = arith.addf %188, %219 : vector<16x16xf32>
    %221 = vector.extract_strided_slice %180 {offsets = [22, 0], sizes = [16, 16], strides = [1, 1]} : vector<96x16xf32> to vector<16x16xf32>
    %222 = vector.broadcast %36 : f32 to vector<16x16xf32>
    %223 = arith.mulf %222, %221 : vector<16x16xf32>
    %224 = vector.extract_strided_slice %180 {offsets = [70, 0], sizes = [16, 16], strides = [1, 1]} : vector<96x16xf32> to vector<16x16xf32>
    %225 = vector.broadcast %85 : f32 to vector<16x16xf32>
    %226 = arith.mulf %225, %224 : vector<16x16xf32>
    %227 = arith.addf %223, %226 : vector<16x16xf32>
    %228 = arith.addf %196, %227 : vector<16x16xf32>
    %229 = vector.extract_strided_slice %180 {offsets = [25, 0], sizes = [16, 16], strides = [1, 1]} : vector<96x16xf32> to vector<16x16xf32>
    %230 = vector.broadcast %43 : f32 to vector<16x16xf32>
    %231 = arith.mulf %230, %229 : vector<16x16xf32>
    %232 = vector.extract_strided_slice %180 {offsets = [73, 0], sizes = [16, 16], strides = [1, 1]} : vector<96x16xf32> to vector<16x16xf32>
    %233 = vector.broadcast %92 : f32 to vector<16x16xf32>
    %234 = arith.mulf %233, %232 : vector<16x16xf32>
    %235 = arith.addf %231, %234 : vector<16x16xf32>
    %236 = arith.addf %204, %235 : vector<16x16xf32>
    %c0_31 = arith.constant 0 : index
    %c6_32 = arith.constant 6 : index
    %237 = vector.load %arg13[%c0_31, %c6_32] : memref<96x34xf32, #tpu.memory_space<vmem>>, vector<96x16xf32>
    %238 = vector.extract_strided_slice %237 {offsets = [7, 0], sizes = [16, 16], strides = [1, 1]} : vector<96x16xf32> to vector<16x16xf32>
    %239 = vector.broadcast %2 : f32 to vector<16x16xf32>
    %240 = arith.mulf %239, %238 : vector<16x16xf32>
    %241 = vector.extract_strided_slice %237 {offsets = [55, 0], sizes = [16, 16], strides = [1, 1]} : vector<96x16xf32> to vector<16x16xf32>
    %242 = vector.broadcast %51 : f32 to vector<16x16xf32>
    %243 = arith.mulf %242, %241 : vector<16x16xf32>
    %244 = arith.addf %240, %243 : vector<16x16xf32>
    %245 = arith.addf %212, %244 : vector<16x16xf32>
    %246 = vector.extract_strided_slice %237 {offsets = [10, 0], sizes = [16, 16], strides = [1, 1]} : vector<96x16xf32> to vector<16x16xf32>
    %247 = vector.broadcast %9 : f32 to vector<16x16xf32>
    %248 = arith.mulf %247, %246 : vector<16x16xf32>
    %249 = vector.extract_strided_slice %237 {offsets = [58, 0], sizes = [16, 16], strides = [1, 1]} : vector<96x16xf32> to vector<16x16xf32>
    %250 = vector.broadcast %58 : f32 to vector<16x16xf32>
    %251 = arith.mulf %250, %249 : vector<16x16xf32>
    %252 = arith.addf %248, %251 : vector<16x16xf32>
    %253 = arith.addf %220, %252 : vector<16x16xf32>
    %254 = vector.extract_strided_slice %237 {offsets = [13, 0], sizes = [16, 16], strides = [1, 1]} : vector<96x16xf32> to vector<16x16xf32>
    %255 = vector.broadcast %16 : f32 to vector<16x16xf32>
    %256 = arith.mulf %255, %254 : vector<16x16xf32>
    %257 = vector.extract_strided_slice %237 {offsets = [61, 0], sizes = [16, 16], strides = [1, 1]} : vector<96x16xf32> to vector<16x16xf32>
    %258 = vector.broadcast %65 : f32 to vector<16x16xf32>
    %259 = arith.mulf %258, %257 : vector<16x16xf32>
    %260 = arith.addf %256, %259 : vector<16x16xf32>
    %261 = arith.addf %228, %260 : vector<16x16xf32>
    %262 = vector.extract_strided_slice %237 {offsets = [16, 0], sizes = [16, 16], strides = [1, 1]} : vector<96x16xf32> to vector<16x16xf32>
    %263 = vector.broadcast %23 : f32 to vector<16x16xf32>
    %264 = arith.mulf %263, %262 : vector<16x16xf32>
    %265 = vector.extract_strided_slice %237 {offsets = [64, 0], sizes = [16, 16], strides = [1, 1]} : vector<96x16xf32> to vector<16x16xf32>
    %266 = vector.broadcast %72 : f32 to vector<16x16xf32>
    %267 = arith.mulf %266, %265 : vector<16x16xf32>
    %268 = arith.addf %264, %267 : vector<16x16xf32>
    %269 = arith.addf %236, %268 : vector<16x16xf32>
    %270 = vector.extract_strided_slice %237 {offsets = [19, 0], sizes = [16, 16], strides = [1, 1]} : vector<96x16xf32> to vector<16x16xf32>
    %271 = vector.broadcast %30 : f32 to vector<16x16xf32>
    %272 = arith.mulf %271, %270 : vector<16x16xf32>
    %273 = vector.extract_strided_slice %237 {offsets = [67, 0], sizes = [16, 16], strides = [1, 1]} : vector<96x16xf32> to vector<16x16xf32>
    %274 = vector.broadcast %79 : f32 to vector<16x16xf32>
    %275 = arith.mulf %274, %273 : vector<16x16xf32>
    %276 = arith.addf %272, %275 : vector<16x16xf32>
    %277 = arith.addf %245, %276 : vector<16x16xf32>
    %278 = vector.extract_strided_slice %237 {offsets = [22, 0], sizes = [16, 16], strides = [1, 1]} : vector<96x16xf32> to vector<16x16xf32>
    %279 = vector.broadcast %37 : f32 to vector<16x16xf32>
    %280 = arith.mulf %279, %278 : vector<16x16xf32>
    %281 = vector.extract_strided_slice %237 {offsets = [70, 0], sizes = [16, 16], strides = [1, 1]} : vector<96x16xf32> to vector<16x16xf32>
    %282 = vector.broadcast %86 : f32 to vector<16x16xf32>
    %283 = arith.mulf %282, %281 : vector<16x16xf32>
    %284 = arith.addf %280, %283 : vector<16x16xf32>
    %285 = arith.addf %253, %284 : vector<16x16xf32>
    %286 = vector.extract_strided_slice %237 {offsets = [25, 0], sizes = [16, 16], strides = [1, 1]} : vector<96x16xf32> to vector<16x16xf32>
    %287 = vector.broadcast %44 : f32 to vector<16x16xf32>
    %288 = arith.mulf %287, %286 : vector<16x16xf32>
    %289 = vector.extract_strided_slice %237 {offsets = [73, 0], sizes = [16, 16], strides = [1, 1]} : vector<96x16xf32> to vector<16x16xf32>
    %290 = vector.broadcast %93 : f32 to vector<16x16xf32>
    %291 = arith.mulf %290, %289 : vector<16x16xf32>
    %292 = arith.addf %288, %291 : vector<16x16xf32>
    %293 = arith.addf %261, %292 : vector<16x16xf32>
    %c0_33 = arith.constant 0 : index
    %c9_34 = arith.constant 9 : index
    %294 = vector.load %arg13[%c0_33, %c9_34] : memref<96x34xf32, #tpu.memory_space<vmem>>, vector<96x16xf32>
    %295 = vector.extract_strided_slice %294 {offsets = [7, 0], sizes = [16, 16], strides = [1, 1]} : vector<96x16xf32> to vector<16x16xf32>
    %296 = vector.broadcast %3 : f32 to vector<16x16xf32>
    %297 = arith.mulf %296, %295 : vector<16x16xf32>
    %298 = vector.extract_strided_slice %294 {offsets = [55, 0], sizes = [16, 16], strides = [1, 1]} : vector<96x16xf32> to vector<16x16xf32>
    %299 = vector.broadcast %52 : f32 to vector<16x16xf32>
    %300 = arith.mulf %299, %298 : vector<16x16xf32>
    %301 = arith.addf %297, %300 : vector<16x16xf32>
    %302 = arith.addf %269, %301 : vector<16x16xf32>
    %303 = vector.extract_strided_slice %294 {offsets = [10, 0], sizes = [16, 16], strides = [1, 1]} : vector<96x16xf32> to vector<16x16xf32>
    %304 = vector.broadcast %10 : f32 to vector<16x16xf32>
    %305 = arith.mulf %304, %303 : vector<16x16xf32>
    %306 = vector.extract_strided_slice %294 {offsets = [58, 0], sizes = [16, 16], strides = [1, 1]} : vector<96x16xf32> to vector<16x16xf32>
    %307 = vector.broadcast %59 : f32 to vector<16x16xf32>
    %308 = arith.mulf %307, %306 : vector<16x16xf32>
    %309 = arith.addf %305, %308 : vector<16x16xf32>
    %310 = arith.addf %277, %309 : vector<16x16xf32>
    %311 = vector.extract_strided_slice %294 {offsets = [13, 0], sizes = [16, 16], strides = [1, 1]} : vector<96x16xf32> to vector<16x16xf32>
    %312 = vector.broadcast %17 : f32 to vector<16x16xf32>
    %313 = arith.mulf %312, %311 : vector<16x16xf32>
    %314 = vector.extract_strided_slice %294 {offsets = [61, 0], sizes = [16, 16], strides = [1, 1]} : vector<96x16xf32> to vector<16x16xf32>
    %315 = vector.broadcast %66 : f32 to vector<16x16xf32>
    %316 = arith.mulf %315, %314 : vector<16x16xf32>
    %317 = arith.addf %313, %316 : vector<16x16xf32>
    %318 = arith.addf %285, %317 : vector<16x16xf32>
    %319 = vector.extract_strided_slice %294 {offsets = [16, 0], sizes = [16, 16], strides = [1, 1]} : vector<96x16xf32> to vector<16x16xf32>
    %320 = vector.broadcast %24 : f32 to vector<16x16xf32>
    %321 = arith.mulf %320, %319 : vector<16x16xf32>
    %322 = vector.extract_strided_slice %294 {offsets = [64, 0], sizes = [16, 16], strides = [1, 1]} : vector<96x16xf32> to vector<16x16xf32>
    %323 = vector.broadcast %73 : f32 to vector<16x16xf32>
    %324 = arith.mulf %323, %322 : vector<16x16xf32>
    %325 = arith.addf %321, %324 : vector<16x16xf32>
    %326 = arith.addf %293, %325 : vector<16x16xf32>
    %327 = vector.extract_strided_slice %294 {offsets = [19, 0], sizes = [16, 16], strides = [1, 1]} : vector<96x16xf32> to vector<16x16xf32>
    %328 = vector.broadcast %31 : f32 to vector<16x16xf32>
    %329 = arith.mulf %328, %327 : vector<16x16xf32>
    %330 = vector.extract_strided_slice %294 {offsets = [67, 0], sizes = [16, 16], strides = [1, 1]} : vector<96x16xf32> to vector<16x16xf32>
    %331 = vector.broadcast %80 : f32 to vector<16x16xf32>
    %332 = arith.mulf %331, %330 : vector<16x16xf32>
    %333 = arith.addf %329, %332 : vector<16x16xf32>
    %334 = arith.addf %302, %333 : vector<16x16xf32>
    %335 = vector.extract_strided_slice %294 {offsets = [22, 0], sizes = [16, 16], strides = [1, 1]} : vector<96x16xf32> to vector<16x16xf32>
    %336 = vector.broadcast %38 : f32 to vector<16x16xf32>
    %337 = arith.mulf %336, %335 : vector<16x16xf32>
    %338 = vector.extract_strided_slice %294 {offsets = [70, 0], sizes = [16, 16], strides = [1, 1]} : vector<96x16xf32> to vector<16x16xf32>
    %339 = vector.broadcast %87 : f32 to vector<16x16xf32>
    %340 = arith.mulf %339, %338 : vector<16x16xf32>
    %341 = arith.addf %337, %340 : vector<16x16xf32>
    %342 = arith.addf %310, %341 : vector<16x16xf32>
    %343 = vector.extract_strided_slice %294 {offsets = [25, 0], sizes = [16, 16], strides = [1, 1]} : vector<96x16xf32> to vector<16x16xf32>
    %344 = vector.broadcast %45 : f32 to vector<16x16xf32>
    %345 = arith.mulf %344, %343 : vector<16x16xf32>
    %346 = vector.extract_strided_slice %294 {offsets = [73, 0], sizes = [16, 16], strides = [1, 1]} : vector<96x16xf32> to vector<16x16xf32>
    %347 = vector.broadcast %94 : f32 to vector<16x16xf32>
    %348 = arith.mulf %347, %346 : vector<16x16xf32>
    %349 = arith.addf %345, %348 : vector<16x16xf32>
    %350 = arith.addf %318, %349 : vector<16x16xf32>
    %c0_35 = arith.constant 0 : index
    %c12_36 = arith.constant 12 : index
    %351 = vector.load %arg13[%c0_35, %c12_36] : memref<96x34xf32, #tpu.memory_space<vmem>>, vector<96x16xf32>
    %352 = vector.extract_strided_slice %351 {offsets = [7, 0], sizes = [16, 16], strides = [1, 1]} : vector<96x16xf32> to vector<16x16xf32>
    %353 = vector.broadcast %4 : f32 to vector<16x16xf32>
    %354 = arith.mulf %353, %352 : vector<16x16xf32>
    %355 = vector.extract_strided_slice %351 {offsets = [55, 0], sizes = [16, 16], strides = [1, 1]} : vector<96x16xf32> to vector<16x16xf32>
    %356 = vector.broadcast %53 : f32 to vector<16x16xf32>
    %357 = arith.mulf %356, %355 : vector<16x16xf32>
    %358 = arith.addf %354, %357 : vector<16x16xf32>
    %359 = arith.addf %326, %358 : vector<16x16xf32>
    %360 = vector.extract_strided_slice %351 {offsets = [10, 0], sizes = [16, 16], strides = [1, 1]} : vector<96x16xf32> to vector<16x16xf32>
    %361 = vector.broadcast %11 : f32 to vector<16x16xf32>
    %362 = arith.mulf %361, %360 : vector<16x16xf32>
    %363 = vector.extract_strided_slice %351 {offsets = [58, 0], sizes = [16, 16], strides = [1, 1]} : vector<96x16xf32> to vector<16x16xf32>
    %364 = vector.broadcast %60 : f32 to vector<16x16xf32>
    %365 = arith.mulf %364, %363 : vector<16x16xf32>
    %366 = arith.addf %362, %365 : vector<16x16xf32>
    %367 = arith.addf %334, %366 : vector<16x16xf32>
    %368 = vector.extract_strided_slice %351 {offsets = [13, 0], sizes = [16, 16], strides = [1, 1]} : vector<96x16xf32> to vector<16x16xf32>
    %369 = vector.broadcast %18 : f32 to vector<16x16xf32>
    %370 = arith.mulf %369, %368 : vector<16x16xf32>
    %371 = vector.extract_strided_slice %351 {offsets = [61, 0], sizes = [16, 16], strides = [1, 1]} : vector<96x16xf32> to vector<16x16xf32>
    %372 = vector.broadcast %67 : f32 to vector<16x16xf32>
    %373 = arith.mulf %372, %371 : vector<16x16xf32>
    %374 = arith.addf %370, %373 : vector<16x16xf32>
    %375 = arith.addf %342, %374 : vector<16x16xf32>
    %376 = vector.extract_strided_slice %351 {offsets = [16, 0], sizes = [16, 16], strides = [1, 1]} : vector<96x16xf32> to vector<16x16xf32>
    %377 = vector.broadcast %25 : f32 to vector<16x16xf32>
    %378 = arith.mulf %377, %376 : vector<16x16xf32>
    %379 = vector.extract_strided_slice %351 {offsets = [64, 0], sizes = [16, 16], strides = [1, 1]} : vector<96x16xf32> to vector<16x16xf32>
    %380 = vector.broadcast %74 : f32 to vector<16x16xf32>
    %381 = arith.mulf %380, %379 : vector<16x16xf32>
    %382 = arith.addf %378, %381 : vector<16x16xf32>
    %383 = arith.addf %350, %382 : vector<16x16xf32>
    %384 = vector.extract_strided_slice %351 {offsets = [19, 0], sizes = [16, 16], strides = [1, 1]} : vector<96x16xf32> to vector<16x16xf32>
    %385 = vector.broadcast %32 : f32 to vector<16x16xf32>
    %386 = arith.mulf %385, %384 : vector<16x16xf32>
    %387 = vector.extract_strided_slice %351 {offsets = [67, 0], sizes = [16, 16], strides = [1, 1]} : vector<96x16xf32> to vector<16x16xf32>
    %388 = vector.broadcast %81 : f32 to vector<16x16xf32>
    %389 = arith.mulf %388, %387 : vector<16x16xf32>
    %390 = arith.addf %386, %389 : vector<16x16xf32>
    %391 = arith.addf %359, %390 : vector<16x16xf32>
    %392 = vector.extract_strided_slice %351 {offsets = [22, 0], sizes = [16, 16], strides = [1, 1]} : vector<96x16xf32> to vector<16x16xf32>
    %393 = vector.broadcast %39 : f32 to vector<16x16xf32>
    %394 = arith.mulf %393, %392 : vector<16x16xf32>
    %395 = vector.extract_strided_slice %351 {offsets = [70, 0], sizes = [16, 16], strides = [1, 1]} : vector<96x16xf32> to vector<16x16xf32>
    %396 = vector.broadcast %88 : f32 to vector<16x16xf32>
    %397 = arith.mulf %396, %395 : vector<16x16xf32>
    %398 = arith.addf %394, %397 : vector<16x16xf32>
    %399 = arith.addf %367, %398 : vector<16x16xf32>
    %400 = vector.extract_strided_slice %351 {offsets = [25, 0], sizes = [16, 16], strides = [1, 1]} : vector<96x16xf32> to vector<16x16xf32>
    %401 = vector.broadcast %46 : f32 to vector<16x16xf32>
    %402 = arith.mulf %401, %400 : vector<16x16xf32>
    %403 = vector.extract_strided_slice %351 {offsets = [73, 0], sizes = [16, 16], strides = [1, 1]} : vector<96x16xf32> to vector<16x16xf32>
    %404 = vector.broadcast %95 : f32 to vector<16x16xf32>
    %405 = arith.mulf %404, %403 : vector<16x16xf32>
    %406 = arith.addf %402, %405 : vector<16x16xf32>
    %407 = arith.addf %375, %406 : vector<16x16xf32>
    %c0_37 = arith.constant 0 : index
    %c15_38 = arith.constant 15 : index
    %408 = vector.load %arg13[%c0_37, %c15_38] : memref<96x34xf32, #tpu.memory_space<vmem>>, vector<96x16xf32>
    %409 = vector.extract_strided_slice %408 {offsets = [7, 0], sizes = [16, 16], strides = [1, 1]} : vector<96x16xf32> to vector<16x16xf32>
    %410 = vector.broadcast %5 : f32 to vector<16x16xf32>
    %411 = arith.mulf %410, %409 : vector<16x16xf32>
    %412 = vector.extract_strided_slice %408 {offsets = [55, 0], sizes = [16, 16], strides = [1, 1]} : vector<96x16xf32> to vector<16x16xf32>
    %413 = vector.broadcast %54 : f32 to vector<16x16xf32>
    %414 = arith.mulf %413, %412 : vector<16x16xf32>
    %415 = arith.addf %411, %414 : vector<16x16xf32>
    %416 = arith.addf %383, %415 : vector<16x16xf32>
    %417 = vector.extract_strided_slice %408 {offsets = [10, 0], sizes = [16, 16], strides = [1, 1]} : vector<96x16xf32> to vector<16x16xf32>
    %418 = vector.broadcast %12 : f32 to vector<16x16xf32>
    %419 = arith.mulf %418, %417 : vector<16x16xf32>
    %420 = vector.extract_strided_slice %408 {offsets = [58, 0], sizes = [16, 16], strides = [1, 1]} : vector<96x16xf32> to vector<16x16xf32>
    %421 = vector.broadcast %61 : f32 to vector<16x16xf32>
    %422 = arith.mulf %421, %420 : vector<16x16xf32>
    %423 = arith.addf %419, %422 : vector<16x16xf32>
    %424 = arith.addf %391, %423 : vector<16x16xf32>
    %425 = vector.extract_strided_slice %408 {offsets = [13, 0], sizes = [16, 16], strides = [1, 1]} : vector<96x16xf32> to vector<16x16xf32>
    %426 = vector.broadcast %19 : f32 to vector<16x16xf32>
    %427 = arith.mulf %426, %425 : vector<16x16xf32>
    %428 = vector.extract_strided_slice %408 {offsets = [61, 0], sizes = [16, 16], strides = [1, 1]} : vector<96x16xf32> to vector<16x16xf32>
    %429 = vector.broadcast %68 : f32 to vector<16x16xf32>
    %430 = arith.mulf %429, %428 : vector<16x16xf32>
    %431 = arith.addf %427, %430 : vector<16x16xf32>
    %432 = arith.addf %399, %431 : vector<16x16xf32>
    %433 = vector.extract_strided_slice %408 {offsets = [16, 0], sizes = [16, 16], strides = [1, 1]} : vector<96x16xf32> to vector<16x16xf32>
    %434 = vector.broadcast %26 : f32 to vector<16x16xf32>
    %435 = arith.mulf %434, %433 : vector<16x16xf32>
    %436 = vector.extract_strided_slice %408 {offsets = [64, 0], sizes = [16, 16], strides = [1, 1]} : vector<96x16xf32> to vector<16x16xf32>
    %437 = vector.broadcast %75 : f32 to vector<16x16xf32>
    %438 = arith.mulf %437, %436 : vector<16x16xf32>
    %439 = arith.addf %435, %438 : vector<16x16xf32>
    %440 = arith.addf %407, %439 : vector<16x16xf32>
    %441 = vector.extract_strided_slice %408 {offsets = [19, 0], sizes = [16, 16], strides = [1, 1]} : vector<96x16xf32> to vector<16x16xf32>
    %442 = vector.broadcast %33 : f32 to vector<16x16xf32>
    %443 = arith.mulf %442, %441 : vector<16x16xf32>
    %444 = vector.extract_strided_slice %408 {offsets = [67, 0], sizes = [16, 16], strides = [1, 1]} : vector<96x16xf32> to vector<16x16xf32>
    %445 = vector.broadcast %82 : f32 to vector<16x16xf32>
    %446 = arith.mulf %445, %444 : vector<16x16xf32>
    %447 = arith.addf %443, %446 : vector<16x16xf32>
    %448 = arith.addf %416, %447 : vector<16x16xf32>
    %449 = vector.extract_strided_slice %408 {offsets = [22, 0], sizes = [16, 16], strides = [1, 1]} : vector<96x16xf32> to vector<16x16xf32>
    %450 = vector.broadcast %40 : f32 to vector<16x16xf32>
    %451 = arith.mulf %450, %449 : vector<16x16xf32>
    %452 = vector.extract_strided_slice %408 {offsets = [70, 0], sizes = [16, 16], strides = [1, 1]} : vector<96x16xf32> to vector<16x16xf32>
    %453 = vector.broadcast %89 : f32 to vector<16x16xf32>
    %454 = arith.mulf %453, %452 : vector<16x16xf32>
    %455 = arith.addf %451, %454 : vector<16x16xf32>
    %456 = arith.addf %424, %455 : vector<16x16xf32>
    %457 = vector.extract_strided_slice %408 {offsets = [25, 0], sizes = [16, 16], strides = [1, 1]} : vector<96x16xf32> to vector<16x16xf32>
    %458 = vector.broadcast %47 : f32 to vector<16x16xf32>
    %459 = arith.mulf %458, %457 : vector<16x16xf32>
    %460 = vector.extract_strided_slice %408 {offsets = [73, 0], sizes = [16, 16], strides = [1, 1]} : vector<96x16xf32> to vector<16x16xf32>
    %461 = vector.broadcast %96 : f32 to vector<16x16xf32>
    %462 = arith.mulf %461, %460 : vector<16x16xf32>
    %463 = arith.addf %459, %462 : vector<16x16xf32>
    %464 = arith.addf %432, %463 : vector<16x16xf32>
    %c0_39 = arith.constant 0 : index
    %c18_40 = arith.constant 18 : index
    %465 = vector.load %arg13[%c0_39, %c18_40] : memref<96x34xf32, #tpu.memory_space<vmem>>, vector<96x16xf32>
    %466 = vector.extract_strided_slice %465 {offsets = [7, 0], sizes = [16, 16], strides = [1, 1]} : vector<96x16xf32> to vector<16x16xf32>
    %467 = vector.broadcast %6 : f32 to vector<16x16xf32>
    %468 = arith.mulf %467, %466 : vector<16x16xf32>
    %469 = vector.extract_strided_slice %465 {offsets = [55, 0], sizes = [16, 16], strides = [1, 1]} : vector<96x16xf32> to vector<16x16xf32>
    %470 = vector.broadcast %55 : f32 to vector<16x16xf32>
    %471 = arith.mulf %470, %469 : vector<16x16xf32>
    %472 = arith.addf %468, %471 : vector<16x16xf32>
    %473 = arith.addf %440, %472 : vector<16x16xf32>
    %474 = vector.extract_strided_slice %465 {offsets = [10, 0], sizes = [16, 16], strides = [1, 1]} : vector<96x16xf32> to vector<16x16xf32>
    %475 = vector.broadcast %13 : f32 to vector<16x16xf32>
    %476 = arith.mulf %475, %474 : vector<16x16xf32>
    %477 = vector.extract_strided_slice %465 {offsets = [58, 0], sizes = [16, 16], strides = [1, 1]} : vector<96x16xf32> to vector<16x16xf32>
    %478 = vector.broadcast %62 : f32 to vector<16x16xf32>
    %479 = arith.mulf %478, %477 : vector<16x16xf32>
    %480 = arith.addf %476, %479 : vector<16x16xf32>
    %481 = arith.addf %448, %480 : vector<16x16xf32>
    %482 = vector.extract_strided_slice %465 {offsets = [13, 0], sizes = [16, 16], strides = [1, 1]} : vector<96x16xf32> to vector<16x16xf32>
    %483 = vector.broadcast %20 : f32 to vector<16x16xf32>
    %484 = arith.mulf %483, %482 : vector<16x16xf32>
    %485 = vector.extract_strided_slice %465 {offsets = [61, 0], sizes = [16, 16], strides = [1, 1]} : vector<96x16xf32> to vector<16x16xf32>
    %486 = vector.broadcast %69 : f32 to vector<16x16xf32>
    %487 = arith.mulf %486, %485 : vector<16x16xf32>
    %488 = arith.addf %484, %487 : vector<16x16xf32>
    %489 = arith.addf %456, %488 : vector<16x16xf32>
    %490 = vector.extract_strided_slice %465 {offsets = [16, 0], sizes = [16, 16], strides = [1, 1]} : vector<96x16xf32> to vector<16x16xf32>
    %491 = vector.broadcast %27 : f32 to vector<16x16xf32>
    %492 = arith.mulf %491, %490 : vector<16x16xf32>
    %493 = vector.extract_strided_slice %465 {offsets = [64, 0], sizes = [16, 16], strides = [1, 1]} : vector<96x16xf32> to vector<16x16xf32>
    %494 = vector.broadcast %76 : f32 to vector<16x16xf32>
    %495 = arith.mulf %494, %493 : vector<16x16xf32>
    %496 = arith.addf %492, %495 : vector<16x16xf32>
    %497 = arith.addf %464, %496 : vector<16x16xf32>
    %498 = vector.extract_strided_slice %465 {offsets = [19, 0], sizes = [16, 16], strides = [1, 1]} : vector<96x16xf32> to vector<16x16xf32>
    %499 = vector.broadcast %34 : f32 to vector<16x16xf32>
    %500 = arith.mulf %499, %498 : vector<16x16xf32>
    %501 = vector.extract_strided_slice %465 {offsets = [67, 0], sizes = [16, 16], strides = [1, 1]} : vector<96x16xf32> to vector<16x16xf32>
    %502 = vector.broadcast %83 : f32 to vector<16x16xf32>
    %503 = arith.mulf %502, %501 : vector<16x16xf32>
    %504 = arith.addf %500, %503 : vector<16x16xf32>
    %505 = arith.addf %473, %504 : vector<16x16xf32>
    %506 = vector.extract_strided_slice %465 {offsets = [22, 0], sizes = [16, 16], strides = [1, 1]} : vector<96x16xf32> to vector<16x16xf32>
    %507 = vector.broadcast %41 : f32 to vector<16x16xf32>
    %508 = arith.mulf %507, %506 : vector<16x16xf32>
    %509 = vector.extract_strided_slice %465 {offsets = [70, 0], sizes = [16, 16], strides = [1, 1]} : vector<96x16xf32> to vector<16x16xf32>
    %510 = vector.broadcast %90 : f32 to vector<16x16xf32>
    %511 = arith.mulf %510, %509 : vector<16x16xf32>
    %512 = arith.addf %508, %511 : vector<16x16xf32>
    %513 = arith.addf %481, %512 : vector<16x16xf32>
    %514 = vector.extract_strided_slice %465 {offsets = [25, 0], sizes = [16, 16], strides = [1, 1]} : vector<96x16xf32> to vector<16x16xf32>
    %515 = vector.broadcast %48 : f32 to vector<16x16xf32>
    %516 = arith.mulf %515, %514 : vector<16x16xf32>
    %517 = vector.extract_strided_slice %465 {offsets = [73, 0], sizes = [16, 16], strides = [1, 1]} : vector<96x16xf32> to vector<16x16xf32>
    %518 = vector.broadcast %97 : f32 to vector<16x16xf32>
    %519 = arith.mulf %518, %517 : vector<16x16xf32>
    %520 = arith.addf %516, %519 : vector<16x16xf32>
    %521 = arith.addf %489, %520 : vector<16x16xf32>
    %522 = arith.addf %521, %497 : vector<16x16xf32>
    %523 = arith.addf %505, %513 : vector<16x16xf32>
    %524 = arith.addf %522, %523 : vector<16x16xf32>
    %525 = arith.negf %524 : vector<16x16xf32>
    %526 = math.exp %525 : vector<16x16xf32>
    %cst_41 = arith.constant 1.000000e+00 : f32
    %527 = vector.broadcast %cst_41 : f32 to vector<16x16xf32>
    %528 = arith.addf %527, %526 : vector<16x16xf32>
    %529 = arith.divf %527, %528 : vector<16x16xf32>
    %c0_42 = arith.constant 0 : index
    %c0_43 = arith.constant 0 : index
    %c0_44 = arith.constant 0 : index
    %c0_45 = arith.constant 0 : index
    %530 = vector.load %arg8[%c0_42, %c0_43, %c0_44, %c0_45] : memref<1x1x16x16xf32, #tpu.memory_space<vmem>>, vector<1x1x16x16xf32>
    %531 = vector.shape_cast %530 : vector<1x1x16x16xf32> to vector<16x16xf32>
    %532 = vector.shape_cast %529 : vector<16x16xf32> to vector<1x1x16x16xf32>
    tpu.vector_store %arg8[%c0_42, %c0_43, %c0_44, %c0_45], %532 {strides = array<i32>} : memref<1x1x16x16xf32, #tpu.memory_space<vmem>>, vector<1x1x16x16xf32>,
    %cst_46 = arith.constant 0.000000e+00 : f32
    %533 = vector.broadcast %cst_46 : f32 to vector<96x34xf32>
    %c0_47 = arith.constant 0 : index
    %c0_48 = arith.constant 0 : index
    %534 = vector.load %arg14[%c0_47, %c0_48] : memref<96x34xf32, #tpu.memory_space<vmem>>, vector<96x34xf32>
    tpu.vector_store %arg14[%c0_47, %c0_48], %533 {strides = array<i32>} : memref<96x34xf32, #tpu.memory_space<vmem>>, vector<96x34xf32>,
    %c0_49 = arith.constant 0 : index
    %c0_50 = arith.constant 0 : index
    %c0_51 = arith.constant 0 : index
    %c0_52 = arith.constant 0 : index
    %535 = vector.load %arg4[%c0_49, %c0_50, %c0_51, %c0_52] : memref<1x8x16x16xf32, #tpu.memory_space<vmem>>, vector<1x1x16x16xf32>
    %536 = vector.shape_cast %535 : vector<1x1x16x16xf32> to vector<16x16xf32>
    %c0_53 = arith.constant 0 : index
    %c1_54 = arith.constant 1 : index
    %c0_55 = arith.constant 0 : index
    %c0_56 = arith.constant 0 : index
    %537 = vector.load %arg4[%c0_53, %c1_54, %c0_55, %c0_56] : memref<1x8x16x16xf32, #tpu.memory_space<vmem>>, vector<1x1x16x16xf32>
    %538 = vector.shape_cast %537 : vector<1x1x16x16xf32> to vector<16x16xf32>
    %c0_57 = arith.constant 0 : index
    %c2_58 = arith.constant 2 : index
    %c0_59 = arith.constant 0 : index
    %c0_60 = arith.constant 0 : index
    %539 = vector.load %arg4[%c0_57, %c2_58, %c0_59, %c0_60] : memref<1x8x16x16xf32, #tpu.memory_space<vmem>>, vector<1x1x16x16xf32>
    %540 = vector.shape_cast %539 : vector<1x1x16x16xf32> to vector<16x16xf32>
    %c0_61 = arith.constant 0 : index
    %c3_62 = arith.constant 3 : index
    %c0_63 = arith.constant 0 : index
    %c0_64 = arith.constant 0 : index
    %541 = vector.load %arg4[%c0_61, %c3_62, %c0_63, %c0_64] : memref<1x8x16x16xf32, #tpu.memory_space<vmem>>, vector<1x1x16x16xf32>
    %542 = vector.shape_cast %541 : vector<1x1x16x16xf32> to vector<16x16xf32>
    %c0_65 = arith.constant 0 : index
    %c4_66 = arith.constant 4 : index
    %c0_67 = arith.constant 0 : index
    %c0_68 = arith.constant 0 : index
    %543 = vector.load %arg4[%c0_65, %c4_66, %c0_67, %c0_68] : memref<1x8x16x16xf32, #tpu.memory_space<vmem>>, vector<1x1x16x16xf32>
    %544 = vector.shape_cast %543 : vector<1x1x16x16xf32> to vector<16x16xf32>
    %545 = arith.addf %536, %544 : vector<16x16xf32>
    %546 = arith.maximumf %536, %544 : vector<16x16xf32>
    %c0_69 = arith.constant 0 : index
    %c5_70 = arith.constant 5 : index
    %c0_71 = arith.constant 0 : index
    %c0_72 = arith.constant 0 : index
    %547 = vector.load %arg4[%c0_69, %c5_70, %c0_71, %c0_72] : memref<1x8x16x16xf32, #tpu.memory_space<vmem>>, vector<1x1x16x16xf32>
    %548 = vector.shape_cast %547 : vector<1x1x16x16xf32> to vector<16x16xf32>
    %549 = arith.addf %538, %548 : vector<16x16xf32>
    %550 = arith.maximumf %538, %548 : vector<16x16xf32>
    %c0_73 = arith.constant 0 : index
    %c6_74 = arith.constant 6 : index
    %c0_75 = arith.constant 0 : index
    %c0_76 = arith.constant 0 : index
    %551 = vector.load %arg4[%c0_73, %c6_74, %c0_75, %c0_76] : memref<1x8x16x16xf32, #tpu.memory_space<vmem>>, vector<1x1x16x16xf32>
    %552 = vector.shape_cast %551 : vector<1x1x16x16xf32> to vector<16x16xf32>
    %553 = arith.addf %540, %552 : vector<16x16xf32>
    %554 = arith.maximumf %540, %552 : vector<16x16xf32>
    %c0_77 = arith.constant 0 : index
    %c7_78 = arith.constant 7 : index
    %c0_79 = arith.constant 0 : index
    %c0_80 = arith.constant 0 : index
    %555 = vector.load %arg4[%c0_77, %c7_78, %c0_79, %c0_80] : memref<1x8x16x16xf32, #tpu.memory_space<vmem>>, vector<1x1x16x16xf32>
    %556 = vector.shape_cast %555 : vector<1x1x16x16xf32> to vector<16x16xf32>
    %557 = arith.addf %542, %556 : vector<16x16xf32>
    %558 = arith.maximumf %542, %556 : vector<16x16xf32>
    %559 = arith.addf %545, %549 : vector<16x16xf32>
    %560 = arith.maximumf %546, %550 : vector<16x16xf32>
    %561 = arith.addf %559, %553 : vector<16x16xf32>
    %562 = arith.maximumf %560, %554 : vector<16x16xf32>
    %563 = arith.addf %561, %557 : vector<16x16xf32>
    %564 = arith.maximumf %562, %558 : vector<16x16xf32>
    %cst_81 = arith.constant 1.250000e-01 : f32
    %565 = vector.broadcast %cst_81 : f32 to vector<16x16xf32>
    %566 = arith.mulf %563, %565 : vector<16x16xf32>
    %c16_82 = arith.constant 16 : index
    %c9_83 = arith.constant 9 : index
    %567 = vector.load %arg14[%c16_82, %c9_83] : memref<96x34xf32, #tpu.memory_space<vmem>>, vector<16x16xf32>
    tpu.vector_store %arg14[%c16_82, %c9_83], %566 {strides = array<i32>} : memref<96x34xf32, #tpu.memory_space<vmem>>, vector<16x16xf32>,
    %c64_84 = arith.constant 64 : index
    %c9_85 = arith.constant 9 : index
    %568 = vector.load %arg14[%c64_84, %c9_85] : memref<96x34xf32, #tpu.memory_space<vmem>>, vector<16x16xf32>
    tpu.vector_store %arg14[%c64_84, %c9_85], %564 {strides = array<i32>} : memref<96x34xf32, #tpu.memory_space<vmem>>, vector<16x16xf32>,
    %569 = vector.broadcast %98 : f32 to vector<16x16xf32>
    %cst_86 = arith.constant 0.000000e+00 : f32
    %570 = vector.broadcast %cst_86 : f32 to vector<16x16xf32>
    %cst_87 = arith.constant 0.000000e+00 : f32
    %571 = vector.broadcast %cst_87 : f32 to vector<16x16xf32>
    %cst_88 = arith.constant 0.000000e+00 : f32
    %572 = vector.broadcast %cst_88 : f32 to vector<16x16xf32>
    %c0_89 = arith.constant 0 : index
    %c0_90 = arith.constant 0 : index
    %573 = vector.load %arg14[%c0_89, %c0_90] : memref<96x34xf32, #tpu.memory_space<vmem>>, vector<96x16xf32>
    %574 = vector.extract_strided_slice %573 {offsets = [7, 0], sizes = [16, 16], strides = [1, 1]} : vector<96x16xf32> to vector<16x16xf32>
    %575 = vector.broadcast %0 : f32 to vector<16x16xf32>
    %576 = arith.mulf %575, %574 : vector<16x16xf32>
    %577 = vector.extract_strided_slice %573 {offsets = [55, 0], sizes = [16, 16], strides = [1, 1]} : vector<96x16xf32> to vector<16x16xf32>
    %578 = vector.broadcast %49 : f32 to vector<16x16xf32>
    %579 = arith.mulf %578, %577 : vector<16x16xf32>
    %580 = arith.addf %576, %579 : vector<16x16xf32>
    %581 = arith.addf %569, %580 : vector<16x16xf32>
    %582 = vector.extract_strided_slice %573 {offsets = [10, 0], sizes = [16, 16], strides = [1, 1]} : vector<96x16xf32> to vector<16x16xf32>
    %583 = vector.broadcast %7 : f32 to vector<16x16xf32>
    %584 = arith.mulf %583, %582 : vector<16x16xf32>
    %585 = vector.extract_strided_slice %573 {offsets = [58, 0], sizes = [16, 16], strides = [1, 1]} : vector<96x16xf32> to vector<16x16xf32>
    %586 = vector.broadcast %56 : f32 to vector<16x16xf32>
    %587 = arith.mulf %586, %585 : vector<16x16xf32>
    %588 = arith.addf %584, %587 : vector<16x16xf32>
    %589 = arith.addf %570, %588 : vector<16x16xf32>
    %590 = vector.extract_strided_slice %573 {offsets = [13, 0], sizes = [16, 16], strides = [1, 1]} : vector<96x16xf32> to vector<16x16xf32>
    %591 = vector.broadcast %14 : f32 to vector<16x16xf32>
    %592 = arith.mulf %591, %590 : vector<16x16xf32>
    %593 = vector.extract_strided_slice %573 {offsets = [61, 0], sizes = [16, 16], strides = [1, 1]} : vector<96x16xf32> to vector<16x16xf32>
    %594 = vector.broadcast %63 : f32 to vector<16x16xf32>
    %595 = arith.mulf %594, %593 : vector<16x16xf32>
    %596 = arith.addf %592, %595 : vector<16x16xf32>
    %597 = arith.addf %571, %596 : vector<16x16xf32>
    %598 = vector.extract_strided_slice %573 {offsets = [16, 0], sizes = [16, 16], strides = [1, 1]} : vector<96x16xf32> to vector<16x16xf32>
    %599 = vector.broadcast %21 : f32 to vector<16x16xf32>
    %600 = arith.mulf %599, %598 : vector<16x16xf32>
    %601 = vector.extract_strided_slice %573 {offsets = [64, 0], sizes = [16, 16], strides = [1, 1]} : vector<96x16xf32> to vector<16x16xf32>
    %602 = vector.broadcast %70 : f32 to vector<16x16xf32>
    %603 = arith.mulf %602, %601 : vector<16x16xf32>
    %604 = arith.addf %600, %603 : vector<16x16xf32>
    %605 = arith.addf %572, %604 : vector<16x16xf32>
    %606 = vector.extract_strided_slice %573 {offsets = [19, 0], sizes = [16, 16], strides = [1, 1]} : vector<96x16xf32> to vector<16x16xf32>
    %607 = vector.broadcast %28 : f32 to vector<16x16xf32>
    %608 = arith.mulf %607, %606 : vector<16x16xf32>
    %609 = vector.extract_strided_slice %573 {offsets = [67, 0], sizes = [16, 16], strides = [1, 1]} : vector<96x16xf32> to vector<16x16xf32>
    %610 = vector.broadcast %77 : f32 to vector<16x16xf32>
    %611 = arith.mulf %610, %609 : vector<16x16xf32>
    %612 = arith.addf %608, %611 : vector<16x16xf32>
    %613 = arith.addf %581, %612 : vector<16x16xf32>
    %614 = vector.extract_strided_slice %573 {offsets = [22, 0], sizes = [16, 16], strides = [1, 1]} : vector<96x16xf32> to vector<16x16xf32>
    %615 = vector.broadcast %35 : f32 to vector<16x16xf32>
    %616 = arith.mulf %615, %614 : vector<16x16xf32>
    %617 = vector.extract_strided_slice %573 {offsets = [70, 0], sizes = [16, 16], strides = [1, 1]} : vector<96x16xf32> to vector<16x16xf32>
    %618 = vector.broadcast %84 : f32 to vector<16x16xf32>
    %619 = arith.mulf %618, %617 : vector<16x16xf32>
    %620 = arith.addf %616, %619 : vector<16x16xf32>
    %621 = arith.addf %589, %620 : vector<16x16xf32>
    %622 = vector.extract_strided_slice %573 {offsets = [25, 0], sizes = [16, 16], strides = [1, 1]} : vector<96x16xf32> to vector<16x16xf32>
    %623 = vector.broadcast %42 : f32 to vector<16x16xf32>
    %624 = arith.mulf %623, %622 : vector<16x16xf32>
    %625 = vector.extract_strided_slice %573 {offsets = [73, 0], sizes = [16, 16], strides = [1, 1]} : vector<96x16xf32> to vector<16x16xf32>
    %626 = vector.broadcast %91 : f32 to vector<16x16xf32>
    %627 = arith.mulf %626, %625 : vector<16x16xf32>
    %628 = arith.addf %624, %627 : vector<16x16xf32>
    %629 = arith.addf %597, %628 : vector<16x16xf32>
    %c0_91 = arith.constant 0 : index
    %c3_92 = arith.constant 3 : index
    %630 = vector.load %arg14[%c0_91, %c3_92] : memref<96x34xf32, #tpu.memory_space<vmem>>, vector<96x16xf32>
    %631 = vector.extract_strided_slice %630 {offsets = [7, 0], sizes = [16, 16], strides = [1, 1]} : vector<96x16xf32> to vector<16x16xf32>
    %632 = vector.broadcast %1 : f32 to vector<16x16xf32>
    %633 = arith.mulf %632, %631 : vector<16x16xf32>
    %634 = vector.extract_strided_slice %630 {offsets = [55, 0], sizes = [16, 16], strides = [1, 1]} : vector<96x16xf32> to vector<16x16xf32>
    %635 = vector.broadcast %50 : f32 to vector<16x16xf32>
    %636 = arith.mulf %635, %634 : vector<16x16xf32>
    %637 = arith.addf %633, %636 : vector<16x16xf32>
    %638 = arith.addf %605, %637 : vector<16x16xf32>
    %639 = vector.extract_strided_slice %630 {offsets = [10, 0], sizes = [16, 16], strides = [1, 1]} : vector<96x16xf32> to vector<16x16xf32>
    %640 = vector.broadcast %8 : f32 to vector<16x16xf32>
    %641 = arith.mulf %640, %639 : vector<16x16xf32>
    %642 = vector.extract_strided_slice %630 {offsets = [58, 0], sizes = [16, 16], strides = [1, 1]} : vector<96x16xf32> to vector<16x16xf32>
    %643 = vector.broadcast %57 : f32 to vector<16x16xf32>
    %644 = arith.mulf %643, %642 : vector<16x16xf32>
    %645 = arith.addf %641, %644 : vector<16x16xf32>
    %646 = arith.addf %613, %645 : vector<16x16xf32>
    %647 = vector.extract_strided_slice %630 {offsets = [13, 0], sizes = [16, 16], strides = [1, 1]} : vector<96x16xf32> to vector<16x16xf32>
    %648 = vector.broadcast %15 : f32 to vector<16x16xf32>
    %649 = arith.mulf %648, %647 : vector<16x16xf32>
    %650 = vector.extract_strided_slice %630 {offsets = [61, 0], sizes = [16, 16], strides = [1, 1]} : vector<96x16xf32> to vector<16x16xf32>
    %651 = vector.broadcast %64 : f32 to vector<16x16xf32>
    %652 = arith.mulf %651, %650 : vector<16x16xf32>
    %653 = arith.addf %649, %652 : vector<16x16xf32>
    %654 = arith.addf %621, %653 : vector<16x16xf32>
    %655 = vector.extract_strided_slice %630 {offsets = [16, 0], sizes = [16, 16], strides = [1, 1]} : vector<96x16xf32> to vector<16x16xf32>
    %656 = vector.broadcast %22 : f32 to vector<16x16xf32>
    %657 = arith.mulf %656, %655 : vector<16x16xf32>
    %658 = vector.extract_strided_slice %630 {offsets = [64, 0], sizes = [16, 16], strides = [1, 1]} : vector<96x16xf32> to vector<16x16xf32>
    %659 = vector.broadcast %71 : f32 to vector<16x16xf32>
    %660 = arith.mulf %659, %658 : vector<16x16xf32>
    %661 = arith.addf %657, %660 : vector<16x16xf32>
    %662 = arith.addf %629, %661 : vector<16x16xf32>
    %663 = vector.extract_strided_slice %630 {offsets = [19, 0], sizes = [16, 16], strides = [1, 1]} : vector<96x16xf32> to vector<16x16xf32>
    %664 = vector.broadcast %29 : f32 to vector<16x16xf32>
    %665 = arith.mulf %664, %663 : vector<16x16xf32>
    %666 = vector.extract_strided_slice %630 {offsets = [67, 0], sizes = [16, 16], strides = [1, 1]} : vector<96x16xf32> to vector<16x16xf32>
    %667 = vector.broadcast %78 : f32 to vector<16x16xf32>
    %668 = arith.mulf %667, %666 : vector<16x16xf32>
    %669 = arith.addf %665, %668 : vector<16x16xf32>
    %670 = arith.addf %638, %669 : vector<16x16xf32>
    %671 = vector.extract_strided_slice %630 {offsets = [22, 0], sizes = [16, 16], strides = [1, 1]} : vector<96x16xf32> to vector<16x16xf32>
    %672 = vector.broadcast %36 : f32 to vector<16x16xf32>
    %673 = arith.mulf %672, %671 : vector<16x16xf32>
    %674 = vector.extract_strided_slice %630 {offsets = [70, 0], sizes = [16, 16], strides = [1, 1]} : vector<96x16xf32> to vector<16x16xf32>
    %675 = vector.broadcast %85 : f32 to vector<16x16xf32>
    %676 = arith.mulf %675, %674 : vector<16x16xf32>
    %677 = arith.addf %673, %676 : vector<16x16xf32>
    %678 = arith.addf %646, %677 : vector<16x16xf32>
    %679 = vector.extract_strided_slice %630 {offsets = [25, 0], sizes = [16, 16], strides = [1, 1]} : vector<96x16xf32> to vector<16x16xf32>
    %680 = vector.broadcast %43 : f32 to vector<16x16xf32>
    %681 = arith.mulf %680, %679 : vector<16x16xf32>
    %682 = vector.extract_strided_slice %630 {offsets = [73, 0], sizes = [16, 16], strides = [1, 1]} : vector<96x16xf32> to vector<16x16xf32>
    %683 = vector.broadcast %92 : f32 to vector<16x16xf32>
    %684 = arith.mulf %683, %682 : vector<16x16xf32>
    %685 = arith.addf %681, %684 : vector<16x16xf32>
    %686 = arith.addf %654, %685 : vector<16x16xf32>
    %c0_93 = arith.constant 0 : index
    %c6_94 = arith.constant 6 : index
    %687 = vector.load %arg14[%c0_93, %c6_94] : memref<96x34xf32, #tpu.memory_space<vmem>>, vector<96x16xf32>
    %688 = vector.extract_strided_slice %687 {offsets = [7, 0], sizes = [16, 16], strides = [1, 1]} : vector<96x16xf32> to vector<16x16xf32>
    %689 = vector.broadcast %2 : f32 to vector<16x16xf32>
    %690 = arith.mulf %689, %688 : vector<16x16xf32>
    %691 = vector.extract_strided_slice %687 {offsets = [55, 0], sizes = [16, 16], strides = [1, 1]} : vector<96x16xf32> to vector<16x16xf32>
    %692 = vector.broadcast %51 : f32 to vector<16x16xf32>
    %693 = arith.mulf %692, %691 : vector<16x16xf32>
    %694 = arith.addf %690, %693 : vector<16x16xf32>
    %695 = arith.addf %662, %694 : vector<16x16xf32>
    %696 = vector.extract_strided_slice %687 {offsets = [10, 0], sizes = [16, 16], strides = [1, 1]} : vector<96x16xf32> to vector<16x16xf32>
    %697 = vector.broadcast %9 : f32 to vector<16x16xf32>
    %698 = arith.mulf %697, %696 : vector<16x16xf32>
    %699 = vector.extract_strided_slice %687 {offsets = [58, 0], sizes = [16, 16], strides = [1, 1]} : vector<96x16xf32> to vector<16x16xf32>
    %700 = vector.broadcast %58 : f32 to vector<16x16xf32>
    %701 = arith.mulf %700, %699 : vector<16x16xf32>
    %702 = arith.addf %698, %701 : vector<16x16xf32>
    %703 = arith.addf %670, %702 : vector<16x16xf32>
    %704 = vector.extract_strided_slice %687 {offsets = [13, 0], sizes = [16, 16], strides = [1, 1]} : vector<96x16xf32> to vector<16x16xf32>
    %705 = vector.broadcast %16 : f32 to vector<16x16xf32>
    %706 = arith.mulf %705, %704 : vector<16x16xf32>
    %707 = vector.extract_strided_slice %687 {offsets = [61, 0], sizes = [16, 16], strides = [1, 1]} : vector<96x16xf32> to vector<16x16xf32>
    %708 = vector.broadcast %65 : f32 to vector<16x16xf32>
    %709 = arith.mulf %708, %707 : vector<16x16xf32>
    %710 = arith.addf %706, %709 : vector<16x16xf32>
    %711 = arith.addf %678, %710 : vector<16x16xf32>
    %712 = vector.extract_strided_slice %687 {offsets = [16, 0], sizes = [16, 16], strides = [1, 1]} : vector<96x16xf32> to vector<16x16xf32>
    %713 = vector.broadcast %23 : f32 to vector<16x16xf32>
    %714 = arith.mulf %713, %712 : vector<16x16xf32>
    %715 = vector.extract_strided_slice %687 {offsets = [64, 0], sizes = [16, 16], strides = [1, 1]} : vector<96x16xf32> to vector<16x16xf32>
    %716 = vector.broadcast %72 : f32 to vector<16x16xf32>
    %717 = arith.mulf %716, %715 : vector<16x16xf32>
    %718 = arith.addf %714, %717 : vector<16x16xf32>
    %719 = arith.addf %686, %718 : vector<16x16xf32>
    %720 = vector.extract_strided_slice %687 {offsets = [19, 0], sizes = [16, 16], strides = [1, 1]} : vector<96x16xf32> to vector<16x16xf32>
    %721 = vector.broadcast %30 : f32 to vector<16x16xf32>
    %722 = arith.mulf %721, %720 : vector<16x16xf32>
    %723 = vector.extract_strided_slice %687 {offsets = [67, 0], sizes = [16, 16], strides = [1, 1]} : vector<96x16xf32> to vector<16x16xf32>
    %724 = vector.broadcast %79 : f32 to vector<16x16xf32>
    %725 = arith.mulf %724, %723 : vector<16x16xf32>
    %726 = arith.addf %722, %725 : vector<16x16xf32>
    %727 = arith.addf %695, %726 : vector<16x16xf32>
    %728 = vector.extract_strided_slice %687 {offsets = [22, 0], sizes = [16, 16], strides = [1, 1]} : vector<96x16xf32> to vector<16x16xf32>
    %729 = vector.broadcast %37 : f32 to vector<16x16xf32>
    %730 = arith.mulf %729, %728 : vector<16x16xf32>
    %731 = vector.extract_strided_slice %687 {offsets = [70, 0], sizes = [16, 16], strides = [1, 1]} : vector<96x16xf32> to vector<16x16xf32>
    %732 = vector.broadcast %86 : f32 to vector<16x16xf32>
    %733 = arith.mulf %732, %731 : vector<16x16xf32>
    %734 = arith.addf %730, %733 : vector<16x16xf32>
    %735 = arith.addf %703, %734 : vector<16x16xf32>
    %736 = vector.extract_strided_slice %687 {offsets = [25, 0], sizes = [16, 16], strides = [1, 1]} : vector<96x16xf32> to vector<16x16xf32>
    %737 = vector.broadcast %44 : f32 to vector<16x16xf32>
    %738 = arith.mulf %737, %736 : vector<16x16xf32>
    %739 = vector.extract_strided_slice %687 {offsets = [73, 0], sizes = [16, 16], strides = [1, 1]} : vector<96x16xf32> to vector<16x16xf32>
    %740 = vector.broadcast %93 : f32 to vector<16x16xf32>
    %741 = arith.mulf %740, %739 : vector<16x16xf32>
    %742 = arith.addf %738, %741 : vector<16x16xf32>
    %743 = arith.addf %711, %742 : vector<16x16xf32>
    %c0_95 = arith.constant 0 : index
    %c9_96 = arith.constant 9 : index
    %744 = vector.load %arg14[%c0_95, %c9_96] : memref<96x34xf32, #tpu.memory_space<vmem>>, vector<96x16xf32>
    %745 = vector.extract_strided_slice %744 {offsets = [7, 0], sizes = [16, 16], strides = [1, 1]} : vector<96x16xf32> to vector<16x16xf32>
    %746 = vector.broadcast %3 : f32 to vector<16x16xf32>
    %747 = arith.mulf %746, %745 : vector<16x16xf32>
    %748 = vector.extract_strided_slice %744 {offsets = [55, 0], sizes = [16, 16], strides = [1, 1]} : vector<96x16xf32> to vector<16x16xf32>
    %749 = vector.broadcast %52 : f32 to vector<16x16xf32>
    %750 = arith.mulf %749, %748 : vector<16x16xf32>
    %751 = arith.addf %747, %750 : vector<16x16xf32>
    %752 = arith.addf %719, %751 : vector<16x16xf32>
    %753 = vector.extract_strided_slice %744 {offsets = [10, 0], sizes = [16, 16], strides = [1, 1]} : vector<96x16xf32> to vector<16x16xf32>
    %754 = vector.broadcast %10 : f32 to vector<16x16xf32>
    %755 = arith.mulf %754, %753 : vector<16x16xf32>
    %756 = vector.extract_strided_slice %744 {offsets = [58, 0], sizes = [16, 16], strides = [1, 1]} : vector<96x16xf32> to vector<16x16xf32>
    %757 = vector.broadcast %59 : f32 to vector<16x16xf32>
    %758 = arith.mulf %757, %756 : vector<16x16xf32>
    %759 = arith.addf %755, %758 : vector<16x16xf32>
    %760 = arith.addf %727, %759 : vector<16x16xf32>
    %761 = vector.extract_strided_slice %744 {offsets = [13, 0], sizes = [16, 16], strides = [1, 1]} : vector<96x16xf32> to vector<16x16xf32>
    %762 = vector.broadcast %17 : f32 to vector<16x16xf32>
    %763 = arith.mulf %762, %761 : vector<16x16xf32>
    %764 = vector.extract_strided_slice %744 {offsets = [61, 0], sizes = [16, 16], strides = [1, 1]} : vector<96x16xf32> to vector<16x16xf32>
    %765 = vector.broadcast %66 : f32 to vector<16x16xf32>
    %766 = arith.mulf %765, %764 : vector<16x16xf32>
    %767 = arith.addf %763, %766 : vector<16x16xf32>
    %768 = arith.addf %735, %767 : vector<16x16xf32>
    %769 = vector.extract_strided_slice %744 {offsets = [16, 0], sizes = [16, 16], strides = [1, 1]} : vector<96x16xf32> to vector<16x16xf32>
    %770 = vector.broadcast %24 : f32 to vector<16x16xf32>
    %771 = arith.mulf %770, %769 : vector<16x16xf32>
    %772 = vector.extract_strided_slice %744 {offsets = [64, 0], sizes = [16, 16], strides = [1, 1]} : vector<96x16xf32> to vector<16x16xf32>
    %773 = vector.broadcast %73 : f32 to vector<16x16xf32>
    %774 = arith.mulf %773, %772 : vector<16x16xf32>
    %775 = arith.addf %771, %774 : vector<16x16xf32>
    %776 = arith.addf %743, %775 : vector<16x16xf32>
    %777 = vector.extract_strided_slice %744 {offsets = [19, 0], sizes = [16, 16], strides = [1, 1]} : vector<96x16xf32> to vector<16x16xf32>
    %778 = vector.broadcast %31 : f32 to vector<16x16xf32>
    %779 = arith.mulf %778, %777 : vector<16x16xf32>
    %780 = vector.extract_strided_slice %744 {offsets = [67, 0], sizes = [16, 16], strides = [1, 1]} : vector<96x16xf32> to vector<16x16xf32>
    %781 = vector.broadcast %80 : f32 to vector<16x16xf32>
    %782 = arith.mulf %781, %780 : vector<16x16xf32>
    %783 = arith.addf %779, %782 : vector<16x16xf32>
    %784 = arith.addf %752, %783 : vector<16x16xf32>
    %785 = vector.extract_strided_slice %744 {offsets = [22, 0], sizes = [16, 16], strides = [1, 1]} : vector<96x16xf32> to vector<16x16xf32>
    %786 = vector.broadcast %38 : f32 to vector<16x16xf32>
    %787 = arith.mulf %786, %785 : vector<16x16xf32>
    %788 = vector.extract_strided_slice %744 {offsets = [70, 0], sizes = [16, 16], strides = [1, 1]} : vector<96x16xf32> to vector<16x16xf32>
    %789 = vector.broadcast %87 : f32 to vector<16x16xf32>
    %790 = arith.mulf %789, %788 : vector<16x16xf32>
    %791 = arith.addf %787, %790 : vector<16x16xf32>
    %792 = arith.addf %760, %791 : vector<16x16xf32>
    %793 = vector.extract_strided_slice %744 {offsets = [25, 0], sizes = [16, 16], strides = [1, 1]} : vector<96x16xf32> to vector<16x16xf32>
    %794 = vector.broadcast %45 : f32 to vector<16x16xf32>
    %795 = arith.mulf %794, %793 : vector<16x16xf32>
    %796 = vector.extract_strided_slice %744 {offsets = [73, 0], sizes = [16, 16], strides = [1, 1]} : vector<96x16xf32> to vector<16x16xf32>
    %797 = vector.broadcast %94 : f32 to vector<16x16xf32>
    %798 = arith.mulf %797, %796 : vector<16x16xf32>
    %799 = arith.addf %795, %798 : vector<16x16xf32>
    %800 = arith.addf %768, %799 : vector<16x16xf32>
    %c0_97 = arith.constant 0 : index
    %c12_98 = arith.constant 12 : index
    %801 = vector.load %arg14[%c0_97, %c12_98] : memref<96x34xf32, #tpu.memory_space<vmem>>, vector<96x16xf32>
    %802 = vector.extract_strided_slice %801 {offsets = [7, 0], sizes = [16, 16], strides = [1, 1]} : vector<96x16xf32> to vector<16x16xf32>
    %803 = vector.broadcast %4 : f32 to vector<16x16xf32>
    %804 = arith.mulf %803, %802 : vector<16x16xf32>
    %805 = vector.extract_strided_slice %801 {offsets = [55, 0], sizes = [16, 16], strides = [1, 1]} : vector<96x16xf32> to vector<16x16xf32>
    %806 = vector.broadcast %53 : f32 to vector<16x16xf32>
    %807 = arith.mulf %806, %805 : vector<16x16xf32>
    %808 = arith.addf %804, %807 : vector<16x16xf32>
    %809 = arith.addf %776, %808 : vector<16x16xf32>
    %810 = vector.extract_strided_slice %801 {offsets = [10, 0], sizes = [16, 16], strides = [1, 1]} : vector<96x16xf32> to vector<16x16xf32>
    %811 = vector.broadcast %11 : f32 to vector<16x16xf32>
    %812 = arith.mulf %811, %810 : vector<16x16xf32>
    %813 = vector.extract_strided_slice %801 {offsets = [58, 0], sizes = [16, 16], strides = [1, 1]} : vector<96x16xf32> to vector<16x16xf32>
    %814 = vector.broadcast %60 : f32 to vector<16x16xf32>
    %815 = arith.mulf %814, %813 : vector<16x16xf32>
    %816 = arith.addf %812, %815 : vector<16x16xf32>
    %817 = arith.addf %784, %816 : vector<16x16xf32>
    %818 = vector.extract_strided_slice %801 {offsets = [13, 0], sizes = [16, 16], strides = [1, 1]} : vector<96x16xf32> to vector<16x16xf32>
    %819 = vector.broadcast %18 : f32 to vector<16x16xf32>
    %820 = arith.mulf %819, %818 : vector<16x16xf32>
    %821 = vector.extract_strided_slice %801 {offsets = [61, 0], sizes = [16, 16], strides = [1, 1]} : vector<96x16xf32> to vector<16x16xf32>
    %822 = vector.broadcast %67 : f32 to vector<16x16xf32>
    %823 = arith.mulf %822, %821 : vector<16x16xf32>
    %824 = arith.addf %820, %823 : vector<16x16xf32>
    %825 = arith.addf %792, %824 : vector<16x16xf32>
    %826 = vector.extract_strided_slice %801 {offsets = [16, 0], sizes = [16, 16], strides = [1, 1]} : vector<96x16xf32> to vector<16x16xf32>
    %827 = vector.broadcast %25 : f32 to vector<16x16xf32>
    %828 = arith.mulf %827, %826 : vector<16x16xf32>
    %829 = vector.extract_strided_slice %801 {offsets = [64, 0], sizes = [16, 16], strides = [1, 1]} : vector<96x16xf32> to vector<16x16xf32>
    %830 = vector.broadcast %74 : f32 to vector<16x16xf32>
    %831 = arith.mulf %830, %829 : vector<16x16xf32>
    %832 = arith.addf %828, %831 : vector<16x16xf32>
    %833 = arith.addf %800, %832 : vector<16x16xf32>
    %834 = vector.extract_strided_slice %801 {offsets = [19, 0], sizes = [16, 16], strides = [1, 1]} : vector<96x16xf32> to vector<16x16xf32>
    %835 = vector.broadcast %32 : f32 to vector<16x16xf32>
    %836 = arith.mulf %835, %834 : vector<16x16xf32>
    %837 = vector.extract_strided_slice %801 {offsets = [67, 0], sizes = [16, 16], strides = [1, 1]} : vector<96x16xf32> to vector<16x16xf32>
    %838 = vector.broadcast %81 : f32 to vector<16x16xf32>
    %839 = arith.mulf %838, %837 : vector<16x16xf32>
    %840 = arith.addf %836, %839 : vector<16x16xf32>
    %841 = arith.addf %809, %840 : vector<16x16xf32>
    %842 = vector.extract_strided_slice %801 {offsets = [22, 0], sizes = [16, 16], strides = [1, 1]} : vector<96x16xf32> to vector<16x16xf32>
    %843 = vector.broadcast %39 : f32 to vector<16x16xf32>
    %844 = arith.mulf %843, %842 : vector<16x16xf32>
    %845 = vector.extract_strided_slice %801 {offsets = [70, 0], sizes = [16, 16], strides = [1, 1]} : vector<96x16xf32> to vector<16x16xf32>
    %846 = vector.broadcast %88 : f32 to vector<16x16xf32>
    %847 = arith.mulf %846, %845 : vector<16x16xf32>
    %848 = arith.addf %844, %847 : vector<16x16xf32>
    %849 = arith.addf %817, %848 : vector<16x16xf32>
    %850 = vector.extract_strided_slice %801 {offsets = [25, 0], sizes = [16, 16], strides = [1, 1]} : vector<96x16xf32> to vector<16x16xf32>
    %851 = vector.broadcast %46 : f32 to vector<16x16xf32>
    %852 = arith.mulf %851, %850 : vector<16x16xf32>
    %853 = vector.extract_strided_slice %801 {offsets = [73, 0], sizes = [16, 16], strides = [1, 1]} : vector<96x16xf32> to vector<16x16xf32>
    %854 = vector.broadcast %95 : f32 to vector<16x16xf32>
    %855 = arith.mulf %854, %853 : vector<16x16xf32>
    %856 = arith.addf %852, %855 : vector<16x16xf32>
    %857 = arith.addf %825, %856 : vector<16x16xf32>
    %c0_99 = arith.constant 0 : index
    %c15_100 = arith.constant 15 : index
    %858 = vector.load %arg14[%c0_99, %c15_100] : memref<96x34xf32, #tpu.memory_space<vmem>>, vector<96x16xf32>
    %859 = vector.extract_strided_slice %858 {offsets = [7, 0], sizes = [16, 16], strides = [1, 1]} : vector<96x16xf32> to vector<16x16xf32>
    %860 = vector.broadcast %5 : f32 to vector<16x16xf32>
    %861 = arith.mulf %860, %859 : vector<16x16xf32>
    %862 = vector.extract_strided_slice %858 {offsets = [55, 0], sizes = [16, 16], strides = [1, 1]} : vector<96x16xf32> to vector<16x16xf32>
    %863 = vector.broadcast %54 : f32 to vector<16x16xf32>
    %864 = arith.mulf %863, %862 : vector<16x16xf32>
    %865 = arith.addf %861, %864 : vector<16x16xf32>
    %866 = arith.addf %833, %865 : vector<16x16xf32>
    %867 = vector.extract_strided_slice %858 {offsets = [10, 0], sizes = [16, 16], strides = [1, 1]} : vector<96x16xf32> to vector<16x16xf32>
    %868 = vector.broadcast %12 : f32 to vector<16x16xf32>
    %869 = arith.mulf %868, %867 : vector<16x16xf32>
    %870 = vector.extract_strided_slice %858 {offsets = [58, 0], sizes = [16, 16], strides = [1, 1]} : vector<96x16xf32> to vector<16x16xf32>
    %871 = vector.broadcast %61 : f32 to vector<16x16xf32>
    %872 = arith.mulf %871, %870 : vector<16x16xf32>
    %873 = arith.addf %869, %872 : vector<16x16xf32>
    %874 = arith.addf %841, %873 : vector<16x16xf32>
    %875 = vector.extract_strided_slice %858 {offsets = [13, 0], sizes = [16, 16], strides = [1, 1]} : vector<96x16xf32> to vector<16x16xf32>
    %876 = vector.broadcast %19 : f32 to vector<16x16xf32>
    %877 = arith.mulf %876, %875 : vector<16x16xf32>
    %878 = vector.extract_strided_slice %858 {offsets = [61, 0], sizes = [16, 16], strides = [1, 1]} : vector<96x16xf32> to vector<16x16xf32>
    %879 = vector.broadcast %68 : f32 to vector<16x16xf32>
    %880 = arith.mulf %879, %878 : vector<16x16xf32>
    %881 = arith.addf %877, %880 : vector<16x16xf32>
    %882 = arith.addf %849, %881 : vector<16x16xf32>
    %883 = vector.extract_strided_slice %858 {offsets = [16, 0], sizes = [16, 16], strides = [1, 1]} : vector<96x16xf32> to vector<16x16xf32>
    %884 = vector.broadcast %26 : f32 to vector<16x16xf32>
    %885 = arith.mulf %884, %883 : vector<16x16xf32>
    %886 = vector.extract_strided_slice %858 {offsets = [64, 0], sizes = [16, 16], strides = [1, 1]} : vector<96x16xf32> to vector<16x16xf32>
    %887 = vector.broadcast %75 : f32 to vector<16x16xf32>
    %888 = arith.mulf %887, %886 : vector<16x16xf32>
    %889 = arith.addf %885, %888 : vector<16x16xf32>
    %890 = arith.addf %857, %889 : vector<16x16xf32>
    %891 = vector.extract_strided_slice %858 {offsets = [19, 0], sizes = [16, 16], strides = [1, 1]} : vector<96x16xf32> to vector<16x16xf32>
    %892 = vector.broadcast %33 : f32 to vector<16x16xf32>
    %893 = arith.mulf %892, %891 : vector<16x16xf32>
    %894 = vector.extract_strided_slice %858 {offsets = [67, 0], sizes = [16, 16], strides = [1, 1]} : vector<96x16xf32> to vector<16x16xf32>
    %895 = vector.broadcast %82 : f32 to vector<16x16xf32>
    %896 = arith.mulf %895, %894 : vector<16x16xf32>
    %897 = arith.addf %893, %896 : vector<16x16xf32>
    %898 = arith.addf %866, %897 : vector<16x16xf32>
    %899 = vector.extract_strided_slice %858 {offsets = [22, 0], sizes = [16, 16], strides = [1, 1]} : vector<96x16xf32> to vector<16x16xf32>
    %900 = vector.broadcast %40 : f32 to vector<16x16xf32>
    %901 = arith.mulf %900, %899 : vector<16x16xf32>
    %902 = vector.extract_strided_slice %858 {offsets = [70, 0], sizes = [16, 16], strides = [1, 1]} : vector<96x16xf32> to vector<16x16xf32>
    %903 = vector.broadcast %89 : f32 to vector<16x16xf32>
    %904 = arith.mulf %903, %902 : vector<16x16xf32>
    %905 = arith.addf %901, %904 : vector<16x16xf32>
    %906 = arith.addf %874, %905 : vector<16x16xf32>
    %907 = vector.extract_strided_slice %858 {offsets = [25, 0], sizes = [16, 16], strides = [1, 1]} : vector<96x16xf32> to vector<16x16xf32>
    %908 = vector.broadcast %47 : f32 to vector<16x16xf32>
    %909 = arith.mulf %908, %907 : vector<16x16xf32>
    %910 = vector.extract_strided_slice %858 {offsets = [73, 0], sizes = [16, 16], strides = [1, 1]} : vector<96x16xf32> to vector<16x16xf32>
    %911 = vector.broadcast %96 : f32 to vector<16x16xf32>
    %912 = arith.mulf %911, %910 : vector<16x16xf32>
    %913 = arith.addf %909, %912 : vector<16x16xf32>
    %914 = arith.addf %882, %913 : vector<16x16xf32>
    %c0_101 = arith.constant 0 : index
    %c18_102 = arith.constant 18 : index
    %915 = vector.load %arg14[%c0_101, %c18_102] : memref<96x34xf32, #tpu.memory_space<vmem>>, vector<96x16xf32>
    %916 = vector.extract_strided_slice %915 {offsets = [7, 0], sizes = [16, 16], strides = [1, 1]} : vector<96x16xf32> to vector<16x16xf32>
    %917 = vector.broadcast %6 : f32 to vector<16x16xf32>
    %918 = arith.mulf %917, %916 : vector<16x16xf32>
    %919 = vector.extract_strided_slice %915 {offsets = [55, 0], sizes = [16, 16], strides = [1, 1]} : vector<96x16xf32> to vector<16x16xf32>
    %920 = vector.broadcast %55 : f32 to vector<16x16xf32>
    %921 = arith.mulf %920, %919 : vector<16x16xf32>
    %922 = arith.addf %918, %921 : vector<16x16xf32>
    %923 = arith.addf %890, %922 : vector<16x16xf32>
    %924 = vector.extract_strided_slice %915 {offsets = [10, 0], sizes = [16, 16], strides = [1, 1]} : vector<96x16xf32> to vector<16x16xf32>
    %925 = vector.broadcast %13 : f32 to vector<16x16xf32>
    %926 = arith.mulf %925, %924 : vector<16x16xf32>
    %927 = vector.extract_strided_slice %915 {offsets = [58, 0], sizes = [16, 16], strides = [1, 1]} : vector<96x16xf32> to vector<16x16xf32>
    %928 = vector.broadcast %62 : f32 to vector<16x16xf32>
    %929 = arith.mulf %928, %927 : vector<16x16xf32>
    %930 = arith.addf %926, %929 : vector<16x16xf32>
    %931 = arith.addf %898, %930 : vector<16x16xf32>
    %932 = vector.extract_strided_slice %915 {offsets = [13, 0], sizes = [16, 16], strides = [1, 1]} : vector<96x16xf32> to vector<16x16xf32>
    %933 = vector.broadcast %20 : f32 to vector<16x16xf32>
    %934 = arith.mulf %933, %932 : vector<16x16xf32>
    %935 = vector.extract_strided_slice %915 {offsets = [61, 0], sizes = [16, 16], strides = [1, 1]} : vector<96x16xf32> to vector<16x16xf32>
    %936 = vector.broadcast %69 : f32 to vector<16x16xf32>
    %937 = arith.mulf %936, %935 : vector<16x16xf32>
    %938 = arith.addf %934, %937 : vector<16x16xf32>
    %939 = arith.addf %906, %938 : vector<16x16xf32>
    %940 = vector.extract_strided_slice %915 {offsets = [16, 0], sizes = [16, 16], strides = [1, 1]} : vector<96x16xf32> to vector<16x16xf32>
    %941 = vector.broadcast %27 : f32 to vector<16x16xf32>
    %942 = arith.mulf %941, %940 : vector<16x16xf32>
    %943 = vector.extract_strided_slice %915 {offsets = [64, 0], sizes = [16, 16], strides = [1, 1]} : vector<96x16xf32> to vector<16x16xf32>
    %944 = vector.broadcast %76 : f32 to vector<16x16xf32>
    %945 = arith.mulf %944, %943 : vector<16x16xf32>
    %946 = arith.addf %942, %945 : vector<16x16xf32>
    %947 = arith.addf %914, %946 : vector<16x16xf32>
    %948 = vector.extract_strided_slice %915 {offsets = [19, 0], sizes = [16, 16], strides = [1, 1]} : vector<96x16xf32> to vector<16x16xf32>
    %949 = vector.broadcast %34 : f32 to vector<16x16xf32>
    %950 = arith.mulf %949, %948 : vector<16x16xf32>
    %951 = vector.extract_strided_slice %915 {offsets = [67, 0], sizes = [16, 16], strides = [1, 1]} : vector<96x16xf32> to vector<16x16xf32>
    %952 = vector.broadcast %83 : f32 to vector<16x16xf32>
    %953 = arith.mulf %952, %951 : vector<16x16xf32>
    %954 = arith.addf %950, %953 : vector<16x16xf32>
    %955 = arith.addf %923, %954 : vector<16x16xf32>
    %956 = vector.extract_strided_slice %915 {offsets = [22, 0], sizes = [16, 16], strides = [1, 1]} : vector<96x16xf32> to vector<16x16xf32>
    %957 = vector.broadcast %41 : f32 to vector<16x16xf32>
    %958 = arith.mulf %957, %956 : vector<16x16xf32>
    %959 = vector.extract_strided_slice %915 {offsets = [70, 0], sizes = [16, 16], strides = [1, 1]} : vector<96x16xf32> to vector<16x16xf32>
    %960 = vector.broadcast %90 : f32 to vector<16x16xf32>
    %961 = arith.mulf %960, %959 : vector<16x16xf32>
    %962 = arith.addf %958, %961 : vector<16x16xf32>
    %963 = arith.addf %931, %962 : vector<16x16xf32>
    %964 = vector.extract_strided_slice %915 {offsets = [25, 0], sizes = [16, 16], strides = [1, 1]} : vector<96x16xf32> to vector<16x16xf32>
    %965 = vector.broadcast %48 : f32 to vector<16x16xf32>
    %966 = arith.mulf %965, %964 : vector<16x16xf32>
    %967 = vector.extract_strided_slice %915 {offsets = [73, 0], sizes = [16, 16], strides = [1, 1]} : vector<96x16xf32> to vector<16x16xf32>
    %968 = vector.broadcast %97 : f32 to vector<16x16xf32>
    %969 = arith.mulf %968, %967 : vector<16x16xf32>
    %970 = arith.addf %966, %969 : vector<16x16xf32>
    %971 = arith.addf %939, %970 : vector<16x16xf32>
    %972 = arith.addf %971, %947 : vector<16x16xf32>
    %973 = arith.addf %955, %963 : vector<16x16xf32>
    %974 = arith.addf %972, %973 : vector<16x16xf32>
    %975 = arith.negf %974 : vector<16x16xf32>
    %976 = math.exp %975 : vector<16x16xf32>
    %cst_103 = arith.constant 1.000000e+00 : f32
    %977 = vector.broadcast %cst_103 : f32 to vector<16x16xf32>
    %978 = arith.addf %977, %976 : vector<16x16xf32>
    %979 = arith.divf %977, %978 : vector<16x16xf32>
    %c0_104 = arith.constant 0 : index
    %c0_105 = arith.constant 0 : index
    %c0_106 = arith.constant 0 : index
    %c0_107 = arith.constant 0 : index
    %980 = vector.load %arg9[%c0_104, %c0_105, %c0_106, %c0_107] : memref<1x1x16x16xf32, #tpu.memory_space<vmem>>, vector<1x1x16x16xf32>
    %981 = vector.shape_cast %980 : vector<1x1x16x16xf32> to vector<16x16xf32>
    %982 = vector.shape_cast %979 : vector<16x16xf32> to vector<1x1x16x16xf32>
    tpu.vector_store %arg9[%c0_104, %c0_105, %c0_106, %c0_107], %982 {strides = array<i32>} : memref<1x1x16x16xf32, #tpu.memory_space<vmem>>, vector<1x1x16x16xf32>,
    %cst_108 = arith.constant 0.000000e+00 : f32
    %983 = vector.broadcast %cst_108 : f32 to vector<80x26xf32>
    %c0_109 = arith.constant 0 : index
    %c0_110 = arith.constant 0 : index
    %984 = vector.load %arg15[%c0_109, %c0_110] : memref<80x26xf32, #tpu.memory_space<vmem>>, vector<80x26xf32>
    tpu.vector_store %arg15[%c0_109, %c0_110], %983 {strides = array<i32>} : memref<80x26xf32, #tpu.memory_space<vmem>>, vector<80x26xf32>,
    %c0_111 = arith.constant 0 : index
    %c0_112 = arith.constant 0 : index
    %c0_113 = arith.constant 0 : index
    %c0_114 = arith.constant 0 : index
    %985 = vector.load %arg5[%c0_111, %c0_112, %c0_113, %c0_114] : memref<1x8x8x8xf32, #tpu.memory_space<vmem>>, vector<1x1x8x8xf32>
    %986 = vector.shape_cast %985 : vector<1x1x8x8xf32> to vector<8x8xf32>
    %c0_115 = arith.constant 0 : index
    %c1_116 = arith.constant 1 : index
    %c0_117 = arith.constant 0 : index
    %c0_118 = arith.constant 0 : index
    %987 = vector.load %arg5[%c0_115, %c1_116, %c0_117, %c0_118] : memref<1x8x8x8xf32, #tpu.memory_space<vmem>>, vector<1x1x8x8xf32>
    %988 = vector.shape_cast %987 : vector<1x1x8x8xf32> to vector<8x8xf32>
    %c0_119 = arith.constant 0 : index
    %c2_120 = arith.constant 2 : index
    %c0_121 = arith.constant 0 : index
    %c0_122 = arith.constant 0 : index
    %989 = vector.load %arg5[%c0_119, %c2_120, %c0_121, %c0_122] : memref<1x8x8x8xf32, #tpu.memory_space<vmem>>, vector<1x1x8x8xf32>
    %990 = vector.shape_cast %989 : vector<1x1x8x8xf32> to vector<8x8xf32>
    %c0_123 = arith.constant 0 : index
    %c3_124 = arith.constant 3 : index
    %c0_125 = arith.constant 0 : index
    %c0_126 = arith.constant 0 : index
    %991 = vector.load %arg5[%c0_123, %c3_124, %c0_125, %c0_126] : memref<1x8x8x8xf32, #tpu.memory_space<vmem>>, vector<1x1x8x8xf32>
    %992 = vector.shape_cast %991 : vector<1x1x8x8xf32> to vector<8x8xf32>
    %c0_127 = arith.constant 0 : index
    %c4_128 = arith.constant 4 : index
    %c0_129 = arith.constant 0 : index
    %c0_130 = arith.constant 0 : index
    %993 = vector.load %arg5[%c0_127, %c4_128, %c0_129, %c0_130] : memref<1x8x8x8xf32, #tpu.memory_space<vmem>>, vector<1x1x8x8xf32>
    %994 = vector.shape_cast %993 : vector<1x1x8x8xf32> to vector<8x8xf32>
    %995 = arith.addf %986, %994 : vector<8x8xf32>
    %996 = arith.maximumf %986, %994 : vector<8x8xf32>
    %c0_131 = arith.constant 0 : index
    %c5_132 = arith.constant 5 : index
    %c0_133 = arith.constant 0 : index
    %c0_134 = arith.constant 0 : index
    %997 = vector.load %arg5[%c0_131, %c5_132, %c0_133, %c0_134] : memref<1x8x8x8xf32, #tpu.memory_space<vmem>>, vector<1x1x8x8xf32>
    %998 = vector.shape_cast %997 : vector<1x1x8x8xf32> to vector<8x8xf32>
    %999 = arith.addf %988, %998 : vector<8x8xf32>
    %1000 = arith.maximumf %988, %998 : vector<8x8xf32>
    %c0_135 = arith.constant 0 : index
    %c6_136 = arith.constant 6 : index
    %c0_137 = arith.constant 0 : index
    %c0_138 = arith.constant 0 : index
    %1001 = vector.load %arg5[%c0_135, %c6_136, %c0_137, %c0_138] : memref<1x8x8x8xf32, #tpu.memory_space<vmem>>, vector<1x1x8x8xf32>
    %1002 = vector.shape_cast %1001 : vector<1x1x8x8xf32> to vector<8x8xf32>
    %1003 = arith.addf %990, %1002 : vector<8x8xf32>
    %1004 = arith.maximumf %990, %1002 : vector<8x8xf32>
    %c0_139 = arith.constant 0 : index
    %c7_140 = arith.constant 7 : index
    %c0_141 = arith.constant 0 : index
    %c0_142 = arith.constant 0 : index
    %1005 = vector.load %arg5[%c0_139, %c7_140, %c0_141, %c0_142] : memref<1x8x8x8xf32, #tpu.memory_space<vmem>>, vector<1x1x8x8xf32>
    %1006 = vector.shape_cast %1005 : vector<1x1x8x8xf32> to vector<8x8xf32>
    %1007 = arith.addf %992, %1006 : vector<8x8xf32>
    %1008 = arith.maximumf %992, %1006 : vector<8x8xf32>
    %1009 = arith.addf %995, %999 : vector<8x8xf32>
    %1010 = arith.maximumf %996, %1000 : vector<8x8xf32>
    %1011 = arith.addf %1009, %1003 : vector<8x8xf32>
    %1012 = arith.maximumf %1010, %1004 : vector<8x8xf32>
    %1013 = arith.addf %1011, %1007 : vector<8x8xf32>
    %1014 = arith.maximumf %1012, %1008 : vector<8x8xf32>
    %cst_143 = arith.constant 1.250000e-01 : f32
    %1015 = vector.broadcast %cst_143 : f32 to vector<8x8xf32>
    %1016 = arith.mulf %1013, %1015 : vector<8x8xf32>
    %c16_144 = arith.constant 16 : index
    %c9_145 = arith.constant 9 : index
    %1017 = vector.load %arg15[%c16_144, %c9_145] : memref<80x26xf32, #tpu.memory_space<vmem>>, vector<8x8xf32>
    tpu.vector_store %arg15[%c16_144, %c9_145], %1016 {strides = array<i32>} : memref<80x26xf32, #tpu.memory_space<vmem>>, vector<8x8xf32>,
    %c56_146 = arith.constant 56 : index
    %c9_147 = arith.constant 9 : index
    %1018 = vector.load %arg15[%c56_146, %c9_147] : memref<80x26xf32, #tpu.memory_space<vmem>>, vector<8x8xf32>
    tpu.vector_store %arg15[%c56_146, %c9_147], %1014 {strides = array<i32>} : memref<80x26xf32, #tpu.memory_space<vmem>>, vector<8x8xf32>,
    %1019 = vector.broadcast %98 : f32 to vector<8x8xf32>
    %cst_148 = arith.constant 0.000000e+00 : f32
    %1020 = vector.broadcast %cst_148 : f32 to vector<8x8xf32>
    %cst_149 = arith.constant 0.000000e+00 : f32
    %1021 = vector.broadcast %cst_149 : f32 to vector<8x8xf32>
    %cst_150 = arith.constant 0.000000e+00 : f32
    %1022 = vector.broadcast %cst_150 : f32 to vector<8x8xf32>
    %c0_151 = arith.constant 0 : index
    %c3_152 = arith.constant 3 : index
    %1023 = vector.load %arg15[%c0_151, %c3_152] : memref<80x26xf32, #tpu.memory_space<vmem>>, vector<80x8xf32>
    %1024 = vector.extract_strided_slice %1023 {offsets = [10, 0], sizes = [8, 8], strides = [1, 1]} : vector<80x8xf32> to vector<8x8xf32>
    %1025 = vector.broadcast %8 : f32 to vector<8x8xf32>
    %1026 = arith.mulf %1025, %1024 : vector<8x8xf32>
    %1027 = vector.extract_strided_slice %1023 {offsets = [50, 0], sizes = [8, 8], strides = [1, 1]} : vector<80x8xf32> to vector<8x8xf32>
    %1028 = vector.broadcast %57 : f32 to vector<8x8xf32>
    %1029 = arith.mulf %1028, %1027 : vector<8x8xf32>
    %1030 = arith.addf %1026, %1029 : vector<8x8xf32>
    %1031 = arith.addf %1019, %1030 : vector<8x8xf32>
    %1032 = vector.extract_strided_slice %1023 {offsets = [13, 0], sizes = [8, 8], strides = [1, 1]} : vector<80x8xf32> to vector<8x8xf32>
    %1033 = vector.broadcast %15 : f32 to vector<8x8xf32>
    %1034 = arith.mulf %1033, %1032 : vector<8x8xf32>
    %1035 = vector.extract_strided_slice %1023 {offsets = [53, 0], sizes = [8, 8], strides = [1, 1]} : vector<80x8xf32> to vector<8x8xf32>
    %1036 = vector.broadcast %64 : f32 to vector<8x8xf32>
    %1037 = arith.mulf %1036, %1035 : vector<8x8xf32>
    %1038 = arith.addf %1034, %1037 : vector<8x8xf32>
    %1039 = arith.addf %1020, %1038 : vector<8x8xf32>
    %1040 = vector.extract_strided_slice %1023 {offsets = [16, 0], sizes = [8, 8], strides = [1, 1]} : vector<80x8xf32> to vector<8x8xf32>
    %1041 = vector.broadcast %22 : f32 to vector<8x8xf32>
    %1042 = arith.mulf %1041, %1040 : vector<8x8xf32>
    %1043 = vector.extract_strided_slice %1023 {offsets = [56, 0], sizes = [8, 8], strides = [1, 1]} : vector<80x8xf32> to vector<8x8xf32>
    %1044 = vector.broadcast %71 : f32 to vector<8x8xf32>
    %1045 = arith.mulf %1044, %1043 : vector<8x8xf32>
    %1046 = arith.addf %1042, %1045 : vector<8x8xf32>
    %1047 = arith.addf %1021, %1046 : vector<8x8xf32>
    %1048 = vector.extract_strided_slice %1023 {offsets = [19, 0], sizes = [8, 8], strides = [1, 1]} : vector<80x8xf32> to vector<8x8xf32>
    %1049 = vector.broadcast %29 : f32 to vector<8x8xf32>
    %1050 = arith.mulf %1049, %1048 : vector<8x8xf32>
    %1051 = vector.extract_strided_slice %1023 {offsets = [59, 0], sizes = [8, 8], strides = [1, 1]} : vector<80x8xf32> to vector<8x8xf32>
    %1052 = vector.broadcast %78 : f32 to vector<8x8xf32>
    %1053 = arith.mulf %1052, %1051 : vector<8x8xf32>
    %1054 = arith.addf %1050, %1053 : vector<8x8xf32>
    %1055 = arith.addf %1022, %1054 : vector<8x8xf32>
    %1056 = vector.extract_strided_slice %1023 {offsets = [22, 0], sizes = [8, 8], strides = [1, 1]} : vector<80x8xf32> to vector<8x8xf32>
    %1057 = vector.broadcast %36 : f32 to vector<8x8xf32>
    %1058 = arith.mulf %1057, %1056 : vector<8x8xf32>
    %1059 = vector.extract_strided_slice %1023 {offsets = [62, 0], sizes = [8, 8], strides = [1, 1]} : vector<80x8xf32> to vector<8x8xf32>
    %1060 = vector.broadcast %85 : f32 to vector<8x8xf32>
    %1061 = arith.mulf %1060, %1059 : vector<8x8xf32>
    %1062 = arith.addf %1058, %1061 : vector<8x8xf32>
    %1063 = arith.addf %1031, %1062 : vector<8x8xf32>
    %c0_153 = arith.constant 0 : index
    %c6_154 = arith.constant 6 : index
    %1064 = vector.load %arg15[%c0_153, %c6_154] : memref<80x26xf32, #tpu.memory_space<vmem>>, vector<80x8xf32>
    %1065 = vector.extract_strided_slice %1064 {offsets = [10, 0], sizes = [8, 8], strides = [1, 1]} : vector<80x8xf32> to vector<8x8xf32>
    %1066 = vector.broadcast %9 : f32 to vector<8x8xf32>
    %1067 = arith.mulf %1066, %1065 : vector<8x8xf32>
    %1068 = vector.extract_strided_slice %1064 {offsets = [50, 0], sizes = [8, 8], strides = [1, 1]} : vector<80x8xf32> to vector<8x8xf32>
    %1069 = vector.broadcast %58 : f32 to vector<8x8xf32>
    %1070 = arith.mulf %1069, %1068 : vector<8x8xf32>
    %1071 = arith.addf %1067, %1070 : vector<8x8xf32>
    %1072 = arith.addf %1039, %1071 : vector<8x8xf32>
    %1073 = vector.extract_strided_slice %1064 {offsets = [13, 0], sizes = [8, 8], strides = [1, 1]} : vector<80x8xf32> to vector<8x8xf32>
    %1074 = vector.broadcast %16 : f32 to vector<8x8xf32>
    %1075 = arith.mulf %1074, %1073 : vector<8x8xf32>
    %1076 = vector.extract_strided_slice %1064 {offsets = [53, 0], sizes = [8, 8], strides = [1, 1]} : vector<80x8xf32> to vector<8x8xf32>
    %1077 = vector.broadcast %65 : f32 to vector<8x8xf32>
    %1078 = arith.mulf %1077, %1076 : vector<8x8xf32>
    %1079 = arith.addf %1075, %1078 : vector<8x8xf32>
    %1080 = arith.addf %1047, %1079 : vector<8x8xf32>
    %1081 = vector.extract_strided_slice %1064 {offsets = [16, 0], sizes = [8, 8], strides = [1, 1]} : vector<80x8xf32> to vector<8x8xf32>
    %1082 = vector.broadcast %23 : f32 to vector<8x8xf32>
    %1083 = arith.mulf %1082, %1081 : vector<8x8xf32>
    %1084 = vector.extract_strided_slice %1064 {offsets = [56, 0], sizes = [8, 8], strides = [1, 1]} : vector<80x8xf32> to vector<8x8xf32>
    %1085 = vector.broadcast %72 : f32 to vector<8x8xf32>
    %1086 = arith.mulf %1085, %1084 : vector<8x8xf32>
    %1087 = arith.addf %1083, %1086 : vector<8x8xf32>
    %1088 = arith.addf %1055, %1087 : vector<8x8xf32>
    %1089 = vector.extract_strided_slice %1064 {offsets = [19, 0], sizes = [8, 8], strides = [1, 1]} : vector<80x8xf32> to vector<8x8xf32>
    %1090 = vector.broadcast %30 : f32 to vector<8x8xf32>
    %1091 = arith.mulf %1090, %1089 : vector<8x8xf32>
    %1092 = vector.extract_strided_slice %1064 {offsets = [59, 0], sizes = [8, 8], strides = [1, 1]} : vector<80x8xf32> to vector<8x8xf32>
    %1093 = vector.broadcast %79 : f32 to vector<8x8xf32>
    %1094 = arith.mulf %1093, %1092 : vector<8x8xf32>
    %1095 = arith.addf %1091, %1094 : vector<8x8xf32>
    %1096 = arith.addf %1063, %1095 : vector<8x8xf32>
    %1097 = vector.extract_strided_slice %1064 {offsets = [22, 0], sizes = [8, 8], strides = [1, 1]} : vector<80x8xf32> to vector<8x8xf32>
    %1098 = vector.broadcast %37 : f32 to vector<8x8xf32>
    %1099 = arith.mulf %1098, %1097 : vector<8x8xf32>
    %1100 = vector.extract_strided_slice %1064 {offsets = [62, 0], sizes = [8, 8], strides = [1, 1]} : vector<80x8xf32> to vector<8x8xf32>
    %1101 = vector.broadcast %86 : f32 to vector<8x8xf32>
    %1102 = arith.mulf %1101, %1100 : vector<8x8xf32>
    %1103 = arith.addf %1099, %1102 : vector<8x8xf32>
    %1104 = arith.addf %1072, %1103 : vector<8x8xf32>
    %c0_155 = arith.constant 0 : index
    %c9_156 = arith.constant 9 : index
    %1105 = vector.load %arg15[%c0_155, %c9_156] : memref<80x26xf32, #tpu.memory_space<vmem>>, vector<80x8xf32>
    %1106 = vector.extract_strided_slice %1105 {offsets = [10, 0], sizes = [8, 8], strides = [1, 1]} : vector<80x8xf32> to vector<8x8xf32>
    %1107 = vector.broadcast %10 : f32 to vector<8x8xf32>
    %1108 = arith.mulf %1107, %1106 : vector<8x8xf32>
    %1109 = vector.extract_strided_slice %1105 {offsets = [50, 0], sizes = [8, 8], strides = [1, 1]} : vector<80x8xf32> to vector<8x8xf32>
    %1110 = vector.broadcast %59 : f32 to vector<8x8xf32>
    %1111 = arith.mulf %1110, %1109 : vector<8x8xf32>
    %1112 = arith.addf %1108, %1111 : vector<8x8xf32>
    %1113 = arith.addf %1080, %1112 : vector<8x8xf32>
    %1114 = vector.extract_strided_slice %1105 {offsets = [13, 0], sizes = [8, 8], strides = [1, 1]} : vector<80x8xf32> to vector<8x8xf32>
    %1115 = vector.broadcast %17 : f32 to vector<8x8xf32>
    %1116 = arith.mulf %1115, %1114 : vector<8x8xf32>
    %1117 = vector.extract_strided_slice %1105 {offsets = [53, 0], sizes = [8, 8], strides = [1, 1]} : vector<80x8xf32> to vector<8x8xf32>
    %1118 = vector.broadcast %66 : f32 to vector<8x8xf32>
    %1119 = arith.mulf %1118, %1117 : vector<8x8xf32>
    %1120 = arith.addf %1116, %1119 : vector<8x8xf32>
    %1121 = arith.addf %1088, %1120 : vector<8x8xf32>
    %1122 = vector.extract_strided_slice %1105 {offsets = [16, 0], sizes = [8, 8], strides = [1, 1]} : vector<80x8xf32> to vector<8x8xf32>
    %1123 = vector.broadcast %24 : f32 to vector<8x8xf32>
    %1124 = arith.mulf %1123, %1122 : vector<8x8xf32>
    %1125 = vector.extract_strided_slice %1105 {offsets = [56, 0], sizes = [8, 8], strides = [1, 1]} : vector<80x8xf32> to vector<8x8xf32>
    %1126 = vector.broadcast %73 : f32 to vector<8x8xf32>
    %1127 = arith.mulf %1126, %1125 : vector<8x8xf32>
    %1128 = arith.addf %1124, %1127 : vector<8x8xf32>
    %1129 = arith.addf %1096, %1128 : vector<8x8xf32>
    %1130 = vector.extract_strided_slice %1105 {offsets = [19, 0], sizes = [8, 8], strides = [1, 1]} : vector<80x8xf32> to vector<8x8xf32>
    %1131 = vector.broadcast %31 : f32 to vector<8x8xf32>
    %1132 = arith.mulf %1131, %1130 : vector<8x8xf32>
    %1133 = vector.extract_strided_slice %1105 {offsets = [59, 0], sizes = [8, 8], strides = [1, 1]} : vector<80x8xf32> to vector<8x8xf32>
    %1134 = vector.broadcast %80 : f32 to vector<8x8xf32>
    %1135 = arith.mulf %1134, %1133 : vector<8x8xf32>
    %1136 = arith.addf %1132, %1135 : vector<8x8xf32>
    %1137 = arith.addf %1104, %1136 : vector<8x8xf32>
    %1138 = vector.extract_strided_slice %1105 {offsets = [22, 0], sizes = [8, 8], strides = [1, 1]} : vector<80x8xf32> to vector<8x8xf32>
    %1139 = vector.broadcast %38 : f32 to vector<8x8xf32>
    %1140 = arith.mulf %1139, %1138 : vector<8x8xf32>
    %1141 = vector.extract_strided_slice %1105 {offsets = [62, 0], sizes = [8, 8], strides = [1, 1]} : vector<80x8xf32> to vector<8x8xf32>
    %1142 = vector.broadcast %87 : f32 to vector<8x8xf32>
    %1143 = arith.mulf %1142, %1141 : vector<8x8xf32>
    %1144 = arith.addf %1140, %1143 : vector<8x8xf32>
    %1145 = arith.addf %1113, %1144 : vector<8x8xf32>
    %c0_157 = arith.constant 0 : index
    %c12_158 = arith.constant 12 : index
    %1146 = vector.load %arg15[%c0_157, %c12_158] : memref<80x26xf32, #tpu.memory_space<vmem>>, vector<80x8xf32>
    %1147 = vector.extract_strided_slice %1146 {offsets = [10, 0], sizes = [8, 8], strides = [1, 1]} : vector<80x8xf32> to vector<8x8xf32>
    %1148 = vector.broadcast %11 : f32 to vector<8x8xf32>
    %1149 = arith.mulf %1148, %1147 : vector<8x8xf32>
    %1150 = vector.extract_strided_slice %1146 {offsets = [50, 0], sizes = [8, 8], strides = [1, 1]} : vector<80x8xf32> to vector<8x8xf32>
    %1151 = vector.broadcast %60 : f32 to vector<8x8xf32>
    %1152 = arith.mulf %1151, %1150 : vector<8x8xf32>
    %1153 = arith.addf %1149, %1152 : vector<8x8xf32>
    %1154 = arith.addf %1121, %1153 : vector<8x8xf32>
    %1155 = vector.extract_strided_slice %1146 {offsets = [13, 0], sizes = [8, 8], strides = [1, 1]} : vector<80x8xf32> to vector<8x8xf32>
    %1156 = vector.broadcast %18 : f32 to vector<8x8xf32>
    %1157 = arith.mulf %1156, %1155 : vector<8x8xf32>
    %1158 = vector.extract_strided_slice %1146 {offsets = [53, 0], sizes = [8, 8], strides = [1, 1]} : vector<80x8xf32> to vector<8x8xf32>
    %1159 = vector.broadcast %67 : f32 to vector<8x8xf32>
    %1160 = arith.mulf %1159, %1158 : vector<8x8xf32>
    %1161 = arith.addf %1157, %1160 : vector<8x8xf32>
    %1162 = arith.addf %1129, %1161 : vector<8x8xf32>
    %1163 = vector.extract_strided_slice %1146 {offsets = [16, 0], sizes = [8, 8], strides = [1, 1]} : vector<80x8xf32> to vector<8x8xf32>
    %1164 = vector.broadcast %25 : f32 to vector<8x8xf32>
    %1165 = arith.mulf %1164, %1163 : vector<8x8xf32>
    %1166 = vector.extract_strided_slice %1146 {offsets = [56, 0], sizes = [8, 8], strides = [1, 1]} : vector<80x8xf32> to vector<8x8xf32>
    %1167 = vector.broadcast %74 : f32 to vector<8x8xf32>
    %1168 = arith.mulf %1167, %1166 : vector<8x8xf32>
    %1169 = arith.addf %1165, %1168 : vector<8x8xf32>
    %1170 = arith.addf %1137, %1169 : vector<8x8xf32>
    %1171 = vector.extract_strided_slice %1146 {offsets = [19, 0], sizes = [8, 8], strides = [1, 1]} : vector<80x8xf32> to vector<8x8xf32>
    %1172 = vector.broadcast %32 : f32 to vector<8x8xf32>
    %1173 = arith.mulf %1172, %1171 : vector<8x8xf32>
    %1174 = vector.extract_strided_slice %1146 {offsets = [59, 0], sizes = [8, 8], strides = [1, 1]} : vector<80x8xf32> to vector<8x8xf32>
    %1175 = vector.broadcast %81 : f32 to vector<8x8xf32>
    %1176 = arith.mulf %1175, %1174 : vector<8x8xf32>
    %1177 = arith.addf %1173, %1176 : vector<8x8xf32>
    %1178 = arith.addf %1145, %1177 : vector<8x8xf32>
    %1179 = vector.extract_strided_slice %1146 {offsets = [22, 0], sizes = [8, 8], strides = [1, 1]} : vector<80x8xf32> to vector<8x8xf32>
    %1180 = vector.broadcast %39 : f32 to vector<8x8xf32>
    %1181 = arith.mulf %1180, %1179 : vector<8x8xf32>
    %1182 = vector.extract_strided_slice %1146 {offsets = [62, 0], sizes = [8, 8], strides = [1, 1]} : vector<80x8xf32> to vector<8x8xf32>
    %1183 = vector.broadcast %88 : f32 to vector<8x8xf32>
    %1184 = arith.mulf %1183, %1182 : vector<8x8xf32>
    %1185 = arith.addf %1181, %1184 : vector<8x8xf32>
    %1186 = arith.addf %1154, %1185 : vector<8x8xf32>
    %c0_159 = arith.constant 0 : index
    %c15_160 = arith.constant 15 : index
    %1187 = vector.load %arg15[%c0_159, %c15_160] : memref<80x26xf32, #tpu.memory_space<vmem>>, vector<80x8xf32>
    %1188 = vector.extract_strided_slice %1187 {offsets = [10, 0], sizes = [8, 8], strides = [1, 1]} : vector<80x8xf32> to vector<8x8xf32>
    %1189 = vector.broadcast %12 : f32 to vector<8x8xf32>
    %1190 = arith.mulf %1189, %1188 : vector<8x8xf32>
    %1191 = vector.extract_strided_slice %1187 {offsets = [50, 0], sizes = [8, 8], strides = [1, 1]} : vector<80x8xf32> to vector<8x8xf32>
    %1192 = vector.broadcast %61 : f32 to vector<8x8xf32>
    %1193 = arith.mulf %1192, %1191 : vector<8x8xf32>
    %1194 = arith.addf %1190, %1193 : vector<8x8xf32>
    %1195 = arith.addf %1162, %1194 : vector<8x8xf32>
    %1196 = vector.extract_strided_slice %1187 {offsets = [13, 0], sizes = [8, 8], strides = [1, 1]} : vector<80x8xf32> to vector<8x8xf32>
    %1197 = vector.broadcast %19 : f32 to vector<8x8xf32>
    %1198 = arith.mulf %1197, %1196 : vector<8x8xf32>
    %1199 = vector.extract_strided_slice %1187 {offsets = [53, 0], sizes = [8, 8], strides = [1, 1]} : vector<80x8xf32> to vector<8x8xf32>
    %1200 = vector.broadcast %68 : f32 to vector<8x8xf32>
    %1201 = arith.mulf %1200, %1199 : vector<8x8xf32>
    %1202 = arith.addf %1198, %1201 : vector<8x8xf32>
    %1203 = arith.addf %1170, %1202 : vector<8x8xf32>
    %1204 = vector.extract_strided_slice %1187 {offsets = [16, 0], sizes = [8, 8], strides = [1, 1]} : vector<80x8xf32> to vector<8x8xf32>
    %1205 = vector.broadcast %26 : f32 to vector<8x8xf32>
    %1206 = arith.mulf %1205, %1204 : vector<8x8xf32>
    %1207 = vector.extract_strided_slice %1187 {offsets = [56, 0], sizes = [8, 8], strides = [1, 1]} : vector<80x8xf32> to vector<8x8xf32>
    %1208 = vector.broadcast %75 : f32 to vector<8x8xf32>
    %1209 = arith.mulf %1208, %1207 : vector<8x8xf32>
    %1210 = arith.addf %1206, %1209 : vector<8x8xf32>
    %1211 = arith.addf %1178, %1210 : vector<8x8xf32>
    %1212 = vector.extract_strided_slice %1187 {offsets = [19, 0], sizes = [8, 8], strides = [1, 1]} : vector<80x8xf32> to vector<8x8xf32>
    %1213 = vector.broadcast %33 : f32 to vector<8x8xf32>
    %1214 = arith.mulf %1213, %1212 : vector<8x8xf32>
    %1215 = vector.extract_strided_slice %1187 {offsets = [59, 0], sizes = [8, 8], strides = [1, 1]} : vector<80x8xf32> to vector<8x8xf32>
    %1216 = vector.broadcast %82 : f32 to vector<8x8xf32>
    %1217 = arith.mulf %1216, %1215 : vector<8x8xf32>
    %1218 = arith.addf %1214, %1217 : vector<8x8xf32>
    %1219 = arith.addf %1186, %1218 : vector<8x8xf32>
    %1220 = vector.extract_strided_slice %1187 {offsets = [22, 0], sizes = [8, 8], strides = [1, 1]} : vector<80x8xf32> to vector<8x8xf32>
    %1221 = vector.broadcast %40 : f32 to vector<8x8xf32>
    %1222 = arith.mulf %1221, %1220 : vector<8x8xf32>
    %1223 = vector.extract_strided_slice %1187 {offsets = [62, 0], sizes = [8, 8], strides = [1, 1]} : vector<80x8xf32> to vector<8x8xf32>
    %1224 = vector.broadcast %89 : f32 to vector<8x8xf32>
    %1225 = arith.mulf %1224, %1223 : vector<8x8xf32>
    %1226 = arith.addf %1222, %1225 : vector<8x8xf32>
    %1227 = arith.addf %1195, %1226 : vector<8x8xf32>
    %1228 = arith.addf %1227, %1203 : vector<8x8xf32>
    %1229 = arith.addf %1211, %1219 : vector<8x8xf32>
    %1230 = arith.addf %1228, %1229 : vector<8x8xf32>
    %1231 = arith.negf %1230 : vector<8x8xf32>
    %1232 = math.exp %1231 : vector<8x8xf32>
    %cst_161 = arith.constant 1.000000e+00 : f32
    %1233 = vector.broadcast %cst_161 : f32 to vector<8x8xf32>
    %1234 = arith.addf %1233, %1232 : vector<8x8xf32>
    %1235 = arith.divf %1233, %1234 : vector<8x8xf32>
    %c0_162 = arith.constant 0 : index
    %c0_163 = arith.constant 0 : index
    %c0_164 = arith.constant 0 : index
    %c0_165 = arith.constant 0 : index
    %1236 = vector.load %arg10[%c0_162, %c0_163, %c0_164, %c0_165] : memref<1x1x8x8xf32, #tpu.memory_space<vmem>>, vector<1x1x8x8xf32>
    %1237 = vector.shape_cast %1236 : vector<1x1x8x8xf32> to vector<8x8xf32>
    %1238 = vector.shape_cast %1235 : vector<8x8xf32> to vector<1x1x8x8xf32>
    tpu.vector_store %arg10[%c0_162, %c0_163, %c0_164, %c0_165], %1238 {strides = array<i32>} : memref<1x1x8x8xf32, #tpu.memory_space<vmem>>, vector<1x1x8x8xf32>,
    %cst_166 = arith.constant 0.000000e+00 : f32
    %1239 = vector.broadcast %cst_166 : f32 to vector<80x26xf32>
    %c0_167 = arith.constant 0 : index
    %c0_168 = arith.constant 0 : index
    %1240 = vector.load %arg16[%c0_167, %c0_168] : memref<80x26xf32, #tpu.memory_space<vmem>>, vector<80x26xf32>
    tpu.vector_store %arg16[%c0_167, %c0_168], %1239 {strides = array<i32>} : memref<80x26xf32, #tpu.memory_space<vmem>>, vector<80x26xf32>,
    %c0_169 = arith.constant 0 : index
    %c0_170 = arith.constant 0 : index
    %c0_171 = arith.constant 0 : index
    %c0_172 = arith.constant 0 : index
    %1241 = vector.load %arg6[%c0_169, %c0_170, %c0_171, %c0_172] : memref<1x16x8x8xf32, #tpu.memory_space<vmem>>, vector<1x1x8x8xf32>
    %1242 = vector.shape_cast %1241 : vector<1x1x8x8xf32> to vector<8x8xf32>
    %c0_173 = arith.constant 0 : index
    %c1_174 = arith.constant 1 : index
    %c0_175 = arith.constant 0 : index
    %c0_176 = arith.constant 0 : index
    %1243 = vector.load %arg6[%c0_173, %c1_174, %c0_175, %c0_176] : memref<1x16x8x8xf32, #tpu.memory_space<vmem>>, vector<1x1x8x8xf32>
    %1244 = vector.shape_cast %1243 : vector<1x1x8x8xf32> to vector<8x8xf32>
    %c0_177 = arith.constant 0 : index
    %c2_178 = arith.constant 2 : index
    %c0_179 = arith.constant 0 : index
    %c0_180 = arith.constant 0 : index
    %1245 = vector.load %arg6[%c0_177, %c2_178, %c0_179, %c0_180] : memref<1x16x8x8xf32, #tpu.memory_space<vmem>>, vector<1x1x8x8xf32>
    %1246 = vector.shape_cast %1245 : vector<1x1x8x8xf32> to vector<8x8xf32>
    %c0_181 = arith.constant 0 : index
    %c3_182 = arith.constant 3 : index
    %c0_183 = arith.constant 0 : index
    %c0_184 = arith.constant 0 : index
    %1247 = vector.load %arg6[%c0_181, %c3_182, %c0_183, %c0_184] : memref<1x16x8x8xf32, #tpu.memory_space<vmem>>, vector<1x1x8x8xf32>
    %1248 = vector.shape_cast %1247 : vector<1x1x8x8xf32> to vector<8x8xf32>
    %c0_185 = arith.constant 0 : index
    %c4_186 = arith.constant 4 : index
    %c0_187 = arith.constant 0 : index
    %c0_188 = arith.constant 0 : index
    %1249 = vector.load %arg6[%c0_185, %c4_186, %c0_187, %c0_188] : memref<1x16x8x8xf32, #tpu.memory_space<vmem>>, vector<1x1x8x8xf32>
    %1250 = vector.shape_cast %1249 : vector<1x1x8x8xf32> to vector<8x8xf32>
    %1251 = arith.addf %1242, %1250 : vector<8x8xf32>
    %1252 = arith.maximumf %1242, %1250 : vector<8x8xf32>
    %c0_189 = arith.constant 0 : index
    %c5_190 = arith.constant 5 : index
    %c0_191 = arith.constant 0 : index
    %c0_192 = arith.constant 0 : index
    %1253 = vector.load %arg6[%c0_189, %c5_190, %c0_191, %c0_192] : memref<1x16x8x8xf32, #tpu.memory_space<vmem>>, vector<1x1x8x8xf32>
    %1254 = vector.shape_cast %1253 : vector<1x1x8x8xf32> to vector<8x8xf32>
    %1255 = arith.addf %1244, %1254 : vector<8x8xf32>
    %1256 = arith.maximumf %1244, %1254 : vector<8x8xf32>
    %c0_193 = arith.constant 0 : index
    %c6_194 = arith.constant 6 : index
    %c0_195 = arith.constant 0 : index
    %c0_196 = arith.constant 0 : index
    %1257 = vector.load %arg6[%c0_193, %c6_194, %c0_195, %c0_196] : memref<1x16x8x8xf32, #tpu.memory_space<vmem>>, vector<1x1x8x8xf32>
    %1258 = vector.shape_cast %1257 : vector<1x1x8x8xf32> to vector<8x8xf32>
    %1259 = arith.addf %1246, %1258 : vector<8x8xf32>
    %1260 = arith.maximumf %1246, %1258 : vector<8x8xf32>
    %c0_197 = arith.constant 0 : index
    %c7_198 = arith.constant 7 : index
    %c0_199 = arith.constant 0 : index
    %c0_200 = arith.constant 0 : index
    %1261 = vector.load %arg6[%c0_197, %c7_198, %c0_199, %c0_200] : memref<1x16x8x8xf32, #tpu.memory_space<vmem>>, vector<1x1x8x8xf32>
    %1262 = vector.shape_cast %1261 : vector<1x1x8x8xf32> to vector<8x8xf32>
    %1263 = arith.addf %1248, %1262 : vector<8x8xf32>
    %1264 = arith.maximumf %1248, %1262 : vector<8x8xf32>
    %c0_201 = arith.constant 0 : index
    %c8_202 = arith.constant 8 : index
    %c0_203 = arith.constant 0 : index
    %c0_204 = arith.constant 0 : index
    %1265 = vector.load %arg6[%c0_201, %c8_202, %c0_203, %c0_204] : memref<1x16x8x8xf32, #tpu.memory_space<vmem>>, vector<1x1x8x8xf32>
    %1266 = vector.shape_cast %1265 : vector<1x1x8x8xf32> to vector<8x8xf32>
    %1267 = arith.addf %1251, %1266 : vector<8x8xf32>
    %1268 = arith.maximumf %1252, %1266 : vector<8x8xf32>
    %c0_205 = arith.constant 0 : index
    %c9_206 = arith.constant 9 : index
    %c0_207 = arith.constant 0 : index
    %c0_208 = arith.constant 0 : index
    %1269 = vector.load %arg6[%c0_205, %c9_206, %c0_207, %c0_208] : memref<1x16x8x8xf32, #tpu.memory_space<vmem>>, vector<1x1x8x8xf32>
    %1270 = vector.shape_cast %1269 : vector<1x1x8x8xf32> to vector<8x8xf32>
    %1271 = arith.addf %1255, %1270 : vector<8x8xf32>
    %1272 = arith.maximumf %1256, %1270 : vector<8x8xf32>
    %c0_209 = arith.constant 0 : index
    %c10_210 = arith.constant 10 : index
    %c0_211 = arith.constant 0 : index
    %c0_212 = arith.constant 0 : index
    %1273 = vector.load %arg6[%c0_209, %c10_210, %c0_211, %c0_212] : memref<1x16x8x8xf32, #tpu.memory_space<vmem>>, vector<1x1x8x8xf32>
    %1274 = vector.shape_cast %1273 : vector<1x1x8x8xf32> to vector<8x8xf32>
    %1275 = arith.addf %1259, %1274 : vector<8x8xf32>
    %1276 = arith.maximumf %1260, %1274 : vector<8x8xf32>
    %c0_213 = arith.constant 0 : index
    %c11_214 = arith.constant 11 : index
    %c0_215 = arith.constant 0 : index
    %c0_216 = arith.constant 0 : index
    %1277 = vector.load %arg6[%c0_213, %c11_214, %c0_215, %c0_216] : memref<1x16x8x8xf32, #tpu.memory_space<vmem>>, vector<1x1x8x8xf32>
    %1278 = vector.shape_cast %1277 : vector<1x1x8x8xf32> to vector<8x8xf32>
    %1279 = arith.addf %1263, %1278 : vector<8x8xf32>
    %1280 = arith.maximumf %1264, %1278 : vector<8x8xf32>
    %c0_217 = arith.constant 0 : index
    %c12_218 = arith.constant 12 : index
    %c0_219 = arith.constant 0 : index
    %c0_220 = arith.constant 0 : index
    %1281 = vector.load %arg6[%c0_217, %c12_218, %c0_219, %c0_220] : memref<1x16x8x8xf32, #tpu.memory_space<vmem>>, vector<1x1x8x8xf32>
    %1282 = vector.shape_cast %1281 : vector<1x1x8x8xf32> to vector<8x8xf32>
    %1283 = arith.addf %1267, %1282 : vector<8x8xf32>
    %1284 = arith.maximumf %1268, %1282 : vector<8x8xf32>
    %c0_221 = arith.constant 0 : index
    %c13_222 = arith.constant 13 : index
    %c0_223 = arith.constant 0 : index
    %c0_224 = arith.constant 0 : index
    %1285 = vector.load %arg6[%c0_221, %c13_222, %c0_223, %c0_224] : memref<1x16x8x8xf32, #tpu.memory_space<vmem>>, vector<1x1x8x8xf32>
    %1286 = vector.shape_cast %1285 : vector<1x1x8x8xf32> to vector<8x8xf32>
    %1287 = arith.addf %1271, %1286 : vector<8x8xf32>
    %1288 = arith.maximumf %1272, %1286 : vector<8x8xf32>
    %c0_225 = arith.constant 0 : index
    %c14_226 = arith.constant 14 : index
    %c0_227 = arith.constant 0 : index
    %c0_228 = arith.constant 0 : index
    %1289 = vector.load %arg6[%c0_225, %c14_226, %c0_227, %c0_228] : memref<1x16x8x8xf32, #tpu.memory_space<vmem>>, vector<1x1x8x8xf32>
    %1290 = vector.shape_cast %1289 : vector<1x1x8x8xf32> to vector<8x8xf32>
    %1291 = arith.addf %1275, %1290 : vector<8x8xf32>
    %1292 = arith.maximumf %1276, %1290 : vector<8x8xf32>
    %c0_229 = arith.constant 0 : index
    %c15_230 = arith.constant 15 : index
    %c0_231 = arith.constant 0 : index
    %c0_232 = arith.constant 0 : index
    %1293 = vector.load %arg6[%c0_229, %c15_230, %c0_231, %c0_232] : memref<1x16x8x8xf32, #tpu.memory_space<vmem>>, vector<1x1x8x8xf32>
    %1294 = vector.shape_cast %1293 : vector<1x1x8x8xf32> to vector<8x8xf32>
    %1295 = arith.addf %1279, %1294 : vector<8x8xf32>
    %1296 = arith.maximumf %1280, %1294 : vector<8x8xf32>
    %1297 = arith.addf %1283, %1287 : vector<8x8xf32>
    %1298 = arith.maximumf %1284, %1288 : vector<8x8xf32>
    %1299 = arith.addf %1297, %1291 : vector<8x8xf32>
    %1300 = arith.maximumf %1298, %1292 : vector<8x8xf32>
    %1301 = arith.addf %1299, %1295 : vector<8x8xf32>
    %1302 = arith.maximumf %1300, %1296 : vector<8x8xf32>
    %cst_233 = arith.constant 6.250000e-02 : f32
    %1303 = vector.broadcast %cst_233 : f32 to vector<8x8xf32>
    %1304 = arith.mulf %1301, %1303 : vector<8x8xf32>
    %c16_234 = arith.constant 16 : index
    %c9_235 = arith.constant 9 : index
    %1305 = vector.load %arg16[%c16_234, %c9_235] : memref<80x26xf32, #tpu.memory_space<vmem>>, vector<8x8xf32>
    tpu.vector_store %arg16[%c16_234, %c9_235], %1304 {strides = array<i32>} : memref<80x26xf32, #tpu.memory_space<vmem>>, vector<8x8xf32>,
    %c56_236 = arith.constant 56 : index
    %c9_237 = arith.constant 9 : index
    %1306 = vector.load %arg16[%c56_236, %c9_237] : memref<80x26xf32, #tpu.memory_space<vmem>>, vector<8x8xf32>
    tpu.vector_store %arg16[%c56_236, %c9_237], %1302 {strides = array<i32>} : memref<80x26xf32, #tpu.memory_space<vmem>>, vector<8x8xf32>,
    %1307 = vector.broadcast %98 : f32 to vector<8x8xf32>
    %cst_238 = arith.constant 0.000000e+00 : f32
    %1308 = vector.broadcast %cst_238 : f32 to vector<8x8xf32>
    %cst_239 = arith.constant 0.000000e+00 : f32
    %1309 = vector.broadcast %cst_239 : f32 to vector<8x8xf32>
    %cst_240 = arith.constant 0.000000e+00 : f32
    %1310 = vector.broadcast %cst_240 : f32 to vector<8x8xf32>
    %c0_241 = arith.constant 0 : index
    %c3_242 = arith.constant 3 : index
    %1311 = vector.load %arg16[%c0_241, %c3_242] : memref<80x26xf32, #tpu.memory_space<vmem>>, vector<80x8xf32>
    %1312 = vector.extract_strided_slice %1311 {offsets = [10, 0], sizes = [8, 8], strides = [1, 1]} : vector<80x8xf32> to vector<8x8xf32>
    %1313 = vector.broadcast %8 : f32 to vector<8x8xf32>
    %1314 = arith.mulf %1313, %1312 : vector<8x8xf32>
    %1315 = vector.extract_strided_slice %1311 {offsets = [50, 0], sizes = [8, 8], strides = [1, 1]} : vector<80x8xf32> to vector<8x8xf32>
    %1316 = vector.broadcast %57 : f32 to vector<8x8xf32>
    %1317 = arith.mulf %1316, %1315 : vector<8x8xf32>
    %1318 = arith.addf %1314, %1317 : vector<8x8xf32>
    %1319 = arith.addf %1307, %1318 : vector<8x8xf32>
    %1320 = vector.extract_strided_slice %1311 {offsets = [13, 0], sizes = [8, 8], strides = [1, 1]} : vector<80x8xf32> to vector<8x8xf32>
    %1321 = vector.broadcast %15 : f32 to vector<8x8xf32>
    %1322 = arith.mulf %1321, %1320 : vector<8x8xf32>
    %1323 = vector.extract_strided_slice %1311 {offsets = [53, 0], sizes = [8, 8], strides = [1, 1]} : vector<80x8xf32> to vector<8x8xf32>
    %1324 = vector.broadcast %64 : f32 to vector<8x8xf32>
    %1325 = arith.mulf %1324, %1323 : vector<8x8xf32>
    %1326 = arith.addf %1322, %1325 : vector<8x8xf32>
    %1327 = arith.addf %1308, %1326 : vector<8x8xf32>
    %1328 = vector.extract_strided_slice %1311 {offsets = [16, 0], sizes = [8, 8], strides = [1, 1]} : vector<80x8xf32> to vector<8x8xf32>
    %1329 = vector.broadcast %22 : f32 to vector<8x8xf32>
    %1330 = arith.mulf %1329, %1328 : vector<8x8xf32>
    %1331 = vector.extract_strided_slice %1311 {offsets = [56, 0], sizes = [8, 8], strides = [1, 1]} : vector<80x8xf32> to vector<8x8xf32>
    %1332 = vector.broadcast %71 : f32 to vector<8x8xf32>
    %1333 = arith.mulf %1332, %1331 : vector<8x8xf32>
    %1334 = arith.addf %1330, %1333 : vector<8x8xf32>
    %1335 = arith.addf %1309, %1334 : vector<8x8xf32>
    %1336 = vector.extract_strided_slice %1311 {offsets = [19, 0], sizes = [8, 8], strides = [1, 1]} : vector<80x8xf32> to vector<8x8xf32>
    %1337 = vector.broadcast %29 : f32 to vector<8x8xf32>
    %1338 = arith.mulf %1337, %1336 : vector<8x8xf32>
    %1339 = vector.extract_strided_slice %1311 {offsets = [59, 0], sizes = [8, 8], strides = [1, 1]} : vector<80x8xf32> to vector<8x8xf32>
    %1340 = vector.broadcast %78 : f32 to vector<8x8xf32>
    %1341 = arith.mulf %1340, %1339 : vector<8x8xf32>
    %1342 = arith.addf %1338, %1341 : vector<8x8xf32>
    %1343 = arith.addf %1310, %1342 : vector<8x8xf32>
    %1344 = vector.extract_strided_slice %1311 {offsets = [22, 0], sizes = [8, 8], strides = [1, 1]} : vector<80x8xf32> to vector<8x8xf32>
    %1345 = vector.broadcast %36 : f32 to vector<8x8xf32>
    %1346 = arith.mulf %1345, %1344 : vector<8x8xf32>
    %1347 = vector.extract_strided_slice %1311 {offsets = [62, 0], sizes = [8, 8], strides = [1, 1]} : vector<80x8xf32> to vector<8x8xf32>
    %1348 = vector.broadcast %85 : f32 to vector<8x8xf32>
    %1349 = arith.mulf %1348, %1347 : vector<8x8xf32>
    %1350 = arith.addf %1346, %1349 : vector<8x8xf32>
    %1351 = arith.addf %1319, %1350 : vector<8x8xf32>
    %c0_243 = arith.constant 0 : index
    %c6_244 = arith.constant 6 : index
    %1352 = vector.load %arg16[%c0_243, %c6_244] : memref<80x26xf32, #tpu.memory_space<vmem>>, vector<80x8xf32>
    %1353 = vector.extract_strided_slice %1352 {offsets = [10, 0], sizes = [8, 8], strides = [1, 1]} : vector<80x8xf32> to vector<8x8xf32>
    %1354 = vector.broadcast %9 : f32 to vector<8x8xf32>
    %1355 = arith.mulf %1354, %1353 : vector<8x8xf32>
    %1356 = vector.extract_strided_slice %1352 {offsets = [50, 0], sizes = [8, 8], strides = [1, 1]} : vector<80x8xf32> to vector<8x8xf32>
    %1357 = vector.broadcast %58 : f32 to vector<8x8xf32>
    %1358 = arith.mulf %1357, %1356 : vector<8x8xf32>
    %1359 = arith.addf %1355, %1358 : vector<8x8xf32>
    %1360 = arith.addf %1327, %1359 : vector<8x8xf32>
    %1361 = vector.extract_strided_slice %1352 {offsets = [13, 0], sizes = [8, 8], strides = [1, 1]} : vector<80x8xf32> to vector<8x8xf32>
    %1362 = vector.broadcast %16 : f32 to vector<8x8xf32>
    %1363 = arith.mulf %1362, %1361 : vector<8x8xf32>
    %1364 = vector.extract_strided_slice %1352 {offsets = [53, 0], sizes = [8, 8], strides = [1, 1]} : vector<80x8xf32> to vector<8x8xf32>
    %1365 = vector.broadcast %65 : f32 to vector<8x8xf32>
    %1366 = arith.mulf %1365, %1364 : vector<8x8xf32>
    %1367 = arith.addf %1363, %1366 : vector<8x8xf32>
    %1368 = arith.addf %1335, %1367 : vector<8x8xf32>
    %1369 = vector.extract_strided_slice %1352 {offsets = [16, 0], sizes = [8, 8], strides = [1, 1]} : vector<80x8xf32> to vector<8x8xf32>
    %1370 = vector.broadcast %23 : f32 to vector<8x8xf32>
    %1371 = arith.mulf %1370, %1369 : vector<8x8xf32>
    %1372 = vector.extract_strided_slice %1352 {offsets = [56, 0], sizes = [8, 8], strides = [1, 1]} : vector<80x8xf32> to vector<8x8xf32>
    %1373 = vector.broadcast %72 : f32 to vector<8x8xf32>
    %1374 = arith.mulf %1373, %1372 : vector<8x8xf32>
    %1375 = arith.addf %1371, %1374 : vector<8x8xf32>
    %1376 = arith.addf %1343, %1375 : vector<8x8xf32>
    %1377 = vector.extract_strided_slice %1352 {offsets = [19, 0], sizes = [8, 8], strides = [1, 1]} : vector<80x8xf32> to vector<8x8xf32>
    %1378 = vector.broadcast %30 : f32 to vector<8x8xf32>
    %1379 = arith.mulf %1378, %1377 : vector<8x8xf32>
    %1380 = vector.extract_strided_slice %1352 {offsets = [59, 0], sizes = [8, 8], strides = [1, 1]} : vector<80x8xf32> to vector<8x8xf32>
    %1381 = vector.broadcast %79 : f32 to vector<8x8xf32>
    %1382 = arith.mulf %1381, %1380 : vector<8x8xf32>
    %1383 = arith.addf %1379, %1382 : vector<8x8xf32>
    %1384 = arith.addf %1351, %1383 : vector<8x8xf32>
    %1385 = vector.extract_strided_slice %1352 {offsets = [22, 0], sizes = [8, 8], strides = [1, 1]} : vector<80x8xf32> to vector<8x8xf32>
    %1386 = vector.broadcast %37 : f32 to vector<8x8xf32>
    %1387 = arith.mulf %1386, %1385 : vector<8x8xf32>
    %1388 = vector.extract_strided_slice %1352 {offsets = [62, 0], sizes = [8, 8], strides = [1, 1]} : vector<80x8xf32> to vector<8x8xf32>
    %1389 = vector.broadcast %86 : f32 to vector<8x8xf32>
    %1390 = arith.mulf %1389, %1388 : vector<8x8xf32>
    %1391 = arith.addf %1387, %1390 : vector<8x8xf32>
    %1392 = arith.addf %1360, %1391 : vector<8x8xf32>
    %c0_245 = arith.constant 0 : index
    %c9_246 = arith.constant 9 : index
    %1393 = vector.load %arg16[%c0_245, %c9_246] : memref<80x26xf32, #tpu.memory_space<vmem>>, vector<80x8xf32>
    %1394 = vector.extract_strided_slice %1393 {offsets = [10, 0], sizes = [8, 8], strides = [1, 1]} : vector<80x8xf32> to vector<8x8xf32>
    %1395 = vector.broadcast %10 : f32 to vector<8x8xf32>
    %1396 = arith.mulf %1395, %1394 : vector<8x8xf32>
    %1397 = vector.extract_strided_slice %1393 {offsets = [50, 0], sizes = [8, 8], strides = [1, 1]} : vector<80x8xf32> to vector<8x8xf32>
    %1398 = vector.broadcast %59 : f32 to vector<8x8xf32>
    %1399 = arith.mulf %1398, %1397 : vector<8x8xf32>
    %1400 = arith.addf %1396, %1399 : vector<8x8xf32>
    %1401 = arith.addf %1368, %1400 : vector<8x8xf32>
    %1402 = vector.extract_strided_slice %1393 {offsets = [13, 0], sizes = [8, 8], strides = [1, 1]} : vector<80x8xf32> to vector<8x8xf32>
    %1403 = vector.broadcast %17 : f32 to vector<8x8xf32>
    %1404 = arith.mulf %1403, %1402 : vector<8x8xf32>
    %1405 = vector.extract_strided_slice %1393 {offsets = [53, 0], sizes = [8, 8], strides = [1, 1]} : vector<80x8xf32> to vector<8x8xf32>
    %1406 = vector.broadcast %66 : f32 to vector<8x8xf32>
    %1407 = arith.mulf %1406, %1405 : vector<8x8xf32>
    %1408 = arith.addf %1404, %1407 : vector<8x8xf32>
    %1409 = arith.addf %1376, %1408 : vector<8x8xf32>
    %1410 = vector.extract_strided_slice %1393 {offsets = [16, 0], sizes = [8, 8], strides = [1, 1]} : vector<80x8xf32> to vector<8x8xf32>
    %1411 = vector.broadcast %24 : f32 to vector<8x8xf32>
    %1412 = arith.mulf %1411, %1410 : vector<8x8xf32>
    %1413 = vector.extract_strided_slice %1393 {offsets = [56, 0], sizes = [8, 8], strides = [1, 1]} : vector<80x8xf32> to vector<8x8xf32>
    %1414 = vector.broadcast %73 : f32 to vector<8x8xf32>
    %1415 = arith.mulf %1414, %1413 : vector<8x8xf32>
    %1416 = arith.addf %1412, %1415 : vector<8x8xf32>
    %1417 = arith.addf %1384, %1416 : vector<8x8xf32>
    %1418 = vector.extract_strided_slice %1393 {offsets = [19, 0], sizes = [8, 8], strides = [1, 1]} : vector<80x8xf32> to vector<8x8xf32>
    %1419 = vector.broadcast %31 : f32 to vector<8x8xf32>
    %1420 = arith.mulf %1419, %1418 : vector<8x8xf32>
    %1421 = vector.extract_strided_slice %1393 {offsets = [59, 0], sizes = [8, 8], strides = [1, 1]} : vector<80x8xf32> to vector<8x8xf32>
    %1422 = vector.broadcast %80 : f32 to vector<8x8xf32>
    %1423 = arith.mulf %1422, %1421 : vector<8x8xf32>
    %1424 = arith.addf %1420, %1423 : vector<8x8xf32>
    %1425 = arith.addf %1392, %1424 : vector<8x8xf32>
    %1426 = vector.extract_strided_slice %1393 {offsets = [22, 0], sizes = [8, 8], strides = [1, 1]} : vector<80x8xf32> to vector<8x8xf32>
    %1427 = vector.broadcast %38 : f32 to vector<8x8xf32>
    %1428 = arith.mulf %1427, %1426 : vector<8x8xf32>
    %1429 = vector.extract_strided_slice %1393 {offsets = [62, 0], sizes = [8, 8], strides = [1, 1]} : vector<80x8xf32> to vector<8x8xf32>
    %1430 = vector.broadcast %87 : f32 to vector<8x8xf32>
    %1431 = arith.mulf %1430, %1429 : vector<8x8xf32>
    %1432 = arith.addf %1428, %1431 : vector<8x8xf32>
    %1433 = arith.addf %1401, %1432 : vector<8x8xf32>
    %c0_247 = arith.constant 0 : index
    %c12_248 = arith.constant 12 : index
    %1434 = vector.load %arg16[%c0_247, %c12_248] : memref<80x26xf32, #tpu.memory_space<vmem>>, vector<80x8xf32>
    %1435 = vector.extract_strided_slice %1434 {offsets = [10, 0], sizes = [8, 8], strides = [1, 1]} : vector<80x8xf32> to vector<8x8xf32>
    %1436 = vector.broadcast %11 : f32 to vector<8x8xf32>
    %1437 = arith.mulf %1436, %1435 : vector<8x8xf32>
    %1438 = vector.extract_strided_slice %1434 {offsets = [50, 0], sizes = [8, 8], strides = [1, 1]} : vector<80x8xf32> to vector<8x8xf32>
    %1439 = vector.broadcast %60 : f32 to vector<8x8xf32>
    %1440 = arith.mulf %1439, %1438 : vector<8x8xf32>
    %1441 = arith.addf %1437, %1440 : vector<8x8xf32>
    %1442 = arith.addf %1409, %1441 : vector<8x8xf32>
    %1443 = vector.extract_strided_slice %1434 {offsets = [13, 0], sizes = [8, 8], strides = [1, 1]} : vector<80x8xf32> to vector<8x8xf32>
    %1444 = vector.broadcast %18 : f32 to vector<8x8xf32>
    %1445 = arith.mulf %1444, %1443 : vector<8x8xf32>
    %1446 = vector.extract_strided_slice %1434 {offsets = [53, 0], sizes = [8, 8], strides = [1, 1]} : vector<80x8xf32> to vector<8x8xf32>
    %1447 = vector.broadcast %67 : f32 to vector<8x8xf32>
    %1448 = arith.mulf %1447, %1446 : vector<8x8xf32>
    %1449 = arith.addf %1445, %1448 : vector<8x8xf32>
    %1450 = arith.addf %1417, %1449 : vector<8x8xf32>
    %1451 = vector.extract_strided_slice %1434 {offsets = [16, 0], sizes = [8, 8], strides = [1, 1]} : vector<80x8xf32> to vector<8x8xf32>
    %1452 = vector.broadcast %25 : f32 to vector<8x8xf32>
    %1453 = arith.mulf %1452, %1451 : vector<8x8xf32>
    %1454 = vector.extract_strided_slice %1434 {offsets = [56, 0], sizes = [8, 8], strides = [1, 1]} : vector<80x8xf32> to vector<8x8xf32>
    %1455 = vector.broadcast %74 : f32 to vector<8x8xf32>
    %1456 = arith.mulf %1455, %1454 : vector<8x8xf32>
    %1457 = arith.addf %1453, %1456 : vector<8x8xf32>
    %1458 = arith.addf %1425, %1457 : vector<8x8xf32>
    %1459 = vector.extract_strided_slice %1434 {offsets = [19, 0], sizes = [8, 8], strides = [1, 1]} : vector<80x8xf32> to vector<8x8xf32>
    %1460 = vector.broadcast %32 : f32 to vector<8x8xf32>
    %1461 = arith.mulf %1460, %1459 : vector<8x8xf32>
    %1462 = vector.extract_strided_slice %1434 {offsets = [59, 0], sizes = [8, 8], strides = [1, 1]} : vector<80x8xf32> to vector<8x8xf32>
    %1463 = vector.broadcast %81 : f32 to vector<8x8xf32>
    %1464 = arith.mulf %1463, %1462 : vector<8x8xf32>
    %1465 = arith.addf %1461, %1464 : vector<8x8xf32>
    %1466 = arith.addf %1433, %1465 : vector<8x8xf32>
    %1467 = vector.extract_strided_slice %1434 {offsets = [22, 0], sizes = [8, 8], strides = [1, 1]} : vector<80x8xf32> to vector<8x8xf32>
    %1468 = vector.broadcast %39 : f32 to vector<8x8xf32>
    %1469 = arith.mulf %1468, %1467 : vector<8x8xf32>
    %1470 = vector.extract_strided_slice %1434 {offsets = [62, 0], sizes = [8, 8], strides = [1, 1]} : vector<80x8xf32> to vector<8x8xf32>
    %1471 = vector.broadcast %88 : f32 to vector<8x8xf32>
    %1472 = arith.mulf %1471, %1470 : vector<8x8xf32>
    %1473 = arith.addf %1469, %1472 : vector<8x8xf32>
    %1474 = arith.addf %1442, %1473 : vector<8x8xf32>
    %c0_249 = arith.constant 0 : index
    %c15_250 = arith.constant 15 : index
    %1475 = vector.load %arg16[%c0_249, %c15_250] : memref<80x26xf32, #tpu.memory_space<vmem>>, vector<80x8xf32>
    %1476 = vector.extract_strided_slice %1475 {offsets = [10, 0], sizes = [8, 8], strides = [1, 1]} : vector<80x8xf32> to vector<8x8xf32>
    %1477 = vector.broadcast %12 : f32 to vector<8x8xf32>
    %1478 = arith.mulf %1477, %1476 : vector<8x8xf32>
    %1479 = vector.extract_strided_slice %1475 {offsets = [50, 0], sizes = [8, 8], strides = [1, 1]} : vector<80x8xf32> to vector<8x8xf32>
    %1480 = vector.broadcast %61 : f32 to vector<8x8xf32>
    %1481 = arith.mulf %1480, %1479 : vector<8x8xf32>
    %1482 = arith.addf %1478, %1481 : vector<8x8xf32>
    %1483 = arith.addf %1450, %1482 : vector<8x8xf32>
    %1484 = vector.extract_strided_slice %1475 {offsets = [13, 0], sizes = [8, 8], strides = [1, 1]} : vector<80x8xf32> to vector<8x8xf32>
    %1485 = vector.broadcast %19 : f32 to vector<8x8xf32>
    %1486 = arith.mulf %1485, %1484 : vector<8x8xf32>
    %1487 = vector.extract_strided_slice %1475 {offsets = [53, 0], sizes = [8, 8], strides = [1, 1]} : vector<80x8xf32> to vector<8x8xf32>
    %1488 = vector.broadcast %68 : f32 to vector<8x8xf32>
    %1489 = arith.mulf %1488, %1487 : vector<8x8xf32>
    %1490 = arith.addf %1486, %1489 : vector<8x8xf32>
    %1491 = arith.addf %1458, %1490 : vector<8x8xf32>
    %1492 = vector.extract_strided_slice %1475 {offsets = [16, 0], sizes = [8, 8], strides = [1, 1]} : vector<80x8xf32> to vector<8x8xf32>
    %1493 = vector.broadcast %26 : f32 to vector<8x8xf32>
    %1494 = arith.mulf %1493, %1492 : vector<8x8xf32>
    %1495 = vector.extract_strided_slice %1475 {offsets = [56, 0], sizes = [8, 8], strides = [1, 1]} : vector<80x8xf32> to vector<8x8xf32>
    %1496 = vector.broadcast %75 : f32 to vector<8x8xf32>
    %1497 = arith.mulf %1496, %1495 : vector<8x8xf32>
    %1498 = arith.addf %1494, %1497 : vector<8x8xf32>
    %1499 = arith.addf %1466, %1498 : vector<8x8xf32>
    %1500 = vector.extract_strided_slice %1475 {offsets = [19, 0], sizes = [8, 8], strides = [1, 1]} : vector<80x8xf32> to vector<8x8xf32>
    %1501 = vector.broadcast %33 : f32 to vector<8x8xf32>
    %1502 = arith.mulf %1501, %1500 : vector<8x8xf32>
    %1503 = vector.extract_strided_slice %1475 {offsets = [59, 0], sizes = [8, 8], strides = [1, 1]} : vector<80x8xf32> to vector<8x8xf32>
    %1504 = vector.broadcast %82 : f32 to vector<8x8xf32>
    %1505 = arith.mulf %1504, %1503 : vector<8x8xf32>
    %1506 = arith.addf %1502, %1505 : vector<8x8xf32>
    %1507 = arith.addf %1474, %1506 : vector<8x8xf32>
    %1508 = vector.extract_strided_slice %1475 {offsets = [22, 0], sizes = [8, 8], strides = [1, 1]} : vector<80x8xf32> to vector<8x8xf32>
    %1509 = vector.broadcast %40 : f32 to vector<8x8xf32>
    %1510 = arith.mulf %1509, %1508 : vector<8x8xf32>
    %1511 = vector.extract_strided_slice %1475 {offsets = [62, 0], sizes = [8, 8], strides = [1, 1]} : vector<80x8xf32> to vector<8x8xf32>
    %1512 = vector.broadcast %89 : f32 to vector<8x8xf32>
    %1513 = arith.mulf %1512, %1511 : vector<8x8xf32>
    %1514 = arith.addf %1510, %1513 : vector<8x8xf32>
    %1515 = arith.addf %1483, %1514 : vector<8x8xf32>
    %1516 = arith.addf %1515, %1491 : vector<8x8xf32>
    %1517 = arith.addf %1499, %1507 : vector<8x8xf32>
    %1518 = arith.addf %1516, %1517 : vector<8x8xf32>
    %1519 = arith.negf %1518 : vector<8x8xf32>
    %1520 = math.exp %1519 : vector<8x8xf32>
    %cst_251 = arith.constant 1.000000e+00 : f32
    %1521 = vector.broadcast %cst_251 : f32 to vector<8x8xf32>
    %1522 = arith.addf %1521, %1520 : vector<8x8xf32>
    %1523 = arith.divf %1521, %1522 : vector<8x8xf32>
    %c0_252 = arith.constant 0 : index
    %c0_253 = arith.constant 0 : index
    %c0_254 = arith.constant 0 : index
    %c0_255 = arith.constant 0 : index
    %1524 = vector.load %arg11[%c0_252, %c0_253, %c0_254, %c0_255] : memref<1x1x8x8xf32, #tpu.memory_space<vmem>>, vector<1x1x8x8xf32>
    %1525 = vector.shape_cast %1524 : vector<1x1x8x8xf32> to vector<8x8xf32>
    %1526 = vector.shape_cast %1523 : vector<8x8xf32> to vector<1x1x8x8xf32>
    tpu.vector_store %arg11[%c0_252, %c0_253, %c0_254, %c0_255], %1526 {strides = array<i32>} : memref<1x1x8x8xf32, #tpu.memory_space<vmem>>, vector<1x1x8x8xf32>,
    %cst_256 = arith.constant 0.000000e+00 : f32
    %1527 = vector.broadcast %cst_256 : f32 to vector<80x26xf32>
    %c0_257 = arith.constant 0 : index
    %c0_258 = arith.constant 0 : index
    %1528 = vector.load %arg17[%c0_257, %c0_258] : memref<80x26xf32, #tpu.memory_space<vmem>>, vector<80x26xf32>
    tpu.vector_store %arg17[%c0_257, %c0_258], %1527 {strides = array<i32>} : memref<80x26xf32, #tpu.memory_space<vmem>>, vector<80x26xf32>,
    %c0_259 = arith.constant 0 : index
    %c0_260 = arith.constant 0 : index
    %c0_261 = arith.constant 0 : index
    %c0_262 = arith.constant 0 : index
    %1529 = vector.load %arg7[%c0_259, %c0_260, %c0_261, %c0_262] : memref<1x16x8x8xf32, #tpu.memory_space<vmem>>, vector<1x1x8x8xf32>
    %1530 = vector.shape_cast %1529 : vector<1x1x8x8xf32> to vector<8x8xf32>
    %c0_263 = arith.constant 0 : index
    %c1_264 = arith.constant 1 : index
    %c0_265 = arith.constant 0 : index
    %c0_266 = arith.constant 0 : index
    %1531 = vector.load %arg7[%c0_263, %c1_264, %c0_265, %c0_266] : memref<1x16x8x8xf32, #tpu.memory_space<vmem>>, vector<1x1x8x8xf32>
    %1532 = vector.shape_cast %1531 : vector<1x1x8x8xf32> to vector<8x8xf32>
    %c0_267 = arith.constant 0 : index
    %c2_268 = arith.constant 2 : index
    %c0_269 = arith.constant 0 : index
    %c0_270 = arith.constant 0 : index
    %1533 = vector.load %arg7[%c0_267, %c2_268, %c0_269, %c0_270] : memref<1x16x8x8xf32, #tpu.memory_space<vmem>>, vector<1x1x8x8xf32>
    %1534 = vector.shape_cast %1533 : vector<1x1x8x8xf32> to vector<8x8xf32>
    %c0_271 = arith.constant 0 : index
    %c3_272 = arith.constant 3 : index
    %c0_273 = arith.constant 0 : index
    %c0_274 = arith.constant 0 : index
    %1535 = vector.load %arg7[%c0_271, %c3_272, %c0_273, %c0_274] : memref<1x16x8x8xf32, #tpu.memory_space<vmem>>, vector<1x1x8x8xf32>
    %1536 = vector.shape_cast %1535 : vector<1x1x8x8xf32> to vector<8x8xf32>
    %c0_275 = arith.constant 0 : index
    %c4_276 = arith.constant 4 : index
    %c0_277 = arith.constant 0 : index
    %c0_278 = arith.constant 0 : index
    %1537 = vector.load %arg7[%c0_275, %c4_276, %c0_277, %c0_278] : memref<1x16x8x8xf32, #tpu.memory_space<vmem>>, vector<1x1x8x8xf32>
    %1538 = vector.shape_cast %1537 : vector<1x1x8x8xf32> to vector<8x8xf32>
    %1539 = arith.addf %1530, %1538 : vector<8x8xf32>
    %1540 = arith.maximumf %1530, %1538 : vector<8x8xf32>
    %c0_279 = arith.constant 0 : index
    %c5_280 = arith.constant 5 : index
    %c0_281 = arith.constant 0 : index
    %c0_282 = arith.constant 0 : index
    %1541 = vector.load %arg7[%c0_279, %c5_280, %c0_281, %c0_282] : memref<1x16x8x8xf32, #tpu.memory_space<vmem>>, vector<1x1x8x8xf32>
    %1542 = vector.shape_cast %1541 : vector<1x1x8x8xf32> to vector<8x8xf32>
    %1543 = arith.addf %1532, %1542 : vector<8x8xf32>
    %1544 = arith.maximumf %1532, %1542 : vector<8x8xf32>
    %c0_283 = arith.constant 0 : index
    %c6_284 = arith.constant 6 : index
    %c0_285 = arith.constant 0 : index
    %c0_286 = arith.constant 0 : index
    %1545 = vector.load %arg7[%c0_283, %c6_284, %c0_285, %c0_286] : memref<1x16x8x8xf32, #tpu.memory_space<vmem>>, vector<1x1x8x8xf32>
    %1546 = vector.shape_cast %1545 : vector<1x1x8x8xf32> to vector<8x8xf32>
    %1547 = arith.addf %1534, %1546 : vector<8x8xf32>
    %1548 = arith.maximumf %1534, %1546 : vector<8x8xf32>
    %c0_287 = arith.constant 0 : index
    %c7_288 = arith.constant 7 : index
    %c0_289 = arith.constant 0 : index
    %c0_290 = arith.constant 0 : index
    %1549 = vector.load %arg7[%c0_287, %c7_288, %c0_289, %c0_290] : memref<1x16x8x8xf32, #tpu.memory_space<vmem>>, vector<1x1x8x8xf32>
    %1550 = vector.shape_cast %1549 : vector<1x1x8x8xf32> to vector<8x8xf32>
    %1551 = arith.addf %1536, %1550 : vector<8x8xf32>
    %1552 = arith.maximumf %1536, %1550 : vector<8x8xf32>
    %c0_291 = arith.constant 0 : index
    %c8_292 = arith.constant 8 : index
    %c0_293 = arith.constant 0 : index
    %c0_294 = arith.constant 0 : index
    %1553 = vector.load %arg7[%c0_291, %c8_292, %c0_293, %c0_294] : memref<1x16x8x8xf32, #tpu.memory_space<vmem>>, vector<1x1x8x8xf32>
    %1554 = vector.shape_cast %1553 : vector<1x1x8x8xf32> to vector<8x8xf32>
    %1555 = arith.addf %1539, %1554 : vector<8x8xf32>
    %1556 = arith.maximumf %1540, %1554 : vector<8x8xf32>
    %c0_295 = arith.constant 0 : index
    %c9_296 = arith.constant 9 : index
    %c0_297 = arith.constant 0 : index
    %c0_298 = arith.constant 0 : index
    %1557 = vector.load %arg7[%c0_295, %c9_296, %c0_297, %c0_298] : memref<1x16x8x8xf32, #tpu.memory_space<vmem>>, vector<1x1x8x8xf32>
    %1558 = vector.shape_cast %1557 : vector<1x1x8x8xf32> to vector<8x8xf32>
    %1559 = arith.addf %1543, %1558 : vector<8x8xf32>
    %1560 = arith.maximumf %1544, %1558 : vector<8x8xf32>
    %c0_299 = arith.constant 0 : index
    %c10_300 = arith.constant 10 : index
    %c0_301 = arith.constant 0 : index
    %c0_302 = arith.constant 0 : index
    %1561 = vector.load %arg7[%c0_299, %c10_300, %c0_301, %c0_302] : memref<1x16x8x8xf32, #tpu.memory_space<vmem>>, vector<1x1x8x8xf32>
    %1562 = vector.shape_cast %1561 : vector<1x1x8x8xf32> to vector<8x8xf32>
    %1563 = arith.addf %1547, %1562 : vector<8x8xf32>
    %1564 = arith.maximumf %1548, %1562 : vector<8x8xf32>
    %c0_303 = arith.constant 0 : index
    %c11_304 = arith.constant 11 : index
    %c0_305 = arith.constant 0 : index
    %c0_306 = arith.constant 0 : index
    %1565 = vector.load %arg7[%c0_303, %c11_304, %c0_305, %c0_306] : memref<1x16x8x8xf32, #tpu.memory_space<vmem>>, vector<1x1x8x8xf32>
    %1566 = vector.shape_cast %1565 : vector<1x1x8x8xf32> to vector<8x8xf32>
    %1567 = arith.addf %1551, %1566 : vector<8x8xf32>
    %1568 = arith.maximumf %1552, %1566 : vector<8x8xf32>
    %c0_307 = arith.constant 0 : index
    %c12_308 = arith.constant 12 : index
    %c0_309 = arith.constant 0 : index
    %c0_310 = arith.constant 0 : index
    %1569 = vector.load %arg7[%c0_307, %c12_308, %c0_309, %c0_310] : memref<1x16x8x8xf32, #tpu.memory_space<vmem>>, vector<1x1x8x8xf32>
    %1570 = vector.shape_cast %1569 : vector<1x1x8x8xf32> to vector<8x8xf32>
    %1571 = arith.addf %1555, %1570 : vector<8x8xf32>
    %1572 = arith.maximumf %1556, %1570 : vector<8x8xf32>
    %c0_311 = arith.constant 0 : index
    %c13_312 = arith.constant 13 : index
    %c0_313 = arith.constant 0 : index
    %c0_314 = arith.constant 0 : index
    %1573 = vector.load %arg7[%c0_311, %c13_312, %c0_313, %c0_314] : memref<1x16x8x8xf32, #tpu.memory_space<vmem>>, vector<1x1x8x8xf32>
    %1574 = vector.shape_cast %1573 : vector<1x1x8x8xf32> to vector<8x8xf32>
    %1575 = arith.addf %1559, %1574 : vector<8x8xf32>
    %1576 = arith.maximumf %1560, %1574 : vector<8x8xf32>
    %c0_315 = arith.constant 0 : index
    %c14_316 = arith.constant 14 : index
    %c0_317 = arith.constant 0 : index
    %c0_318 = arith.constant 0 : index
    %1577 = vector.load %arg7[%c0_315, %c14_316, %c0_317, %c0_318] : memref<1x16x8x8xf32, #tpu.memory_space<vmem>>, vector<1x1x8x8xf32>
    %1578 = vector.shape_cast %1577 : vector<1x1x8x8xf32> to vector<8x8xf32>
    %1579 = arith.addf %1563, %1578 : vector<8x8xf32>
    %1580 = arith.maximumf %1564, %1578 : vector<8x8xf32>
    %c0_319 = arith.constant 0 : index
    %c15_320 = arith.constant 15 : index
    %c0_321 = arith.constant 0 : index
    %c0_322 = arith.constant 0 : index
    %1581 = vector.load %arg7[%c0_319, %c15_320, %c0_321, %c0_322] : memref<1x16x8x8xf32, #tpu.memory_space<vmem>>, vector<1x1x8x8xf32>
    %1582 = vector.shape_cast %1581 : vector<1x1x8x8xf32> to vector<8x8xf32>
    %1583 = arith.addf %1567, %1582 : vector<8x8xf32>
    %1584 = arith.maximumf %1568, %1582 : vector<8x8xf32>
    %1585 = arith.addf %1571, %1575 : vector<8x8xf32>
    %1586 = arith.maximumf %1572, %1576 : vector<8x8xf32>
    %1587 = arith.addf %1585, %1579 : vector<8x8xf32>
    %1588 = arith.maximumf %1586, %1580 : vector<8x8xf32>
    %1589 = arith.addf %1587, %1583 : vector<8x8xf32>
    %1590 = arith.maximumf %1588, %1584 : vector<8x8xf32>
    %cst_323 = arith.constant 6.250000e-02 : f32
    %1591 = vector.broadcast %cst_323 : f32 to vector<8x8xf32>
    %1592 = arith.mulf %1589, %1591 : vector<8x8xf32>
    %c16_324 = arith.constant 16 : index
    %c9_325 = arith.constant 9 : index
    %1593 = vector.load %arg17[%c16_324, %c9_325] : memref<80x26xf32, #tpu.memory_space<vmem>>, vector<8x8xf32>
    tpu.vector_store %arg17[%c16_324, %c9_325], %1592 {strides = array<i32>} : memref<80x26xf32, #tpu.memory_space<vmem>>, vector<8x8xf32>,
    %c56_326 = arith.constant 56 : index
    %c9_327 = arith.constant 9 : index
    %1594 = vector.load %arg17[%c56_326, %c9_327] : memref<80x26xf32, #tpu.memory_space<vmem>>, vector<8x8xf32>
    tpu.vector_store %arg17[%c56_326, %c9_327], %1590 {strides = array<i32>} : memref<80x26xf32, #tpu.memory_space<vmem>>, vector<8x8xf32>,
    %1595 = vector.broadcast %98 : f32 to vector<8x8xf32>
    %cst_328 = arith.constant 0.000000e+00 : f32
    %1596 = vector.broadcast %cst_328 : f32 to vector<8x8xf32>
    %cst_329 = arith.constant 0.000000e+00 : f32
    %1597 = vector.broadcast %cst_329 : f32 to vector<8x8xf32>
    %cst_330 = arith.constant 0.000000e+00 : f32
    %1598 = vector.broadcast %cst_330 : f32 to vector<8x8xf32>
    %c0_331 = arith.constant 0 : index
    %c3_332 = arith.constant 3 : index
    %1599 = vector.load %arg17[%c0_331, %c3_332] : memref<80x26xf32, #tpu.memory_space<vmem>>, vector<80x8xf32>
    %1600 = vector.extract_strided_slice %1599 {offsets = [10, 0], sizes = [8, 8], strides = [1, 1]} : vector<80x8xf32> to vector<8x8xf32>
    %1601 = vector.broadcast %8 : f32 to vector<8x8xf32>
    %1602 = arith.mulf %1601, %1600 : vector<8x8xf32>
    %1603 = vector.extract_strided_slice %1599 {offsets = [50, 0], sizes = [8, 8], strides = [1, 1]} : vector<80x8xf32> to vector<8x8xf32>
    %1604 = vector.broadcast %57 : f32 to vector<8x8xf32>
    %1605 = arith.mulf %1604, %1603 : vector<8x8xf32>
    %1606 = arith.addf %1602, %1605 : vector<8x8xf32>
    %1607 = arith.addf %1595, %1606 : vector<8x8xf32>
    %1608 = vector.extract_strided_slice %1599 {offsets = [13, 0], sizes = [8, 8], strides = [1, 1]} : vector<80x8xf32> to vector<8x8xf32>
    %1609 = vector.broadcast %15 : f32 to vector<8x8xf32>
    %1610 = arith.mulf %1609, %1608 : vector<8x8xf32>
    %1611 = vector.extract_strided_slice %1599 {offsets = [53, 0], sizes = [8, 8], strides = [1, 1]} : vector<80x8xf32> to vector<8x8xf32>
    %1612 = vector.broadcast %64 : f32 to vector<8x8xf32>
    %1613 = arith.mulf %1612, %1611 : vector<8x8xf32>
    %1614 = arith.addf %1610, %1613 : vector<8x8xf32>
    %1615 = arith.addf %1596, %1614 : vector<8x8xf32>
    %1616 = vector.extract_strided_slice %1599 {offsets = [16, 0], sizes = [8, 8], strides = [1, 1]} : vector<80x8xf32> to vector<8x8xf32>
    %1617 = vector.broadcast %22 : f32 to vector<8x8xf32>
    %1618 = arith.mulf %1617, %1616 : vector<8x8xf32>
    %1619 = vector.extract_strided_slice %1599 {offsets = [56, 0], sizes = [8, 8], strides = [1, 1]} : vector<80x8xf32> to vector<8x8xf32>
    %1620 = vector.broadcast %71 : f32 to vector<8x8xf32>
    %1621 = arith.mulf %1620, %1619 : vector<8x8xf32>
    %1622 = arith.addf %1618, %1621 : vector<8x8xf32>
    %1623 = arith.addf %1597, %1622 : vector<8x8xf32>
    %1624 = vector.extract_strided_slice %1599 {offsets = [19, 0], sizes = [8, 8], strides = [1, 1]} : vector<80x8xf32> to vector<8x8xf32>
    %1625 = vector.broadcast %29 : f32 to vector<8x8xf32>
    %1626 = arith.mulf %1625, %1624 : vector<8x8xf32>
    %1627 = vector.extract_strided_slice %1599 {offsets = [59, 0], sizes = [8, 8], strides = [1, 1]} : vector<80x8xf32> to vector<8x8xf32>
    %1628 = vector.broadcast %78 : f32 to vector<8x8xf32>
    %1629 = arith.mulf %1628, %1627 : vector<8x8xf32>
    %1630 = arith.addf %1626, %1629 : vector<8x8xf32>
    %1631 = arith.addf %1598, %1630 : vector<8x8xf32>
    %1632 = vector.extract_strided_slice %1599 {offsets = [22, 0], sizes = [8, 8], strides = [1, 1]} : vector<80x8xf32> to vector<8x8xf32>
    %1633 = vector.broadcast %36 : f32 to vector<8x8xf32>
    %1634 = arith.mulf %1633, %1632 : vector<8x8xf32>
    %1635 = vector.extract_strided_slice %1599 {offsets = [62, 0], sizes = [8, 8], strides = [1, 1]} : vector<80x8xf32> to vector<8x8xf32>
    %1636 = vector.broadcast %85 : f32 to vector<8x8xf32>
    %1637 = arith.mulf %1636, %1635 : vector<8x8xf32>
    %1638 = arith.addf %1634, %1637 : vector<8x8xf32>
    %1639 = arith.addf %1607, %1638 : vector<8x8xf32>
    %c0_333 = arith.constant 0 : index
    %c6_334 = arith.constant 6 : index
    %1640 = vector.load %arg17[%c0_333, %c6_334] : memref<80x26xf32, #tpu.memory_space<vmem>>, vector<80x8xf32>
    %1641 = vector.extract_strided_slice %1640 {offsets = [10, 0], sizes = [8, 8], strides = [1, 1]} : vector<80x8xf32> to vector<8x8xf32>
    %1642 = vector.broadcast %9 : f32 to vector<8x8xf32>
    %1643 = arith.mulf %1642, %1641 : vector<8x8xf32>
    %1644 = vector.extract_strided_slice %1640 {offsets = [50, 0], sizes = [8, 8], strides = [1, 1]} : vector<80x8xf32> to vector<8x8xf32>
    %1645 = vector.broadcast %58 : f32 to vector<8x8xf32>
    %1646 = arith.mulf %1645, %1644 : vector<8x8xf32>
    %1647 = arith.addf %1643, %1646 : vector<8x8xf32>
    %1648 = arith.addf %1615, %1647 : vector<8x8xf32>
    %1649 = vector.extract_strided_slice %1640 {offsets = [13, 0], sizes = [8, 8], strides = [1, 1]} : vector<80x8xf32> to vector<8x8xf32>
    %1650 = vector.broadcast %16 : f32 to vector<8x8xf32>
    %1651 = arith.mulf %1650, %1649 : vector<8x8xf32>
    %1652 = vector.extract_strided_slice %1640 {offsets = [53, 0], sizes = [8, 8], strides = [1, 1]} : vector<80x8xf32> to vector<8x8xf32>
    %1653 = vector.broadcast %65 : f32 to vector<8x8xf32>
    %1654 = arith.mulf %1653, %1652 : vector<8x8xf32>
    %1655 = arith.addf %1651, %1654 : vector<8x8xf32>
    %1656 = arith.addf %1623, %1655 : vector<8x8xf32>
    %1657 = vector.extract_strided_slice %1640 {offsets = [16, 0], sizes = [8, 8], strides = [1, 1]} : vector<80x8xf32> to vector<8x8xf32>
    %1658 = vector.broadcast %23 : f32 to vector<8x8xf32>
    %1659 = arith.mulf %1658, %1657 : vector<8x8xf32>
    %1660 = vector.extract_strided_slice %1640 {offsets = [56, 0], sizes = [8, 8], strides = [1, 1]} : vector<80x8xf32> to vector<8x8xf32>
    %1661 = vector.broadcast %72 : f32 to vector<8x8xf32>
    %1662 = arith.mulf %1661, %1660 : vector<8x8xf32>
    %1663 = arith.addf %1659, %1662 : vector<8x8xf32>
    %1664 = arith.addf %1631, %1663 : vector<8x8xf32>
    %1665 = vector.extract_strided_slice %1640 {offsets = [19, 0], sizes = [8, 8], strides = [1, 1]} : vector<80x8xf32> to vector<8x8xf32>
    %1666 = vector.broadcast %30 : f32 to vector<8x8xf32>
    %1667 = arith.mulf %1666, %1665 : vector<8x8xf32>
    %1668 = vector.extract_strided_slice %1640 {offsets = [59, 0], sizes = [8, 8], strides = [1, 1]} : vector<80x8xf32> to vector<8x8xf32>
    %1669 = vector.broadcast %79 : f32 to vector<8x8xf32>
    %1670 = arith.mulf %1669, %1668 : vector<8x8xf32>
    %1671 = arith.addf %1667, %1670 : vector<8x8xf32>
    %1672 = arith.addf %1639, %1671 : vector<8x8xf32>
    %1673 = vector.extract_strided_slice %1640 {offsets = [22, 0], sizes = [8, 8], strides = [1, 1]} : vector<80x8xf32> to vector<8x8xf32>
    %1674 = vector.broadcast %37 : f32 to vector<8x8xf32>
    %1675 = arith.mulf %1674, %1673 : vector<8x8xf32>
    %1676 = vector.extract_strided_slice %1640 {offsets = [62, 0], sizes = [8, 8], strides = [1, 1]} : vector<80x8xf32> to vector<8x8xf32>
    %1677 = vector.broadcast %86 : f32 to vector<8x8xf32>
    %1678 = arith.mulf %1677, %1676 : vector<8x8xf32>
    %1679 = arith.addf %1675, %1678 : vector<8x8xf32>
    %1680 = arith.addf %1648, %1679 : vector<8x8xf32>
    %c0_335 = arith.constant 0 : index
    %c9_336 = arith.constant 9 : index
    %1681 = vector.load %arg17[%c0_335, %c9_336] : memref<80x26xf32, #tpu.memory_space<vmem>>, vector<80x8xf32>
    %1682 = vector.extract_strided_slice %1681 {offsets = [10, 0], sizes = [8, 8], strides = [1, 1]} : vector<80x8xf32> to vector<8x8xf32>
    %1683 = vector.broadcast %10 : f32 to vector<8x8xf32>
    %1684 = arith.mulf %1683, %1682 : vector<8x8xf32>
    %1685 = vector.extract_strided_slice %1681 {offsets = [50, 0], sizes = [8, 8], strides = [1, 1]} : vector<80x8xf32> to vector<8x8xf32>
    %1686 = vector.broadcast %59 : f32 to vector<8x8xf32>
    %1687 = arith.mulf %1686, %1685 : vector<8x8xf32>
    %1688 = arith.addf %1684, %1687 : vector<8x8xf32>
    %1689 = arith.addf %1656, %1688 : vector<8x8xf32>
    %1690 = vector.extract_strided_slice %1681 {offsets = [13, 0], sizes = [8, 8], strides = [1, 1]} : vector<80x8xf32> to vector<8x8xf32>
    %1691 = vector.broadcast %17 : f32 to vector<8x8xf32>
    %1692 = arith.mulf %1691, %1690 : vector<8x8xf32>
    %1693 = vector.extract_strided_slice %1681 {offsets = [53, 0], sizes = [8, 8], strides = [1, 1]} : vector<80x8xf32> to vector<8x8xf32>
    %1694 = vector.broadcast %66 : f32 to vector<8x8xf32>
    %1695 = arith.mulf %1694, %1693 : vector<8x8xf32>
    %1696 = arith.addf %1692, %1695 : vector<8x8xf32>
    %1697 = arith.addf %1664, %1696 : vector<8x8xf32>
    %1698 = vector.extract_strided_slice %1681 {offsets = [16, 0], sizes = [8, 8], strides = [1, 1]} : vector<80x8xf32> to vector<8x8xf32>
    %1699 = vector.broadcast %24 : f32 to vector<8x8xf32>
    %1700 = arith.mulf %1699, %1698 : vector<8x8xf32>
    %1701 = vector.extract_strided_slice %1681 {offsets = [56, 0], sizes = [8, 8], strides = [1, 1]} : vector<80x8xf32> to vector<8x8xf32>
    %1702 = vector.broadcast %73 : f32 to vector<8x8xf32>
    %1703 = arith.mulf %1702, %1701 : vector<8x8xf32>
    %1704 = arith.addf %1700, %1703 : vector<8x8xf32>
    %1705 = arith.addf %1672, %1704 : vector<8x8xf32>
    %1706 = vector.extract_strided_slice %1681 {offsets = [19, 0], sizes = [8, 8], strides = [1, 1]} : vector<80x8xf32> to vector<8x8xf32>
    %1707 = vector.broadcast %31 : f32 to vector<8x8xf32>
    %1708 = arith.mulf %1707, %1706 : vector<8x8xf32>
    %1709 = vector.extract_strided_slice %1681 {offsets = [59, 0], sizes = [8, 8], strides = [1, 1]} : vector<80x8xf32> to vector<8x8xf32>
    %1710 = vector.broadcast %80 : f32 to vector<8x8xf32>
    %1711 = arith.mulf %1710, %1709 : vector<8x8xf32>
    %1712 = arith.addf %1708, %1711 : vector<8x8xf32>
    %1713 = arith.addf %1680, %1712 : vector<8x8xf32>
    %1714 = vector.extract_strided_slice %1681 {offsets = [22, 0], sizes = [8, 8], strides = [1, 1]} : vector<80x8xf32> to vector<8x8xf32>
    %1715 = vector.broadcast %38 : f32 to vector<8x8xf32>
    %1716 = arith.mulf %1715, %1714 : vector<8x8xf32>
    %1717 = vector.extract_strided_slice %1681 {offsets = [62, 0], sizes = [8, 8], strides = [1, 1]} : vector<80x8xf32> to vector<8x8xf32>
    %1718 = vector.broadcast %87 : f32 to vector<8x8xf32>
    %1719 = arith.mulf %1718, %1717 : vector<8x8xf32>
    %1720 = arith.addf %1716, %1719 : vector<8x8xf32>
    %1721 = arith.addf %1689, %1720 : vector<8x8xf32>
    %c0_337 = arith.constant 0 : index
    %c12_338 = arith.constant 12 : index
    %1722 = vector.load %arg17[%c0_337, %c12_338] : memref<80x26xf32, #tpu.memory_space<vmem>>, vector<80x8xf32>
    %1723 = vector.extract_strided_slice %1722 {offsets = [10, 0], sizes = [8, 8], strides = [1, 1]} : vector<80x8xf32> to vector<8x8xf32>
    %1724 = vector.broadcast %11 : f32 to vector<8x8xf32>
    %1725 = arith.mulf %1724, %1723 : vector<8x8xf32>
    %1726 = vector.extract_strided_slice %1722 {offsets = [50, 0], sizes = [8, 8], strides = [1, 1]} : vector<80x8xf32> to vector<8x8xf32>
    %1727 = vector.broadcast %60 : f32 to vector<8x8xf32>
    %1728 = arith.mulf %1727, %1726 : vector<8x8xf32>
    %1729 = arith.addf %1725, %1728 : vector<8x8xf32>
    %1730 = arith.addf %1697, %1729 : vector<8x8xf32>
    %1731 = vector.extract_strided_slice %1722 {offsets = [13, 0], sizes = [8, 8], strides = [1, 1]} : vector<80x8xf32> to vector<8x8xf32>
    %1732 = vector.broadcast %18 : f32 to vector<8x8xf32>
    %1733 = arith.mulf %1732, %1731 : vector<8x8xf32>
    %1734 = vector.extract_strided_slice %1722 {offsets = [53, 0], sizes = [8, 8], strides = [1, 1]} : vector<80x8xf32> to vector<8x8xf32>
    %1735 = vector.broadcast %67 : f32 to vector<8x8xf32>
    %1736 = arith.mulf %1735, %1734 : vector<8x8xf32>
    %1737 = arith.addf %1733, %1736 : vector<8x8xf32>
    %1738 = arith.addf %1705, %1737 : vector<8x8xf32>
    %1739 = vector.extract_strided_slice %1722 {offsets = [16, 0], sizes = [8, 8], strides = [1, 1]} : vector<80x8xf32> to vector<8x8xf32>
    %1740 = vector.broadcast %25 : f32 to vector<8x8xf32>
    %1741 = arith.mulf %1740, %1739 : vector<8x8xf32>
    %1742 = vector.extract_strided_slice %1722 {offsets = [56, 0], sizes = [8, 8], strides = [1, 1]} : vector<80x8xf32> to vector<8x8xf32>
    %1743 = vector.broadcast %74 : f32 to vector<8x8xf32>
    %1744 = arith.mulf %1743, %1742 : vector<8x8xf32>
    %1745 = arith.addf %1741, %1744 : vector<8x8xf32>
    %1746 = arith.addf %1713, %1745 : vector<8x8xf32>
    %1747 = vector.extract_strided_slice %1722 {offsets = [19, 0], sizes = [8, 8], strides = [1, 1]} : vector<80x8xf32> to vector<8x8xf32>
    %1748 = vector.broadcast %32 : f32 to vector<8x8xf32>
    %1749 = arith.mulf %1748, %1747 : vector<8x8xf32>
    %1750 = vector.extract_strided_slice %1722 {offsets = [59, 0], sizes = [8, 8], strides = [1, 1]} : vector<80x8xf32> to vector<8x8xf32>
    %1751 = vector.broadcast %81 : f32 to vector<8x8xf32>
    %1752 = arith.mulf %1751, %1750 : vector<8x8xf32>
    %1753 = arith.addf %1749, %1752 : vector<8x8xf32>
    %1754 = arith.addf %1721, %1753 : vector<8x8xf32>
    %1755 = vector.extract_strided_slice %1722 {offsets = [22, 0], sizes = [8, 8], strides = [1, 1]} : vector<80x8xf32> to vector<8x8xf32>
    %1756 = vector.broadcast %39 : f32 to vector<8x8xf32>
    %1757 = arith.mulf %1756, %1755 : vector<8x8xf32>
    %1758 = vector.extract_strided_slice %1722 {offsets = [62, 0], sizes = [8, 8], strides = [1, 1]} : vector<80x8xf32> to vector<8x8xf32>
    %1759 = vector.broadcast %88 : f32 to vector<8x8xf32>
    %1760 = arith.mulf %1759, %1758 : vector<8x8xf32>
    %1761 = arith.addf %1757, %1760 : vector<8x8xf32>
    %1762 = arith.addf %1730, %1761 : vector<8x8xf32>
    %c0_339 = arith.constant 0 : index
    %c15_340 = arith.constant 15 : index
    %1763 = vector.load %arg17[%c0_339, %c15_340] : memref<80x26xf32, #tpu.memory_space<vmem>>, vector<80x8xf32>
    %1764 = vector.extract_strided_slice %1763 {offsets = [10, 0], sizes = [8, 8], strides = [1, 1]} : vector<80x8xf32> to vector<8x8xf32>
    %1765 = vector.broadcast %12 : f32 to vector<8x8xf32>
    %1766 = arith.mulf %1765, %1764 : vector<8x8xf32>
    %1767 = vector.extract_strided_slice %1763 {offsets = [50, 0], sizes = [8, 8], strides = [1, 1]} : vector<80x8xf32> to vector<8x8xf32>
    %1768 = vector.broadcast %61 : f32 to vector<8x8xf32>
    %1769 = arith.mulf %1768, %1767 : vector<8x8xf32>
    %1770 = arith.addf %1766, %1769 : vector<8x8xf32>
    %1771 = arith.addf %1738, %1770 : vector<8x8xf32>
    %1772 = vector.extract_strided_slice %1763 {offsets = [13, 0], sizes = [8, 8], strides = [1, 1]} : vector<80x8xf32> to vector<8x8xf32>
    %1773 = vector.broadcast %19 : f32 to vector<8x8xf32>
    %1774 = arith.mulf %1773, %1772 : vector<8x8xf32>
    %1775 = vector.extract_strided_slice %1763 {offsets = [53, 0], sizes = [8, 8], strides = [1, 1]} : vector<80x8xf32> to vector<8x8xf32>
    %1776 = vector.broadcast %68 : f32 to vector<8x8xf32>
    %1777 = arith.mulf %1776, %1775 : vector<8x8xf32>
    %1778 = arith.addf %1774, %1777 : vector<8x8xf32>
    %1779 = arith.addf %1746, %1778 : vector<8x8xf32>
    %1780 = vector.extract_strided_slice %1763 {offsets = [16, 0], sizes = [8, 8], strides = [1, 1]} : vector<80x8xf32> to vector<8x8xf32>
    %1781 = vector.broadcast %26 : f32 to vector<8x8xf32>
    %1782 = arith.mulf %1781, %1780 : vector<8x8xf32>
    %1783 = vector.extract_strided_slice %1763 {offsets = [56, 0], sizes = [8, 8], strides = [1, 1]} : vector<80x8xf32> to vector<8x8xf32>
    %1784 = vector.broadcast %75 : f32 to vector<8x8xf32>
    %1785 = arith.mulf %1784, %1783 : vector<8x8xf32>
    %1786 = arith.addf %1782, %1785 : vector<8x8xf32>
    %1787 = arith.addf %1754, %1786 : vector<8x8xf32>
    %1788 = vector.extract_strided_slice %1763 {offsets = [19, 0], sizes = [8, 8], strides = [1, 1]} : vector<80x8xf32> to vector<8x8xf32>
    %1789 = vector.broadcast %33 : f32 to vector<8x8xf32>
    %1790 = arith.mulf %1789, %1788 : vector<8x8xf32>
    %1791 = vector.extract_strided_slice %1763 {offsets = [59, 0], sizes = [8, 8], strides = [1, 1]} : vector<80x8xf32> to vector<8x8xf32>
    %1792 = vector.broadcast %82 : f32 to vector<8x8xf32>
    %1793 = arith.mulf %1792, %1791 : vector<8x8xf32>
    %1794 = arith.addf %1790, %1793 : vector<8x8xf32>
    %1795 = arith.addf %1762, %1794 : vector<8x8xf32>
    %1796 = vector.extract_strided_slice %1763 {offsets = [22, 0], sizes = [8, 8], strides = [1, 1]} : vector<80x8xf32> to vector<8x8xf32>
    %1797 = vector.broadcast %40 : f32 to vector<8x8xf32>
    %1798 = arith.mulf %1797, %1796 : vector<8x8xf32>
    %1799 = vector.extract_strided_slice %1763 {offsets = [62, 0], sizes = [8, 8], strides = [1, 1]} : vector<80x8xf32> to vector<8x8xf32>
    %1800 = vector.broadcast %89 : f32 to vector<8x8xf32>
    %1801 = arith.mulf %1800, %1799 : vector<8x8xf32>
    %1802 = arith.addf %1798, %1801 : vector<8x8xf32>
    %1803 = arith.addf %1771, %1802 : vector<8x8xf32>
    %1804 = arith.addf %1803, %1779 : vector<8x8xf32>
    %1805 = arith.addf %1787, %1795 : vector<8x8xf32>
    %1806 = arith.addf %1804, %1805 : vector<8x8xf32>
    %1807 = arith.negf %1806 : vector<8x8xf32>
    %1808 = math.exp %1807 : vector<8x8xf32>
    %cst_341 = arith.constant 1.000000e+00 : f32
    %1809 = vector.broadcast %cst_341 : f32 to vector<8x8xf32>
    %1810 = arith.addf %1809, %1808 : vector<8x8xf32>
    %1811 = arith.divf %1809, %1810 : vector<8x8xf32>
    %c0_342 = arith.constant 0 : index
    %c0_343 = arith.constant 0 : index
    %c0_344 = arith.constant 0 : index
    %c0_345 = arith.constant 0 : index
    %1812 = vector.load %arg12[%c0_342, %c0_343, %c0_344, %c0_345] : memref<1x1x8x8xf32, #tpu.memory_space<vmem>>, vector<1x1x8x8xf32>
    %1813 = vector.shape_cast %1812 : vector<1x1x8x8xf32> to vector<8x8xf32>
    %1814 = vector.shape_cast %1811 : vector<8x8xf32> to vector<1x1x8x8xf32>
    tpu.vector_store %arg12[%c0_342, %c0_343, %c0_344, %c0_345], %1814 {strides = array<i32>} : memref<1x1x8x8xf32, #tpu.memory_space<vmem>>, vector<1x1x8x8xf32>,
    return
  }
  func.func @transform_0(%arg0: i32) -> i32 {
    %c0_i32 = arith.constant 0 : i32
    %c0_i32_0 = arith.constant 0 : i32
    return %c0_i32 : i32
  }
  func.func @transform_1(%arg0: i32) -> i32 {
    %c0_i32 = arith.constant 0 : i32
    %c0_i32_0 = arith.constant 0 : i32
    return %c0_i32 : i32
  }
  func.func @transform_2(%arg0: i32) -> (i32, i32, i32, i32) {
    %c0_i32 = arith.constant 0 : i32
    %c0_i32_0 = arith.constant 0 : i32
    %c0_i32_1 = arith.constant 0 : i32
    %c0_i32_2 = arith.constant 0 : i32
    return %arg0, %c0_i32, %c0_i32_0, %c0_i32_1 : i32, i32, i32, i32
  }
  func.func @transform_3(%arg0: i32) -> (i32, i32, i32, i32) {
    %c0_i32 = arith.constant 0 : i32
    %c0_i32_0 = arith.constant 0 : i32
    %c0_i32_1 = arith.constant 0 : i32
    %c0_i32_2 = arith.constant 0 : i32
    return %arg0, %c0_i32, %c0_i32_0, %c0_i32_1 : i32, i32, i32, i32
  }
  func.func @transform_4(%arg0: i32) -> (i32, i32, i32, i32) {
    %c0_i32 = arith.constant 0 : i32
    %c0_i32_0 = arith.constant 0 : i32
    %c0_i32_1 = arith.constant 0 : i32
    %c0_i32_2 = arith.constant 0 : i32
    return %arg0, %c0_i32, %c0_i32_0, %c0_i32_1 : i32, i32, i32, i32
  }
  func.func @transform_5(%arg0: i32) -> (i32, i32, i32, i32) {
    %c0_i32 = arith.constant 0 : i32
    %c0_i32_0 = arith.constant 0 : i32
    %c0_i32_1 = arith.constant 0 : i32
    %c0_i32_2 = arith.constant 0 : i32
    return %arg0, %c0_i32, %c0_i32_0, %c0_i32_1 : i32, i32, i32, i32
  }
  func.func @transform_6(%arg0: i32) -> (i32, i32, i32, i32) {
    %c0_i32 = arith.constant 0 : i32
    %c0_i32_0 = arith.constant 0 : i32
    %c0_i32_1 = arith.constant 0 : i32
    %c0_i32_2 = arith.constant 0 : i32
    return %arg0, %c0_i32, %c0_i32_0, %c0_i32_1 : i32, i32, i32, i32
  }
  func.func @transform_7(%arg0: i32) -> (i32, i32, i32, i32) {
    %c0_i32 = arith.constant 0 : i32
    %c0_i32_0 = arith.constant 0 : i32
    %c0_i32_1 = arith.constant 0 : i32
    %c0_i32_2 = arith.constant 0 : i32
    return %arg0, %c0_i32, %c0_i32_0, %c0_i32_1 : i32, i32, i32, i32
  }
  func.func @transform_8(%arg0: i32) -> (i32, i32, i32, i32) {
    %c0_i32 = arith.constant 0 : i32
    %c0_i32_0 = arith.constant 0 : i32
    %c0_i32_1 = arith.constant 0 : i32
    %c0_i32_2 = arith.constant 0 : i32
    return %arg0, %c0_i32, %c0_i32_0, %c0_i32_1 : i32, i32, i32, i32
  }
  func.func @transform_9(%arg0: i32) -> (i32, i32, i32, i32) {
    %c0_i32 = arith.constant 0 : i32
    %c0_i32_0 = arith.constant 0 : i32
    %c0_i32_1 = arith.constant 0 : i32
    %c0_i32_2 = arith.constant 0 : i32
    return %arg0, %c0_i32, %c0_i32_0, %c0_i32_1 : i32, i32, i32, i32
  }
  func.func @transform_10(%arg0: i32) -> (i32, i32, i32, i32) {
    %c0_i32 = arith.constant 0 : i32
    %c0_i32_0 = arith.constant 0 : i32
    %c0_i32_1 = arith.constant 0 : i32
    %c0_i32_2 = arith.constant 0 : i32
    return %arg0, %c0_i32, %c0_i32_0, %c0_i32_1 : i32, i32, i32, i32
  }
  func.func @transform_11(%arg0: i32) -> (i32, i32, i32, i32) {
    %c0_i32 = arith.constant 0 : i32
    %c0_i32_0 = arith.constant 0 : i32
    %c0_i32_1 = arith.constant 0 : i32
    %c0_i32_2 = arith.constant 0 : i32
    return %arg0, %c0_i32, %c0_i32_0, %c0_i32_1 : i32, i32, i32, i32
  }
}

</mosaic_0001>

<bundles_post_ra>
// kernel: tpu_custom_call.1
= control target key start
LH: loop header
LB: loop body
LE: loop exit
PB: predicated region body
PF: predicated region fallthrough
CT: control target
= control target key end

     0   :  { %s10506_s0 = inlined_call_operand.vmem [shape: f32[98], index: 0, kind: input, shape index: {}]   ;;  %s10507_s1 = inlined_call_operand.<no memory space> [shape: f32[1], index: 1, kind: input, shape index: {}]   ;;  %s10508_s2 = inlined_call_operand.vmem [shape: f32[2,4,16,16], index: 2, kind: input, shape index: {}]   ;;  %s10509_s3 = inlined_call_operand.vmem [shape: f32[2,8,16,16], index: 3, kind: input, shape index: {}]   ;;  %s10510_s4 = inlined_call_operand.vmem [shape: f32[2,8,8,8], index: 4, kind: input, shape index: {}]   ;;  %s10511_s5 = inlined_call_operand.vmem [shape: f32[2,16,8,8], index: 5, kind: input, shape index: {}]   ;;  %s10512_s6 = inlined_call_operand.vmem [shape: f32[2,16,8,8], index: 6, kind: input, shape index: {}]   ;;  %s10513_s7 = inlined_call_operand.hbm [shape: f32[2,1,16,16], index: 7, kind: output, shape index: {0}]   ;;  %s10514_s8 = inlined_call_operand.hbm [shape: f32[2,1,16,16], index: 8, kind: output, shape index: {1}]   ;;  %s10515_s9 = inlined_call_operand.hbm [shape: f32[2,1,8,8], index: 9, kind: output, shape index: {2}]   ;;  %s10516_s10 = inlined_call_operand.hbm [shape: f32[2,1,8,8], index: 10, kind: output, shape index: {3}]   ;;  %s10517_s11 = inlined_call_operand.hbm [shape: f32[2,1,8,8], index: 11, kind: output, shape index: {4}]  }
   0x1   :  { %10853 = sst [smem:[#allocation208_spill]] %s10506_s0 }
   0x2   :  { %10854 = sst [smem:[#allocation209_spill]] %s10508_s2 }
   0x3   :  { %10855 = sst [smem:[#allocation210_spill]] %s10509_s3 }
   0x4   :  { %17 = sst [smem:[#allocation7]] %s10507_s1 }
   0x5   :  { %18 = vsyncpa [#allocation10], 0 }
   0x6   :  { %19 = vsyncpa [#allocation9], 0 }
   0x7   :  { %21 = vsyncpa [#allocation9 + $0x1], 0 }
   0x8   :  { %22 = vsyncpa [#allocation13], 0 }
   0x9   :  { %24 = vsyncpa [#allocation13 + $0x1], 0 }
   0xa   :  { %25 = vsyncpa [#allocation16], 0 }
   0xb   :  { %27 = vsyncpa [#allocation16 + $0x1], 0  ;;  %s5921_s19 = smov 0   ;;  %s5923_s20 = smov 0  }
   0xc   :  { %s5925_s21 = smov 0   ;;  %s5927_s22 = smov 0  }
   0xd LB: > { %10856 = sst [smem:[#allocation22_spill]] %s5836_s21  ;;  %s5942_s1 = sadd.s32 4294967295, %s5840_s22   ;;  %s5840_s22 = sphi %s5927_s22, %s11537_s22   ;;  %s5836_s21 = sphi %s5925_s21, %s11539_s21   ;;  %s5832_s20 = sphi %s5923_s20, %s11541_s20   ;;  %s5828_s19 = sphi %s5921_s19, %s11540_s19  }
   0xe   : > { %s10518_s23 = sadd.s32 4294967294, %s5840_s22   ;;  %s5946_s24 = sadd.s32 1, %s5840_s22  }
   0xf   : > { %10857 = sst [smem:[#allocation23_spill]] %s5946_s24  ;;  %s212_s25 = sadd.s32 1, %s5836_s21 }
  0x10   : > { %s209_s26 = ssub.s32 %s5840_s22, %s5946_s24  ;;  %p222_p0 = scmp.ne.s32.totalorder %s5836_s21, %s5832_s20 }
  0x11   : > { %p210_p1 = scmp.eq.s32.totalorder %s209_s26, 0  ;;  %p223_p2 = scmp.eq.s32.totalorder %s5942_s1, 1 }
  0x12   : > { %p228_p3 = scmp.ne.s32.totalorder %s5832_s20, %s5828_s19  ;;  %p229_p4 = scmp.eq.s32.totalorder %s10518_s23, 1 }
  0x13   : > { %s5959_s27 = scalar_select %p210_p1, %s5836_s21, %s212_s25  }
  0x14   : > { %p5961_p5 = por %p223_p2, %p222_p0  ;;  %p5965_p6 = por %p229_p4, %p228_p3 }
  0x15   : > { %10858 = sst [smem:[#allocation24_spill]] %s5959_s27  ;;  %p5256_p7 = scmp.ge.s32.totalorder %s5840_s22, 1 }
  0x16   : > { %s10860_s29 = scalar_select %p5965_p6, 1, 0 }
  0x17   : > { %p340_p8 = scmp.lt.s32.totalorder %s5840_s22, 3  ;;  %p5497_p9 = scmp.eq.s32.totalorder %s5942_s1, 0 }
  0x18   : > { %10861 = sst [smem:[#allocation25_spill]] %s10860_s29  ;;  %s10863_s0 = sld [smem:[#allocation208_spill]] }
  0x19   : > { %p5972_p10 = pnand %p5256_p7, %p340_p8 }
  0x1b   : > { %p5477_p11 = pneg %p5972_p10 }
  0x1d   : > { %p5478_p12 = pnand %p5497_p9, %p5477_p11 }
  0x1e   : > { %s353_s14 = sshll.u32 %s10863_s0, 4  ;;  %s354_s14 = int_to_ptr.vmem [resolvable:$true] %s353_s14 }
  0x1f   : > { %s5639_s15 = scalar_lea.vmem %s354_s14, 16  ;;  %p5641_p0 = pneg %p5478_p12 }
  0x20   : > { %p5640_p13 = scmp.ne.s32.totalorder %s354_s14, %s5639_s15  ;;  %p5647_p3 = scmp.lt.s32.totalorder %s354_s14, %s354_s14 }
  0x21   : > { %p5648_p4 = scmp.lt.s32.totalorder %s5639_s15, %s5639_s15 }
  0x22   : > { %p5642_p1 = pnand %p5641_p0, %p5640_p13 }
  0x23   : > { %p5649_p7 = por %p5648_p4, %p5647_p3 }
  0x24   : > { %p5643_p2 = pneg %p5642_p1 }
  0x26   : > { %p5650_p8 = pnand %p5649_p7, %p5643_p2 }
  0x28   : > { %5653 = shalt.err (!%p5650_p8)
}
  0x29   : > { %s5842_s16 = smov [#allocation8]   ;;  %409 = sbr.rel (%p5972_p10) target bundleno = 1384 (0x568), region = 48 }
  0x2a   : > { %5480 = dma.vmem_to_smem (!%p5478_p12), %s354_s14, 16, %s5842_s16, [#allocation10]  }
  0x30   : > { %5811 = dma.done.wait (%p5497_p9), [#allocation10], 16  }
  0x31   : > { %5813 = vsyncadd (%p5497_p9), [#allocation10], 4294967280 }
  0x32   : > { %415 = sfence }
  0x33   : > { %p490_p11 = scmp.lt.s32.totalorder %s5942_s1, 1  ;;  %vm614_vm0 = vcmask 277504   ;;  %s5990_s17 = sld [smem:[#allocation8 + $0x8]]  ;;  %v10526_v0 = vmov 0.0   ;;  %vm828_vm1 = vcmask 1040384   ;;  %vm1033_vm2 = vcmask 1045504  }
  0x34   : > { %s5992_s18 = sld [smem:[#allocation8 + $0x39]]  ;;  %616 = vst.msk [vmem:[#allocation2 + $0x8] sm:$0xff] %vm614_vm0, %v10526_v0  ;;  %622 = vst.msk [vmem:[#allocation2 + $0x38] sm:$0xff] %vm614_vm0, %v10526_v0  ;;  %s10864_s2 = sld [smem:[#allocation209_spill]]  ;;  %vm1238_vm3 = vcmask 1042432   ;;  %vm1324_vm4 = vcmask 1046528  }
  0x35   : > { %615 = vst.msk [vmem:[#allocation2] sm:$0xff] %vm614_vm0, %v10526_v0  ;;  %617 = vst.msk [vmem:[#allocation2 + $0x10] sm:$0xff] %vm614_vm0, %v10526_v0  ;;  %s6045_s25 = scalar_select %p490_p11, %s5942_s1, 1  ;;  %vm660_vm5 = vcmask 203848   ;;  %vm856_vm6 = vcmask 1044480   ;;  %vm1092_vm7 = vcmask 1041408  }
  0x36   : > { %618 = vst.msk [vmem:[#allocation2 + $0x18] sm:$0xff] %vm614_vm0, %v10526_v0  ;;  %619 = vst.msk [vmem:[#allocation2 + $0x20] sm:$0xff] %vm614_vm0, %v10526_v0  ;;  %s5276_s26 = sld [smem:[#allocation8 + $0x1]]  ;;  %s6056_s15 = sld [smem:[#allocation8 + $0x32]]  ;;  %vm752_vm8 = vcmask 1043456   ;;  %vm2081_vm9 = vcmask 130055  }
  0x37   : > { %620 = vst.msk [vmem:[#allocation2 + $0x28] sm:$0xff] %vm614_vm0, %v10526_v0  ;;  %621 = vst.msk [vmem:[#allocation2 + $0x30] sm:$0xff] %vm614_vm0, %v10526_v0  ;;  %s10519_s30 = sshll.u32 %s6045_s25, 6  ;;  %s6063_s16 = sld [smem:[#allocation8 + $0x2]]  ;;  %vm2083_vm10 = vcmask 130048   ;;  %vm2085_vm11 = vcmask 129024  }
  0x38   : > { %623 = vst.msk [vmem:[#allocation2 + $0x40] sm:$0xff] %vm614_vm0, %v10526_v0  ;;  %624 = vst.msk [vmem:[#allocation2 + $0x48] sm:$0xff] %vm614_vm0, %v10526_v0  ;;  %s6077_s12 = sld [smem:[#allocation8 + $0x5c]]  ;;  %s10520_s23 = smov 9   ;;  %vm3477_vm12 = vcmask 211968   ;;  %vm3522_vm13 = vcmask 138312  }
  0x39   : > { %625 = vst.msk [vmem:[#allocation2 + $0x50] sm:$0xff] %vm614_vm0, %v10526_v0  ;;  %626 = vst.msk [vmem:[#allocation2 + $0x58] sm:$0xff] %vm614_vm0, %v10526_v0  ;;  %v6054_v8 = vstv %s5990_s17  ;;  %s5326_s17 = sld [smem:[#allocation8 + $0x33]]  ;;  %s6081_s13 = sld [smem:[#allocation8 + $0x2c]] }
  0x3a   : > { %2087 = vst.msk [vmem:[#allocation3] sm:$0xff] %vm614_vm0, %v10526_v0  ;;  %2088 = vst.msk [vmem:[#allocation3 + $0x8] sm:$0xff] %vm614_vm0, %v10526_v0  ;;  %s494_s14 = scalar_lea.vmem %s10864_s2, %s10519_s30  ;;  %v6061_v14 = vstv %s5992_s18  ;;  %s6075_s18 = sld [smem:[#allocation8 + $0x2b]] }
  0x3b   : > { %2089 = vst.msk [vmem:[#allocation3 + $0x10] sm:$0xff] %vm614_vm0, %v10526_v0  ;;  %2090 = vst.msk [vmem:[#allocation3 + $0x18] sm:$0xff] %vm614_vm0, %v10526_v0  ;;  %v627_v1 = vld [vmem:[%s494_s14] sm:$0xff]  ;;  %v5373_v2 = vld [vmem:[%s494_s14 + $0x10] sm:$0xff]  ;;  %s6144_s30 = sld [smem:[#allocation8 + $0x3]]  ;;  %s6174_s0 = sld [smem:[#allocation8 + $0x26]] }
  0x3c   : > { %2091 = vst.msk [vmem:[#allocation3 + $0x20] sm:$0xff] %vm614_vm0, %v10526_v0  ;;  %2092 = vst.msk [vmem:[#allocation3 + $0x28] sm:$0xff] %vm614_vm0, %v10526_v0  ;;  %v5375_v3 = vld [vmem:[%s494_s14 + $0x20] sm:$0xff]  ;;  %v640_v4 = vmax.f32 %v627_v1, %v5373_v2  ;;  %v638_v5 = vadd.f32 %v5373_v2, %v627_v1  ;;  %v628_v6 = vld [vmem:[%s494_s14 + $0x8] sm:$0xff]  ;;  %v6071_v21 = vstv %s5276_s26  ;;  %s6089_s26 = sld [smem:[#allocation8 + $0x5d]]  ;;  %v6095_v34 = vstv %s6056_s15  ;;  %s6122_s15 = sld [smem:[#allocation8 + $0x41]] }
  0x3d   : > { %2093 = vst.msk [vmem:[#allocation3 + $0x30] sm:$0xff] %vm614_vm0, %v10526_v0  ;;  %2094 = vst.msk [vmem:[#allocation3 + $0x38] sm:$0xff] %vm614_vm0, %v10526_v0  ;;  %v5374_v7 = vld [vmem:[%s494_s14 + $0x18] sm:$0xff]  ;;  %v5377_v9 = vld [vmem:[%s494_s14 + $0x30] sm:$0xff]  ;;  %v6104_v39 = vstv %s6063_s16  ;;  %s6124_s16 = sld [smem:[#allocation8 + $0xa]]  ;;  %s10524_s2 = smov 122  }
  0x3e   : > { %2095 = vst.msk [vmem:[#allocation3 + $0x40] sm:$0xff] %vm614_vm0, %v10526_v0  ;;  %2096 = vst.msk [vmem:[#allocation3 + $0x48] sm:$0xff] %vm614_vm0, %v10526_v0  ;;  %v5376_v10 = vld [vmem:[%s494_s14 + $0x28] sm:$0xff]  ;;  %v641_v11 = vmax.f32 %v628_v6, %v5374_v7  ;;  %v639_v12 = vadd.f32 %v5374_v7, %v628_v6  ;;  %v644_v15 = vmax.f32 %v640_v4, %v5375_v3  ;;  %v5378_v17 = vld [vmem:[%s494_s14 + $0x38] sm:$0xff]  ;;  %s6091_s14 = sld [smem:[#allocation8 + $0x10]]  ;;  %v6135_v52 = vstv %s6077_s12  ;;  %s6167_s12 = sld [smem:[#allocation8 + $0x1f]] }
  0x3f   : > { %2097 = vst.msk [vmem:[#allocation3 + $0x50] sm:$0xff] %vm614_vm0, %v10526_v0  ;;  %2098 = vst.msk [vmem:[#allocation3 + $0x58] sm:$0xff] %vm614_vm0, %v10526_v0  ;;  %v6058_v13 = vld [vmem:[#allocation2 + $0x8] sm:$0xff]  ;;  %v642_v16 = vadd.f32 %v5375_v3, %v638_v5  ;;  %v6065_v18 = vld [vmem:[#allocation2 + $0x38] sm:$0xff]  ;;  %v6106_v40 = vstv %s5326_s17  ;;  %s6137_s17 = sld [smem:[#allocation8 + $0x3b]]  ;;  %v6159_v62 = vstv %s6081_s13  ;;  %s10522_s13 = smov 125  }
  0x40   : > { %10865 = vst [vmem:[#allocation26_spill] sm:$0xff] %v6054_v8  ;;  %10866 = vst [vmem:[#allocation27_spill] sm:$0xff] %v6061_v14  ;;  %v843_v19 = vmul.f32 %v6054_v8, %v6058_v13  ;;  %v6069_v20 = vld [vmem:[#allocation2] sm:$0xff]  ;;  %v645_v22 = vmax.f32 %v641_v11, %v5376_v10  ;;  %v643_v23 = vadd.f32 %v5376_v10, %v639_v12  ;;  %v6079_v27 = vld [vmem:[#allocation2 + $0x30] sm:$0xff]  ;;  %v6132_v51 = vstv %s6075_s18  ;;  %s6153_s18 = sld [smem:[#allocation8 + $0x34]]  ;;  %s11020_s3 = sld [smem:[#allocation210_spill]] }
  0x41   : > { %10867 = vst [vmem:[#allocation28_spill] sm:$0xff] %v6071_v21  ;;  %v847_v24 = vmul.f32 %v6061_v14, %v6065_v18  ;;  %v648_v25 = vmax.f32 %v644_v15, %v5377_v9  ;;  %v646_v26 = vadd.f32 %v5377_v9, %v642_v16  ;;  %v815_v30 = vmul.f32 %v6071_v21, %v6069_v20  ;;  %v6108_v41 = vld [vmem:[#allocation2 + $0x20] sm:$0xff]  ;;  %v6110_v42 = vld [vmem:[#allocation2 + $0x28] sm:$0xff]  ;;  %v6118_v47 = vld [vmem:[#allocation2 + $0x50] sm:$0xff]  ;;  %s5296_s27 = sld [smem:[#allocation8 + $0x15]]  ;;  %s5345_s21 = sld [smem:[#allocation8 + $0x46]] }
  0x42   : > { %v647_v28 = vadd.f32 %v5378_v17, %v643_v23  ;;  %v816_v31 = vmul.f32 %v6071_v21, %v6058_v13  ;;  %v649_v33 = vmax.f32 %v645_v22, %v5378_v17  ;;  %10868 = vst [vmem:[#allocation29_spill] sm:$0xff] %v6095_v34  ;;  %v819_v35 = vmul.f32 %v6095_v34, %v6079_v27  ;;  %v6120_v48 = vld [vmem:[#allocation2 + $0x58] sm:$0xff]  ;;  %s5282_s24 = sld [smem:[#allocation8 + $0x7]]  ;;  %s5331_s29 = sld [smem:[#allocation8 + $0x38]] }
  0x43   : > { %v6083_v29 = vadd.f32 %v847_v24, %v843_v19  ;;  %665 = vrot.lane.b32.xlu1 %v648_v25, %s10520_s23  ;;  %v650_v32 = vmul.f32 0.25, %v646_v26  ;;  %v820_v36 = vmul.f32 %v6095_v34, %v6065_v18  ;;  %10869 = vst [vmem:[#allocation30_spill] sm:$0xff] %v6104_v39  ;;  %10870 = vst [vmem:[#allocation31_spill] sm:$0xff] %v6106_v40  ;;  %v6162_v63 = vstv %s6089_s26  ;;  %s6193_s26 = sld [smem:[#allocation8 + $0x57]] }
  0x44   : > { %v651_v37 = vmul.f32 0.25, %v647_v28  ;;  %v822_v43 = vadd.f32 %v819_v35, %v815_v30  ;;  %v1020_v45 = vmul.f32 %v6104_v39, %v6069_v20  ;;  %v1021_v46 = vmul.f32 %v6104_v39, %v6058_v13  ;;  %10871 = vst [vmem:[#allocation32_spill] sm:$0xff] %v6132_v51  ;;  %10872 = vst [vmem:[#allocation33_spill] sm:$0xff] %v6135_v52 }
  0x45   : > { %654 = vrot.lane.b32.xlu0 %v650_v32, %s10520_s23  ;;  %v10537_v38 = vrot.slane %v6083_v29, 3  ;;  %v6112_v44 = vadd.f32 %v820_v36, %v816_v31  ;;  %v1024_v49 = vmul.f32 %v6106_v40, %v6079_v27  ;;  %v1025_v50 = vmul.f32 %v6106_v40, %v6065_v18  ;;  %10873 = vst [vmem:[#allocation34_spill] sm:$0xff] %v6159_v62 }
  0x46   : > { %v829_v53 = vrot.slane %v822_v43, 7  ;;  %v990_v55 = vmul.f32 %v6132_v51, %v6108_v41  ;;  %v991_v56 = vmul.f32 %v6132_v51, %v6110_v42  ;;  %v994_v59 = vmul.f32 %v6135_v52, %v6118_v47  ;;  %10874 = vst [vmem:[#allocation35_spill] sm:$0xff] %v6162_v63 }
  0x47   : > { %667 = vrot.lane.b32.xlu1 %v649_v33, %s10520_s23  ;;  %v10538_v54 = vrot.slane %v6112_v44, 7  ;;  %v1027_v57 = vadd.f32 %v1024_v49, %v1020_v45  ;;  %v6147_v58 = vadd.f32 %v1025_v50, %v1021_v46  ;;  %v995_v60 = vmul.f32 %v6135_v52, %v6120_v48 }
  0x48   : > { %v6165_v1 = vstv %s6091_s14  ;;  %v6170_v4 = vadd.f32 %v994_v59, %v990_v55  ;;  %v1195_v6 = vmul.f32 %v6159_v62, %v6108_v41  ;;  %v1196_v7 = vmul.f32 %v6159_v62, %v6110_v42  ;;  %s6195_s14 = sld [smem:[#allocation8 + $0x4]] }
  0x49   : > { %656 = vrot.lane.b32.xlu0 %v651_v37, %s10520_s23  ;;  %v831_v61 = vsel %vm828_vm1, %v829_v53, %v10538_v54  ;;  %10875 = vst [vmem:[#allocation36_spill] sm:$0xff] %v6165_v1  ;;  %v1034_v2 = vrot.slane %v1027_v57, 2  ;;  %v10535_v3 = vrot.slane %v6147_v58, 2  ;;  %v998_v5 = vadd.f32 %v995_v60, %v991_v56  ;;  %s6172_s23 = sld [smem:[#allocation8 + $0x50]] }
  0x4a   : > { %v1199_v9 = vmul.f32 %v6162_v63, %v6118_v47  ;;  %v1200_v10 = vmul.f32 %v6162_v63, %v6120_v48  ;;  %v10536_v12 = vrot.slane %v6170_v4, 7  ;;  %v1079_v16 = vmul.f32 %v6165_v1, %v6058_v13 }
  0x4b   : > { %v1036_v11 = vsel %vm1033_vm2, %v1034_v2, %v10535_v3  ;;  %v1005_v15 = vrot.slane %v998_v5, 7  ;;  %v6201_v22 = vstv %s6122_s15  ;;  %v6204_v23 = vstv %s6124_s16  ;;  %s6218_s15 = sld [smem:[#allocation8 + $0x2d]]  ;;  %s6220_s16 = sld [smem:[#allocation8 + $0x5e]] }
  0x4c   : > { %1039 = vrot.lane.b32.xlu1 %v1036_v11, %s10524_s2  ;;  %v6198_v17 = vadd.f32 %v1199_v9, %v1195_v6  ;;  %v1203_v19 = vadd.f32 %v1200_v10, %v1196_v7  ;;  %10876 = vst [vmem:[#allocation37_spill] sm:$0xff] %v6201_v22  ;;  %10877 = vst [vmem:[#allocation38_spill] sm:$0xff] %v6204_v23  ;;  %v1083_v25 = vmul.f32 %v6201_v22, %v6065_v18  ;;  %s10880_s2 = smov 125  }
  0x4d   : > { %862 = vrot.lane.b32.xlu0 %v10537_v38, %s10522_s13  ;;  %s6206_s13 = sld [smem:[#allocation8 + $0x35]]  ;;  %v1006_v24 = vsel %vm828_vm1, %v10536_v12, %v1005_v15  ;;  %v1257_v26 = vmul.f32 %v6204_v23, %v6058_v13  ;;  %v6216_v28 = vstv %s6137_s17  ;;  %v6226_v33 = vstv %s6144_s30  ;;  %s10882_s30 = smov 122  }
  0x4e   : > { %10878 = vst [vmem:[#allocation39_spill] sm:$0xff] %v6216_v28  ;;  %v10532_v30 = vrot.slane %v6198_v17, 2  ;;  %v1210_v31 = vrot.slane %v1203_v19, 2  ;;  %v1261_v32 = vmul.f32 %v6216_v28, %v6065_v18  ;;  %10879 = vst [vmem:[#allocation40_spill] sm:$0xff] %v6226_v33  ;;  %v6229_v35 = vadd.f32 %v1083_v25, %v1079_v16  ;;  %s6263_s17 = sld [smem:[#allocation8 + $0x12]] }
  0x4f   : > { %v1225_v36 = vmul.f32 %v6226_v33, %v6069_v20  ;;  %v1226_v37 = vmul.f32 %v6226_v33, %v6058_v13  ;;  %v6236_v43 = vstv %s6153_s18  ;;  %v6250_v55 = vstv %s6167_s12  ;;  %s5286_s18 = sld [smem:[#allocation8 + $0xb]]  ;;  %s5335_s12 = sld [smem:[#allocation8 + $0x3c]] }
  0x50   : > { %10881 = vst [vmem:[#allocation41_spill] sm:$0xff] %v6236_v43  ;;  %v1211_v45 = vsel %vm1033_vm2, %v10532_v30, %v1210_v31  ;;  %v6241_v46 = vadd.f32 %v1261_v32, %v1257_v26  ;;  %v1229_v49 = vmul.f32 %v6236_v43, %v6079_v27  ;;  %v1230_v50 = vmul.f32 %v6236_v43, %v6065_v18 }
  0x51   : > { %834 = vrot.lane.b32.xlu0 %v831_v61, %s10880_s2  ;;  %1216 = vrot.lane.b32.xlu1 %v1211_v45, %s10882_s30  ;;  %v10534_v53 = vrot.slane %v6229_v35, 6  ;;  %10883 = vst [vmem:[#allocation42_spill] sm:$0xff] %v6250_v55  ;;  %v6253_v56 = vstv %s6172_s23  ;;  %v6256_v57 = vstv %s6174_s0  ;;  %v1343_v2 = vmul.f32 %v6250_v55, %v6108_v41  ;;  %s5342_s0 = sld [smem:[#allocation8 + $0x43]]  ;;  %s10736_s23 = smov 119  }
  0x52   : > { %10884 = vst [vmem:[#allocation43_spill] sm:$0xff] %v6253_v56  ;;  %10885 = vst [vmem:[#allocation44_spill] sm:$0xff] %v6256_v57  ;;  %v10531_v59 = vrot.slane %v6241_v46, 5  ;;  %v1232_v60 = vadd.f32 %v1229_v49, %v1225_v36  ;;  %v6259_v61 = vadd.f32 %v1230_v50, %v1226_v37  ;;  %v1347_v5 = vmul.f32 %v6253_v56, %v6118_v47 }
  0x53   : > { %v1374_v6 = vmul.f32 %v6256_v57, %v6108_v41  ;;  %v6271_v7 = vstv %s6193_s26  ;;  %v6274_v9 = vstv %s6195_s14  ;;  %v6290_v25 = vstv %s6218_s15  ;;  %s5300_s26 = sld [smem:[#allocation8 + $0x19]]  ;;  %s5349_s14 = sld [smem:[#allocation8 + $0x4a]] }
  0x54   : > { %10886 = vst [vmem:[#allocation45_spill] sm:$0xff] %v6271_v7  ;;  %10887 = vst [vmem:[#allocation46_spill] sm:$0xff] %v6274_v9  ;;  %v1239_v10 = vrot.slane %v1232_v60, 5  ;;  %v10533_v11 = vrot.slane %v6259_v61, 5  ;;  %v1378_v15 = vmul.f32 %v6271_v7, %v6118_v47  ;;  %v1430_v16 = vmul.f32 %v6274_v9, %v6069_v20  ;;  %s5297_s15 = sld [smem:[#allocation8 + $0x16]] }
  0x55   : > { %1011 = vrot.lane.b32.xlu0 %v1006_v24, %s10880_s2  ;;  %1275 = vrot.lane.b32.xlu1 %v10531_v59, %s10736_s23  ;;  %v6284_v19 = vadd.f32 %v1347_v5, %v1343_v2  ;;  %v6287_v24 = vstv %s6206_s13  ;;  %10890 = vst [vmem:[#allocation49_spill] sm:$0xff] %v6290_v25  ;;  %v6293_v26 = vstv %s6220_s16  ;;  %v1404_v20 = vmul.f32 %v6290_v25, %v6108_v41  ;;  %s10709_s13 = smov 116   ;;  %s5346_s16 = sld [smem:[#allocation8 + $0x47]] }
  0x56   : > { %10889 = vst [vmem:[#allocation48_spill] sm:$0xff] %v6287_v24  ;;  %10891 = vst [vmem:[#allocation50_spill] sm:$0xff] %v6293_v26  ;;  %v6295_v31 = vadd.f32 %v1378_v15, %v1374_v6  ;;  %v1434_v32 = vmul.f32 %v6287_v24, %v6079_v27  ;;  %v1405_v37 = vmul.f32 %v6290_v25, %v6110_v42  ;;  %v6320_v2 = vstv %s6263_s17  ;;  %s5290_s17 = sld [smem:[#allocation8 + $0xf]] }
  0x57   : > { %10888 = vst [vmem:[#allocation47_spill] sm:$0xff] %v6284_v19  ;;  %v10530_v36 = vrot.slane %v6284_v19, 1  ;;  %v1408_v45 = vmul.f32 %v6293_v26, %v6118_v47  ;;  %v1409_v49 = vmul.f32 %v6293_v26, %v6120_v48  ;;  %v1241_v27 = vsel %vm1238_vm3, %v1239_v10, %v10533_v11  ;;  %10894 = vst [vmem:[#allocation53_spill] sm:$0xff] %v6320_v2 }
  0x58   : > { %10892 = vst [vmem:[#allocation51_spill] sm:$0xff] %v6295_v31  ;;  %v1437_v50 = vadd.f32 %v1434_v32, %v1430_v16  ;;  %v10529_v48 = vrot.slane %v6295_v31, 1  ;;  %v1482_v5 = vmul.f32 %v6320_v2, %v6058_v13  ;;  %v6326_v6 = vstv %s5342_s0  ;;  %s5339_s0 = sld [smem:[#allocation8 + $0x40]] }
  0x59   : > { %1098 = vrot.lane.b32.xlu0 %v10534_v53, %s10882_s30  ;;  %1363 = vrot.lane.b32.xlu1 %v10530_v36, %s10736_s23  ;;  %v6317_v60 = vadd.f32 %v1408_v45, %v1404_v20  ;;  %v1412_v42 = vadd.f32 %v1409_v49, %v1405_v37  ;;  %10895 = vst [vmem:[#allocation54_spill] sm:$0xff] %v6326_v6  ;;  %v6342_v49 = vstv %s5286_s18  ;;  %s5311_s18 = sld [smem:[#allocation8 + $0x24]]  ;;  %v6387_v59 = vstv %s5300_s26  ;;  %s5305_s26 = sld [smem:[#allocation8 + $0x1e]] }
  0x5a   : > { %v1486_v16 = vmul.f32 %v6326_v6, %v6065_v18  ;;  %v1431_v20 = vmul.f32 %v6274_v9, %v6058_v13  ;;  %v1435_v37 = vmul.f32 %v6287_v24, %v6065_v18  ;;  %10896 = vst [vmem:[#allocation55_spill] sm:$0xff] %v6342_v49  ;;  %10898 = vst [vmem:[#allocation57_spill] sm:$0xff] %v6387_v59  ;;  %v6389_v30 = vstv %s5349_s14  ;;  %s5354_s14 = sld [smem:[#allocation8 + $0x4f]] }
  0x5b   : > { %10893 = vst [vmem:[#allocation52_spill] sm:$0xff] %v6317_v60  ;;  %v10528_v10 = vrot.slane %v6317_v60, 1  ;;  %v1419_v15 = vrot.slane %v1412_v42, 1  ;;  %v1456_v42 = vmul.f32 %v6342_v49, %v6058_v13  ;;  %10899 = vst [vmem:[#allocation58_spill] sm:$0xff] %v6389_v30  ;;  %v6391_v53 = vstv %s5297_s15  ;;  %s5298_s15 = sld [smem:[#allocation8 + $0x17]] }
  0x5c   : > { %v1489_v32 = vadd.f32 %v1486_v16, %v1482_v5  ;;  %10900 = vst [vmem:[#allocation59_spill] sm:$0xff] %v6391_v53  ;;  %v6393_v3 = vstv %s5346_s16  ;;  %v6395_v12 = vstv %s5290_s17  ;;  %s5347_s16 = sld [smem:[#allocation8 + $0x48]] }
  0x5d   : > { %1244 = vrot.lane.b32.xlu0 %v1241_v27, %s10736_s23  ;;  %1443 = vrot.lane.b32.xlu1 %v1437_v50, %s10709_s13  ;;  %v1420_v45 = vsel %vm1324_vm4, %v10528_v10, %v1419_v15  ;;  %v6344_v27 = vstv %s5335_s12  ;;  %v1438_v50 = vadd.f32 %v1435_v37, %v1431_v20  ;;  %s5360_s12 = sld [smem:[#allocation8 + $0x55]]  ;;  %10901 = vst [vmem:[#allocation60_spill] sm:$0xff] %v6393_v3  ;;  %10902 = vst [vmem:[#allocation61_spill] sm:$0xff] %v6395_v12  ;;  %s5299_s17 = sld [smem:[#allocation8 + $0x18]] }
  0x5e   : > { %10897 = vst [vmem:[#allocation56_spill] sm:$0xff] %v6344_v27  ;;  %v1460_v5 = vmul.f32 %v6344_v27, %v6065_v18  ;;  %v6397_v38 = vstv %s5339_s0  ;;  %s5348_s0 = sld [smem:[#allocation8 + $0x49]] }
  0x5f   : > { %10903 = vst [vmem:[#allocation62_spill] sm:$0xff] %v6397_v38 }
  0x60   : > { %v1463_v16 = vadd.f32 %v1460_v5, %v1456_v42 }
  0x61   : > { %1394 = vrot.lane.b32.xlu0 %v10529_v48, %s10736_s23  ;;  %1495 = vrot.lane.b32.xlu1 %v1489_v32, %s10709_s13 }
  0x65   : > { %1423 = vrot.lane.b32.xlu0 %v1420_v45, %s10736_s23 }
  0x69   : > { %1445 = vrot.lane.b32.xlu0 %v1438_v50, %s10709_s13 }
  0x6d   : > { %1469 = vrot.lane.b32.xlu0 %v1463_v16, %s10709_s13 }
  0xb5   : > { %v666_v15 = vpop.permute.xlu1 %665 }
  0xb6   : > { %671 = vst.msk [vmem:[#allocation2 + $0x40] sm:$0xff] %vm660_vm5, %v666_v15 }
  0xb7   : > { %v655_v0 = vpop.permute.xlu0 %654 }
  0xb8   : > { %661 = vst.msk [vmem:[#allocation2 + $0x10] sm:$0xff] %vm660_vm5, %v655_v0 }
  0xb9   : > { %v668_v32 = vpop.permute.xlu1 %667 }
  0xba   : > { %672 = vst.msk [vmem:[#allocation2 + $0x48] sm:$0xff] %vm660_vm5, %v668_v32 }
  0xbb   : > { %v657_v20 = vpop.permute.xlu0 %656 }
  0xbc   : > { %662 = vst.msk [vmem:[#allocation2 + $0x18] sm:$0xff] %vm660_vm5, %v657_v20 }
  0xbd   : > { %v6358_v37 = vld [vmem:[#allocation2 + $0x40] sm:$0xff] }
  0xbe   : > { %v1436_v45 = vmul.f32 %v6287_v24, %v6358_v37  ;;  %v1461_v15 = vmul.f32 %v6344_v27, %v6358_v37  ;;  %v1487_v36 = vmul.f32 %v6326_v6, %v6358_v37 }
  0xbf   : > { %v6362_v50 = vld [vmem:[#allocation2 + $0x10] sm:$0xff] }
  0xc0   : > { %v1432_v0 = vmul.f32 %v6274_v9, %v6362_v50  ;;  %v1457_v16 = vmul.f32 %v6342_v49, %v6362_v50 }
  0xc1   : > { %v6366_v42 = vld [vmem:[#allocation2 + $0x48] sm:$0xff] }
  0xc2   : > { %v1439_v5 = vadd.f32 %v1436_v45, %v1432_v0  ;;  %v1462_v20 = vmul.f32 %v6344_v27, %v6366_v42  ;;  %v1488_v45 = vmul.f32 %v6326_v6, %v6366_v42  ;;  %v1483_v0 = vmul.f32 %v6320_v2, %v6362_v50 }
  0xc3   : > { %v6372_v32 = vld [vmem:[#allocation2 + $0x18] sm:$0xff]  ;;  %v6403_v6 = vstv %s5311_s18  ;;  %s5307_s18 = sld [smem:[#allocation8 + $0x20]]  ;;  %v849_v31 = vmul.f32 %v6061_v14, %v6366_v42 }
  0xc4   : > { %1447 = vrot.lane.b32.xlu1 %v1439_v5, %s10709_s13  ;;  %v1458_v10 = vmul.f32 %v6342_v49, %v6372_v32  ;;  %v1484_v48 = vmul.f32 %v6320_v2, %v6372_v32  ;;  %v1464_v5 = vadd.f32 %v1461_v15, %v1457_v16  ;;  %v1511_v2 = vmul.f32 %v6389_v30, %v6358_v37 }
  0xc5   : > { %10904 = vst [vmem:[#allocation63_spill] sm:$0xff] %v6403_v6  ;;  %v6405_v16 = vstv %s5360_s12  ;;  %v1508_v15 = vmul.f32 %v6387_v59, %v6362_v50  ;;  %v907_v9 = vmul.f32 %v6391_v53, %v6372_v32  ;;  %s5356_s12 = sld [smem:[#allocation8 + $0x51]] }
  0xc6   : > { %v1465_v11 = vadd.f32 %v1462_v20, %v1458_v10  ;;  %v1491_v54 = vadd.f32 %v1488_v45, %v1484_v48  ;;  %10905 = vst [vmem:[#allocation64_spill] sm:$0xff] %v6405_v16  ;;  %v1490_v10 = vadd.f32 %v1487_v36, %v1483_v0  ;;  %v906_v20 = vmul.f32 %v6391_v53, %v6362_v50 }
  0xc7   : > { %v1509_v48 = vmul.f32 %v6387_v59, %v6372_v32  ;;  %v1512_v45 = vmul.f32 %v6389_v30, %v6366_v42  ;;  %v881_v36 = vmul.f32 %v6397_v38, %v6366_v42  ;;  %v1513_v0 = vadd.f32 %v1511_v2, %v1508_v15 }
  0xc8   : > { %1471 = vrot.lane.b32.xlu1 %v1464_v5, %s10709_s13  ;;  %1473 = vrot.lane.b32.xlu0 %v1465_v11, %s10709_s13  ;;  %v909_v11 = vmul.f32 %v6393_v3, %v6358_v37  ;;  %v877_v5 = vmul.f32 %v6395_v12, %v6372_v32  ;;  %v958_v59 = vmul.f32 %v6403_v6, %v6362_v50  ;;  %v6437_v2 = vstv %s5305_s26  ;;  %s5304_s26 = sld [smem:[#allocation8 + $0x1d]] }
  0xc9   : > { %v962_v30 = vmul.f32 %v6405_v16, %v6358_v37  ;;  %v1514_v49 = vadd.f32 %v1512_v45, %v1509_v48  ;;  %10906 = vst [vmem:[#allocation65_spill] sm:$0xff] %v6437_v2  ;;  %v993_v48 = vmul.f32 %v6135_v52, %v6366_v42  ;;  %v1231_v53 = vmul.f32 %v6236_v43, %v6358_v37 }
  0xca   : > { %v6423_v27 = vadd.f32 %v909_v11, %v906_v20  ;;  %v6429_v24 = vadd.f32 %v881_v36, %v877_v5  ;;  %v989_v11 = vmul.f32 %v6132_v51, %v6372_v32  ;;  %v1022_v5 = vmul.f32 %v6104_v39, %v6362_v50 }
  0xcb   : > { %v6442_v20 = vadd.f32 %v962_v30, %v958_v59  ;;  %v1026_v36 = vmul.f32 %v6106_v40, %v6358_v37  ;;  %v6457_v30 = vstv %s5347_s16  ;;  %v1227_v51 = vmul.f32 %v6226_v33, %v6362_v50  ;;  %s5333_s16 = sld [smem:[#allocation8 + $0x3a]] }
  0xcc   : > { %1499 = vrot.lane.b32.xlu1 %v1491_v54, %s10709_s13  ;;  %1497 = vrot.lane.b32.xlu0 %v1490_v10, %s10709_s13  ;;  %v910_v54 = vmul.f32 %v6393_v3, %v6366_v42  ;;  %v6439_v10 = vstv %s5354_s14  ;;  %v10561_v15 = vrot.slane %v6423_v27, 3  ;;  %10909 = vst [vmem:[#allocation68_spill] sm:$0xff] %v6457_v30  ;;  %v1115_v60 = vmul.f32 %v6457_v30, %v6366_v42  ;;  %s5353_s14 = sld [smem:[#allocation8 + $0x4e]] }
  0xcd   : > { %10907 = vst [vmem:[#allocation66_spill] sm:$0xff] %v6439_v10  ;;  %v10570_v59 = vrot.slane %v6442_v20, 7  ;;  %v1140_v40 = vmul.f32 %v6439_v10, %v6358_v37  ;;  %v6473_v52 = vadd.f32 %v1026_v36, %v1022_v5 }
  0xce   : > { %v6449_v45 = vadd.f32 %v910_v54, %v907_v9  ;;  %v6466_v9 = vadd.f32 %v993_v48, %v989_v11  ;;  %v1136_v54 = vmul.f32 %v6437_v2, %v6362_v50  ;;  %v6485_v11 = vstv %s5299_s17  ;;  %s5312_s17 = sld [smem:[#allocation8 + $0x25]] }
  0xcf   : > { %10910 = vst [vmem:[#allocation69_spill] sm:$0xff] %v6485_v11  ;;  %v6487_v48 = vstv %s5348_s0  ;;  %s5361_s0 = sld [smem:[#allocation8 + $0x56]] }
  0xd0   : > { %1519 = vrot.lane.b32.xlu1 %v1514_v49, %s10709_s13  ;;  %1517 = vrot.lane.b32.xlu0 %v1513_v0, %s10709_s13  ;;  %v10562_v49 = vrot.slane %v6429_v24, 3  ;;  %v6455_v0 = vstv %s5298_s15  ;;  %v10567_v39 = vrot.slane %v6449_v45, 3  ;;  %10911 = vst [vmem:[#allocation70_spill] sm:$0xff] %v6487_v48  ;;  %v10576_v5 = vrot.slane %v6466_v9, 7  ;;  %s5284_s15 = sld [smem:[#allocation8 + $0x9]] }
  0xd1   : > { %10908 = vst [vmem:[#allocation67_spill] sm:$0xff] %v6455_v0  ;;  %v6490_v36 = vadd.f32 %v1140_v40, %v1136_v54  ;;  %v1318_v54 = vmul.f32 %v6487_v48, %v6358_v37  ;;  %v10923_v25 = vrot.slane %v6449_v45, 3 }
  0xd3   : > { %v10588_v40 = vrot.slane %v6490_v36, 6 }
  0xd4   : > { %918 = vrot.lane.b32.xlu0 %v10561_v15, %s10880_s2  ;;  %897 = vrot.lane.b32.xlu1 %v10562_v49, %s10880_s2  ;;  %v1111_v15 = vmul.f32 %v6455_v0, %v6362_v50  ;;  %v1114_v49 = vmul.f32 %v6457_v30, %v6358_v37 }
  0xd6   : > { %v6497_v3 = vadd.f32 %v1114_v49, %v1111_v15  ;;  %v6510_v15 = vadd.f32 %v1231_v53, %v1227_v51  ;;  %v1315_v49 = vmul.f32 %v6485_v11, %v6362_v50  ;;  %v817_v51 = vmul.f32 %v6071_v21, %v6362_v50 }
  0xd7   : > { %v821_v53 = vmul.f32 %v6095_v34, %v6358_v37  ;;  %v6543_v34 = vstv %s5307_s18  ;;  %v6545_v21 = vstv %s5356_s12  ;;  %s5292_s18 = sld [smem:[#allocation8 + $0x11]]  ;;  %s5341_s12 = sld [smem:[#allocation8 + $0x42]] }
  0xd8   : > { %922 = vrot.lane.b32.xlu0 %v10567_v39, %s10880_s2  ;;  %976 = vrot.lane.b32.xlu1 %v10570_v59, %s10880_s2  ;;  %v10577_v39 = vrot.slane %v6473_v52, 2  ;;  %v1112_v59 = vmul.f32 %v6455_v0, %v6372_v32  ;;  %v10591_v43 = vrot.slane %v6497_v3, 6  ;;  %10912 = vst [vmem:[#allocation71_spill] sm:$0xff] %v6543_v34  ;;  %10913 = vst [vmem:[#allocation72_spill] sm:$0xff] %v6545_v21 }
  0xda   : > { %v6517_v33 = vadd.f32 %v1115_v60, %v1112_v59  ;;  %v6533_v60 = vadd.f32 %v1318_v54, %v1315_v49  ;;  %v1316_v59 = vmul.f32 %v6485_v11, %v6372_v32  ;;  %v844_v49 = vmul.f32 %v6054_v8, %v6362_v50 }
  0xdb   : > { %v848_v54 = vmul.f32 %v6061_v14, %v6358_v37  ;;  %v876_v11 = vmul.f32 %v6395_v12, %v6362_v50 }
  0xdc   : > { %1007 = vrot.lane.b32.xlu0 %v10576_v5, %s10880_s2  ;;  %1043 = vrot.lane.b32.xlu1 %v10577_v39, %s10882_s30  ;;  %v1194_v5 = vmul.f32 %v6159_v62, %v6372_v32  ;;  %v1198_v39 = vmul.f32 %v6162_v63, %v6366_v42  ;;  %v1319_v63 = vmul.f32 %v6487_v48, %v6366_v42  ;;  %v10592_v62 = vrot.slane %v6510_v15, 5 }
  0xdd   : > { %v10593_v30 = vrot.slane %v6517_v33, 6  ;;  %v845_v48 = vmul.f32 %v6054_v8, %v6372_v32 }
  0xde   : > { %v6541_v0 = vadd.f32 %v1198_v39, %v1194_v5  ;;  %v875_v39 = vmul.f32 %v6395_v12, %v6058_v13  ;;  %v880_v5 = vmul.f32 %v6397_v38, %v6358_v37 }
  0xdf   : > { %v852_v14 = vadd.f32 %v849_v31, %v845_v48  ;;  %v10920_v48 = vrot.slane %v6083_v29, 3  ;;  %v959_v29 = vmul.f32 %v6403_v6, %v6372_v32 }
  0xe0   : > { %1154 = vrot.lane.b32.xlu0 %v10588_v40, %s10882_s30  ;;  %1123 = vrot.lane.b32.xlu1 %v10591_v43, %s10882_s30  ;;  %v824_v40 = vadd.f32 %v821_v53, %v817_v51  ;;  %v6560_v51 = vadd.f32 %v1319_v63, %v1316_v59  ;;  %v1526_v53 = vmul.f32 %v6543_v34, %v6362_v50  ;;  %v10915_v19 = vrot.slane %v6541_v0, 2 }
  0xe1   : > { %v879_v43 = vmul.f32 %v6397_v38, %v6065_v18  ;;  %v851_v59 = vadd.f32 %v848_v54, %v844_v49  ;;  %v10917_v49 = vrot.slane %v6112_v44, 7  ;;  %v883_v8 = vadd.f32 %v880_v5, %v876_v11 }
  0xe2   : > { %v832_v63 = vrot.slane %v824_v40, 7  ;;  %v10611_v12 = vrot.slane %v6560_v51, 1 }
  0xe3   : > { %v882_v40 = vadd.f32 %v879_v43, %v875_v39  ;;  %v858_v38 = vrot.slane %v851_v59, 3  ;;  %v889_v5 = vrot.slane %v883_v8, 3  ;;  %v960_v8 = vmul.f32 %v6403_v6, %v6108_v41 }
  0xe4   : > { %1248 = vrot.lane.b32.xlu0 %v10592_v62, %s10736_s23  ;;  %1127 = vrot.lane.b32.xlu1 %v10593_v30, %s10882_s30  ;;  %v1530_v30 = vmul.f32 %v6545_v21, %v6358_v37  ;;  %v10914_v62 = vrot.slane %v6533_v60, 1  ;;  %v833_v54 = vsel %vm828_vm1, %v10917_v49, %v832_v63  ;;  %v964_v49 = vmul.f32 %v6405_v16, %v6118_v47 }
  0xe5   : > { %v859_v39 = vsel %vm856_vm6, %v10920_v48, %v858_v38  ;;  %v6629_v6 = vstv %s5284_s15  ;;  %s6827_s15 = sld [smem:[#allocation8 + $0x2e]] }
  0xe6   : > { %v6584_v26 = vadd.f32 %v1530_v30, %v1526_v53  ;;  %v888_v30 = vrot.slane %v882_v40, 3  ;;  %v860_v53 = vrot.slane %v852_v14, 3  ;;  %v963_v14 = vmul.f32 %v6405_v16, %v6366_v42  ;;  %10921 = vst [vmem:[#allocation76_spill] sm:$0xff] %v6629_v6 }
  0xe7   : > { %v10924_v16 = vrot.slane %v6423_v27, 3 }
  0xe8   : > { %1328 = vrot.lane.b32.xlu0 %v10914_v62, %s10736_s23  ;;  %1212 = vrot.lane.b32.xlu1 %v10915_v19, %s10882_s30  ;;  %10916 = vst [vmem:[#allocation73_spill] sm:$0xff] %v6584_v26  ;;  %v6593_v62 = vstv %s5304_s26  ;;  %v6595_v19 = vstv %s5353_s14  ;;  %v10610_v44 = vrot.slane %v6584_v26, 4  ;;  %v861_v48 = vsel %vm856_vm6, %v858_v38, %v860_v53  ;;  %s6791_s26 = sld [smem:[#allocation8 + $0x27]]  ;;  %s6793_s14 = sld [smem:[#allocation8 + $0x58]] }
  0xe9   : > { %10918 = vst [vmem:[#allocation74_spill] sm:$0xff] %v6593_v62  ;;  %10919 = vst [vmem:[#allocation75_spill] sm:$0xff] %v6595_v19  ;;  %v933_v43 = vmul.f32 %v6593_v62, %v6108_v41  ;;  %v932_v31 = vmul.f32 %v6593_v62, %v6372_v32  ;;  %v937_v11 = vmul.f32 %v6595_v19, %v6118_v47  ;;  %v6631_v26 = vstv %s5333_s16  ;;  %s6829_s16 = sld [smem:[#allocation8 + $0x5]] }
  0xea   : > { %v936_v63 = vmul.f32 %v6595_v19, %v6366_v42  ;;  %v931_v59 = vmul.f32 %v6593_v62, %v6362_v50  ;;  %v935_v40 = vmul.f32 %v6595_v19, %v6358_v37  ;;  %v966_v19 = vadd.f32 %v963_v14, %v959_v29  ;;  %10922 = vst [vmem:[#allocation77_spill] sm:$0xff] %v6631_v26 }
  0xeb   : > { %v967_v62 = vadd.f32 %v964_v49, %v960_v8  ;;  %v10925_v38 = vrot.slane %v6429_v24, 3  ;;  %v1056_v45 = vmul.f32 %v6631_v26, %v6065_v18  ;;  %v1053_v24 = vmul.f32 %v6629_v6, %v6362_v50 }
  0xec   : > { %1332 = vrot.lane.b32.xlu0 %v10611_v12, %s10736_s23  ;;  %836 = vrot.lane.b32.xlu1 %v833_v54, %s10880_s2  ;;  %v890_v54 = vsel %vm856_vm6, %v888_v30, %v889_v5  ;;  %v938_v12 = vadd.f32 %v935_v40, %v931_v59  ;;  %v917_v30 = vsel %vm856_vm6, %v10924_v16, %v10923_v25  ;;  %v972_v27 = vrot.slane %v966_v19, 7 }
  0xed   : > { %v974_v59 = vrot.slane %v967_v62, 7  ;;  %v1054_v25 = vmul.f32 %v6629_v6, %v6372_v32  ;;  %v1080_v40 = vmul.f32 %v6165_v1, %v6362_v50  ;;  %v1084_v29 = vmul.f32 %v6201_v22, %v6358_v37 }
  0xee   : > { %v944_v53 = vrot.slane %v938_v12, 3  ;;  %v1057_v12 = vmul.f32 %v6631_v26, %v6358_v37  ;;  %v1081_v8 = vmul.f32 %v6165_v1, %v6372_v32  ;;  %v10926_v14 = vrot.slane %v6442_v20, 7 }
  0xef   : > { %v975_v19 = vsel %vm828_vm1, %v972_v27, %v974_v59  ;;  %v1137_v20 = vmul.f32 %v6437_v2, %v6372_v32 }
  0xf0   : > { %1544 = vrot.lane.b32.xlu0 %v10610_v44, %s10709_s13  ;;  %864 = vrot.lane.b32.xlu1 %v859_v39, %s10880_s2  ;;  %v939_v39 = vadd.f32 %v936_v63, %v932_v31  ;;  %v940_v44 = vadd.f32 %v937_v11, %v933_v43  ;;  %v892_v43 = vsel %vm856_vm6, %v889_v5, %v10925_v38  ;;  %v10927_v38 = vrot.slane %v6170_v4, 7 }
  0xf1   : > { %v1052_v63 = vmul.f32 %v6629_v6, %v6058_v13  ;;  %v1058_v5 = vmul.f32 %v6631_v26, %v6366_v42  ;;  %v973_v49 = vsel %vm828_vm1, %v10926_v14, %v972_v27  ;;  %v7149_v6 = vld [vmem:[#allocation2 + $0x18] sm:$0xff] }
  0xf2   : > { %v945_v31 = vrot.slane %v939_v39, 3  ;;  %v947_v11 = vrot.slane %v940_v44, 3  ;;  %v1085_v39 = vmul.f32 %v6201_v22, %v6366_v42  ;;  %v7133_v22 = vld [vmem:[#allocation2 + $0x48] sm:$0xff] }
  0xf3   : > { %v1059_v62 = vadd.f32 %v1056_v45, %v1052_v63  ;;  %v10929_v63 = vrot.slane %v6473_v52, 2  ;;  %v10930_v45 = vrot.slane %v6147_v58, 2 }
  0xf4   : > { %893 = vrot.lane.b32.xlu1 %v890_v54, %s10880_s2  ;;  %866 = vrot.lane.b32.xlu0 %v861_v48, %s10880_s2  ;;  %v946_v16 = vsel %vm856_vm6, %v944_v53, %v945_v31  ;;  %v948_v44 = vsel %vm856_vm6, %v945_v31, %v947_v11  ;;  %v1060_v54 = vadd.f32 %v1057_v12, %v1053_v24 }
  0xf5   : > { %v1061_v48 = vadd.f32 %v1058_v5, %v1054_v25  ;;  %v1087_v11 = vadd.f32 %v1084_v29, %v1080_v40  ;;  %v1141_v53 = vmul.f32 %v6439_v10, %v6366_v42  ;;  %v1038_v27 = vsel %vm1033_vm2, %v10930_v45, %v10929_v63 }
  0xf6   : > { %v1066_v59 = vrot.slane %v1060_v54, 2  ;;  %v1088_v4 = vadd.f32 %v1085_v39, %v1081_v8  ;;  %v6691_v25 = vstv %s5361_s0  ;;  %v1142_v5 = vmul.f32 %v6439_v10, %v6118_v47  ;;  %s6847_s0 = sld [smem:[#allocation8 + $0x36]] }
  0xf7   : > { %v1068_v24 = vrot.slane %v1061_v48, 2  ;;  %10932 = vst [vmem:[#allocation79_spill] sm:$0xff] %v6691_v25  ;;  %v1094_v52 = vrot.slane %v1087_v11, 6  ;;  %v1144_v58 = vadd.f32 %v1141_v53, %v1137_v20  ;;  %v1172_v29 = vmul.f32 %v6691_v25, %v6366_v42 }
  0xf8   : > { %920 = vrot.lane.b32.xlu1 %v917_v30, %s10880_s2  ;;  %895 = vrot.lane.b32.xlu0 %v892_v43, %s10880_s2  ;;  %v1065_v30 = vrot.slane %v1059_v62, 2  ;;  %v10928_v43 = vrot.slane %v6466_v9, 7  ;;  %v6689_v9 = vstv %s5312_s17  ;;  %v1096_v40 = vrot.slane %v1088_v4, 6  ;;  %s6835_s17 = sld [smem:[#allocation8 + $0x5f]] }
  0xf9   : > { %10931 = vst [vmem:[#allocation78_spill] sm:$0xff] %v6689_v9  ;;  %v1168_v12 = vmul.f32 %v6689_v9, %v6372_v32  ;;  %v1069_v62 = vsel %vm1033_vm2, %v1066_v59, %v1068_v24  ;;  %v1167_v8 = vmul.f32 %v6689_v9, %v6362_v50  ;;  %v1171_v14 = vmul.f32 %v6691_v25, %v6358_v37 }
  0xfa   : > { %v1004_v31 = vsel %vm828_vm1, %v10928_v43, %v10927_v38  ;;  %v1169_v54 = vmul.f32 %v6689_v9, %v6108_v41  ;;  %v1173_v48 = vmul.f32 %v6691_v25, %v6118_v47  ;;  %v10933_v39 = vrot.slane %v6229_v35, 6 }
  0xfb   : > { %v1097_v38 = vsel %vm1092_vm7, %v1094_v52, %v1096_v40  ;;  %v1150_v43 = vrot.slane %v1144_v58, 6  ;;  %v1174_v20 = vadd.f32 %v1171_v14, %v1167_v8  ;;  %v10934_v53 = vrot.slane %v6517_v33, 6 }
  0xfc   : > { %949 = vrot.lane.b32.xlu1 %v946_v16, %s10880_s2  ;;  %951 = vrot.lane.b32.xlu0 %v948_v44, %s10880_s2  ;;  %v1138_v16 = vmul.f32 %v6437_v2, %v6108_v41  ;;  %v6695_v44 = vpop.permute.xlu0 %862  ;;  %v10935_v63 = vrot.slane %v6497_v3, 6  ;;  %v1258_v58 = vmul.f32 %v6204_v23, %v6362_v50  ;;  %v6748_v40 = vstv %s5341_s12  ;;  %s6871_s12 = sld [smem:[#allocation8 + $0x3d]] }
  0xfd   : > { %v1180_v33 = vrot.slane %v1174_v20, 6  ;;  %10939 = vst [vmem:[#allocation82_spill] sm:$0xff] %v6748_v40  ;;  %v10942_v20 = vrot.slane %v6259_v61, 5 }
  0xfe   : > { %v1122_v45 = vsel %vm1092_vm7, %v10935_v63, %v10934_v53 }
 0x100   : > { %980 = vrot.lane.b32.xlu1 %v975_v19, %s10880_s2  ;;  %978 = vrot.lane.b32.xlu0 %v973_v49, %s10880_s2  ;;  %v1067_v19 = vsel %vm1033_vm2, %v1065_v30, %v1066_v59  ;;  %v1145_v49 = vadd.f32 %v1142_v5, %v1138_v16  ;;  %v1095_v30 = vsel %vm1092_vm7, %v10933_v39, %v1094_v52  ;;  %v6719_v11 = vpop.permute.xlu0 %834  ;;  %v10936_v59 = vrot.slane %v6490_v36, 6 }
 0x101   : > { %v1259_v16 = vmul.f32 %v6204_v23, %v6372_v32  ;;  %v1263_v52 = vmul.f32 %v6216_v28, %v6366_v42  ;;  %v1262_v36 = vmul.f32 %v6216_v28, %v6358_v37  ;;  %v1293_v39 = vmul.f32 %v6748_v40, %v6358_v37 }
 0x102   : > { %v1152_v35 = vrot.slane %v1145_v49, 6  ;;  %v1151_v24 = vsel %vm1092_vm7, %v10936_v59, %v1150_v43  ;;  %v1294_v49 = vmul.f32 %v6748_v40, %v6366_v42 }
 0x103   : > { %v1266_v8 = vadd.f32 %v1263_v52, %v1259_v16  ;;  %v1342_v52 = vmul.f32 %v6250_v55, %v6372_v32 }
 0x104   : > { %1009 = vrot.lane.b32.xlu1 %v1004_v31, %s10880_s2  ;;  %1041 = vrot.lane.b32.xlu0 %v1038_v27, %s10882_s30  ;;  %v1175_v31 = vadd.f32 %v1172_v29, %v1168_v12  ;;  %v1176_v27 = vadd.f32 %v1173_v48, %v1169_v54  ;;  %v6737_v3 = vpop.permute.xlu0 %1011  ;;  %v1153_v12 = vsel %vm1092_vm7, %v1150_v43, %v1152_v35 }
 0x105   : > { %10937 = vst [vmem:[#allocation80_spill] sm:$0xff] %v6737_v3  ;;  %v1265_v54 = vadd.f32 %v1262_v36, %v1258_v58  ;;  %v1292_v43 = vmul.f32 %v6748_v40, %v6065_v18  ;;  %v10944_v18 = vrot.slane %v6198_v17, 2  ;;  %v1345_v36 = vmul.f32 %v6253_v56, %v6358_v37 }
 0x106   : > { %v1181_v4 = vrot.slane %v1175_v31, 6  ;;  %v1183_v5 = vrot.slane %v1176_v27, 6  ;;  %v10941_v31 = vrot.slane %v6510_v15, 5  ;;  %v10945_v15 = vrot.slane %v6541_v0, 2 }
 0x107   : > { %v1341_v0 = vmul.f32 %v6250_v55, %v6362_v50 }
 0x108   : > { %1072 = vrot.lane.b32.xlu1 %v1069_v62, %s10882_s30  ;;  %1070 = vrot.lane.b32.xlu0 %v1067_v19, %s10882_s30  ;;  %v6744_v62 = vpop.permute.xlu1 %1039  ;;  %v6746_v19 = vstv %s5292_s18  ;;  %v1182_v29 = vsel %vm1092_vm7, %v1180_v33, %v1181_v4  ;;  %v1243_v53 = vsel %vm1238_vm3, %v10942_v20, %v10941_v31  ;;  %v1184_v63 = vsel %vm1092_vm7, %v1181_v4, %v1183_v5  ;;  %s6865_s18 = sld [smem:[#allocation8 + $0xc]] }
 0x109   : > { %10938 = vst [vmem:[#allocation81_spill] sm:$0xff] %v6746_v19  ;;  %v1290_v14 = vmul.f32 %v6746_v19, %v6372_v32  ;;  %v1289_v48 = vmul.f32 %v6746_v19, %v6362_v50  ;;  %v1209_v61 = vsel %vm1033_vm2, %v10945_v15, %v10944_v18  ;;  %v1346_v33 = vmul.f32 %v6253_v56, %v6366_v42  ;;  %v10953_v18 = vld [vmem:[#allocation50_spill] sm:$0xff] }
 0x10a   : > { %v10950_v31 = vrot.slane %v6533_v60, 1  ;;  %v1407_v15 = vmul.f32 %v10953_v18, %v6366_v42  ;;  %v10973_v18 = vld [vmem:[#allocation73_spill] sm:$0xff] }
 0x10b   : > { %v1297_v35 = vadd.f32 %v1294_v49, %v1290_v14  ;;  %v1296_v59 = vadd.f32 %v1293_v39, %v1289_v48  ;;  %v1349_v49 = vadd.f32 %v1346_v33, %v1342_v52  ;;  %v1377_v48 = vmul.f32 %v6271_v7, %v6366_v42 }
 0x10c   : > { %1100 = vrot.lane.b32.xlu1 %v1095_v30, %s10882_s30  ;;  %1102 = vrot.lane.b32.xlu0 %v1097_v38, %s10882_s30  ;;  %v6761_v30 = vpop.permute.xlu0 %1098  ;;  %v1288_v38 = vmul.f32 %v6746_v19, %v6058_v13  ;;  %v6775_v27 = vpop.permute.xlu1 %1216  ;;  %v1271_v13 = vrot.slane %v1265_v54, 5  ;;  %v1373_v54 = vmul.f32 %v6256_v57, %v6372_v32  ;;  %v1348_v39 = vadd.f32 %v1345_v36, %v1341_v0 }
 0x10d   : > { %10940 = vst [vmem:[#allocation83_spill] sm:$0xff] %v6761_v30  ;;  %10943 = vst [vmem:[#allocation84_spill] sm:$0xff] %v6775_v27  ;;  %v1304_v4 = vrot.slane %v1297_v35, 5  ;;  %v1302_v17 = vrot.slane %v1296_v59, 5  ;;  %v1532_v35 = vmul.f32 %v6545_v21, %v6118_v47  ;;  %v1527_v33 = vmul.f32 %v6543_v34, %v6372_v32 }
 0x10e   : > { %v1380_v60 = vadd.f32 %v1377_v48, %v1373_v54 }
 0x10f   : > { %v1305_v14 = vsel %vm1238_vm3, %v1302_v17, %v1304_v4  ;;  %v1354_v4 = vrot.slane %v1348_v39, 1 }
 0x110   : > { %1156 = vrot.lane.b32.xlu1 %v1151_v24, %s10882_s30  ;;  %1125 = vrot.lane.b32.xlu0 %v1122_v45, %s10882_s30  ;;  %v1273_v45 = vrot.slane %v1266_v8, 5  ;;  %v1295_v24 = vadd.f32 %v1292_v43, %v1288_v38  ;;  %v6789_v58 = vpop.permute.xlu0 %1244  ;;  %v6802_v8 = vpop.permute.xlu1 %1275  ;;  %v1376_v38 = vmul.f32 %v6271_v7, %v6358_v37  ;;  %v10949_v43 = vrot.slane %v6560_v51, 1 }
 0x111   : > { %10946 = vst [vmem:[#allocation85_spill] sm:$0xff] %v6789_v58  ;;  %10948 = vst [vmem:[#allocation86_spill] sm:$0xff] %v6802_v8  ;;  %v1355_v51 = vrot.slane %v1349_v49, 1  ;;  %v1386_v54 = vrot.slane %v1380_v60, 1 }
 0x112   : > { %v1274_v16 = vsel %vm1238_vm3, %v1271_v13, %v1273_v45  ;;  %v1327_v20 = vsel %vm1324_vm4, %v10950_v31, %v10949_v43  ;;  %v1528_v45 = vmul.f32 %v6543_v34, %v6108_v41  ;;  %v6938_v34 = vld [vmem:[#allocation2 + $0x38] sm:$0xff] }
 0x114   : > { %1185 = vrot.lane.b32.xlu1 %v1182_v29, %s10882_s30  ;;  %1158 = vrot.lane.b32.xlu0 %v1153_v12, %s10882_s30  ;;  %v10947_v12 = vrot.slane %v6241_v46, 5  ;;  %v1301_v29 = vrot.slane %v1295_v24, 5  ;;  %v1372_v46 = vmul.f32 %v6256_v57, %v6362_v50  ;;  %v6842_v24 = vstv %s6791_s26  ;;  %s6921_s26 = sld [smem:[#allocation8 + $0x13]] }
 0x115   : > { %10955 = vst [vmem:[#allocation89_spill] sm:$0xff] %v6842_v24  ;;  %v1535_v0 = vadd.f32 %v1532_v35, %v1528_v45  ;;  %v1559_v36 = vmul.f32 %v6842_v24, %v6108_v41  ;;  %v6881_v45 = vstv %s6829_s16  ;;  %v10963_v35 = vld [vmem:[#allocation51_spill] sm:$0xff]  ;;  %s5350_s16 = sld [smem:[#allocation8 + $0x4b]] }
 0x116   : > { %v1272_v5 = vsel %vm1238_vm3, %v10947_v12, %v1271_v13  ;;  %v10952_v13 = vld [vmem:[#allocation49_spill] sm:$0xff]  ;;  %v1379_v52 = vadd.f32 %v1376_v38, %v1372_v46  ;;  %v1558_v46 = vmul.f32 %v6842_v24, %v6372_v32  ;;  %10962 = vst [vmem:[#allocation93_spill] sm:$0xff] %v6881_v45  ;;  %v1621_v56 = vmul.f32 %v6881_v45, %v6362_v50 }
 0x117   : > { %v1403_v59 = vmul.f32 %v10952_v13, %v6372_v32  ;;  %v1542_v31 = vrot.slane %v1535_v0, 4  ;;  %v10974_v13 = vrot.slane %v10973_v18, 4 }
 0x118   : > { %1246 = vrot.lane.b32.xlu1 %v1243_v53, %s10736_s23  ;;  %1187 = vrot.lane.b32.xlu0 %v1184_v63, %s10882_s30  ;;  %v1303_v53 = vsel %vm1238_vm3, %v1301_v29, %v1302_v17  ;;  %v6821_v63 = vpop.permute.xlu0 %1394  ;;  %v1531_v17 = vmul.f32 %v6545_v21, %v6366_v42  ;;  %v10957_v29 = vld [vmem:[#allocation47_spill] sm:$0xff]  ;;  %v1385_v41 = vrot.slane %v1379_v52, 1 }
 0x119   : > { %10951 = vst [vmem:[#allocation87_spill] sm:$0xff] %v6821_v63  ;;  %v1410_v48 = vadd.f32 %v1407_v15, %v1403_v59  ;;  %v6892_v52 = vld [vmem:[#allocation2 + $0x28] sm:$0xff] }
 0x11a   : > { %v1387_v59 = vsel %vm1324_vm4, %v1385_v41, %v1386_v54  ;;  %v6913_v41 = vld [vmem:[#allocation2 + $0x20] sm:$0xff] }
 0x11b   : > { %v1416_v15 = vrot.slane %v1410_v48, 1 }
 0x11c   : > { %1279 = vrot.lane.b32.xlu1 %v1274_v16, %s10736_s23  ;;  %1214 = vrot.lane.b32.xlu0 %v1209_v61, %s10882_s30  ;;  %v6839_v61 = vpop.permute.xlu1 %1363  ;;  %v6845_v16 = vstv %s6793_s14  ;;  %v6863_v39 = vpop.permute.xlu0 %1423  ;;  %s6923_s14 = sld [smem:[#allocation8 + $0x44]] }
 0x11d   : > { %10954 = vst [vmem:[#allocation88_spill] sm:$0xff] %v6839_v61  ;;  %10956 = vst [vmem:[#allocation90_spill] sm:$0xff] %v6845_v16  ;;  %v1563_v12 = vmul.f32 %v6845_v16, %v6118_v47  ;;  %v1534_v47 = vadd.f32 %v1531_v17, %v1527_v33  ;;  %v1562_v38 = vmul.f32 %v6845_v16, %v6366_v42  ;;  %v6896_v17 = vld [vmem:[#allocation2 + $0x58] sm:$0xff] }
 0x11e   : > { %10959 = vst [vmem:[#allocation47_spill] sm:$0xff] %v6863_v39 }
 0x120   : > { %1308 = vrot.lane.b32.xlu1 %v1305_v14, %s10736_s23  ;;  %1277 = vrot.lane.b32.xlu0 %v1272_v5, %s10736_s23  ;;  %v1356_v5 = vsel %vm1324_vm4, %v1354_v4, %v1355_v51  ;;  %v10958_v14 = vrot.slane %v10957_v29, 1  ;;  %v6873_v43 = vpop.permute.xlu1 %1443  ;;  %v6888_v4 = vstv %s6835_s17  ;;  %v1557_v29 = vmul.f32 %v6842_v24, %v6362_v50  ;;  %s7011_s17 = sld [smem:[#allocation8 + $0x21]] }
 0x121   : > { %10960 = vst [vmem:[#allocation91_spill] sm:$0xff] %v6873_v43  ;;  %10965 = vst [vmem:[#allocation51_spill] sm:$0xff] %v6888_v4  ;;  %v1594_v0 = vmul.f32 %v6896_v17, %v6888_v4  ;;  %v1592_v48 = vmul.f32 %v6888_v4, %v6366_v42 }
 0x122   : > { %v1358_v49 = vsel %vm1324_vm4, %v1355_v51, %v10958_v14  ;;  %v10964_v51 = vrot.slane %v10963_v35, 1  ;;  %v1561_v14 = vmul.f32 %v6845_v16, %v6358_v37  ;;  %v10968_v35 = vld [vmem:[#allocation52_spill] sm:$0xff] }
 0x124   : > { %1330 = vrot.lane.b32.xlu1 %v1327_v20, %s10736_s23  ;;  %1306 = vrot.lane.b32.xlu0 %v1303_v53, %s10736_s23  ;;  %v6875_v20 = vadd.f32 %v1563_v12, %v1559_v36  ;;  %v6878_v53 = vstv %s6827_s15  ;;  %v1389_v60 = vsel %vm1324_vm4, %v1386_v54, %v10964_v51  ;;  %v6901_v36 = vstv %s6847_s0  ;;  %s5301_s15 = sld [smem:[#allocation8 + $0x1a]] }
 0x125   : > { %10961 = vst [vmem:[#allocation92_spill] sm:$0xff] %v6878_v53  ;;  %v1590_v33 = vmul.f32 %v6892_v52, %v6878_v53  ;;  %10966 = vst [vmem:[#allocation94_spill] sm:$0xff] %v6901_v36  ;;  %v1540_v12 = vrot.slane %v1534_v47, 4  ;;  %v1588_v54 = vmul.f32 %v6878_v53, %v6372_v32  ;;  %v1589_v47 = vmul.f32 %v6913_v41, %v6878_v53  ;;  %v6932_v53 = vpop.permute.xlu1 %1495  ;;  %s7013_s0 = sld [smem:[#allocation8 + $0x52]] }
 0x126   : > { %v10969_v51 = vrot.slane %v10968_v35, 1  ;;  %v1573_v16 = vrot.slane %v6875_v20, 4  ;;  %10970 = vst [vmem:[#allocation52_spill] sm:$0xff] %v6932_v53  ;;  %v6943_v35 = vstv %s6865_s18  ;;  %v1564_v20 = vadd.f32 %v1561_v14, %v1557_v29  ;;  %v6964_v29 = vld [vmem:[#allocation2] sm:$0xff]  ;;  %s10703_s18 = smov 113  }
 0x127   : > { %10971 = vst [vmem:[#allocation96_spill] sm:$0xff] %v6943_v35  ;;  %v1541_v7 = vsel %vm752_vm8, %v10974_v13, %v1540_v12  ;;  %v1625_v55 = vmul.f32 %v6901_v36, %v6358_v37  ;;  %v1619_v14 = vmul.f32 %v6964_v29, %v6881_v45 }
 0x128   : > { %1359 = vrot.lane.b32.xlu1 %v1356_v5, %s10736_s23  ;;  %1361 = vrot.lane.b32.xlu0 %v1358_v49, %s10736_s23  ;;  %v1565_v5 = vadd.f32 %v1562_v38, %v1558_v46  ;;  %v6907_v49 = vpop.permute.xlu0 %1445  ;;  %v6917_v46 = vld [vmem:[#allocation2 + $0x50] sm:$0xff] }
 0x129   : > { %10967 = vst [vmem:[#allocation95_spill] sm:$0xff] %v6907_v49  ;;  %v1593_v38 = vmul.f32 %v6917_v46, %v6888_v4  ;;  %v6934_v4 = vld [vmem:[#allocation2 + $0x8] sm:$0xff] }
 0x12a   : > { %v1620_v24 = vmul.f32 %v6934_v4, %v6881_v45  ;;  %v1646_v13 = vmul.f32 %v6934_v4, %v6943_v35 }
 0x12b   : > { %v1596_v21 = vadd.f32 %v1593_v38, %v1589_v47  ;;  %v6975_v47 = vstv %s6921_s26  ;;  %v6978_v38 = vstv %s6923_s14  ;;  %s7044_s26 = sld [smem:[#allocation8 + $0x59]]  ;;  %s7048_s14 = sld [smem:[#allocation8 + $0x2f]] }
 0x12c   : > { %1392 = vrot.lane.b32.xlu1 %v1389_v60, %s10736_s23  ;;  %1390 = vrot.lane.b32.xlu0 %v1387_v59, %s10736_s23  ;;  %v1418_v60 = vsel %vm1324_vm4, %v1416_v15, %v10969_v51  ;;  %v1543_v59 = vsel %vm752_vm8, %v1540_v12, %v1542_v31  ;;  %v1624_v15 = vmul.f32 %v6938_v34, %v6901_v36  ;;  %v1571_v31 = vrot.slane %v1565_v5, 4 }
 0x12d   : > { %v1597_v51 = vadd.f32 %v1594_v0, %v1590_v33  ;;  %v6958_v33 = vpop.permute.xlu0 %1469  ;;  %v1570_v12 = vrot.slane %v1564_v20, 4  ;;  %10977 = vst [vmem:[#allocation99_spill] sm:$0xff] %v6975_v47  ;;  %10978 = vst [vmem:[#allocation100_spill] sm:$0xff] %v6978_v38  ;;  %v1628_v20 = vadd.f32 %v1625_v55, %v1621_v56  ;;  %v1677_v55 = vmul.f32 %v6934_v4, %v6975_v47 }
 0x12e   : > { %v1574_v57 = vsel %vm752_vm8, %v1571_v31, %v1573_v16  ;;  %10975 = vst [vmem:[#allocation73_spill] sm:$0xff] %v6958_v33  ;;  %v1627_v0 = vadd.f32 %v1624_v15, %v1620_v24  ;;  %v1678_v56 = vmul.f32 %v6975_v47, %v6362_v50 }
 0x12f   : > { %v1604_v5 = vrot.slane %v1597_v51, 4  ;;  %v1572_v15 = vsel %vm752_vm8, %v1570_v12, %v1571_v31  ;;  %v1647_v51 = vmul.f32 %v6943_v35, %v6362_v50  ;;  %v1681_v12 = vmul.f32 %v6938_v34, %v6978_v38 }
 0x130   : > { %1421 = vrot.lane.b32.xlu1 %v1418_v60, %s10736_s23  ;;  %1548 = vrot.lane.b32.xlu0 %v1543_v59, %s10709_s13  ;;  %v6946_v60 = vstv %s6871_s12  ;;  %v1595_v59 = vadd.f32 %v1592_v48, %v1588_v54  ;;  %v1602_v48 = vrot.slane %v1596_v21, 4  ;;  %s7037_s12 = sld [smem:[#allocation8 + $0x28]]  ;;  %s5317_s23 = sld [smem:[#allocation8 + $0x2a]] }
 0x131   : > { %10972 = vst [vmem:[#allocation97_spill] sm:$0xff] %v6946_v60  ;;  %v1650_v18 = vmul.f32 %v6938_v34, %v6946_v60  ;;  %v1651_v45 = vmul.f32 %v6946_v60, %v6358_v37  ;;  %v1684_v25 = vadd.f32 %v1681_v12, %v1677_v55 }
 0x132   : > { %v1601_v24 = vrot.slane %v1595_v59, 4  ;;  %v1605_v59 = vsel %vm752_vm8, %v1602_v48, %v1604_v5  ;;  %v1682_v5 = vmul.f32 %v6978_v38, %v6358_v37 }
 0x134   : > { %1546 = vrot.lane.b32.xlu1 %v1541_v7, %s10709_s13  ;;  %1577 = vrot.lane.b32.xlu0 %v1574_v57, %s10709_s13  ;;  %v6968_v7 = vld [vmem:[#allocation2 + $0x30] sm:$0xff]  ;;  %v1603_v28 = vsel %vm752_vm8, %v1601_v24, %v1602_v48  ;;  %v7009_v9 = vadd.f32 %v1682_v5, %v1678_v56  ;;  %v7026_v48 = vstv %s5350_s16  ;;  %v1679_v56 = vmul.f32 %v6975_v47, %v6372_v32  ;;  %s7075_s16 = sld [smem:[#allocation8 + $0x6]] }
 0x135   : > { %v1623_v57 = vmul.f32 %v6968_v7, %v6901_v36  ;;  %v1653_v36 = vadd.f32 %v1650_v18, %v1646_v13  ;;  %v1635_v13 = vrot.slane %v1628_v20, 7  ;;  %v7000_v18 = vadd.f32 %v1651_v45, %v1647_v51  ;;  %10984 = vst [vmem:[#allocation106_spill] sm:$0xff] %v7026_v48 }
 0x136   : > { %v6972_v54 = vpop.permute.xlu1 %1447  ;;  %v1652_v20 = vmul.f32 %v6946_v60, %v6366_v42  ;;  %v1691_v55 = vrot.slane %v7009_v9, 3 }
 0x137   : > { %10976 = vst [vmem:[#allocation98_spill] sm:$0xff] %v6972_v54  ;;  %v1626_v21 = vadd.f32 %v1623_v57, %v1619_v14  ;;  %v1633_v14 = vrot.slane %v1627_v0, 7  ;;  %v1659_v23 = vrot.slane %v1653_v36, 3  ;;  %v1648_v0 = vmul.f32 %v6943_v35, %v6372_v32 }
 0x138   : > { %1575 = vrot.lane.b32.xlu1 %v1572_v15, %s10709_s13  ;;  %1606 = vrot.lane.b32.xlu0 %v1601_v24, %s10709_s13  ;;  %v7024_v24 = vstv %s5301_s15  ;;  %s7054_s15 = sld [smem:[#allocation8 + $0x60]] }
 0x139   : > { %v1632_v57 = vrot.slane %v1626_v21, 7  ;;  %v1636_v45 = vsel %vm828_vm1, %v1633_v14, %v1635_v13  ;;  %10983 = vst [vmem:[#allocation105_spill] sm:$0xff] %v7024_v24  ;;  %v1690_v21 = vrot.slane %v1684_v25, 3  ;;  %v1655_v5 = vadd.f32 %v1652_v20, %v1648_v0 }
 0x13a   : > { %v6988_v40 = vpop.permute.xlu1 %1471  ;;  %v6990_v31 = vpop.permute.xlu0 %1473  ;;  %v1712_v25 = vmul.f32 %v7026_v48, %v6366_v42  ;;  %v1708_v9 = vmul.f32 %v7024_v24, %v6362_v50  ;;  %v1711_v13 = vmul.f32 %v7026_v48, %v6358_v37  ;;  %v7062_v20 = vstv %s7011_s17  ;;  %s7081_s17 = sld [smem:[#allocation8 + $0x37]] }
 0x13b   : > { %10979 = vst [vmem:[#allocation101_spill] sm:$0xff] %v6988_v40  ;;  %10980 = vst [vmem:[#allocation102_spill] sm:$0xff] %v6990_v31  ;;  %v1634_v36 = vsel %vm828_vm1, %v1632_v57, %v1633_v14  ;;  %v1709_v14 = vmul.f32 %v7024_v24, %v6372_v32  ;;  %v1734_v48 = vmul.f32 %v7062_v20, %v6372_v32  ;;  %v7129_v2 = vstv %s7075_s16  ;;  %s7215_s16 = sld [smem:[#allocation8 + $0x4c]] }
 0x13c   : > { %1579 = vrot.lane.b32.xlu1 %v1573_v16, %s10709_s13  ;;  %1610 = vrot.lane.b32.xlu0 %v1605_v59, %s10709_s13  ;;  %v1660_v16 = vrot.slane %v7000_v18, 3  ;;  %10988 = vst [vmem:[#allocation110_spill] sm:$0xff] %v7062_v20  ;;  %10996 = vst [vmem:[#allocation118_spill] sm:$0xff] %v7129_v2 }
 0x13e   : > { %v7004_v15 = vpop.permute.xlu1 %1499  ;;  %v7006_v19 = vpop.permute.xlu0 %1497  ;;  %v1661_v12 = vsel %vm856_vm6, %v1659_v23, %v1660_v16  ;;  %v7105_v35 = vstv %s7054_s15  ;;  %s7207_s15 = sld [smem:[#allocation8 + $0x1b]] }
 0x13f   : > { %10981 = vst [vmem:[#allocation103_spill] sm:$0xff] %v7004_v15  ;;  %10982 = vst [vmem:[#allocation104_spill] sm:$0xff] %v7006_v19  ;;  %v1795_v54 = vmul.f32 %v7133_v22, %v7105_v35  ;;  %v1797_v27 = vmul.f32 %v6896_v17, %v7105_v35 }
 0x140   : > { %1608 = vrot.lane.b32.xlu1 %v1603_v28, %s10709_s13  ;;  %1639 = vrot.lane.b32.xlu0 %v1636_v45, %s10703_s18  ;;  %v1683_v28 = vmul.f32 %v6978_v38, %v6366_v42  ;;  %v1692_v45 = vsel %vm856_vm6, %v1690_v21, %v1691_v55  ;;  %v7067_v38 = vadd.f32 %v1712_v25, %v1709_v14  ;;  %v7088_v14 = vstv %s7037_s12  ;;  %s5337_s12 = sld [smem:[#allocation8 + $0x3e]] }
 0x141   : > { %v1713_v21 = vadd.f32 %v1711_v13, %v1708_v9  ;;  %10991 = vst [vmem:[#allocation113_spill] sm:$0xff] %v7088_v14  ;;  %10994 = vst [vmem:[#allocation116_spill] sm:$0xff] %v7105_v35 }
 0x142   : > { %v7028_v51 = vpop.permute.xlu1 %1519  ;;  %v7030_v59 = vpop.permute.xlu0 %1517  ;;  %v1686_v0 = vadd.f32 %v1683_v28, %v1679_v56  ;;  %v1733_v56 = vmul.f32 %v7062_v20, %v6362_v50  ;;  %v1718_v9 = vrot.slane %v7067_v38, 3 }
 0x143   : > { %10985 = vst [vmem:[#allocation107_spill] sm:$0xff] %v7028_v51  ;;  %10986 = vst [vmem:[#allocation108_spill] sm:$0xff] %v7030_v59  ;;  %v1717_v47 = vrot.slane %v1713_v21, 3 }
 0x144   : > { %1637 = vrot.lane.b32.xlu1 %v1634_v36, %s10703_s18  ;;  %1666 = vrot.lane.b32.xlu0 %v1661_v12, %s10703_s18  ;;  %v7065_v36 = vstv %s7013_s0  ;;  %v1662_v12 = vrot.slane %v1655_v5, 3  ;;  %s5288_s0 = sld [smem:[#allocation8 + $0xd]]  ;;  %v7255_v19 = vstv %s7207_s15  ;;  %s7280_s15 = sld [smem:[#allocation8 + $0x30]] }
 0x145   : > { %10989 = vst [vmem:[#allocation111_spill] sm:$0xff] %v7065_v36  ;;  %v1738_v24 = vmul.f32 %v7065_v36, %v6366_v42  ;;  %v1737_v28 = vmul.f32 %v7065_v36, %v6358_v37  ;;  %v7100_v37 = vstv %s7048_s14  ;;  %v1739_v21 = vmul.f32 %v6917_v46, %v7065_v36  ;;  %s7173_s14 = sld [smem:[#allocation8 + $0x45]]  ;;  %11013 = vst [vmem:[#allocation135_spill] sm:$0xff] %v7255_v19 }
 0x146   : > { %v7056_v18 = vpop.permute.xlu1 %897  ;;  %v7058_v57 = vpop.permute.xlu0 %918  ;;  %v1663_v25 = vsel %vm856_vm6, %v1660_v16, %v1662_v12  ;;  %10993 = vst [vmem:[#allocation115_spill] sm:$0xff] %v7100_v37  ;;  %v1761_v36 = vmul.f32 %v7088_v14, %v6372_v32  ;;  %v1793_v61 = vmul.f32 %v6892_v52, %v7100_v37 }
 0x147   : > { %10987 = vst [vmem:[#allocation109_spill] sm:$0xff] %v7056_v18  ;;  %v7092_v13 = vadd.f32 %v1738_v24, %v1734_v48  ;;  %v1740_v60 = vadd.f32 %v1737_v28, %v1733_v56  ;;  %v1760_v24 = vmul.f32 %v7088_v14, %v6362_v50  ;;  %v7113_v48 = vld [vmem:[#allocation2 + $0x40] sm:$0xff]  ;;  %v1762_v56 = vmul.f32 %v6913_v41, %v7088_v14 }
 0x148   : > { %1664 = vrot.lane.b32.xlu1 %v1659_v23, %s10703_s18  ;;  %1695 = vrot.lane.b32.xlu0 %v1692_v45, %s10703_s18  ;;  %v1693_v23 = vrot.slane %v1686_v0, 3  ;;  %v7095_v45 = vstv %s7044_s26  ;;  %v1735_v0 = vmul.f32 %v6913_v41, %v7062_v20  ;;  %s7169_s26 = sld [smem:[#allocation8 + $0x14]] }
 0x149   : > { %10992 = vst [vmem:[#allocation114_spill] sm:$0xff] %v7095_v45  ;;  %v1764_v12 = vmul.f32 %v7113_v48, %v7095_v45  ;;  %v1747_v20 = vrot.slane %v7092_v13, 3  ;;  %v1766_v50 = vmul.f32 %v6917_v46, %v7095_v45  ;;  %v1746_v10 = vrot.slane %v1740_v60, 3 }
 0x14a   : > { %v7083_v5 = vpop.permute.xlu1 %976  ;;  %v7085_v42 = vpop.permute.xlu0 %922  ;;  %v1694_v28 = vsel %vm856_vm6, %v1691_v55, %v1693_v23  ;;  %v1765_v55 = vmul.f32 %v7133_v22, %v7095_v45  ;;  %v1742_v26 = vadd.f32 %v1739_v21, %v1735_v0  ;;  %v1796_v60 = vmul.f32 %v6917_v46, %v7105_v35 }
 0x14b   : > { %10990 = vst [vmem:[#allocation112_spill] sm:$0xff] %v7085_v42  ;;  %v1748_v32 = vsel %vm856_vm6, %v1746_v10, %v1747_v20  ;;  %v1769_v14 = vadd.f32 %v1766_v50, %v1762_v56  ;;  %v1791_v45 = vmul.f32 %v7149_v6, %v7100_v37  ;;  %v1823_v50 = vmul.f32 %v6934_v4, %v7129_v2 }
 0x14c   : > { %1668 = vrot.lane.b32.xlu1 %v1663_v25, %s10703_s18  ;;  %1699 = vrot.lane.b32.xlu0 %v1693_v23, %s10703_s18  ;;  %v1719_v25 = vsel %vm856_vm6, %v1717_v47, %v1718_v9  ;;  %v7138_v23 = vstv %s7081_s17  ;;  %v1768_v0 = vadd.f32 %v1765_v55, %v1761_v36  ;;  %v1749_v36 = vrot.slane %v1742_v26, 3  ;;  %s10730_s17 = smov 110  }
 0x14d   : > { %10997 = vst [vmem:[#allocation119_spill] sm:$0xff] %v7138_v23  ;;  %v1826_v10 = vmul.f32 %v6968_v7, %v7138_v23  ;;  %v1776_v55 = vrot.slane %v1769_v14, 7 }
 0x14e   : > { %v7107_v16 = vpop.permute.xlu1 %1043  ;;  %v7109_v38 = vpop.permute.xlu0 %1007  ;;  %v1774_v15 = vrot.slane %v1768_v0, 7  ;;  %v1750_v14 = vsel %vm856_vm6, %v1747_v20, %v1749_v36  ;;  %v1800_v0 = vadd.f32 %v1797_v27, %v1793_v61  ;;  %v1828_v36 = vmul.f32 %v7113_v48, %v7138_v23 }
 0x14f   : > { %10995 = vst [vmem:[#allocation117_spill] sm:$0xff] %v7107_v16  ;;  %v7205_v27 = vstv %s7169_s26  ;;  %s7264_s26 = sld [smem:[#allocation8 + $0x29]] }
 0x150   : > { %1697 = vrot.lane.b32.xlu1 %v1694_v28, %s10703_s18  ;;  %1722 = vrot.lane.b32.xlu0 %v1719_v25, %s10703_s18  ;;  %v1767_v28 = vadd.f32 %v1764_v12, %v1760_v24  ;;  %v1792_v25 = vmul.f32 %v6913_v41, %v7100_v37  ;;  %v1822_v24 = vmul.f32 %v6964_v29, %v7129_v2 }
 0x151   : > { %11008 = vst [vmem:[#allocation130_spill] sm:$0xff] %v7205_v27 }
 0x152   : > { %v7140_v13 = vpop.permute.xlu1 %1123  ;;  %v7142_v1 = vpop.permute.xlu0 %1154  ;;  %v1773_v56 = vrot.slane %v1767_v28, 7  ;;  %v1799_v31 = vadd.f32 %v1796_v60, %v1792_v25  ;;  %v1829_v28 = vadd.f32 %v1826_v10, %v1822_v24  ;;  %v7189_v24 = vstv %s5288_s0  ;;  %s7246_s0 = sld [smem:[#allocation8 + $0x22]] }
 0x153   : > { %10998 = vst [vmem:[#allocation120_spill] sm:$0xff] %v7140_v13  ;;  %10999 = vst [vmem:[#allocation121_spill] sm:$0xff] %v7142_v1  ;;  %v7191_v10 = vstv %s5337_s12  ;;  %s7248_s12 = sld [smem:[#allocation8 + $0x53]] }
 0x154   : > { %1720 = vrot.lane.b32.xlu1 %v1717_v47, %s10703_s18  ;;  %1751 = vrot.lane.b32.xlu0 %v1748_v32, %s10703_s18  ;;  %v1827_v47 = vmul.f32 %v6938_v34, %v7138_v23  ;;  %v1798_v32 = vadd.f32 %v1795_v54, %v1791_v45  ;;  %v1805_v25 = vrot.slane %v1799_v31, 7  ;;  %v1835_v60 = vrot.slane %v1829_v28, 2  ;;  %11004 = vst [vmem:[#allocation126_spill] sm:$0xff] %v7189_v24 }
 0x155   : > { %11005 = vst [vmem:[#allocation127_spill] sm:$0xff] %v7191_v10  ;;  %v1775_v61 = vsel %vm828_vm1, %v1773_v56, %v1774_v15  ;;  %v1859_v28 = vmul.f32 %v7133_v22, %v7191_v10 }
 0x156   : > { %v7161_v12 = vpop.permute.xlu1 %1127  ;;  %v7163_v21 = vpop.permute.xlu0 %1248  ;;  %v7183_v54 = vadd.f32 %v1827_v47, %v1823_v50  ;;  %v1804_v45 = vrot.slane %v1798_v32, 7  ;;  %v7198_v47 = vld [vmem:[#allocation2 + $0x10] sm:$0xff]  ;;  %v1855_v32 = vmul.f32 %v7149_v6, %v7189_v24 }
 0x157   : > { %11000 = vst [vmem:[#allocation122_spill] sm:$0xff] %v7161_v12  ;;  %11001 = vst [vmem:[#allocation123_spill] sm:$0xff] %v7163_v21  ;;  %v1824_v31 = vmul.f32 %v7198_v47, %v7129_v2  ;;  %v1854_v23 = vmul.f32 %v7198_v47, %v7189_v24  ;;  %v1858_v2 = vmul.f32 %v7113_v48, %v7191_v10 }
 0x158   : > { %1724 = vrot.lane.b32.xlu1 %v1718_v9, %s10703_s18  ;;  %1778 = vrot.lane.b32.xlu0 %v1773_v56, %s10703_s18  ;;  %v1777_v9 = vsel %vm828_vm1, %v1774_v15, %v1776_v55  ;;  %v1836_v20 = vrot.slane %v7183_v54, 2  ;;  %v1806_v55 = vsel %vm828_vm1, %v1804_v45, %v1805_v25  ;;  %v1853_v54 = vmul.f32 %v6934_v4, %v7189_v24 }
 0x159   : > { %v1857_v15 = vmul.f32 %v6938_v34, %v7191_v10  ;;  %v7224_v56 = vstv %s7173_s14  ;;  %v1831_v37 = vadd.f32 %v1828_v36, %v1824_v31  ;;  %v1862_v49 = vadd.f32 %v1859_v28, %v1855_v32  ;;  %s7266_s14 = sld [smem:[#allocation8 + $0x5a]] }
 0x15a   : > { %v7179_v63 = vpop.permute.xlu1 %1212  ;;  %v7181_v26 = vpop.permute.xlu0 %1328  ;;  %11009 = vst [vmem:[#allocation131_spill] sm:$0xff] %v7224_v56  ;;  %v1885_v24 = vmul.f32 %v7113_v48, %v7224_v56  ;;  %v1861_v36 = vadd.f32 %v1858_v2, %v1854_v23 }
 0x15b   : > { %11002 = vst [vmem:[#allocation124_spill] sm:$0xff] %v7179_v63  ;;  %11003 = vst [vmem:[#allocation125_spill] sm:$0xff] %v7181_v26  ;;  %v1860_v10 = vadd.f32 %v1857_v15, %v1853_v54  ;;  %v1838_v21 = vrot.slane %v1831_v37, 2  ;;  %v1869_v40 = vrot.slane %v1862_v49, 2 }
 0x15c   : > { %1753 = vrot.lane.b32.xlu1 %v1750_v14, %s10703_s18  ;;  %1782 = vrot.lane.b32.xlu0 %v1777_v9, %s10703_s18  ;;  %v1837_v14 = vsel %vm1033_vm2, %v1835_v60, %v1836_v20  ;;  %v1807_v9 = vrot.slane %v1800_v0, 7  ;;  %v1881_v60 = vmul.f32 %v7198_v47, %v7205_v27  ;;  %v1884_v0 = vmul.f32 %v6938_v34, %v7224_v56 }
 0x15d   : > { %v1867_v2 = vrot.slane %v1861_v36, 2  ;;  %v1866_v23 = vrot.slane %v1860_v10, 2  ;;  %v1882_v10 = vmul.f32 %v7149_v6, %v7205_v27  ;;  %v1839_v54 = vsel %vm1033_vm2, %v1836_v20, %v1838_v21 }
 0x15e   : > { %v7193_v35 = vpop.permute.xlu1 %836  ;;  %v7195_v50 = vpop.permute.xlu0 %1332  ;;  %v1808_v31 = vsel %vm828_vm1, %v1805_v25, %v1807_v9  ;;  %v7257_v51 = vadd.f32 %v1885_v24, %v1881_v60  ;;  %v1911_v25 = vmul.f32 %v7198_v47, %v7255_v19  ;;  %v1912_v36 = vmul.f32 %v7149_v6, %v7255_v19 }
 0x15f   : > { %11006 = vst [vmem:[#allocation128_spill] sm:$0xff] %v7193_v35  ;;  %11007 = vst [vmem:[#allocation129_spill] sm:$0xff] %v7195_v50  ;;  %v1880_v50 = vmul.f32 %v6934_v4, %v7205_v27  ;;  %v1870_v15 = vsel %vm1033_vm2, %v1867_v2, %v1869_v40  ;;  %v7338_v19 = vstv %s7280_s15  ;;  %s5310_s15 = sld [smem:[#allocation8 + $0x23]] }
 0x160   : > { %1780 = vrot.lane.b32.xlu1 %v1775_v61, %s10703_s18  ;;  %1811 = vrot.lane.b32.xlu0 %v1806_v55, %s10703_s18  ;;  %v1894_v60 = vrot.slane %v7257_v51, 6  ;;  %11025 = vst [vmem:[#allocation146_spill] sm:$0xff] %v7338_v19 }
 0x162   : > { %v7231_v61 = vpop.permute.xlu1 %864  ;;  %v7233_v55 = vpop.permute.xlu0 %1544 }
 0x163   : > { %11010 = vst [vmem:[#allocation132_spill] sm:$0xff] %v7231_v61  ;;  %11011 = vst [vmem:[#allocation133_spill] sm:$0xff] %v7233_v55 }
 0x164   : > { %1809 = vrot.lane.b32.xlu1 %v1804_v45, %s10703_s18  ;;  %1840 = vrot.lane.b32.xlu0 %v1837_v14, %s10730_s17  ;;  %v1887_v45 = vadd.f32 %v1884_v0, %v1880_v50  ;;  %v7260_v14 = vstv %s7215_s16  ;;  %v1886_v50 = vmul.f32 %v7133_v22, %v7224_v56  ;;  %s7285_s16 = sld [smem:[#allocation8 + $0x61]]  ;;  %v7293_v0 = vstv %s7246_s0  ;;  %s5303_s0 = sld [smem:[#allocation8 + $0x1c]] }
 0x165   : > { %11014 = vst [vmem:[#allocation136_spill] sm:$0xff] %v7260_v14  ;;  %v1914_v24 = vmul.f32 %v7113_v48, %v7260_v14  ;;  %11017 = vst [vmem:[#allocation139_spill] sm:$0xff] %v7293_v0  ;;  %v1937_v56 = vmul.f32 %v7149_v6, %v7293_v0 }
 0x166   : > { %v7250_v32 = vpop.permute.xlu1 %893  ;;  %v7252_v28 = vpop.permute.xlu0 %866  ;;  %v1893_v9 = vrot.slane %v1887_v45, 6  ;;  %v1889_v20 = vadd.f32 %v1886_v50, %v1882_v10  ;;  %v1915_v45 = vmul.f32 %v7133_v22, %v7260_v14 }
 0x167   : > { %11012 = vst [vmem:[#allocation134_spill] sm:$0xff] %v7252_v28  ;;  %v7302_v51 = vadd.f32 %v1914_v24, %v1911_v25  ;;  %v7327_v25 = vstv %s7264_s26  ;;  %v7330_v24 = vstv %s7266_s14  ;;  %s515_s26 = sld [smem:[#allocation8]]  ;;  %s5324_s14 = sld [smem:[#allocation8 + $0x31]] }
 0x168   : > { %1813 = vrot.lane.b32.xlu1 %v1808_v31, %s10703_s18  ;;  %1844 = vrot.lane.b32.xlu0 %v1838_v21, %s10730_s17  ;;  %s7290_s18 = sshll.u32 %s6045_s25, 7  ;;  %v7296_v31 = vstv %s7248_s12  ;;  %11021 = vst [vmem:[#allocation142_spill] sm:$0xff] %v7327_v25  ;;  %11022 = vst [vmem:[#allocation143_spill] sm:$0xff] %v7330_v24  ;;  %v1917_v14 = vadd.f32 %v1915_v45, %v1912_v36  ;;  %v1968_v12 = vmul.f32 %v7149_v6, %v7327_v25  ;;  %s5352_s12 = sld [smem:[#allocation8 + $0x4d]] }
 0x169   : > { %11018 = vst [vmem:[#allocation140_spill] sm:$0xff] %v7296_v31  ;;  %v1941_v27 = vmul.f32 %v7133_v22, %v7296_v31  ;;  %s7318_s13 = scalar_lea.vmem %s11020_s3, %s7290_s18  ;;  %v1972_v55 = vmul.f32 %v7133_v22, %v7330_v24  ;;  %v1971_v36 = vmul.f32 %v7113_v48, %v7330_v24  ;;  %v1938_v45 = vmul.f32 %v6913_v41, %v7293_v0  ;;  %s5366_s3 = sld [smem:[#allocation8 + $0x5b]] }
 0x16a   : > { %v7268_v37 = vpop.permute.xlu1 %920  ;;  %v7270_v49 = vpop.permute.xlu0 %895  ;;  %v7347_v39 = vstv %s7285_s16  ;;  %v7350_v53 = vld [vmem:[%s7318_s13 + $0x8] sm:$0xff]  ;;  %v1921_v61 = vrot.slane %v1917_v14, 6  ;;  %v7407_v33 = vld [vmem:[%s7318_s13 + $0x10] sm:$0xff]  ;;  %v7410_v3 = vld [vmem:[%s7318_s13 + $0x40] sm:$0xff]  ;;  %s5359_s16 = sld [smem:[#allocation8 + $0x54]] }
 0x16b   : > { %11015 = vst [vmem:[#allocation137_spill] sm:$0xff] %v7268_v37  ;;  %11016 = vst [vmem:[#allocation138_spill] sm:$0xff] %v7270_v49  ;;  %v7340_v28 = vadd.f32 %v1941_v27, %v1937_v56  ;;  %v7361_v27 = vld [vmem:[%s7318_s13 + $0x58] sm:$0xff]  ;;  %v7379_v59 = vadd.f32 %v1972_v55, %v1968_v12  ;;  %v1995_v12 = vmul.f32 %v6913_v41, %v7338_v19 }
 0x16c   : > { %1842 = vrot.lane.b32.xlu1 %v1839_v54, %s10730_s17  ;;  %1873 = vrot.lane.b32.xlu0 %v1870_v15, %s10730_s17  ;;  %v1868_v54 = vsel %vm1033_vm2, %v1866_v23, %v1867_v2  ;;  %v1895_v15 = vsel %vm1092_vm7, %v1893_v9, %v1894_v60  ;;  %v1936_v2 = vmul.f32 %v7198_v47, %v7293_v0  ;;  %v7382_v0 = vld [vmem:[%s7318_s13 + $0x28] sm:$0xff]  ;;  %v7427_v18 = vld [vmem:[%s7318_s13 + $0x38] sm:$0xff] }
 0x16d   : > { %v1940_v23 = vmul.f32 %v7113_v48, %v7296_v31  ;;  %11026 = vst [vmem:[#allocation147_spill] sm:$0xff] %v7347_v39  ;;  %v1950_v16 = vrot.slane %v7340_v28, 6  ;;  %v1973_v28 = vmul.f32 %v6917_v46, %v7330_v24  ;;  %v1999_v55 = vmul.f32 %v6917_v46, %v7347_v39  ;;  %v7432_v58 = vld [vmem:[%s7318_s13 + $0x78] sm:$0xff] }
 0x16e   : > { %v7298_v21 = vpop.permute.xlu1 %949  ;;  %v7300_v40 = vpop.permute.xlu0 %951  ;;  %v2000_v24 = vmul.f32 %v6896_v17, %v7347_v39  ;;  %v1998_v26 = vmul.f32 %v7133_v22, %v7347_v39  ;;  %v1981_v8 = vrot.slane %v7379_v59, 6  ;;  %v2135_v1 = vadd.f32 %v7432_v58, %v7427_v18 }
 0x16f   : > { %11019 = vst [vmem:[#allocation141_spill] sm:$0xff] %v7300_v40  ;;  %v1943_v56 = vadd.f32 %v1940_v23, %v1936_v2  ;;  %v1942_v2 = vmul.f32 %v6917_v46, %v7296_v31  ;;  %v1969_v23 = vmul.f32 %v6913_v41, %v7327_v25  ;;  %v2002_v40 = vadd.f32 %v1999_v55, %v1995_v12 }
 0x170   : > { %1871 = vrot.lane.b32.xlu1 %v1868_v54, %s10730_s17  ;;  %1900 = vrot.lane.b32.xlu0 %v1895_v15, %s10730_s17  ;;  %v1920_v54 = vrot.slane %v7302_v51, 6  ;;  %v1896_v15 = vrot.slane %v1889_v20, 6  ;;  %v7358_v51 = vld [vmem:[%s7318_s13 + $0x48] sm:$0xff]  ;;  %v1967_v20 = vmul.f32 %v7198_v47, %v7327_v25 }
 0x171   : > { %v1949_v25 = vrot.slane %v1943_v56, 6 }
 0x172   : > { %v7332_v10 = vpop.permute.xlu1 %980  ;;  %v7334_v50 = vpop.permute.xlu0 %978  ;;  %v1897_v43 = vsel %vm1092_vm7, %v1894_v60, %v1896_v15  ;;  %v7397_v60 = vld [vmem:[%s7318_s13 + $0x68] sm:$0xff]  ;;  %v7400_v15 = vld [vmem:[%s7318_s13] sm:$0xff]  ;;  %v1974_v31 = vadd.f32 %v1971_v36, %v1967_v20  ;;  %v1922_v56 = vsel %vm1092_vm7, %v1920_v54, %v1921_v61  ;;  %v1945_v20 = vadd.f32 %v1942_v2, %v1938_v45 }
 0x173   : > { %11023 = vst [vmem:[#allocation144_spill] sm:$0xff] %v7332_v10  ;;  %11024 = vst [vmem:[#allocation145_spill] sm:$0xff] %v7334_v50  ;;  %v7353_v10 = vld [vmem:[%s7318_s13 + $0x18] sm:$0xff]  ;;  %v1994_v36 = vmul.f32 %v7149_v6, %v7338_v19  ;;  %v1951_v49 = vsel %vm1092_vm7, %v1949_v25, %v1950_v16  ;;  %v7444_v45 = vld [vmem:[%s7318_s13 + $0x60] sm:$0xff] }
 0x174   : > { %1898 = vrot.lane.b32.xlu1 %v1893_v9, %s10730_s17  ;;  %1923 = vrot.lane.b32.xlu0 %v1920_v54, %s10730_s17  ;;  %v2121_v14 = vadd.f32 %v7361_v27, %v7353_v10  ;;  %v2113_v54 = vadd.f32 %v7410_v3, %v7400_v15  ;;  %v1980_v2 = vrot.slane %v1974_v31, 6  ;;  %v5386_v31 = vld [vmem:[%s7318_s13 + $0x30] sm:$0xff] }
 0x176   : > { %v7369_v50 = vpop.permute.xlu1 %1009  ;;  %v7371_v9 = vpop.permute.xlu0 %1041  ;;  %v1982_v30 = vsel %vm1092_vm7, %v1980_v2, %v1981_v8 }
 0x177   : > { %11027 = vst [vmem:[#allocation148_spill] sm:$0xff] %v7369_v50  ;;  %11028 = vst [vmem:[#allocation149_spill] sm:$0xff] %v7371_v9  ;;  %v2114_v9 = vadd.f32 %v7358_v51, %v7350_v53  ;;  %v7413_v50 = vld [vmem:[%s7318_s13 + $0x50] sm:$0xff] }
 0x178   : > { %1902 = vrot.lane.b32.xlu1 %v1897_v43, %s10730_s17  ;;  %1927 = vrot.lane.b32.xlu0 %v1921_v61, %s10730_s17  ;;  %v1996_v43 = vmul.f32 %v6892_v52, %v7338_v19  ;;  %v7437_v61 = vld [vmem:[%s7318_s13 + $0x20] sm:$0xff]  ;;  %v2120_v59 = vadd.f32 %v7413_v50, %v7407_v33 }
 0x179   : > { %v2139_v63 = vadd.f32 %v2121_v14, %v2114_v9  ;;  %v1952_v14 = vrot.slane %v1945_v20, 6  ;;  %v2127_v13 = vadd.f32 %v7444_v45, %v7437_v61  ;;  %v2008_v20 = vrot.slane %v2002_v40, 2  ;;  %v7477_v40 = vld [vmem:[#allocation3] sm:$0xff] }
 0x17a   : > { %v7415_v37 = vpop.permute.xlu1 %1072  ;;  %v7417_v42 = vpop.permute.xlu0 %1070  ;;  %v2003_v39 = vadd.f32 %v2000_v24, %v1996_v43  ;;  %v5394_v24 = vld [vmem:[%s7318_s13 + $0x70] sm:$0xff]  ;;  %v2138_v43 = vadd.f32 %v2120_v59, %v2113_v54  ;;  %v2130_v54 = vmax.f32 %v7382_v0, %v7397_v60  ;;  %11033 = vst [vmem:[#allocation154_spill] sm:$0xff] %v7477_v40  ;;  %s11041_s13 = smov 9  }
 0x17b   : > { %11029 = vst [vmem:[#allocation150_spill] sm:$0xff] %v7415_v37  ;;  %v2128_v37 = vadd.f32 %v7397_v60, %v7382_v0  ;;  %v7483_v0 = vld [vmem:[#allocation3 + $0x8] sm:$0xff]  ;;  %v2137_v60 = vmax.f32 %v7427_v18, %v7432_v58 }
 0x17c   : > { %1925 = vrot.lane.b32.xlu1 %v1922_v56, %s10730_s17  ;;  %1956 = vrot.lane.b32.xlu0 %v1951_v49, %s10730_s17  ;;  %v2001_v49 = vadd.f32 %v1998_v26, %v1994_v36  ;;  %v1976_v56 = vadd.f32 %v1973_v28, %v1969_v23  ;;  %v2116_v26 = vmax.f32 %v7350_v53, %v7358_v51  ;;  %v2010_v28 = vrot.slane %v2003_v39, 2 }
 0x17d   : > { %v2143_v35 = vadd.f32 %v2139_v63, %v2128_v37  ;;  %v2123_v23 = vmax.f32 %v7353_v10, %v7361_v27  ;;  %v1953_v37 = vsel %vm1092_vm7, %v1950_v16, %v1952_v14  ;;  %v2134_v36 = vadd.f32 %v5394_v24, %v5386_v31  ;;  %11035 = vst [vmem:[#allocation156_spill] sm:$0xff] %v7483_v0  ;;  %v7487_v27 = vld [vmem:[#allocation3 + $0x38] sm:$0xff]  ;;  %v11038_v14 = vld [vmem:[#allocation28_spill] sm:$0xff] }
 0x17e   : > { %v7446_v19 = vpop.permute.xlu1 %1100  ;;  %v7448_v9 = vpop.permute.xlu0 %1102  ;;  %v2007_v55 = vrot.slane %v2001_v49, 2  ;;  %v2115_v53 = vmax.f32 %v7400_v15, %v7410_v3  ;;  %v2142_v39 = vadd.f32 %v2138_v43, %v2127_v13  ;;  %v2122_v16 = vmax.f32 %v7407_v33, %v7413_v50  ;;  %v7485_v3 = vld [vmem:[#allocation3 + $0x30] sm:$0xff]  ;;  %11037 = vst [vmem:[#allocation158_spill] sm:$0xff] %v7487_v27 }
 0x17f   : > { %11030 = vst [vmem:[#allocation151_spill] sm:$0xff] %v7446_v19  ;;  %11031 = vst [vmem:[#allocation152_spill] sm:$0xff] %v7448_v9  ;;  %v2141_v10 = vmax.f32 %v2116_v26, %v2123_v23  ;;  %v2011_v51 = vsel %vm1033_vm2, %v2008_v20, %v2010_v28  ;;  %v2129_v33 = vmax.f32 %v7437_v61, %v7444_v45 }
 0x180   : > { %1954 = vrot.lane.b32.xlu1 %v1949_v25, %s10730_s17  ;;  %1985 = vrot.lane.b32.xlu0 %v1982_v30, %s10730_s17  ;;  %v1983_v25 = vrot.slane %v1976_v56, 6  ;;  %v2147_v30 = vadd.f32 %v2143_v35, %v2135_v1  ;;  %11036 = vst [vmem:[#allocation157_spill] sm:$0xff] %v7485_v3  ;;  %v2146_v15 = vadd.f32 %v2142_v39, %v2134_v36  ;;  %v11039_v56 = vld [vmem:[#allocation29_spill] sm:$0xff]  ;;  %v11046_v39 = vld [vmem:[#allocation27_spill] sm:$0xff] }
 0x181   : > { %v2145_v59 = vmax.f32 %v2141_v10, %v2130_v54  ;;  %v2140_v2 = vmax.f32 %v2115_v53, %v2122_v16  ;;  %v2297_v49 = vmul.f32 %v7477_v40, %v11038_v14  ;;  %v2300_v58 = vmul.f32 %v7485_v3, %v11039_v56 }
 0x182   : > { %v7463_v12 = vpop.permute.xlu1 %1156  ;;  %v7465_v63 = vpop.permute.xlu0 %1125  ;;  %v1984_v13 = vsel %vm1092_vm7, %v1981_v8, %v1983_v25  ;;  %v2151_v50 = vmul.f32 0.125, %v2147_v30  ;;  %v2298_v8 = vmul.f32 %v7483_v0, %v11038_v14  ;;  %v2301_v18 = vmul.f32 %v7487_v27, %v11039_v56 }
 0x183   : > { %11032 = vst [vmem:[#allocation153_spill] sm:$0xff] %v7463_v12  ;;  %v2009_v43 = vsel %vm1033_vm2, %v2007_v55, %v2008_v20  ;;  %v2150_v26 = vmul.f32 0.125, %v2146_v15  ;;  %v2149_v23 = vmax.f32 %v2145_v59, %v2137_v60  ;;  %v2136_v28 = vmax.f32 %v5386_v31, %v5394_v24  ;;  %v11045_v20 = vld [vmem:[#allocation26_spill] sm:$0xff] }
 0x184   : > { %1958 = vrot.lane.b32.xlu1 %v1953_v37, %s10730_s17  ;;  %2012 = vrot.lane.b32.xlu0 %v2007_v55, %s10730_s17  ;;  %v2144_v37 = vmax.f32 %v2140_v2, %v2129_v33  ;;  %v2303_v25 = vadd.f32 %v2300_v58, %v2297_v49  ;;  %v7511_v30 = vadd.f32 %v2301_v18, %v2298_v8  ;;  %v7583_v40 = vstv %s515_s26  ;;  %s7603_s26 = sld [smem:[#allocation8 + $0xe]] }
 0x185   : > { %v2322_v53 = vmul.f32 %v7483_v0, %v11045_v20  ;;  %v2325_v10 = vmul.f32 %v7487_v27, %v11046_v39  ;;  %11066 = vst [vmem:[#allocation182_spill] sm:$0xff] %v7583_v40  ;;  %v687_v14 = vmul.f32 %v6964_v29, %v7583_v40  ;;  %v7599_v20 = vstv %s5310_s15 }
 0x186   : > { %v7479_v1 = vpop.permute.xlu1 %1185  ;;  %v7481_v35 = vpop.permute.xlu0 %1158  ;;  %11042 = vst [vmem:[#allocation160_spill] sm:$0xff] %v7511_v30  ;;  %v2148_v55 = vmax.f32 %v2144_v37, %v2136_v28  ;;  %v2309_v31 = vrot.slane %v2303_v25, 7  ;;  %v10728_v24 = vrot.slane %v7511_v30, 7  ;;  %11072 = vst [vmem:[#allocation188_spill] sm:$0xff] %v7599_v20 }
 0x187   : > { %11034 = vst [vmem:[#allocation155_spill] sm:$0xff] %v7481_v35  ;;  %v7642_v35 = vstv %s5331_s29  ;;  %s11229_s29 = smov 116  }
 0x188   : > { %1987 = vrot.lane.b32.xlu1 %v1984_v13, %s10730_s17  ;;  %2016 = vrot.lane.b32.xlu0 %v2011_v51, %s10730_s17  ;;  %v7529_v13 = vadd.f32 %v2325_v10, %v2322_v53  ;;  %v2311_v60 = vsel %vm828_vm1, %v2309_v31, %v10728_v24  ;;  %11084 = vst [vmem:[#allocation200_spill] sm:$0xff] %v7642_v35 }
 0x18a   : > { %v7504_v61 = vpop.permute.xlu1 %1246  ;;  %v7506_v45 = vpop.permute.xlu0 %1187  ;;  %11048 = vst [vmem:[#allocation164_spill] sm:$0xff] %v7529_v13  ;;  %v10727_v15 = vrot.slane %v7529_v13, 3  ;;  %v7585_v13 = vstv %s5324_s14  ;;  %s7605_s14 = sld [smem:[#allocation8 + $0x3f]]  ;;  %v7663_v19 = vstv %s7603_s26  ;;  %s8614_s26 = scalar_lea.vmem %s10512_s6, %s7290_s18 }
 0x18b   : > { %11040 = vst [vmem:[#allocation159_spill] sm:$0xff] %v7504_v61  ;;  %11067 = vst [vmem:[#allocation183_spill] sm:$0xff] %v7585_v13  ;;  %v691_v27 = vmul.f32 %v6968_v7, %v7585_v13  ;;  %v766_v7 = vmul.f32 %v7149_v6, %v7599_v20 }
 0x18c   : > { %2014 = vrot.lane.b32.xlu1 %v2009_v43, %s10730_s17  ;;  %2156 = vrot.lane.b32.xlu0 %v2151_v50, %s11041_s13  ;;  %s613_s17 = sld [smem:[#allocation7]]  ;;  %11087 = vst [vmem:[#allocation203_spill] sm:$0xff] %v7663_v19 }
 0x18e   : > { %v7513_v36 = vpop.permute.xlu1 %1279  ;;  %v7515_v54 = vpop.permute.xlu0 %1214 }
 0x18f   : > { %11043 = vst [vmem:[#allocation161_spill] sm:$0xff] %v7513_v36  ;;  %11044 = vst [vmem:[#allocation162_spill] sm:$0xff] %v7515_v54 }
 0x190   : > { %2154 = vrot.lane.b32.xlu1 %v2150_v26, %s11041_s13  ;;  %2166 = vrot.lane.b32.xlu0 %v2149_v23, %s11041_s13 }
 0x192   : > { %v7524_v16 = vpop.permute.xlu1 %1308  ;;  %v7526_v51 = vpop.permute.xlu0 %1277 }
 0x193   : > { %11047 = vst [vmem:[#allocation163_spill] sm:$0xff] %v7526_v51 }
 0x194   : > { %2164 = vrot.lane.b32.xlu1 %v2148_v55, %s11041_s13 }
 0x196   : > { %v7534_v33 = vpop.permute.xlu1 %1330  ;;  %v7536_v50 = vpop.permute.xlu0 %1306 }
 0x197   : > { %11049 = vst [vmem:[#allocation165_spill] sm:$0xff] %v7534_v33  ;;  %v7640_v33 = vstv %s5282_s24 }
 0x198   : > { %2314 = vrot.lane.b32.xlu1 %v2311_v60, %s10880_s2  ;;  %11083 = vst [vmem:[#allocation199_spill] sm:$0xff] %v7640_v33 }
 0x19a   : > { %v7540_v59 = vpop.permute.xlu1 %1359  ;;  %v7542_v2 = vpop.permute.xlu0 %1361 }
 0x19b   : > { %11050 = vst [vmem:[#allocation166_spill] sm:$0xff] %v7542_v2  ;;  %v705_v2 = vmul.f32 %v6938_v34, %v7642_v35 }
 0x19c   : > { %2339 = vrot.lane.b32.xlu1 %v10727_v15, %s10880_s2 }
 0x19e   : > { %v7547_v49 = vpop.permute.xlu1 %1392  ;;  %v7549_v8 = vpop.permute.xlu0 %1390 }
 0x19f   : > { %11051 = vst [vmem:[#allocation167_spill] sm:$0xff] %v7547_v49 }
 0x1a2   : > { %v7551_v58 = vpop.permute.xlu1 %1421  ;;  %v7553_v18 = vpop.permute.xlu0 %1548 }
 0x1a3   : > { %11052 = vst [vmem:[#allocation168_spill] sm:$0xff] %v7553_v18  ;;  %v694_v18 = vadd.f32 %v691_v27, %v687_v14 }
 0x1a6   : > { %v7555_v43 = vpop.permute.xlu1 %1546  ;;  %v7557_v26 = vpop.permute.xlu0 %1577 }
 0x1a7   : > { %11053 = vst [vmem:[#allocation169_spill] sm:$0xff] %v7555_v43  ;;  %11054 = vst [vmem:[#allocation170_spill] sm:$0xff] %v7557_v26  ;;  %v7627_v26 = vstv %s5366_s3  ;;  %s7950_s3 = sand.u32 1, %s5832_s20  }
 0x1a8   : > { %11080 = vst [vmem:[#allocation196_spill] sm:$0xff] %v7627_v26  ;;  %v795_v49 = vmul.f32 %v6917_v46, %v7627_v26 }
 0x1aa   : > { %v7559_v23 = vpop.permute.xlu1 %1575  ;;  %v7561_v28 = vpop.permute.xlu0 %1606 }
 0x1ab   : > { %11055 = vst [vmem:[#allocation171_spill] sm:$0xff] %v7561_v28 }
 0x1ae   : > { %v7563_v37 = vpop.permute.xlu1 %1579  ;;  %v7565_v25 = vpop.permute.xlu0 %1610 }
 0x1af   : > { %11056 = vst [vmem:[#allocation172_spill] sm:$0xff] %v7563_v37  ;;  %11057 = vst [vmem:[#allocation173_spill] sm:$0xff] %v7565_v25  ;;  %v7613_v37 = vstv %s5352_s12  ;;  %v7615_v25 = vstv %s613_s17 }
 0x1b0   : > { %11075 = vst [vmem:[#allocation191_spill] sm:$0xff] %v7613_v37  ;;  %11076 = vst [vmem:[#allocation192_spill] sm:$0xff] %v7615_v25  ;;  %v743_v14 = vmul.f32 %v7113_v48, %v7613_v37  ;;  %v697_v9 = vadd.f32 %v694_v18, %v7615_v25 }
 0x1b2   : > { %v7567_v55 = vpop.permute.xlu1 %1608  ;;  %v7569_v53 = vpop.permute.xlu0 %1639 }
 0x1b3   : > { %11058 = vst [vmem:[#allocation174_spill] sm:$0xff] %v7567_v55  ;;  %11059 = vst [vmem:[#allocation175_spill] sm:$0xff] %v7569_v53  ;;  %v7625_v55 = vstv %s5317_s23  ;;  %v7636_v53 = vstv %s5296_s27  ;;  %s11215_s27 = smov 119   ;;  %s11265_s23 = smov 113  }
 0x1b4   : > { %11079 = vst [vmem:[#allocation195_spill] sm:$0xff] %v7625_v55  ;;  %11081 = vst [vmem:[#allocation197_spill] sm:$0xff] %v7636_v53  ;;  %v792_v18 = vmul.f32 %v6892_v52, %v7625_v55  ;;  %v767_v52 = vmul.f32 %v6913_v41, %v7599_v20  ;;  %v729_v28 = vmul.f32 %v7198_v47, %v7636_v53 }
 0x1b6   : > { %v7571_v10 = vpop.permute.xlu1 %1637  ;;  %v7573_v31 = vpop.permute.xlu0 %1666 }
 0x1b7   : > { %11060 = vst [vmem:[#allocation176_spill] sm:$0xff] %v7571_v10  ;;  %11061 = vst [vmem:[#allocation177_spill] sm:$0xff] %v7573_v31  ;;  %v765_v31 = vmul.f32 %v7198_v47, %v7599_v20 }
 0x1ba   : > { %v7575_v60 = vpop.permute.xlu1 %1664  ;;  %v7577_v15 = vpop.permute.xlu0 %1695 }
 0x1bb   : > { %11062 = vst [vmem:[#allocation178_spill] sm:$0xff] %v7575_v60  ;;  %11063 = vst [vmem:[#allocation179_spill] sm:$0xff] %v7577_v15  ;;  %v701_v60 = vmul.f32 %v6934_v4, %v7640_v33 }
 0x1be   : > { %v7579_v24 = vpop.permute.xlu1 %1668  ;;  %v7581_v3 = vpop.permute.xlu0 %1699 }
 0x1bf   : > { %11064 = vst [vmem:[#allocation180_spill] sm:$0xff] %v7579_v24  ;;  %11065 = vst [vmem:[#allocation181_spill] sm:$0xff] %v7581_v3  ;;  %v7601_v24 = vstv %s5359_s16  ;;  %v7611_v3 = vstv %s5303_s0  ;;  %s8501_s16 = scalar_lea.vmem %s10511_s5, %s7290_s18  ;;  %s11299_s18 = sshll.u32 %s6045_s25, 6 }
 0x1c0   : > { %11073 = vst [vmem:[#allocation189_spill] sm:$0xff] %v7601_v24  ;;  %v770_v29 = vmul.f32 %v7133_v22, %v7601_v24  ;;  %11074 = vst [vmem:[#allocation190_spill] sm:$0xff] %v7611_v3  ;;  %v739_v27 = vmul.f32 %v7198_v47, %v7611_v3  ;;  %s8654_s15 = scalar_lea.vmem %s10510_s4, %s11299_s18  ;;  %s11304_s25 = smov 110  }
 0x1c2   : > { %v7587_v30 = vpop.permute.xlu1 %1697  ;;  %v7589_v56 = vpop.permute.xlu0 %1722  ;;  %v7633_v36 = vadd.f32 %v770_v29, %v766_v7  ;;  %v7660_v51 = vadd.f32 %v743_v14, %v739_v27  ;;  %v715_v27 = vmul.f32 %v6934_v4, %v7663_v19 }
 0x1c3   : > { %11068 = vst [vmem:[#allocation184_spill] sm:$0xff] %v7587_v30  ;;  %11069 = vst [vmem:[#allocation185_spill] sm:$0xff] %v7589_v56  ;;  %v769_v56 = vmul.f32 %v7113_v48, %v7601_v24 }
 0x1c4   : > { %v11093_v10 = vrot.slane %v7660_v51, 4 }
 0x1c5   : > { %v772_v29 = vadd.f32 %v769_v56, %v765_v31  ;;  %v7666_v56 = vstv %s7605_s14 }
 0x1c6   : > { %v7595_v0 = vpop.permute.xlu1 %1720  ;;  %v7597_v39 = vpop.permute.xlu0 %1751  ;;  %11088 = vst [vmem:[#allocation204_spill] sm:$0xff] %v7666_v56  ;;  %v719_v14 = vmul.f32 %v6938_v34, %v7666_v56 }
 0x1c7   : > { %11070 = vst [vmem:[#allocation186_spill] sm:$0xff] %v7595_v0  ;;  %11071 = vst [vmem:[#allocation187_spill] sm:$0xff] %v7597_v39  ;;  %v796_v0 = vmul.f32 %v6896_v17, %v7627_v26  ;;  %v771_v17 = vmul.f32 %v6917_v46, %v7601_v24  ;;  %v778_v31 = vrot.slane %v772_v29, 4  ;;  %v708_v24 = vadd.f32 %v705_v2, %v701_v60 }
 0x1c9   : > { %v799_v46 = vadd.f32 %v796_v0, %v792_v18  ;;  %v5603_v18 = vld [vmem:[#allocation2 + $0x20] sm:$0xff]  ;;  %v774_v20 = vadd.f32 %v771_v17, %v767_v52  ;;  %v721_v17 = vmul.f32 %v7133_v22, %v7666_v56 }
 0x1ca   : > { %v7621_v43 = vpop.permute.xlu1 %1724  ;;  %v7623_v30 = vpop.permute.xlu0 %1778 }
 0x1cb   : > { %11077 = vst [vmem:[#allocation193_spill] sm:$0xff] %v7621_v43  ;;  %11078 = vst [vmem:[#allocation194_spill] sm:$0xff] %v7623_v30  ;;  %v7638_v43 = vstv %s5345_s21  ;;  %v791_v30 = vmul.f32 %v6913_v41, %v7625_v55  ;;  %s5261_s21 = sshll.u32 %s7950_s3, 4 }
 0x1cc   : > { %11082 = vst [vmem:[#allocation198_spill] sm:$0xff] %v7638_v43  ;;  %s7976_s24 = scalar_lea.vmem [#allocation11], %s5261_s21 }
 0x1cd   : > { %v7681_v39 = vadd.f32 %v795_v49, %v791_v30  ;;  %v732_v30 = vmul.f32 %v7113_v48, %v7638_v43  ;;  %v11091_v49 = vrot.slane %v7633_v36, 4 }
 0x1ce   : > { %v7648_v7 = vpop.permute.xlu1 %1753  ;;  %v7650_v54 = vpop.permute.xlu0 %1782 }
 0x1cf   : > { %11085 = vst [vmem:[#allocation201_spill] sm:$0xff] %v7648_v7  ;;  %11086 = vst [vmem:[#allocation202_spill] sm:$0xff] %v7650_v54  ;;  %v790_v54 = vmul.f32 %v7149_v6, %v7625_v55  ;;  %v794_v7 = vmul.f32 %v7133_v22, %v7627_v26  ;;  %v688_v55 = vmul.f32 %v6934_v4, %v7583_v40  ;;  %v804_v61 = vrot.slane %v7681_v39, 4 }
 0x1d0   : > { %v692_v26 = vmul.f32 %v6938_v34, %v7585_v13  ;;  %v780_v29 = vsel %vm752_vm8, %v778_v31, %v11091_v49  ;;  %v741_v4 = vmul.f32 %v5603_v18, %v7611_v3  ;;  %v761_v31 = vadd.f32 %v11093_v10, %v697_v9 }
 0x1d1   : > { %v7699_v0 = vadd.f32 %v794_v7, %v790_v54  ;;  %v786_v12 = vadd.f32 %v780_v29, %v708_v24  ;;  %v734_v54 = vadd.f32 %v732_v30, %v729_v28  ;;  %v806_v7 = vrot.slane %v799_v46, 4 }
 0x1d2   : > { %v7683_v15 = vpop.permute.xlu1 %1780  ;;  %v7685_v41 = vpop.permute.xlu0 %1811  ;;  %v695_v49 = vadd.f32 %v692_v26, %v688_v55  ;;  %v707_v18 = vmul.f32 %v7133_v22, %v7642_v35  ;;  %v717_v39 = vmul.f32 %v7149_v6, %v7663_v19  ;;  %v744_v24 = vmul.f32 %v7133_v22, %v7613_v37 }
 0x1d3   : > { %11089 = vst [vmem:[#allocation205_spill] sm:$0xff] %v7683_v15  ;;  %11090 = vst [vmem:[#allocation206_spill] sm:$0xff] %v7685_v41  ;;  %v5604_v15 = vld [vmem:[#allocation2 + $0x50] sm:$0xff]  ;;  %v722_v41 = vadd.f32 %v719_v14, %v715_v27  ;;  %v902_v52 = vadd.f32 %v7250_v32, %v786_v12  ;;  %v740_v9 = vmul.f32 %v7149_v6, %v7611_v3  ;;  %v781_v14 = vrot.slane %v774_v20, 4 }
 0x1d4   : > { %v745_v34 = vmul.f32 %v5604_v15, %v7613_v37  ;;  %v703_v15 = vmul.f32 %v7149_v6, %v7640_v33  ;;  %v733_v32 = vmul.f32 %v7133_v22, %v7638_v43  ;;  %v730_v12 = vmul.f32 %v7149_v6, %v7636_v53  ;;  %v8732_v53 = vld [vmem:[%s8614_s26 + $0x48] sm:$0xff] }
 0x1d5   : > { %v840_v27 = vadd.f32 %v6719_v11, %v734_v54  ;;  %v871_v46 = vadd.f32 %v6695_v44, %v761_v31  ;;  %v724_v11 = vadd.f32 %v721_v17, %v717_v39  ;;  %v702_v31 = vmul.f32 %v7198_v47, %v7640_v33  ;;  %v11096_v17 = vld [vmem:[#allocation121_spill] sm:$0xff] }
 0x1d6   : > { %v7703_v2 = vpop.permute.xlu1 %1809  ;;  %v7705_v60 = vpop.permute.xlu0 %1840  ;;  %v748_v26 = vadd.f32 %v745_v34, %v741_v4  ;;  %v710_v30 = vadd.f32 %v707_v18, %v703_v15  ;;  %v698_v4 = vadd.f32 %v695_v49, %v7615_v25  ;;  %v747_v34 = vadd.f32 %v744_v24, %v740_v9  ;;  %v11094_v18 = vld [vmem:[#allocation120_spill] sm:$0xff] }
 0x1d7   : > { %11092 = vst [vmem:[#allocation207_spill] sm:$0xff] %v7703_v2  ;;  %v803_v2 = vrot.slane %v7699_v0, 4  ;;  %v1016_v0 = vadd.f32 %v7109_v38, %v902_v52  ;;  %v985_v6 = vadd.f32 %v7083_v5, %v871_v46  ;;  %v735_v20 = vadd.f32 %v733_v32, %v730_v12 }
 0x1d8   : > { %v756_v37 = vrot.slane %v748_v26, 4  ;;  %v955_v44 = vadd.f32 %v7298_v21, %v840_v27  ;;  %v693_v38 = vmul.f32 %v7113_v48, %v7585_v13  ;;  %v706_v54 = vmul.f32 %v7113_v48, %v7642_v35  ;;  %v11095_v21 = vld [vmem:[#allocation128_spill] sm:$0xff] }
 0x1d9   : > { %v811_v10 = vadd.f32 %v803_v2, %v722_v41  ;;  %v807_v41 = vsel %vm752_vm8, %v804_v61, %v806_v7  ;;  %v788_v7 = vadd.f32 %v781_v14, %v710_v30  ;;  %v1132_v15 = vadd.f32 %v11094_v18, %v1016_v0  ;;  %v11099_v0 = vld [vmem:[#allocation141_spill] sm:$0xff] }
 0x1da   : > { %v7722_v28 = vpop.permute.xlu1 %1813  ;;  %v7724_v55 = vpop.permute.xlu0 %1844  ;;  %v1076_v5 = vadd.f32 %v7417_v42, %v955_v44  ;;  %v841_v52 = vadd.f32 %v11095_v21, %v735_v20  ;;  %v754_v39 = vrot.slane %v747_v34, 4  ;;  %v716_v24 = vmul.f32 %v7198_v47, %v7663_v19  ;;  %v8769_v19 = vld [vmem:[%s8614_s26 + $0x18] sm:$0xff] }
 0x1db   : > { %v927_v29 = vadd.f32 %v7058_v57, %v811_v10  ;;  %v689_v57 = vmul.f32 %v7198_v47, %v7583_v40  ;;  %v720_v9 = vmul.f32 %v7113_v48, %v7666_v56  ;;  %v11098_v42 = vrot.slane %v7633_v36, 4  ;;  %v11100_v48 = vld [vmem:[#allocation124_spill] sm:$0xff] }
 0x1dc   : > { %v1191_v46 = vadd.f32 %v7479_v1, %v1076_v5  ;;  %v813_v30 = vadd.f32 %v807_v41, %v724_v11  ;;  %v709_v47 = vadd.f32 %v706_v54, %v702_v31  ;;  %v956_v34 = vadd.f32 %v11099_v0, %v841_v52  ;;  %v11103_v1 = vld [vmem:[#allocation150_spill] sm:$0xff]  ;;  %v8777_v40 = vld [vmem:[%s8614_s26 + $0x50] sm:$0xff] }
 0x1dd   : > { %v1048_v49 = vadd.f32 %v6744_v62, %v927_v29  ;;  %v11097_v62 = vld [vmem:[#allocation83_spill] sm:$0xff]  ;;  %v782_v27 = vsel %vm752_vm8, %v11098_v42, %v781_v14  ;;  %v696_v29 = vadd.f32 %v693_v38, %v689_v57  ;;  %v805_v44 = vsel %vm752_vm8, %v803_v2, %v804_v61  ;;  %v11104_v38 = vld [vmem:[#allocation109_spill] sm:$0xff]  ;;  %v11105_v61 = vld [vmem:[#allocation86_spill] sm:$0xff] }
 0x1de   : > { %v7738_v22 = vpop.permute.xlu1 %1842  ;;  %v7740_v43 = vpop.permute.xlu0 %1873  ;;  %v1107_v12 = vadd.f32 %v11097_v62, %v985_v6  ;;  %v1312_v18 = vadd.f32 %v7536_v50, %v1191_v46  ;;  %v11102_v6 = vrot.slane %v7660_v51, 4  ;;  %v723_v14 = vadd.f32 %v720_v9, %v716_v24  ;;  %v11107_v9 = vld [vmem:[#allocation125_spill] sm:$0xff] }
 0x1df   : > { %v1163_v32 = vadd.f32 %v11096_v17, %v1048_v49  ;;  %v11101_v49 = vld [vmem:[#allocation85_spill] sm:$0xff]  ;;  %v787_v17 = vadd.f32 %v782_v27, %v709_v47  ;;  %v1077_v41 = vadd.f32 %v11103_v1, %v956_v34  ;;  %v904_v31 = vadd.f32 %v11104_v38, %v788_v7  ;;  %v11108_v27 = vld [vmem:[#allocation112_spill] sm:$0xff] }
 0x1e0   : > { %v1221_v20 = vadd.f32 %v11100_v48, %v1107_v12  ;;  %v1253_v21 = vadd.f32 %v11101_v49, %v1132_v15  ;;  %v755_v36 = vsel %vm752_vm8, %v11102_v6, %v754_v39  ;;  %v1427_v50 = vadd.f32 %v7551_v58, %v1312_v18  ;;  %v11106_v15 = vld [vmem:[#allocation138_spill] sm:$0xff]  ;;  %v11109_v46 = vld [vmem:[#allocation137_spill] sm:$0xff]  ;;  %v11110_v47 = vld [vmem:[#allocation148_spill] sm:$0xff] }
 0x1e1   : > { %v1284_v2 = vadd.f32 %v11105_v61, %v1163_v32  ;;  %v757_v5 = vsel %vm752_vm8, %v754_v39, %v756_v37  ;;  %v812_v51 = vadd.f32 %v805_v44, %v723_v14  ;;  %v903_v52 = vadd.f32 %v11106_v15, %v787_v17  ;;  %v11118_v1 = vld [vmem:[#allocation52_spill] sm:$0xff]  ;;  %v11120_v61 = vld [vmem:[#allocation145_spill] sm:$0xff]  ;;  %v11123_v15 = vld [vmem:[#allocation47_spill] sm:$0xff] }
 0x1e2   : > { %v7760_v26 = vpop.permute.xlu1 %1871  ;;  %v7762_v10 = vpop.permute.xlu0 %1900  ;;  %v1368_v54 = vadd.f32 %v7540_v59, %v1253_v21  ;;  %v1192_v24 = vadd.f32 %v7506_v45, %v1077_v41  ;;  %v1337_v62 = vadd.f32 %v11107_v9, %v1221_v20  ;;  %v762_v12 = vadd.f32 %v755_v36, %v698_v4  ;;  %v11111_v45 = vld [vmem:[#allocation80_spill] sm:$0xff]  ;;  %v11112_v4 = vld [vmem:[#allocation73_spill] sm:$0xff] }
 0x1e3   : > { %v699_v42 = vadd.f32 %v696_v29, %v7615_v25  ;;  %v1399_v7 = vadd.f32 %v7549_v8, %v1284_v2  ;;  %v929_v59 = vadd.f32 %v11108_v27, %v813_v30  ;;  %v928_v32 = vadd.f32 %v11109_v46, %v812_v51  ;;  %v11113_v29 = vld [vmem:[#allocation108_spill] sm:$0xff]  ;;  %v11114_v8 = vld [vmem:[#allocation117_spill] sm:$0xff]  ;;  %v11128_v46 = vld [vmem:[#allocation122_spill] sm:$0xff] }
 0x1e4   : > { %v1017_v58 = vadd.f32 %v11110_v47, %v903_v52  ;;  %v1313_v37 = vadd.f32 %v7524_v16, %v1192_v24  ;;  %v1018_v34 = vadd.f32 %v11111_v45, %v904_v31  ;;  %v1478_v20 = vadd.f32 %v11112_v4, %v1368_v54  ;;  %v11115_v30 = vld [vmem:[#allocation132_spill] sm:$0xff]  ;;  %v11116_v21 = vld [vmem:[#allocation149_spill] sm:$0xff]  ;;  %v11117_v16 = vld [vmem:[#allocation91_spill] sm:$0xff] }
 0x1e5   : > { %v763_v48 = vadd.f32 %v757_v5, %v699_v42  ;;  %v1523_v44 = vadd.f32 %v11113_v29, %v1427_v50  ;;  %v1050_v18 = vadd.f32 %v11114_v8, %v929_v59  ;;  %v872_v49 = vadd.f32 %v11115_v30, %v762_v12  ;;  %v11119_v38 = vld [vmem:[#allocation176_spill] sm:$0xff]  ;;  %v11121_v2 = vld [vmem:[#allocation153_spill] sm:$0xff]  ;;  %v11122_v5 = vld [vmem:[#allocation159_spill] sm:$0xff] }
 0x1e6   : > { %v7779_v11 = vpop.permute.xlu1 %1898  ;;  %v1924_v57 = vpop.permute.xlu0 %1923  ;;  %v1049_v6 = vadd.f32 %v11116_v21, %v928_v32  ;;  %v1133_v36 = vadd.f32 %v7465_v63, %v1017_v58  ;;  %v1452_v14 = vadd.f32 %v11117_v16, %v1337_v62  ;;  %v1584_v17 = vadd.f32 %v7559_v23, %v1478_v20  ;;  %v11124_v63 = vld [vmem:[#allocation133_spill] sm:$0xff]  ;;  %v11125_v62 = vld [vmem:[#allocation171_spill] sm:$0xff]  ;;  %v11131_v20 = vld [vmem:[#allocation166_spill] sm:$0xff] }
 0x1e7   : > { %v1504_v41 = vadd.f32 %v11118_v1, %v1399_v7  ;;  %v1643_v31 = vadd.f32 %v11119_v38, %v1523_v44  ;;  %v986_v54 = vadd.f32 %v11120_v61, %v872_v49  ;;  %v1428_v52 = vadd.f32 %v11123_v15, %v1313_v37  ;;  %v11126_v23 = vld [vmem:[#allocation179_spill] sm:$0xff]  ;;  %v11132_v37 = vld [vmem:[#allocation178_spill] sm:$0xff]  ;;  %v11140_v15 = vld [vmem:[#allocation144_spill] sm:$0xff] }
 0x1e8   : > { %v1164_v50 = vadd.f32 %v11121_v2, %v1049_v6  ;;  %v1254_v51 = vadd.f32 %v11122_v5, %v1133_v36  ;;  %v1553_v12 = vadd.f32 %v11124_v63, %v1452_v14  ;;  %v1704_v27 = vadd.f32 %v11126_v23, %v1584_v17  ;;  %v11127_v7 = vld [vmem:[#allocation187_spill] sm:$0xff]  ;;  %v11133_v8 = vld [vmem:[#allocation186_spill] sm:$0xff]  ;;  %v8772_v25 = vld [vmem:[%s8614_s26 + $0x38] sm:$0xff] }
 0x1e9   : > { %v1615_v42 = vadd.f32 %v11125_v62, %v1504_v41  ;;  %v1757_v59 = vadd.f32 %v11127_v7, %v1643_v31  ;;  %v1134_v32 = vadd.f32 %v11128_v46, %v1018_v34  ;;  %v11129_v47 = vld [vmem:[#allocation151_spill] sm:$0xff]  ;;  %v11135_v36 = vld [vmem:[#allocation134_spill] sm:$0xff] }
 0x1ea   : > { %v7795_v39 = vpop.permute.xlu1 %1902  ;;  %v7797_v0 = vpop.permute.xlu0 %1927  ;;  %v1108_v58 = vadd.f32 %v11129_v47, %v986_v54  ;;  %v11130_v45 = vld [vmem:[#allocation163_spill] sm:$0xff]  ;;  %v1369_v29 = vadd.f32 %v11131_v20, %v1254_v51  ;;  %v1673_v44 = vadd.f32 %v11132_v37, %v1553_v12  ;;  %v873_v16 = vadd.f32 %v11135_v36, %v763_v48  ;;  %v11136_v14 = vld [vmem:[#allocation162_spill] sm:$0xff]  ;;  %v11142_v48 = vld [vmem:[#allocation165_spill] sm:$0xff] }
 0x1eb   : > { %v1285_v4 = vadd.f32 %v11130_v45, %v1164_v50  ;;  %v1729_v30 = vadd.f32 %v11133_v8, %v1615_v42  ;;  %v11134_v49 = vld [vmem:[#allocation207_spill] sm:$0xff]  ;;  %v1877_v6 = vadd.f32 %v7760_v26, %v1757_v59  ;;  %v11139_v54 = vld [vmem:[#allocation194_spill] sm:$0xff]  ;;  %v11143_v42 = vld [vmem:[#allocation101_spill] sm:$0xff] }
 0x1ec   : > { %v1818_v21 = vadd.f32 %v11134_v49, %v1704_v27  ;;  %v1222_v17 = vadd.f32 %v11136_v14, %v1108_v58  ;;  %v11137_v1 = vld [vmem:[#allocation167_spill] sm:$0xff]  ;;  %v1787_v2 = vadd.f32 %v11139_v54, %v1673_v44  ;;  %v987_v63 = vadd.f32 %v11140_v15, %v873_v16  ;;  %v11145_v47 = vld [vmem:[#allocation152_spill] sm:$0xff]  ;;  %v11147_v45 = vld [vmem:[#allocation170_spill] sm:$0xff] }
 0x1ed   : > { %v1400_v34 = vadd.f32 %v11137_v1, %v1285_v4  ;;  %v11138_v41 = vld [vmem:[#allocation107_spill] sm:$0xff]  ;;  %v1849_v50 = vadd.f32 %v7705_v60, %v1729_v30  ;;  %v1479_v23 = vadd.f32 %v11143_v42, %v1369_v29  ;;  %v11146_v60 = vld [vmem:[#allocation161_spill] sm:$0xff]  ;;  %v11148_v20 = vld [vmem:[#allocation104_spill] sm:$0xff] }
 0x1ee   : > { %v1926_v24 = vpop.permute.xlu1 %1925  ;;  %v7814_v9 = vpop.permute.xlu0 %1956  ;;  %v1524_v38 = vadd.f32 %v11138_v41, %v1428_v52  ;;  %v7834_v5 = vadd.f32 %v1924_v57, %v1818_v21  ;;  %v11141_v26 = vld [vmem:[#allocation155_spill] sm:$0xff]  ;;  %v1338_v62 = vadd.f32 %v11142_v48, %v1222_v17  ;;  %v1907_v52 = vadd.f32 %v7779_v11, %v1787_v2  ;;  %v11149_v8 = vld [vmem:[#allocation201_spill] sm:$0xff]  ;;  %v11152_v14 = vld [vmem:[#allocation174_spill] sm:$0xff] }
 0x1ef   : > { %v1165_v12 = vadd.f32 %v11141_v26, %v1050_v18  ;;  %v11144_v27 = vld [vmem:[#allocation175_spill] sm:$0xff]  ;;  %v1109_v58 = vadd.f32 %v11145_v47, %v987_v63  ;;  %v1585_v4 = vadd.f32 %v11147_v45, %v1479_v23  ;;  %v1505_v37 = vadd.f32 %v11148_v20, %v1400_v34  ;;  %v11153_v1 = vld [vmem:[#allocation184_spill] sm:$0xff]  ;;  %v11155_v2 = vld [vmem:[#allocation169_spill] sm:$0xff] }
 0x1f0   : > { %v1644_v7 = vadd.f32 %v11144_v27, %v1524_v38  ;;  %v2027_v29 = vrot.slane %v7834_v5, 3  ;;  %v11151_v36 = vld [vmem:[#allocation95_spill] sm:$0xff]  ;;  %v11159_v23 = vld [vmem:[#allocation88_spill] sm:$0xff] }
 0x1f1   : > { %v1286_v57 = vadd.f32 %v11146_v60, %v1165_v12  ;;  %v1453_v16 = vadd.f32 %v11151_v36, %v1338_v62  ;;  %v1616_v17 = vadd.f32 %v11152_v14, %v1505_v37  ;;  %v1705_v41 = vadd.f32 %v11153_v1, %v1585_v4  ;;  %v11158_v12 = vld [vmem:[#allocation206_spill] sm:$0xff]  ;;  %v11162_v4 = vld [vmem:[#allocation205_spill] sm:$0xff]  ;;  %v11166_v14 = vld [vmem:[#allocation172_spill] sm:$0xff] }
 0x1f2   : > { %v1955_v31 = vpop.permute.xlu1 %1954  ;;  %v1986_v61 = vpop.permute.xlu0 %1985  ;;  %v1758_v30 = vadd.f32 %v11149_v8, %v1644_v7  ;;  %v11163_v8 = vld [vmem:[#allocation129_spill] sm:$0xff] }
 0x1f3   : > { %v1991_v51 = vadd.f32 %v1986_v61, %v1877_v6  ;;  %v1963_v59 = vadd.f32 %v1955_v31, %v1849_v50  ;;  %v11150_v6 = vld [vmem:[#allocation123_spill] sm:$0xff]  ;;  %v1554_v50 = vadd.f32 %v11155_v2, %v1453_v16  ;;  %v1819_v48 = vadd.f32 %v11158_v12, %v1705_v41  ;;  %v11169_v2 = vld [vmem:[#allocation181_spill] sm:$0xff] }
 0x1f4   : > { %v1255_v11 = vadd.f32 %v11150_v6, %v1134_v32  ;;  %v1878_v38 = vadd.f32 %v7740_v43, %v1758_v30  ;;  %v11154_v61 = vld [vmem:[#allocation87_spill] sm:$0xff]  ;;  %v11157_v32 = vld [vmem:[#allocation84_spill] sm:$0xff]  ;;  %v11160_v43 = vld [vmem:[#allocation177_spill] sm:$0xff] }
 0x1f5   : > { %v2040_v46 = vrot.slane %v1991_v51, 3  ;;  %v1401_v54 = vadd.f32 %v11154_v61, %v1286_v57  ;;  %v11156_v51 = vld [vmem:[#allocation185_spill] sm:$0xff]  ;;  %v1223_v26 = vadd.f32 %v11157_v32, %v1109_v58  ;;  %v1674_v7 = vadd.f32 %v11160_v43, %v1554_v50  ;;  %v11161_v57 = vld [vmem:[#allocation103_spill] sm:$0xff] }
 0x1f6   : > { %v1959_v44 = vpop.permute.xlu1 %1958  ;;  %v2013_v18 = vpop.permute.xlu0 %2012  ;;  %v1730_v5 = vadd.f32 %v11156_v51, %v1616_v17  ;;  %v1370_v27 = vadd.f32 %v11159_v23, %v1255_v11  ;;  %v11170_v51 = vld [vmem:[#allocation168_spill] sm:$0xff] }
 0x1f7   : > { %v2046_v49 = vadd.f32 %v2040_v46, %v1963_v59  ;;  %v2021_v21 = vadd.f32 %v2013_v18, %v1907_v52  ;;  %v1933_v59 = vadd.f32 %v1926_v24, %v1819_v48  ;;  %v1506_v45 = vadd.f32 %v11161_v57, %v1401_v54 }
 0x1f8   : > { %v1850_v52 = vadd.f32 %v7738_v22, %v1730_v5  ;;  %v1788_v20 = vadd.f32 %v11162_v4, %v1674_v7  ;;  %v1339_v30 = vadd.f32 %v11163_v8, %v1223_v26  ;;  %v11165_v22 = vld [vmem:[#allocation173_spill] sm:$0xff] }
 0x1f9   : > { %v2052_v31 = vrot.slane %v2046_v49, 6  ;;  %v2035_v34 = vadd.f32 %v2027_v29, %v2021_v21  ;;  %v11164_v21 = vld [vmem:[#allocation102_spill] sm:$0xff]  ;;  %v1617_v24 = vadd.f32 %v11165_v22, %v1506_v45  ;;  %v2028_v16 = vrot.slane %v1933_v59, 3 }
 0x1fa   : > { %v1988_v15 = vpop.permute.xlu1 %1987  ;;  %v7856_v63 = vpop.permute.xlu0 %2016  ;;  %v1964_v37 = vadd.f32 %v7814_v9, %v1850_v52  ;;  %v1480_v6 = vadd.f32 %v11164_v21, %v1370_v27  ;;  %v1908_v11 = vadd.f32 %v7762_v10, %v1788_v20  ;;  %v11167_v9 = vld [vmem:[#allocation193_spill] sm:$0xff] }
 0x1fb   : > { %v2060_v62 = vadd.f32 %v2052_v31, %v2035_v34  ;;  %v1992_v42 = vadd.f32 %v1988_v15, %v1878_v38  ;;  %v1731_v1 = vadd.f32 %v11167_v9, %v1617_v24  ;;  %v2029_v15 = vsel %vm856_vm6, %v2027_v29, %v2028_v16  ;;  %v11173_v29 = vld [vmem:[#allocation26_spill] sm:$0xff]  ;;  %v11180_v9 = vld [vmem:[#allocation29_spill] sm:$0xff] }
 0x1fc   : > { %v1586_v17 = vadd.f32 %v11166_v14, %v1480_v6  ;;  %v11179_v14 = vld [vmem:[#allocation28_spill] sm:$0xff] }
 0x1fd   : > { %v5379_v47 = vmul.f32 -1.442695, %v2060_v62  ;;  %v2041_v60 = vrot.slane %v1992_v42, 3  ;;  %v1851_v10 = vadd.f32 %v7724_v55, %v1731_v1  ;;  %v11171_v42 = vld [vmem:[#allocation180_spill] sm:$0xff]  ;;  %v11172_v55 = vld [vmem:[#allocation202_spill] sm:$0xff] }
 0x1fe   : > { %v2015_v58 = vpop.permute.xlu1 %2014  ;;  %v2157_v18 = vpop.permute.xlu0 %2156  ;;  %v1706_v50 = vadd.f32 %v11169_v2, %v1586_v17 }
 0x1ff   : > { %v2042_v49 = vsel %vm856_vm6, %v2040_v46, %v2041_v60  ;;  %2161 = vst.msk [vmem:[#allocation3 + $0x18] sm:$0xff] %vm660_vm5, %v2157_v18  ;;  %5543 = vpow2.f32 %v5379_v47  ;;  %v2022_v38 = vadd.f32 %v2015_v58, %v1908_v11  ;;  %v11168_v46 = vld [vmem:[#allocation98_spill] sm:$0xff]  ;;  %v1965_v12 = vadd.f32 %v1959_v44, %v1851_v10 }
 0x200   : > { %v2047_v36 = vadd.f32 %v2042_v49, %v1964_v37  ;;  %v1454_v54 = vadd.f32 %v11168_v46, %v1339_v30  ;;  %v1820_v26 = vadd.f32 %v7722_v28, %v1706_v50  ;;  %v11175_v37 = vld [vmem:[#allocation61_spill] sm:$0xff]  ;;  %v11176_v18 = vld [vmem:[#allocation62_spill] sm:$0xff]  ;;  %v11177_v30 = vld [vmem:[#allocation156_spill] sm:$0xff] }
 0x201   : > { %v2036_v48 = vadd.f32 %v2029_v15, %v2022_v38  ;;  %v2048_v43 = vadd.f32 %v2041_v60, %v1965_v12  ;;  %v2351_v49 = vmul.f32 %v11177_v30, %v11175_v37  ;;  %v11181_v12 = vld [vmem:[#allocation60_spill] sm:$0xff] }
 0x202   : > { %v2053_v41 = vrot.slane %v2047_v36, 6  ;;  %v2155_v34 = vpop.permute.xlu1 %2154  ;;  %v2167_v61 = vpop.permute.xlu0 %2166  ;;  %v1555_v5 = vadd.f32 %v11170_v51, %v1454_v54  ;;  %v1934_v27 = vadd.f32 %v7797_v0, %v1820_v26  ;;  %v11174_v0 = vld [vmem:[#allocation27_spill] sm:$0xff] }
 0x203   : > { %2160 = vst.msk [vmem:[#allocation3 + $0x10] sm:$0xff] %vm660_vm5, %v2155_v34  ;;  %2171 = vst.msk [vmem:[#allocation3 + $0x48] sm:$0xff] %vm660_vm5, %v2167_v61  ;;  %v2055_v45 = vrot.slane %v2048_v43, 6 }
 0x204   : > { %v2054_v32 = vsel %vm1092_vm7, %v2052_v31, %v2053_v41  ;;  %v1675_v23 = vadd.f32 %v11171_v42, %v1555_v5  ;;  %v2030_v57 = vrot.slane %v1934_v27, 3 }
 0x205   : > { %v2061_v7 = vadd.f32 %v2054_v32, %v2036_v48  ;;  %v2056_v61 = vsel %vm1092_vm7, %v2053_v41, %v2055_v45  ;;  %v11182_v48 = vld [vmem:[#allocation160_spill] sm:$0xff] }
 0x206   : > { %v2165_v62 = vpop.permute.xlu1 %2164  ;;  %v1789_v52 = vadd.f32 %v11172_v55, %v1675_v23  ;;  %v7887_v59 = vld [vmem:[#allocation3 + $0x18] sm:$0xff]  ;;  %v2031_v22 = vsel %vm856_vm6, %v2028_v16, %v2030_v57  ;;  %v11186_v57 = vld [vmem:[#allocation75_spill] sm:$0xff] }
 0x207   : > { %2170 = vst.msk [vmem:[#allocation3 + $0x40] sm:$0xff] %vm660_vm5, %v2165_v62  ;;  %v2324_v31 = vmul.f32 %v7887_v59, %v11173_v29  ;;  %v5380_v4 = vmul.f32 -1.442695, %v2061_v7  ;;  %v2353_v58 = vmul.f32 %v7887_v59, %v11175_v37  ;;  %v11183_v62 = vrot.slane %v11182_v48, 7  ;;  %v11184_v7 = vld [vmem:[#allocation59_spill] sm:$0xff] }
 0x208   : > { %v1909_v28 = vadd.f32 %v7795_v39, %v1789_v52  ;;  %v11178_v39 = vld [vmem:[#allocation158_spill] sm:$0xff] }
 0x209   : > { %v5544_v47 = vpop.eup %5543  ;;  %v2354_v21 = vmul.f32 %v11178_v39, %v11176_v18  ;;  %5545 = vpow2.f32 %v5380_v4  ;;  %v7933_v52 = vld [vmem:[#allocation3 + $0x20] sm:$0xff] }
 0x20a   : > { %v7892_v44 = vld [vmem:[#allocation3 + $0x48] sm:$0xff]  ;;  %v7894_v20 = vld [vmem:[#allocation3 + $0x10] sm:$0xff]  ;;  %v2072_v6 = vadd.f32 1.0, %v5544_v47  ;;  %v2023_v24 = vadd.f32 %v7856_v63, %v1909_v28  ;;  %v11185_v47 = vld [vmem:[#allocation74_spill] sm:$0xff] }
 0x20b   : > { %v2327_v60 = vmul.f32 %v7892_v44, %v11174_v0  ;;  %v2356_v8 = vmul.f32 %v7892_v44, %v11176_v18  ;;  %v2299_v17 = vmul.f32 %v7894_v20, %v11179_v14  ;;  %v2323_v38 = vmul.f32 %v7894_v20, %v11173_v29 }
 0x20c   : > { %v2352_v63 = vmul.f32 %v7894_v20, %v11175_v37  ;;  %5547 = vrcp.f32 %v2072_v6  ;;  %v2037_v10 = vadd.f32 %v2031_v22, %v2023_v24  ;;  %v2357_v26 = vadd.f32 %v2354_v21, %v2351_v49  ;;  %v11187_v49 = vld [vmem:[#allocation164_spill] sm:$0xff]  ;;  %v11223_v37 = vld [vmem:[#allocation50_spill] sm:$0xff] }
 0x20d   : > { %v2330_v36 = vadd.f32 %v2327_v60, %v2324_v31  ;;  %v2359_v50 = vadd.f32 %v2356_v8, %v2353_v58  ;;  %v2380_v55 = vmul.f32 %v7894_v20, %v11184_v7  ;;  %v7935_v31 = vld [vmem:[#allocation3 + $0x50] sm:$0xff]  ;;  %v2405_v28 = vmul.f32 %v7933_v52, %v11185_v47 }
 0x20e   : > { %v7908_v11 = vld [vmem:[#allocation3 + $0x40] sm:$0xff]  ;;  %v2062_v32 = vadd.f32 %v2056_v61, %v2037_v10  ;;  %v2408_v45 = vmul.f32 %v7935_v31, %v11186_v57  ;;  %v2381_v58 = vmul.f32 %v7887_v59, %v11184_v7  ;;  %v2383_v8 = vmul.f32 %v7892_v44, %v11181_v12  ;;  %v11189_v61 = vld [vmem:[#allocation63_spill] sm:$0xff] }
 0x20f   : > { %v2302_v1 = vmul.f32 %v7908_v11, %v11180_v9  ;;  %v2326_v34 = vmul.f32 %v7908_v11, %v11174_v0  ;;  %v2355_v16 = vmul.f32 %v7908_v11, %v11176_v18  ;;  %v2337_v2 = vrot.slane %v2330_v36, 3 }
 0x210   : > { %v2382_v41 = vmul.f32 %v7908_v11, %v11181_v12  ;;  %v2366_v43 = vrot.slane %v2359_v50, 3  ;;  %v5381_v4 = vmul.f32 -1.442695, %v2062_v32  ;;  %v11188_v21 = vrot.slane %v11187_v49, 3 }
 0x211   : > { %v2305_v46 = vadd.f32 %v2302_v1, %v2299_v17  ;;  %v2329_v54 = vadd.f32 %v2326_v34, %v2323_v38  ;;  %v2358_v51 = vadd.f32 %v2355_v16, %v2352_v63  ;;  %v2363_v24 = vrot.slane %v2357_v26, 3 }
 0x212   : > { %v2384_v60 = vadd.f32 %v2382_v41, %v2380_v55  ;;  %v2404_v14 = vmul.f32 %v7887_v59, %v11185_v47  ;;  %v2407_v17 = vmul.f32 %v7892_v44, %v11186_v57  ;;  %v2411_v9 = vadd.f32 %v2408_v45, %v2405_v28  ;;  %v11192_v28 = vld [vmem:[#allocation33_spill] sm:$0xff] }
 0x213   : > { %v2312_v5 = vrot.slane %v2305_v46, 7  ;;  %v2335_v15 = vrot.slane %v2329_v54, 3  ;;  %v2364_v27 = vrot.slane %v2358_v51, 3  ;;  %v5546_v36 = vpop.eup %5545  ;;  %5549 = vpow2.f32 %v5381_v4  ;;  %v11190_v54 = vld [vmem:[#allocation64_spill] sm:$0xff] }
 0x214   : > { %v2388_v38 = vrot.slane %v2384_v60, 3  ;;  %v2385_v34 = vadd.f32 %v2383_v8, %v2381_v58  ;;  %v2429_v63 = vmul.f32 %v7887_v59, %v11189_v61  ;;  %v2406_v46 = vmul.f32 %v7908_v11, %v11186_v57 }
 0x215   : > { %v2313_v42 = vsel %vm828_vm1, %v11183_v62, %v2312_v5  ;;  %v2338_v23 = vsel %vm856_vm6, %v2335_v15, %v2337_v2  ;;  %v2336_v6 = vsel %vm856_vm6, %v11188_v21, %v2335_v15  ;;  %v2367_v22 = vsel %vm856_vm6, %v2364_v27, %v2366_v43 }
 0x216   : > { %2316 = vrot.lane.b32.xlu0 %v2313_v42, %s10880_s2  ;;  %2343 = vrot.lane.b32.xlu1 %v2338_v23, %s10880_s2  ;;  %v5548_v1 = vpop.eup %5547  ;;  %v2365_v16 = vsel %vm856_vm6, %v2363_v24, %v2364_v27  ;;  %v2431_v2 = vmul.f32 %v7908_v11, %v11190_v54  ;;  %v2432_v50 = vmul.f32 %v7892_v44, %v11190_v54  ;;  %v2073_v10 = vadd.f32 1.0, %v5546_v36  ;;  %v7980_v42 = vld [vmem:[#allocation3 + $0x28] sm:$0xff]  ;;  %v7982_v23 = vld [vmem:[#allocation3 + $0x58] sm:$0xff]  ;;  %v11191_v27 = vld [vmem:[#allocation32_spill] sm:$0xff] }
 0x217   : > { %v2410_v51 = vadd.f32 %v2407_v17, %v2404_v14  ;;  %v2403_v5 = vmul.f32 %v7894_v20, %v11185_v47  ;;  %v2428_v15 = vmul.f32 %v7894_v20, %v11189_v61  ;;  %2082 = vst.msk [vmem:[%s7976_s24 - $0x7] sm:$0x80] %vm2081_vm9, %v5548_v1  ;;  %v2389_v32 = vrot.slane %v2385_v34, 3 }
 0x218   : > { %v2418_v26 = vrot.slane %v2411_v9, 3  ;;  %v2435_v62 = vadd.f32 %v2432_v50, %v2429_v63  ;;  %5551 = vrcp.f32 %v2073_v10  ;;  %v2459_v55 = vmul.f32 %v7980_v42, %v11191_v27  ;;  %v11193_v63 = vld [vmem:[#allocation30_spill] sm:$0xff]  ;;  %v11194_v50 = vld [vmem:[#allocation31_spill] sm:$0xff] }
 0x219   : > { %v2409_v41 = vadd.f32 %v2406_v46, %v2403_v5  ;;  %v2434_v48 = vadd.f32 %v2431_v2, %v2428_v15  ;;  %v2462_v45 = vmul.f32 %v7982_v23, %v11192_v28  ;;  %v2416_v4 = vrot.slane %v2410_v51, 3 }
 0x21a   : > { %2341 = vrot.lane.b32.xlu0 %v2336_v6, %s10880_s2  ;;  %2370 = vrot.lane.b32.xlu1 %v2367_v22, %s10880_s2  ;;  %v2430_v60 = vmul.f32 %v7933_v52, %v11189_v61  ;;  %v2433_v58 = vmul.f32 %v7935_v31, %v11190_v54  ;;  %v2458_v8 = vmul.f32 %v7933_v52, %v11191_v27  ;;  %v2441_v14 = vrot.slane %v2435_v62, 7 }
 0x21b   : > { %v2457_v49 = vmul.f32 %v7887_v59, %v11191_v27  ;;  %v2460_v21 = vmul.f32 %v7892_v44, %v11192_v28  ;;  %v2461_v6 = vmul.f32 %v7935_v31, %v11192_v28  ;;  %v2419_v22 = vsel %vm856_vm6, %v2416_v4, %v2418_v26  ;;  %v11197_v27 = vld [vmem:[#allocation76_spill] sm:$0xff]  ;;  %v11198_v28 = vld [vmem:[#allocation77_spill] sm:$0xff] }
 0x21c   : > { %v2415_v24 = vrot.slane %v2409_v41, 3  ;;  %v2440_v36 = vrot.slane %v2434_v48, 7  ;;  %v2465_v9 = vadd.f32 %v2462_v45, %v2459_v55  ;;  %v2490_v10 = vmul.f32 %v11178_v39, %v11194_v50  ;;  %v11196_v48 = vld [vmem:[#allocation157_spill] sm:$0xff] }
 0x21d   : > { %v5550_v17 = vpop.eup %5549  ;;  %v2463_v1 = vadd.f32 %v2460_v21, %v2457_v49  ;;  %v2464_v34 = vadd.f32 %v2461_v6, %v2458_v8  ;;  %v2491_v51 = vmul.f32 %v7908_v11, %v11194_v50  ;;  %v2488_v41 = vmul.f32 %v7894_v20, %v11193_v63 }
 0x21e   : > { %2368 = vrot.lane.b32.xlu0 %v2365_v16, %s10880_s2  ;;  %2391 = vrot.lane.b32.xlu1 %v2388_v38, %s10880_s2  ;;  %v2487_v16 = vmul.f32 %v11177_v30, %v11193_v63  ;;  %v2417_v46 = vsel %vm856_vm6, %v2415_v24, %v2416_v4  ;;  %v2442_v2 = vsel %vm828_vm1, %v2440_v36, %v2441_v14  ;;  %v2074_v5 = vadd.f32 1.0, %v5550_v17 }
 0x21f   : > { %v2472_v15 = vrot.slane %v2465_v9, 7  ;;  %v2489_v62 = vmul.f32 %v11196_v48, %v11194_v50  ;;  %v2515_v55 = vmul.f32 %v11177_v30, %v11197_v27  ;;  %v2518_v45 = vmul.f32 %v11178_v39, %v11198_v28 }
 0x220   : > { %v2470_v8 = vrot.slane %v2464_v34, 7  ;;  %v2494_v49 = vadd.f32 %v2491_v51, %v2488_v41  ;;  %v2519_v21 = vmul.f32 %v7908_v11, %v11198_v28  ;;  %5553 = vrcp.f32 %v2074_v5 }
 0x221   : > { %v2516_v24 = vmul.f32 %v7894_v20, %v11197_v27  ;;  %v2521_v17 = vadd.f32 %v2518_v45, %v2515_v55 }
 0x222   : > { %2372 = vrot.lane.b32.xlu0 %v2366_v43, %s10880_s2  ;;  %2395 = vrot.lane.b32.xlu1 %v2389_v32, %s10880_s2  ;;  %v2390_v43 = vsel %vm856_vm6, %v2388_v38, %v2389_v32  ;;  %v2436_v38 = vadd.f32 %v2433_v58, %v2430_v60  ;;  %v11195_v32 = vld [vmem:[#allocation154_spill] sm:$0xff]  ;;  %v5552_v4 = vpop.eup %5551  ;;  %v2469_v60 = vrot.slane %v2463_v1, 7  ;;  %v2473_v6 = vsel %vm828_vm1, %v2470_v8, %v2472_v15 }
 0x223   : > { %v2486_v26 = vmul.f32 %v11195_v32, %v11193_v63  ;;  %2084 = vst.msk [vmem:[%s7976_s24 + $0x1] sm:$0xff] %vm2083_vm10, %v5552_v4  ;;  %v2522_v34 = vadd.f32 %v2519_v21, %v2516_v24  ;;  %v2527_v63 = vrot.slane %v2521_v17, 2  ;;  %v11201_v4 = vld [vmem:[#allocation67_spill] sm:$0xff] }
 0x224   : > { %v2443_v58 = vrot.slane %v2436_v38, 7  ;;  %v2501_v38 = vrot.slane %v2494_v49, 2  ;;  %v2471_v15 = vsel %vm828_vm1, %v2469_v60, %v2470_v8 }
 0x226   : > { %2393 = vrot.lane.b32.xlu0 %v2390_v43, %s10880_s2  ;;  %2422 = vrot.lane.b32.xlu1 %v2419_v22, %s10880_s2  ;;  %v2493_v43 = vadd.f32 %v2490_v10, %v2487_v16  ;;  %v2492_v22 = vadd.f32 %v2489_v62, %v2486_v26  ;;  %v2444_v9 = vsel %vm828_vm1, %v2441_v14, %v2443_v58  ;;  %v11199_v16 = vld [vmem:[#allocation36_spill] sm:$0xff] }
 0x227   : > { %v2517_v10 = vmul.f32 %v7887_v59, %v11197_v27  ;;  %v2520_v14 = vmul.f32 %v7892_v44, %v11198_v28  ;;  %v2542_v51 = vmul.f32 %v7887_v59, %v11199_v16  ;;  %v2541_v26 = vmul.f32 %v7894_v20, %v11199_v16  ;;  %v8784_v27 = vld [vmem:[%s8614_s26 + $0x60] sm:$0xff] }
 0x228   : > { %v2499_v1 = vrot.slane %v2493_v43, 2  ;;  %v11202_v43 = vld [vmem:[#allocation68_spill] sm:$0xff] }
 0x229   : > { %v2523_v55 = vadd.f32 %v2520_v14, %v2517_v10  ;;  %v2571_v49 = vmul.f32 %v7908_v11, %v11202_v43  ;;  %v2572_v21 = vmul.f32 %v7892_v44, %v11202_v43  ;;  %v11243_v43 = vld [vmem:[#allocation89_spill] sm:$0xff] }
 0x22a   : > { %2420 = vrot.lane.b32.xlu0 %v2417_v46, %s10880_s2  ;;  %2447 = vrot.lane.b32.xlu1 %v2442_v2, %s10880_s2  ;;  %v2540_v46 = vmul.f32 %v11177_v30, %v11199_v16  ;;  %v11200_v2 = vld [vmem:[#allocation37_spill] sm:$0xff]  ;;  %v2502_v32 = vsel %vm1033_vm2, %v2499_v1, %v2501_v38  ;;  %v2528_v30 = vrot.slane %v2522_v34, 2  ;;  %v5554_v48 = vpop.eup %5553  ;;  %v11259_v16 = vld [vmem:[#allocation99_spill] sm:$0xff] }
 0x22b   : > { %v2543_v50 = vmul.f32 %v11178_v39, %v11200_v2  ;;  %v2544_v5 = vmul.f32 %v7908_v11, %v11200_v2  ;;  %v2545_v39 = vmul.f32 %v7892_v44, %v11200_v2  ;;  %2086 = vst.msk [vmem:[%s7976_s24 + $0x9] sm:$0x7f] %vm2085_vm11, %v5554_v48  ;;  %v2530_v24 = vrot.slane %v2523_v55, 2 }
 0x22c   : > { %v2529_v58 = vsel %vm1033_vm2, %v2527_v63, %v2528_v30 }
 0x22d   : > { %v2546_v62 = vadd.f32 %v2543_v50, %v2540_v46  ;;  %v2547_v45 = vadd.f32 %v2544_v5, %v2541_v26  ;;  %v2548_v8 = vadd.f32 %v2545_v39, %v2542_v51  ;;  %v11204_v46 = vld [vmem:[#allocation65_spill] sm:$0xff]  ;;  %v2531_v14 = vsel %vm1033_vm2, %v2528_v30, %v2530_v24 }
 0x22e   : > { %2445 = vrot.lane.b32.xlu0 %v2440_v36, %s10880_s2  ;;  %2474 = vrot.lane.b32.xlu1 %v2469_v60, %s10880_s2  ;;  %v2498_v36 = vrot.slane %v2492_v22, 2  ;;  %v2570_v60 = vmul.f32 %v7887_v59, %v11201_v4  ;;  %v2594_v50 = vmul.f32 %v7933_v52, %v11204_v46 }
 0x22f   : > { %v2552_v22 = vrot.slane %v2546_v62, 6  ;;  %v2553_v17 = vrot.slane %v2547_v45, 6  ;;  %v11205_v62 = vld [vmem:[#allocation78_spill] sm:$0xff]  ;;  %v11206_v45 = vld [vmem:[#allocation79_spill] sm:$0xff] }
 0x230   : > { %v2500_v41 = vsel %vm1033_vm2, %v2498_v36, %v2499_v1  ;;  %v2574_v34 = vadd.f32 %v2572_v21, %v2570_v60  ;;  %v11203_v36 = vld [vmem:[#allocation66_spill] sm:$0xff]  ;;  %v2623_v55 = vmul.f32 %v7933_v52, %v11205_v62  ;;  %v2626_v60 = vmul.f32 %v7935_v31, %v11206_v45 }
 0x231   : > { %v2595_v63 = vmul.f32 %v7908_v11, %v11203_v36  ;;  %v2597_v10 = vmul.f32 %v7935_v31, %v11203_v36  ;;  %v2596_v39 = vmul.f32 %v7892_v44, %v11203_v36  ;;  %v2554_v30 = vsel %vm1092_vm7, %v2552_v22, %v2553_v17 }
 0x232   : > { %2449 = vrot.lane.b32.xlu0 %v2444_v9, %s10880_s2  ;;  %2478 = vrot.lane.b32.xlu1 %v2473_v6, %s10880_s2  ;;  %v2569_v6 = vmul.f32 %v7894_v20, %v11201_v4  ;;  %v2555_v9 = vrot.slane %v2548_v8, 6  ;;  %v2622_v8 = vmul.f32 %v7887_v59, %v11205_v62  ;;  %v2983_v4 = vmul.f32 %v7933_v52, %v11243_v43 }
 0x234   : > { %v2573_v1 = vadd.f32 %v2571_v49, %v2569_v6  ;;  %v2556_v51 = vsel %vm1092_vm7, %v2553_v17, %v2555_v9  ;;  %v2625_v49 = vmul.f32 %v7892_v44, %v11206_v45  ;;  %v11208_v17 = vld [vmem:[#allocation35_spill] sm:$0xff] }
 0x235   : > { %v2650_v9 = vmul.f32 %v7935_v31, %v11208_v17  ;;  %v2651_v7 = vmul.f32 %v7982_v23, %v11208_v17 }
 0x236   : > { %2476 = vrot.lane.b32.xlu0 %v2471_v15, %s10880_s2  ;;  %2505 = vrot.lane.b32.xlu1 %v2502_v32, %s10882_s30  ;;  %v2577_v5 = vrot.slane %v2573_v1, 6  ;;  %v2578_v15 = vrot.slane %v2574_v34, 6  ;;  %v2593_v32 = vmul.f32 %v7887_v59, %v11204_v46  ;;  %v2629_v1 = vadd.f32 %v2626_v60, %v2623_v55  ;;  %v8124_v55 = vld [vmem:[#allocation3 + $0x8] sm:$0xff]  ;;  %v8128_v60 = vld [vmem:[#allocation3 + $0x38] sm:$0xff] }
 0x237   : > { %v2624_v34 = vmul.f32 %v7908_v11, %v11206_v45 }
 0x238   : > { %v2579_v48 = vsel %vm1092_vm7, %v2577_v5, %v2578_v15 }
 0x23a   : > { %2503 = vrot.lane.b32.xlu0 %v2500_v41, %s10882_s30  ;;  %2532 = vrot.lane.b32.xlu1 %v2529_v58, %s10882_s30  ;;  %v2600_v41 = vadd.f32 %v2597_v10, %v2594_v50  ;;  %v2599_v58 = vadd.f32 %v2596_v39, %v2593_v32  ;;  %v2649_v50 = vmul.f32 %v7892_v44, %v11208_v17  ;;  %v8114_v10 = vld [vmem:[#allocation3] sm:$0xff] }
 0x23b   : > { %v2628_v32 = vadd.f32 %v2625_v49, %v2622_v8  ;;  %v2621_v39 = vmul.f32 %v7894_v20, %v11205_v62  ;;  %v2636_v49 = vrot.slane %v2629_v1, 6  ;;  %v11254_v62 = vld [vmem:[#allocation94_spill] sm:$0xff] }
 0x23c   : > { %v2607_v6 = vrot.slane %v2600_v41, 6  ;;  %v11210_v41 = vld [vmem:[#allocation41_spill] sm:$0xff] }
 0x23d   : > { %v2627_v57 = vadd.f32 %v2624_v34, %v2621_v39 }
 0x23e   : > { %2507 = vrot.lane.b32.xlu0 %v2501_v38, %s10882_s30  ;;  %2557 = vrot.lane.b32.xlu1 %v2552_v22, %s10882_s30  ;;  %v2592_v38 = vmul.f32 %v7894_v20, %v11204_v46  ;;  %v11207_v22 = vld [vmem:[#allocation34_spill] sm:$0xff] }
 0x23f   : > { %v2647_v24 = vmul.f32 %v7933_v52, %v11207_v22  ;;  %v2648_v12 = vmul.f32 %v7980_v42, %v11207_v22  ;;  %v2633_v1 = vrot.slane %v2627_v57, 6 }
 0x240   : > { %v2598_v26 = vadd.f32 %v2595_v63, %v2592_v38  ;;  %v2646_v63 = vmul.f32 %v7887_v59, %v11207_v22  ;;  %v2605_v38 = vrot.slane %v2599_v58, 6  ;;  %v2679_v58 = vmul.f32 %v8128_v60, %v11210_v41 }
 0x241   : > { %v2680_v22 = vmul.f32 %v7908_v11, %v11210_v41 }
 0x242   : > { %2534 = vrot.lane.b32.xlu0 %v2531_v14, %s10882_s30  ;;  %2561 = vrot.lane.b32.xlu1 %v2556_v51, %s10882_s30  ;;  %v2604_v21 = vrot.slane %v2598_v26, 6  ;;  %v11209_v14 = vld [vmem:[#allocation40_spill] sm:$0xff]  ;;  %v2608_v8 = vsel %vm1092_vm7, %v2605_v38, %v2607_v6  ;;  %v2652_v47 = vadd.f32 %v2649_v50, %v2646_v63  ;;  %v2654_v63 = vadd.f32 %v2651_v7, %v2648_v12  ;;  %v11211_v50 = vld [vmem:[#allocation38_spill] sm:$0xff] }
 0x243   : > { %v2675_v51 = vmul.f32 %v8114_v10, %v11209_v14  ;;  %v8120_v26 = vld [vmem:[#allocation3 + $0x30] sm:$0xff]  ;;  %v2704_v17 = vmul.f32 %v8124_v55, %v11211_v50  ;;  %v2677_v12 = vmul.f32 %v7894_v20, %v11209_v14  ;;  %v2705_v39 = vmul.f32 %v7894_v20, %v11211_v50 }
 0x244   : > { %v2606_v18 = vsel %vm1092_vm7, %v2604_v21, %v2605_v38  ;;  %v2658_v34 = vrot.slane %v2652_v47, 2  ;;  %v2661_v38 = vrot.slane %v2654_v63, 2 }
 0x246   : > { %2559 = vrot.lane.b32.xlu0 %v2554_v30, %s10882_s30  ;;  %2582 = vrot.lane.b32.xlu1 %v2579_v48, %s10882_s30  ;;  %v2678_v30 = vmul.f32 %v8120_v26, %v11210_v41  ;;  %v2653_v48 = vadd.f32 %v2650_v9, %v2647_v24  ;;  %v2634_v24 = vrot.slane %v2628_v32, 6  ;;  %v2683_v41 = vadd.f32 %v2680_v22, %v2677_v12 }
 0x248   : > { %v2681_v9 = vadd.f32 %v2678_v30, %v2675_v51  ;;  %v2659_v0 = vrot.slane %v2653_v48, 2  ;;  %v2637_v6 = vsel %vm1092_vm7, %v2634_v24, %v2636_v49  ;;  %v11212_v51 = vld [vmem:[#allocation39_spill] sm:$0xff] }
 0x249   : > { %v2707_v32 = vmul.f32 %v8128_v60, %v11212_v51 }
 0x24a   : > { %2580 = vrot.lane.b32.xlu0 %v2577_v5, %s10882_s30  ;;  %2609 = vrot.lane.b32.xlu1 %v2604_v21, %s10882_s30  ;;  %v2676_v5 = vmul.f32 %v8124_v55, %v11209_v14  ;;  %v2635_v21 = vsel %vm1092_vm7, %v2633_v1, %v2634_v24  ;;  %v2660_v57 = vsel %vm1033_vm2, %v2658_v34, %v2659_v0  ;;  %v2690_v1 = vrot.slane %v2683_v41, 5 }
 0x24b   : > { %v2710_v30 = vadd.f32 %v2707_v32, %v2704_v17  ;;  %v2662_v14 = vsel %vm1033_vm2, %v2659_v0, %v2661_v38  ;;  %v11216_v0 = vld [vmem:[#allocation70_spill] sm:$0xff] }
 0x24c   : > { %v2682_v29 = vadd.f32 %v2679_v58, %v2676_v5  ;;  %v11214_v58 = vld [vmem:[#allocation82_spill] sm:$0xff]  ;;  %v2760_v32 = vmul.f32 %v7908_v11, %v11216_v0 }
 0x24d   : > { %v2737_v49 = vmul.f32 %v7908_v11, %v11214_v58 }
 0x24e   : > { %2584 = vrot.lane.b32.xlu0 %v2578_v15, %s10882_s30  ;;  %2613 = vrot.lane.b32.xlu1 %v2608_v8, %s10882_s30  ;;  %v2687_v15 = vrot.slane %v2681_v9, 5  ;;  %v2688_v47 = vrot.slane %v2682_v29, 5  ;;  %v11213_v29 = vld [vmem:[#allocation81_spill] sm:$0xff]  ;;  %v2736_v8 = vmul.f32 %v8128_v60, %v11214_v58  ;;  %v2706_v9 = vmul.f32 %v7887_v59, %v11211_v50 }
 0x24f   : > { %v2733_v5 = vmul.f32 %v8124_v55, %v11213_v29  ;;  %v2734_v24 = vmul.f32 %v7894_v20, %v11213_v29  ;;  %v11253_v50 = vld [vmem:[#allocation93_spill] sm:$0xff] }
 0x250   : > { %v2689_v7 = vsel %vm1238_vm3, %v2687_v15, %v2688_v47  ;;  %v2716_v15 = vrot.slane %v2710_v30, 5 }
 0x251   : > { %v2739_v22 = vadd.f32 %v2736_v8, %v2733_v5  ;;  %v2740_v17 = vadd.f32 %v2737_v49, %v2734_v24  ;;  %v11219_v8 = vld [vmem:[#allocation43_spill] sm:$0xff] }
 0x252   : > { %2611 = vrot.lane.b32.xlu0 %v2606_v18, %s10882_s30  ;;  %2640 = vrot.lane.b32.xlu1 %v2637_v6, %s10882_s30  ;;  %v2708_v18 = vmul.f32 %v7908_v11, %v11212_v51  ;;  %v2709_v6 = vmul.f32 %v7892_v44, %v11212_v51  ;;  %v2786_v49 = vmul.f32 %v7935_v31, %v11219_v8 }
 0x253   : > { %v2746_v38 = vrot.slane %v2740_v17, 5 }
 0x254   : > { %v2711_v48 = vadd.f32 %v2708_v18, %v2705_v39  ;;  %v2691_v18 = vsel %vm1238_vm3, %v2688_v47, %v2690_v1  ;;  %v11217_v39 = vld [vmem:[#allocation69_spill] sm:$0xff] }
 0x255   : > { %v2758_v41 = vmul.f32 %v7894_v20, %v11217_v39  ;;  %v2759_v24 = vmul.f32 %v7887_v59, %v11217_v39 }
 0x256   : > { %2638 = vrot.lane.b32.xlu0 %v2635_v21, %s10882_s30  ;;  %2665 = vrot.lane.b32.xlu1 %v2660_v57, %s10882_s30  ;;  %v2717_v63 = vrot.slane %v2711_v48, 5  ;;  %v2735_v21 = vmul.f32 %v7887_v59, %v11213_v29  ;;  %v2738_v57 = vmul.f32 %v7892_v44, %v11214_v58  ;;  %v11218_v48 = vld [vmem:[#allocation42_spill] sm:$0xff]  ;;  %v11248_v58 = vld [vmem:[#allocation51_spill] sm:$0xff] }
 0x257   : > { %v2783_v5 = vmul.f32 %v7933_v52, %v11218_v48 }
 0x258   : > { %v2718_v12 = vsel %vm1238_vm3, %v2716_v15, %v2717_v63  ;;  %v2741_v47 = vadd.f32 %v2738_v57, %v2735_v21 }
 0x259   : > { %v2789_v17 = vadd.f32 %v2786_v49, %v2783_v5 }
 0x25a   : > { %2663 = vrot.lane.b32.xlu0 %v2658_v34, %s10882_s30  ;;  %2692 = vrot.lane.b32.xlu1 %v2689_v7, %s11215_s27  ;;  %v2712_v34 = vadd.f32 %v2709_v6, %v2706_v9  ;;  %v2745_v7 = vrot.slane %v2739_v22, 5  ;;  %v2761_v9 = vmul.f32 %v7892_v44, %v11216_v0  ;;  %v2785_v22 = vmul.f32 %v7892_v44, %v11219_v8 }
 0x25b   : > { %v2748_v21 = vrot.slane %v2741_v47, 5 }
 0x25c   : > { %v2719_v30 = vrot.slane %v2712_v34, 5  ;;  %v2747_v6 = vsel %vm1238_vm3, %v2745_v7, %v2746_v38  ;;  %v2763_v57 = vadd.f32 %v2761_v9, %v2759_v24  ;;  %v11221_v7 = vld [vmem:[#allocation45_spill] sm:$0xff] }
 0x25d   : > { %v2749_v47 = vsel %vm1238_vm3, %v2746_v38, %v2748_v21  ;;  %v2815_v38 = vmul.f32 %v7935_v31, %v11221_v7 }
 0x25e   : > { %2667 = vrot.lane.b32.xlu0 %v2662_v14, %s10882_s30  ;;  %2696 = vrot.lane.b32.xlu1 %v2690_v1, %s11215_s27  ;;  %v2762_v14 = vadd.f32 %v2760_v32, %v2758_v41  ;;  %v2782_v1 = vmul.f32 %v7887_v59, %v11218_v48  ;;  %v2720_v34 = vsel %vm1238_vm3, %v2717_v63, %v2719_v30  ;;  %v2767_v49 = vrot.slane %v2763_v57, 1 }
 0x25f   : > { %v2813_v41 = vmul.f32 %v7908_v11, %v11221_v7  ;;  %v2781_v30 = vmul.f32 %v7894_v20, %v11218_v48  ;;  %v2844_v57 = vmul.f32 %v7982_v23, %v11223_v37 }
 0x260   : > { %v2766_v32 = vrot.slane %v2762_v14, 1  ;;  %v2788_v63 = vadd.f32 %v2785_v22, %v2782_v1  ;;  %v2796_v14 = vrot.slane %v2789_v17, 1  ;;  %v11222_v22 = vld [vmem:[#allocation49_spill] sm:$0xff] }
 0x261   : > { %v2841_v61 = vmul.f32 %v7980_v42, %v11222_v22  ;;  %v2840_v21 = vmul.f32 %v7933_v52, %v11222_v22  ;;  %v2839_v0 = vmul.f32 %v7887_v59, %v11222_v22 }
 0x262   : > { %2694 = vrot.lane.b32.xlu0 %v2691_v18, %s11215_s27  ;;  %2723 = vrot.lane.b32.xlu1 %v2718_v12, %s11215_s27  ;;  %v2784_v18 = vmul.f32 %v7908_v11, %v11219_v8  ;;  %v11220_v12 = vld [vmem:[#allocation44_spill] sm:$0xff]  ;;  %v2768_v17 = vsel %vm1324_vm4, %v2766_v32, %v2767_v49  ;;  %v2842_v8 = vmul.f32 %v7892_v44, %v11223_v37 }
 0x263   : > { %v2810_v5 = vmul.f32 %v7894_v20, %v11220_v12  ;;  %v2812_v1 = vmul.f32 %v7933_v52, %v11220_v12 }
 0x264   : > { %v2787_v24 = vadd.f32 %v2784_v18, %v2781_v30  ;;  %v2843_v18 = vmul.f32 %v7935_v31, %v11223_v37  ;;  %v2847_v30 = vadd.f32 %v2844_v57, %v2841_v61  ;;  %v2845_v61 = vadd.f32 %v2842_v8, %v2839_v0  ;;  %v11225_v57 = vld [vmem:[#allocation48_spill] sm:$0xff]  ;;  %v8258_v8 = vpop.permute.xlu1 %2314 }
 0x265   : > { %v2816_v9 = vadd.f32 %v2813_v41, %v2810_v5  ;;  %v2868_v22 = vmul.f32 %v8128_v60, %v11225_v57  ;;  %v2867_v0 = vmul.f32 %v8120_v26, %v11225_v57  ;;  %11226 = vst [vmem:[#allocation120_spill] sm:$0xff] %v8258_v8  ;;  %v8729_v8 = vld [vmem:[%s8614_s26 + $0x40] sm:$0xff] }
 0x266   : > { %2721 = vrot.lane.b32.xlu0 %v2716_v15, %s11215_s27  ;;  %2750 = vrot.lane.b32.xlu1 %v2747_v6, %s11215_s27  ;;  %v2811_v15 = vmul.f32 %v7887_v59, %v11220_v12  ;;  %v2814_v6 = vmul.f32 %v7892_v44, %v11221_v7  ;;  %v2793_v41 = vrot.slane %v2787_v24, 1  ;;  %v2846_v5 = vadd.f32 %v2843_v18, %v2840_v21  ;;  %v11227_v18 = vld [vmem:[#allocation55_spill] sm:$0xff] }
 0x268   : > { %v2817_v54 = vadd.f32 %v2814_v6, %v2811_v15  ;;  %v2822_v6 = vrot.slane %v2816_v9, 1  ;;  %v2852_v9 = vrot.slane %v2846_v5, 1  ;;  %v8269_v5 = vpop.permute.xlu1 %2339 }
 0x269   : > { %11230 = vst [vmem:[#allocation128_spill] sm:$0xff] %v8269_v5 }
 0x26a   : > { %2725 = vrot.lane.b32.xlu0 %v2720_v34, %s11215_s27  ;;  %2769 = vrot.lane.b32.xlu1 %v2766_v32, %s11215_s27  ;;  %v2794_v34 = vrot.slane %v2788_v63, 1  ;;  %v2823_v63 = vrot.slane %v2817_v54, 1  ;;  %v2818_v32 = vadd.f32 %v2815_v38, %v2812_v1  ;;  %v2854_v54 = vrot.slane %v2847_v30, 1 }
 0x26b   : > { %v2851_v38 = vrot.slane %v2845_v61, 1 }
 0x26c   : > { %v2797_v15 = vsel %vm1324_vm4, %v2794_v34, %v2796_v14  ;;  %v2825_v24 = vrot.slane %v2818_v32, 1  ;;  %v2855_v37 = vsel %vm1324_vm4, %v2852_v9, %v2854_v54 }
 0x26e   : > { %2752 = vrot.lane.b32.xlu0 %v2749_v47, %s11215_s27  ;;  %2773 = vrot.lane.b32.xlu1 %v2767_v49, %s11215_s27  ;;  %v2795_v49 = vsel %vm1324_vm4, %v2793_v41, %v2794_v34  ;;  %v2824_v47 = vsel %vm1324_vm4, %v2822_v6, %v2823_v63  ;;  %v11224_v34 = vld [vmem:[#allocation46_spill] sm:$0xff]  ;;  %v11228_v41 = vld [vmem:[#allocation56_spill] sm:$0xff] }
 0x26f   : > { %v2865_v1 = vmul.f32 %v8124_v55, %v11224_v34  ;;  %v2864_v21 = vmul.f32 %v8114_v10, %v11224_v34  ;;  %v2891_v6 = vmul.f32 %v8128_v60, %v11228_v41  ;;  %v2893_v54 = vmul.f32 %v7892_v44, %v11228_v41 }
 0x271   : > { %v2870_v30 = vadd.f32 %v2867_v0, %v2864_v21 }
 0x272   : > { %2771 = vrot.lane.b32.xlu0 %v2768_v17, %s11215_s27  ;;  %2800 = vrot.lane.b32.xlu1 %v2797_v15, %s11215_s27  ;;  %v2826_v17 = vsel %vm1324_vm4, %v2823_v63, %v2825_v24  ;;  %v2888_v15 = vmul.f32 %v8124_v55, %v11227_v18  ;;  %v2853_v63 = vsel %vm1324_vm4, %v2851_v38, %v2852_v9 }
 0x273   : > { %v2889_v38 = vmul.f32 %v7894_v20, %v11227_v18 }
 0x274   : > { %v2894_v32 = vadd.f32 %v2891_v6, %v2888_v15 }
 0x276   : > { %2798 = vrot.lane.b32.xlu0 %v2795_v49, %s11215_s27  ;;  %2827 = vrot.lane.b32.xlu1 %v2824_v47, %s11215_s27  ;;  %v2869_v49 = vmul.f32 %v7908_v11, %v11225_v57  ;;  %v2890_v47 = vmul.f32 %v7887_v59, %v11227_v18  ;;  %v2892_v57 = vmul.f32 %v7908_v11, %v11228_v41  ;;  %v11240_v18 = vld [vmem:[#allocation57_spill] sm:$0xff] }
 0x27a   : > { %2802 = vrot.lane.b32.xlu0 %v2796_v14, %s11215_s27  ;;  %2831 = vrot.lane.b32.xlu1 %v2825_v24, %s11215_s27  ;;  %v2871_v14 = vadd.f32 %v2868_v22, %v2865_v1  ;;  %v2866_v24 = vmul.f32 %v7894_v20, %v11224_v34  ;;  %v2896_v22 = vadd.f32 %v2893_v54, %v2890_v47  ;;  %v11234_v34 = vld [vmem:[#allocation53_spill] sm:$0xff]  ;;  %v11238_v47 = vld [vmem:[#allocation72_spill] sm:$0xff] }
 0x27b   : > { %v2913_v21 = vmul.f32 %v7894_v20, %v11234_v34  ;;  %v2912_v0 = vmul.f32 %v8124_v55, %v11234_v34  ;;  %v2955_v54 = vmul.f32 %v7908_v11, %v11238_v47 }
 0x27c   : > { %v2872_v1 = vadd.f32 %v2869_v49, %v2866_v24  ;;  %v11239_v24 = vld [vmem:[#allocation71_spill] sm:$0xff] }
 0x27d   : > { %v2953_v39 = vmul.f32 %v7887_v59, %v11239_v24 }
 0x27e   : > { %2829 = vrot.lane.b32.xlu0 %v2826_v17, %s11215_s27  ;;  %2858 = vrot.lane.b32.xlu1 %v2855_v37, %s11215_s27  ;;  %v11233_v37 = vld [vmem:[#allocation54_spill] sm:$0xff] }
 0x27f   : > { %v2916_v17 = vmul.f32 %v7908_v11, %v11233_v37 }
 0x282   : > { %2856 = vrot.lane.b32.xlu0 %v2853_v63, %s11215_s27  ;;  %2878 = vrot.lane.b32.xlu1 %v2871_v14, %s11229_s29  ;;  %v2915_v14 = vmul.f32 %v8128_v60, %v11233_v37  ;;  %v2895_v63 = vadd.f32 %v2892_v57, %v2889_v38  ;;  %v2936_v57 = vmul.f32 %v7894_v20, %v11240_v18 }
 0x283   : > { %v2914_v38 = vmul.f32 %v7887_v59, %v11234_v34  ;;  %v11244_v34 = vld [vmem:[#allocation90_spill] sm:$0xff] }
 0x284   : > { %v2918_v41 = vadd.f32 %v2915_v14, %v2912_v0  ;;  %v2986_v12 = vmul.f32 %v7935_v31, %v11244_v34 }
 0x286   : > { %2876 = vrot.lane.b32.xlu0 %v2870_v30, %s11229_s29  ;;  %2900 = vrot.lane.b32.xlu1 %v2894_v32, %s11229_s29  ;;  %v2919_v30 = vadd.f32 %v2916_v17, %v2913_v21  ;;  %v11237_v32 = vld [vmem:[#allocation58_spill] sm:$0xff]  ;;  %v2952_v17 = vmul.f32 %v7894_v20, %v11239_v24  ;;  %v2917_v21 = vmul.f32 %v7892_v44, %v11233_v37 }
 0x287   : > { %v2938_v49 = vmul.f32 %v7908_v11, %v11237_v32 }
 0x288   : > { %v8281_v9 = vpop.permute.xlu1 %2343  ;;  %v8283_v61 = vpop.permute.xlu0 %2316  ;;  %v2958_v48 = vadd.f32 %v2955_v54, %v2952_v17 }
 0x289   : > { %11231 = vst [vmem:[#allocation121_spill] sm:$0xff] %v8281_v9  ;;  %11232 = vst [vmem:[#allocation83_spill] sm:$0xff] %v8283_v61  ;;  %v2940_v14 = vadd.f32 %v2938_v49, %v2936_v57  ;;  %v2985_v49 = vmul.f32 %v7892_v44, %v11244_v34  ;;  %v2937_v57 = vmul.f32 %v7887_v59, %v11240_v18 }
 0x28a   : > { %2880 = vrot.lane.b32.xlu0 %v2872_v1, %s11229_s29  ;;  %2904 = vrot.lane.b32.xlu1 %v2896_v22, %s11229_s29  ;;  %v2954_v1 = vmul.f32 %v7933_v52, %v11239_v24  ;;  %v2957_v22 = vmul.f32 %v7935_v31, %v11238_v47  ;;  %v2920_v24 = vadd.f32 %v2917_v21, %v2914_v38 }
 0x28b   : > { %v2989_v38 = vadd.f32 %v2986_v12, %v2983_v4  ;;  %v2981_v21 = vmul.f32 %v7894_v20, %v11243_v43 }
 0x28c   : > { %v8299_v15 = vpop.permute.xlu1 %2370  ;;  %v8301_v6 = vpop.permute.xlu0 %2341  ;;  %v2960_v7 = vadd.f32 %v2957_v22, %v2954_v1  ;;  %v2964_v22 = vrot.slane %v2958_v48, 4 }
 0x28d   : > { %11235 = vst [vmem:[#allocation141_spill] sm:$0xff] %v8299_v15  ;;  %11236 = vst [vmem:[#allocation124_spill] sm:$0xff] %v8301_v6  ;;  %v8678_v15 = vld [vmem:[%s8614_s26 + $0x20] sm:$0xff] }
 0x28e   : > { %2902 = vrot.lane.b32.xlu0 %v2895_v63, %s11229_s29  ;;  %2926 = vrot.lane.b32.xlu1 %v2919_v30, %s11229_s29  ;;  %v2956_v63 = vmul.f32 %v7892_v44, %v11238_v47  ;;  %v2982_v47 = vmul.f32 %v7887_v59, %v11243_v43  ;;  %v2967_v17 = vrot.slane %v2960_v7, 4  ;;  %v3014_v43 = vmul.f32 %v7935_v31, %v11248_v58 }
 0x290   : > { %v8325_v30 = vpop.permute.xlu1 %2391  ;;  %v8327_v0 = vpop.permute.xlu0 %2368  ;;  %v2959_v37 = vadd.f32 %v2956_v63, %v2953_v39  ;;  %v2984_v39 = vmul.f32 %v7908_v11, %v11244_v34  ;;  %v2988_v48 = vadd.f32 %v2985_v49, %v2982_v47  ;;  %v2996_v47 = vrot.slane %v2989_v38, 4 }
 0x291   : > { %11241 = vst [vmem:[#allocation85_spill] sm:$0xff] %v8325_v30  ;;  %11242 = vst [vmem:[#allocation150_spill] sm:$0xff] %v8327_v0  ;;  %v5419_v30 = vld [vmem:[%s8501_s16 + $0x60] sm:$0xff]  ;;  %v8669_v0 = vld [vmem:[%s8614_s26 + $0x8] sm:$0xff] }
 0x292   : > { %2924 = vrot.lane.b32.xlu0 %v2918_v41, %s11229_s29  ;;  %2944 = vrot.lane.b32.xlu1 %v2940_v14, %s11229_s29  ;;  %v2939_v41 = vmul.f32 %v7892_v44, %v11237_v32  ;;  %v2965_v63 = vrot.slane %v2959_v37, 4  ;;  %v11247_v14 = vld [vmem:[#allocation92_spill] sm:$0xff]  ;;  %v3015_v32 = vmul.f32 %v7982_v23, %v11248_v58  ;;  %v2987_v12 = vadd.f32 %v2984_v39, %v2981_v21 }
 0x293   : > { %v3012_v18 = vmul.f32 %v7980_v42, %v11247_v14  ;;  %v3010_v7 = vmul.f32 %v7887_v59, %v11247_v14  ;;  %v3011_v49 = vmul.f32 %v7933_v52, %v11247_v14  ;;  %v3040_v14 = vmul.f32 %v8124_v55, %v11253_v50 }
 0x294   : > { %v8339_v54 = vpop.permute.xlu1 %2395  ;;  %v8341_v1 = vpop.permute.xlu0 %2372  ;;  %v2941_v4 = vadd.f32 %v2939_v41, %v2937_v57  ;;  %v2968_v37 = vsel %vm752_vm8, %v2965_v63, %v2967_v17  ;;  %v2994_v57 = vrot.slane %v2988_v48, 4  ;;  %v2966_v51 = vsel %vm752_vm8, %v2964_v22, %v2965_v63 }
 0x295   : > { %11245 = vst [vmem:[#allocation109_spill] sm:$0xff] %v8339_v54  ;;  %11246 = vst [vmem:[#allocation86_spill] sm:$0xff] %v8341_v1  ;;  %v3018_v41 = vadd.f32 %v3015_v32, %v3012_v18  ;;  %v2993_v17 = vrot.slane %v2987_v12, 4  ;;  %v3044_v18 = vmul.f32 %v7908_v11, %v11254_v62  ;;  %v3039_v63 = vmul.f32 %v8114_v10, %v11253_v50  ;;  %v8646_v54 = vld [vmem:[%s8501_s16 + $0x18] sm:$0xff] }
 0x296   : > { %2928 = vrot.lane.b32.xlu0 %v2920_v24, %s11229_s29  ;;  %2969 = vrot.lane.b32.xlu1 %v2964_v22, %s11229_s29  ;;  %v3013_v24 = vmul.f32 %v7892_v44, %v11248_v58  ;;  %v2997_v45 = vsel %vm752_vm8, %v2994_v57, %v2996_v47  ;;  %v3017_v58 = vadd.f32 %v3014_v43, %v3011_v49 }
 0x297   : > { %v3025_v32 = vrot.slane %v3018_v41, 4  ;;  %v3041_v22 = vmul.f32 %v7894_v20, %v11253_v50  ;;  %v3042_v43 = vmul.f32 %v8120_v26, %v11254_v62  ;;  %v2995_v41 = vsel %vm752_vm8, %v2993_v17, %v2994_v57 }
 0x298   : > { %v8357_v29 = vpop.permute.xlu1 %2422  ;;  %v8359_v34 = vpop.permute.xlu0 %2393  ;;  %v3016_v38 = vadd.f32 %v3013_v24, %v3010_v7  ;;  %v11257_v24 = vld [vmem:[#allocation96_spill] sm:$0xff]  ;;  %v3023_v50 = vrot.slane %v3017_v58, 4 }
 0x299   : > { %11249 = vst [vmem:[#allocation138_spill] sm:$0xff] %v8357_v29  ;;  %11250 = vst [vmem:[#allocation125_spill] sm:$0xff] %v8359_v34  ;;  %v3047_v46 = vadd.f32 %v3044_v18, %v3041_v22  ;;  %v3045_v2 = vadd.f32 %v3042_v43, %v3039_v63  ;;  %v3094_v63 = vmul.f32 %v7894_v20, %v11259_v16 }
 0x29a   : > { %2946 = vrot.lane.b32.xlu0 %v2941_v4, %s11229_s29  ;;  %2973 = vrot.lane.b32.xlu1 %v2968_v37, %s11229_s29  ;;  %v3043_v4 = vmul.f32 %v8128_v60, %v11254_v62  ;;  %v3022_v7 = vrot.slane %v3016_v38, 4  ;;  %v11258_v37 = vld [vmem:[#allocation97_spill] sm:$0xff]  ;;  %v3065_v62 = vmul.f32 %v7894_v20, %v11257_v24  ;;  %v3026_v38 = vsel %vm752_vm8, %v3023_v50, %v3025_v32 }
 0x29b   : > { %v3068_v49 = vmul.f32 %v7908_v11, %v11258_v37  ;;  %v3054_v18 = vrot.slane %v3047_v46, 7  ;;  %v3051_v32 = vrot.slane %v3045_v2, 7  ;;  %v3069_v46 = vmul.f32 %v7892_v44, %v11258_v37 }
 0x29c   : > { %v8372_v39 = vpop.permute.xlu1 %2447  ;;  %v8374_v21 = vpop.permute.xlu0 %2420  ;;  %v3046_v36 = vadd.f32 %v3043_v4, %v3040_v14 }
 0x29d   : > { %11251 = vst [vmem:[#allocation112_spill] sm:$0xff] %v8372_v39  ;;  %11252 = vst [vmem:[#allocation137_spill] sm:$0xff] %v8374_v21  ;;  %v3071_v58 = vadd.f32 %v3068_v49, %v3065_v62  ;;  %v8635_v39 = vld [vmem:[%s8501_s16 + $0x30] sm:$0xff] }
 0x29e   : > { %2971 = vrot.lane.b32.xlu0 %v2966_v51, %s11229_s29  ;;  %3000 = vrot.lane.b32.xlu1 %v2997_v45, %s11229_s29  ;;  %v3064_v51 = vmul.f32 %v8124_v55, %v11257_v24  ;;  %v3067_v45 = vmul.f32 %v8128_v60, %v11258_v37  ;;  %v3052_v4 = vrot.slane %v3046_v36, 7  ;;  %v3066_v36 = vmul.f32 %v7887_v59, %v11257_v24  ;;  %v11274_v24 = vld [vmem:[#allocation111_spill] sm:$0xff] }
 0x2a0   : > { %v8392_v48 = vpop.permute.xlu1 %2474  ;;  %v8394_v12 = vpop.permute.xlu0 %2445  ;;  %v3070_v14 = vadd.f32 %v3067_v45, %v3064_v51  ;;  %v3077_v45 = vrot.slane %v3071_v58, 3  ;;  %v3055_v2 = vsel %vm828_vm1, %v3052_v4, %v3054_v18  ;;  %v3053_v20 = vsel %vm828_vm1, %v3051_v32, %v3052_v4  ;;  %v8444_v18 = vld [vmem:[#allocation3 + $0x18] sm:$0xff]  ;;  %v11269_v32 = vld [vmem:[#allocation106_spill] sm:$0xff] }
 0x2a1   : > { %11255 = vst [vmem:[#allocation148_spill] sm:$0xff] %v8392_v48  ;;  %11256 = vst [vmem:[#allocation80_spill] sm:$0xff] %v8394_v12  ;;  %v3093_v12 = vmul.f32 %v8124_v55, %v11259_v16  ;;  %v11260_v48 = vld [vmem:[#allocation100_spill] sm:$0xff] }
 0x2a2   : > { %2998 = vrot.lane.b32.xlu0 %v2995_v41, %s11229_s29  ;;  %3027 = vrot.lane.b32.xlu1 %v3022_v7, %s11229_s29  ;;  %v3096_v21 = vmul.f32 %v8128_v60, %v11260_v48  ;;  %v3097_v22 = vmul.f32 %v7908_v11, %v11260_v48  ;;  %v3076_v51 = vrot.slane %v3070_v14, 3 }
 0x2a4   : > { %v8412_v57 = vpop.permute.xlu1 %2478  ;;  %v8414_v17 = vpop.permute.xlu0 %2449  ;;  %v3099_v43 = vadd.f32 %v3096_v21, %v3093_v12  ;;  %v3100_v49 = vadd.f32 %v3097_v22, %v3094_v63  ;;  %v3095_v21 = vmul.f32 %v7887_v59, %v11259_v16  ;;  %v11268_v22 = vld [vmem:[#allocation105_spill] sm:$0xff]  ;;  %v3124_v59 = vmul.f32 %v7908_v11, %v11269_v32  ;;  %v8450_v63 = vld [vmem:[#allocation3 + $0x48] sm:$0xff] }
 0x2a5   : > { %11261 = vst [vmem:[#allocation73_spill] sm:$0xff] %v8412_v57  ;;  %11262 = vst [vmem:[#allocation108_spill] sm:$0xff] %v8414_v17  ;;  %v3123_v4 = vmul.f32 %v8444_v18, %v11268_v22 }
 0x2a6   : > { %3002 = vrot.lane.b32.xlu0 %v2996_v47, %s11229_s29  ;;  %3031 = vrot.lane.b32.xlu1 %v3026_v38, %s11229_s29  ;;  %v3024_v47 = vsel %vm752_vm8, %v3022_v7, %v3023_v50  ;;  %v3078_v38 = vsel %vm856_vm6, %v3076_v51, %v3077_v45  ;;  %v3105_v14 = vrot.slane %v3099_v43, 3  ;;  %v3072_v7 = vadd.f32 %v3069_v46, %v3066_v36  ;;  %v8456_v43 = vld [vmem:[#allocation3 + $0x10] sm:$0xff] }
 0x2a7   : > { %v3098_v50 = vmul.f32 %v7892_v44, %v11260_v48  ;;  %v3106_v58 = vrot.slane %v3100_v49, 3  ;;  %11270 = vst [vmem:[#allocation52_spill] sm:$0xff] %v8456_v43  ;;  %v3122_v44 = vmul.f32 %v8456_v43, %v11268_v22  ;;  %v11273_v49 = vld [vmem:[#allocation110_spill] sm:$0xff] }
 0x2a8   : > { %v8422_v41 = vpop.permute.xlu1 %2505  ;;  %v8424_v57 = vpop.permute.xlu0 %2476  ;;  %v3146_v37 = vmul.f32 %v8444_v18, %v11273_v49  ;;  %v3079_v48 = vrot.slane %v3072_v7, 3 }
 0x2a9   : > { %11263 = vst [vmem:[#allocation117_spill] sm:$0xff] %v8422_v41  ;;  %11264 = vst [vmem:[#allocation132_spill] sm:$0xff] %v8424_v57  ;;  %v3126_v16 = vadd.f32 %v3124_v59, %v3122_v44  ;;  %v11277_v59 = vld [vmem:[#allocation114_spill] sm:$0xff]  ;;  %v11278_v44 = vld [vmem:[#allocation113_spill] sm:$0xff] }
 0x2aa   : > { %3029 = vrot.lane.b32.xlu0 %v3024_v47, %s11229_s29  ;;  %3058 = vrot.lane.b32.xlu1 %v3055_v2, %s11265_s23  ;;  %v3125_v47 = vmul.f32 %v8450_v63, %v11269_v32  ;;  %v3101_v2 = vadd.f32 %v3098_v50, %v3095_v21  ;;  %v3148_v32 = vmul.f32 %v7908_v11, %v11274_v24 }
 0x2ab   : > { %v3145_v21 = vmul.f32 %v8456_v43, %v11273_v49  ;;  %v3130_v7 = vrot.slane %v3126_v16, 3  ;;  %v3150_v16 = vmul.f32 %v7935_v31, %v11274_v24 }
 0x2ac   : > { %v8437_v12 = vpop.permute.xlu1 %2532  ;;  %v8439_v62 = vpop.permute.xlu0 %2503  ;;  %v3108_v22 = vrot.slane %v3101_v2, 3  ;;  %v3170_v2 = vmul.f32 %v8456_v43, %v11278_v44 }
 0x2ad   : > { %11266 = vst [vmem:[#allocation149_spill] sm:$0xff] %v8437_v12  ;;  %11267 = vst [vmem:[#allocation91_spill] sm:$0xff] %v8439_v62  ;;  %v8471_v62 = vadd.f32 %v3125_v47, %v3123_v4  ;;  %v8554_v12 = vld [vmem:[%s8501_s16 + $0x50] sm:$0xff] }
 0x2ae   : > { %3056 = vrot.lane.b32.xlu0 %v3053_v20, %s11265_s23  ;;  %3083 = vrot.lane.b32.xlu1 %v3078_v38, %s11265_s23  ;;  %v3149_v20 = vmul.f32 %v8450_v63, %v11274_v24  ;;  %v3107_v38 = vsel %vm856_vm6, %v3105_v14, %v3106_v58  ;;  %v3080_v14 = vsel %vm856_vm6, %v3077_v45, %v3079_v48 }
 0x2af   : > { %v3131_v4 = vrot.slane %v8471_v62, 3  ;;  %v3171_v48 = vmul.f32 %v8444_v18, %v11278_v44  ;;  %v3172_v45 = vmul.f32 %v7933_v52, %v11278_v44  ;;  %v3174_v62 = vmul.f32 %v8450_v63, %v11277_v59  ;;  %v11281_v44 = vld [vmem:[#allocation115_spill] sm:$0xff] }
 0x2b0   : > { %v8460_v36 = vpop.permute.xlu1 %2557  ;;  %v8462_v46 = vpop.permute.xlu0 %2507  ;;  %v3109_v24 = vsel %vm856_vm6, %v3106_v58, %v3108_v22 }
 0x2b1   : > { %11271 = vst [vmem:[#allocation176_spill] sm:$0xff] %v8460_v36  ;;  %11272 = vst [vmem:[#allocation145_spill] sm:$0xff] %v8462_v46  ;;  %v3151_v36 = vadd.f32 %v3148_v32, %v3145_v21  ;;  %v8481_v46 = vadd.f32 %v3149_v20, %v3146_v37  ;;  %v3147_v37 = vmul.f32 %v7933_v52, %v11273_v49 }
 0x2b2   : > { %3081 = vrot.lane.b32.xlu0 %v3076_v51, %s11265_s23  ;;  %3110 = vrot.lane.b32.xlu1 %v3107_v38, %s11265_s23  ;;  %v8485_v51 = vld [vmem:[#allocation3 + $0x40] sm:$0xff]  ;;  %v3175_v32 = vmul.f32 %v7935_v31, %v11277_v59  ;;  %v3132_v49 = vsel %vm856_vm6, %v3130_v7, %v3131_v4  ;;  %v3199_v31 = vmul.f32 %v8444_v18, %v11281_v44 }
 0x2b3   : > { %v3173_v47 = vmul.f32 %v8485_v51, %v11277_v59  ;;  %v3157_v21 = vrot.slane %v3151_v36, 3  ;;  %v3153_v52 = vadd.f32 %v3150_v16, %v3147_v37  ;;  %v11282_v59 = vld [vmem:[#allocation116_spill] sm:$0xff]  ;;  %v8528_v36 = vld [vmem:[%s8501_s16 + $0x48] sm:$0xff] }
 0x2b4   : > { %v8477_v50 = vpop.permute.xlu1 %2561  ;;  %v8479_v11 = vpop.permute.xlu0 %2534  ;;  %v3178_v58 = vadd.f32 %v3175_v32, %v3172_v45  ;;  %v8539_v37 = vld [vmem:[#allocation3 + $0x50] sm:$0xff]  ;;  %v11288_v45 = vld [vmem:[#allocation119_spill] sm:$0xff] }
 0x2b5   : > { %11275 = vst [vmem:[#allocation153_spill] sm:$0xff] %v8477_v50  ;;  %11276 = vst [vmem:[#allocation159_spill] sm:$0xff] %v8479_v11  ;;  %v3176_v11 = vadd.f32 %v3173_v47, %v3170_v2  ;;  %v3203_v16 = vmul.f32 %v8539_v37, %v11282_v59  ;;  %v11287_v50 = vld [vmem:[#allocation118_spill] sm:$0xff]  ;;  %v3232_v57 = vmul.f32 %v8128_v60, %v11288_v45 }
 0x2b6   : > { %3085 = vrot.lane.b32.xlu0 %v3080_v14, %s11265_s23  ;;  %3114 = vrot.lane.b32.xlu1 %v3108_v22, %s11265_s23  ;;  %v3158_v14 = vrot.slane %v8481_v46, 3  ;;  %v3177_v46 = vadd.f32 %v3174_v62, %v3171_v48  ;;  %11286 = vst [vmem:[#allocation122_spill] sm:$0xff] %v8539_v37  ;;  %v3228_v48 = vmul.f32 %v8114_v10, %v11287_v50  ;;  %v3185_v10 = vrot.slane %v3178_v58, 7  ;;  %v8787_v37 = vld [vmem:[%s8614_s26 + $0x68] sm:$0xff] }
 0x2b7   : > { %v3231_v62 = vmul.f32 %v8120_v26, %v11288_v45  ;;  %v3229_v26 = vmul.f32 %v8124_v55, %v11287_v50 }
 0x2b8   : > { %v8511_v20 = vpop.permute.xlu1 %2582  ;;  %v8513_v38 = vpop.permute.xlu0 %2559  ;;  %v3183_v41 = vrot.slane %v3177_v46, 7 }
 0x2b9   : > { %11279 = vst [vmem:[#allocation47_spill] sm:$0xff] %v8511_v20  ;;  %11280 = vst [vmem:[#allocation133_spill] sm:$0xff] %v8513_v38  ;;  %v3202_v20 = vmul.f32 %v8450_v63, %v11282_v59  ;;  %v8525_v38 = vld [vmem:[%s8501_s16 + $0x40] sm:$0xff] }
 0x2ba   : > { %3112 = vrot.lane.b32.xlu0 %v3109_v24, %s11265_s23  ;;  %3135 = vrot.lane.b32.xlu1 %v3132_v49, %s11265_s23  ;;  %v3159_v24 = vsel %vm856_vm6, %v3157_v21, %v3158_v14  ;;  %v8535_v49 = vld [vmem:[#allocation3 + $0x20] sm:$0xff]  ;;  %v3976_v32 = vmax.f32 %v8528_v36, %v8525_v38  ;;  %v3182_v21 = vrot.slane %v3176_v11, 7  ;;  %v3201_v11 = vmul.f32 %v7980_v42, %v11281_v44  ;;  %v8579_v42 = vld [vmem:[%s8501_s16 + $0x58] sm:$0xff] }
 0x2bb   : > { %11285 = vst [vmem:[#allocation187_spill] sm:$0xff] %v8535_v49  ;;  %v3200_v2 = vmul.f32 %v8535_v49, %v11281_v44  ;;  %v8583_v44 = vadd.f32 %v3232_v57, %v3229_v26 }
 0x2bc   : > { %v8530_v22 = vpop.permute.xlu1 %2609  ;;  %v8532_v47 = vpop.permute.xlu0 %2580  ;;  %v3980_v46 = vmax.f32 %v8554_v12, %v3976_v32  ;;  %v11293_v32 = vld [vmem:[#allocation126_spill] sm:$0xff] }
 0x2bd   : > { %11283 = vst [vmem:[#allocation171_spill] sm:$0xff] %v8530_v22  ;;  %11284 = vst [vmem:[#allocation179_spill] sm:$0xff] %v8532_v47  ;;  %v3160_v47 = vrot.slane %v3153_v52, 3  ;;  %v8551_v22 = vadd.f32 %v3202_v20, %v3199_v31  ;;  %v3204_v20 = vmul.f32 %v7982_v23, %v11282_v59  ;;  %v8568_v52 = vadd.f32 %v3203_v16, %v3200_v2  ;;  %v8588_v2 = vld [vmem:[%s8501_s16 + $0x8] sm:$0xff]  ;;  %v8591_v16 = vld [vmem:[%s8501_s16 + $0x20] sm:$0xff] }
 0x2be   : > { %3133 = vrot.lane.b32.xlu0 %v3130_v7, %s11265_s23  ;;  %3162 = vrot.lane.b32.xlu1 %v3159_v24, %s11265_s23  ;;  %v3234_v31 = vadd.f32 %v3231_v62, %v3228_v48  ;;  %v3186_v23 = vsel %vm828_vm1, %v3183_v41, %v3185_v10  ;;  %v3184_v59 = vsel %vm828_vm1, %v3182_v21, %v3183_v41 }
 0x2bf   : > { %v3161_v58 = vsel %vm856_vm6, %v3158_v14, %v3160_v47  ;;  %v8594_v14 = vld [vmem:[%s8501_s16 + $0x28] sm:$0xff]  ;;  %v3207_v62 = vadd.f32 %v3204_v20, %v3201_v11  ;;  %v3259_v41 = vmul.f32 %v8444_v18, %v11293_v32  ;;  %v3212_v10 = vrot.slane %v8568_v52, 7 }
 0x2c0   : > { %v8560_v17 = vpop.permute.xlu1 %2613  ;;  %v8562_v7 = vpop.permute.xlu0 %2584  ;;  %v3240_v26 = vrot.slane %v3234_v31, 2  ;;  %v3230_v24 = vmul.f32 %v8456_v43, %v11287_v50  ;;  %v3258_v11 = vmul.f32 %v8456_v43, %v11293_v32  ;;  %v3963_v50 = vadd.f32 %v8594_v14, %v8588_v2 }
 0x2c1   : > { %11289 = vst [vmem:[#allocation151_spill] sm:$0xff] %v8560_v17  ;;  %11290 = vst [vmem:[#allocation163_spill] sm:$0xff] %v8562_v7  ;;  %v8576_v7 = vld [vmem:[%s8501_s16] sm:$0xff]  ;;  %v3241_v52 = vrot.slane %v8583_v44, 2  ;;  %v8632_v17 = vld [vmem:[%s8501_s16 + $0x10] sm:$0xff]  ;;  %v3214_v44 = vrot.slane %v3207_v62, 7 }
 0x2c2   : > { %3137 = vrot.lane.b32.xlu0 %v3131_v4, %s11265_s23  ;;  %3187 = vrot.lane.b32.xlu1 %v3182_v21, %s11265_s23  ;;  %v3233_v4 = vmul.f32 %v8485_v51, %v11288_v45  ;;  %v11294_v21 = vld [vmem:[#allocation127_spill] sm:$0xff]  ;;  %v3959_v20 = vadd.f32 %v8591_v16, %v8576_v7  ;;  %v3979_v6 = vadd.f32 %v8528_v36, %v3963_v50 }
 0x2c3   : > { %v3261_v57 = vmul.f32 %v8485_v51, %v11294_v21  ;;  %v3262_v45 = vmul.f32 %v8450_v63, %v11294_v21  ;;  %v3215_v61 = vsel %vm828_vm1, %v3212_v10, %v3214_v44 }
 0x2c4   : > { %v8596_v47 = vpop.permute.xlu1 %2640  ;;  %v8598_v48 = vpop.permute.xlu0 %2611  ;;  %v8625_v31 = vadd.f32 %v3233_v4, %v3230_v24 }
 0x2c5   : > { %11291 = vst [vmem:[#allocation166_spill] sm:$0xff] %v8596_v47  ;;  %11292 = vst [vmem:[#allocation178_spill] sm:$0xff] %v8598_v48  ;;  %v3984_v48 = vmax.f32 %v8579_v42, %v3980_v46  ;;  %v11295_v46 = vld [vmem:[#allocation130_spill] sm:$0xff]  ;;  %v8641_v24 = vadd.f32 %v3261_v57, %v3258_v11  ;;  %v3265_v4 = vadd.f32 %v3262_v45, %v3259_v41  ;;  %v8663_v45 = vld [vmem:[%s8501_s16 + $0x38] sm:$0xff] }
 0x2c6   : > { %3164 = vrot.lane.b32.xlu0 %v3161_v58, %s11265_s23  ;;  %3191 = vrot.lane.b32.xlu1 %v3186_v23, %s11265_s23  ;;  %v3282_v58 = vmul.f32 %v8124_v55, %v11295_v46  ;;  %v11296_v23 = vld [vmem:[#allocation131_spill] sm:$0xff]  ;;  %v3242_v41 = vsel %vm1033_vm2, %v3240_v26, %v3241_v52  ;;  %v3283_v57 = vmul.f32 %v8456_v43, %v11295_v46  ;;  %v3243_v9 = vrot.slane %v8625_v31, 2 }
 0x2c7   : > { %v3285_v47 = vmul.f32 %v8128_v60, %v11296_v23  ;;  %v3286_v1 = vmul.f32 %v8485_v51, %v11296_v23  ;;  %v3988_v11 = vmax.f32 %v5419_v30, %v3984_v48  ;;  %v3975_v26 = vadd.f32 %v8525_v38, %v3959_v20  ;;  %v8681_v48 = vld [vmem:[%s8614_s26 + $0x28] sm:$0xff] }
 0x2c8   : > { %v8637_v34 = vpop.permute.xlu1 %2665  ;;  %v8639_v29 = vpop.permute.xlu0 %2638  ;;  %v3260_v38 = vmul.f32 %v8128_v60, %v11294_v21  ;;  %v5420_v20 = vld [vmem:[%s8501_s16 + $0x68] sm:$0xff]  ;;  %v3272_v5 = vrot.slane %v3265_v4, 2  ;;  %v8706_v60 = vld [vmem:[%s8654_s15 + $0x20] sm:$0xff]  ;;  %v4454_v44 = vadd.f32 %v8681_v48, %v8669_v0  ;;  %v8721_v4 = vld [vmem:[%s8614_s26 + $0x30] sm:$0xff]  ;;  %v8735_v35 = vsel %vm1033_vm2, %v3241_v52, %v3243_v9 }
 0x2c9   : > { %11297 = vst [vmem:[#allocation186_spill] sm:$0xff] %v8637_v34  ;;  %11298 = vst [vmem:[#allocation207_spill] sm:$0xff] %v8639_v29  ;;  %v11300_v29 = vrot.slane %v8551_v22, 7  ;;  %v8666_v34 = vld [vmem:[%s8614_s26] sm:$0xff]  ;;  %v3992_v21 = vmax.f32 %v5420_v20, %v3988_v11  ;;  %v3991_v31 = vadd.f32 %v5419_v30, %v3975_v26  ;;  %v5421_v30 = vld [vmem:[%s8501_s16 + $0x70] sm:$0xff]  ;;  %v3284_v49 = vmul.f32 %v8444_v18, %v11295_v46 }
 0x2ca   : > { %3189 = vrot.lane.b32.xlu0 %v3184_v59, %s11265_s23  ;;  %v8684_v59 = vadd.f32 %v3285_v47, %v3282_v58  ;;  %v8697_v47 = vadd.f32 %v3286_v1, %v3283_v57  ;;  %v8700_v58 = vld [vmem:[%s8654_s15] sm:$0xff]  ;;  %v4450_v1 = vadd.f32 %v8678_v15, %v8666_v34  ;;  %v11303_v57 = vrot.slane %v8551_v22, 7  ;;  %v8752_v52 = vld [vmem:[%s8654_s15 + $0x10] sm:$0xff] }
 0x2cb   : > { %v3213_v62 = vsel %vm828_vm1, %v11300_v29, %v3212_v10  ;;  %v3967_v29 = vadd.f32 %v8635_v39, %v8632_v17  ;;  %v8714_v10 = vld [vmem:[%s8614_s26 + $0x10] sm:$0xff]  ;;  %v8766_v56 = vmax.f32 %v5421_v30, %v3992_v21  ;;  %v4470_v13 = vadd.f32 %v8732_v53, %v4454_v44  ;;  %v5422_v44 = vld [vmem:[%s8501_s16 + $0x78] sm:$0xff] }
 0x2cc   : > { %3218 = vrot.lane.b32.xlu1 %v3213_v62, %s11265_s23  ;;  %v3257_v62 = vmul.f32 %v8124_v55, %v11293_v32  ;;  %v8691_v36 = vpop.permute.xlu1 %2692  ;;  %v8693_v50 = vpop.permute.xlu0 %2663  ;;  %v8703_v55 = vld [vmem:[%s8654_s15 + $0x8] sm:$0xff]  ;;  %v3971_v32 = vadd.f32 %v8663_v45, %v8646_v54  ;;  %v4458_v22 = vadd.f32 %v8721_v4, %v8714_v10  ;;  %v4466_v3 = vadd.f32 %v8729_v8, %v4450_v1 }
 0x2cd   : > { %11301 = vst [vmem:[#allocation134_spill] sm:$0xff] %v8691_v36  ;;  %11302 = vst [vmem:[#allocation162_spill] sm:$0xff] %v8693_v50  ;;  %v8711_v50 = vld [vmem:[%s8654_s15 + $0x28] sm:$0xff]  ;;  %v3983_v11 = vadd.f32 %v8554_v12, %v3967_v29  ;;  %v3995_v36 = vadd.f32 %v5420_v20, %v3979_v6  ;;  %v11308_v29 = vld [vmem:[#allocation136_spill] sm:$0xff]  ;;  %v3497_v20 = vadd.f32 %v8706_v60, %v8700_v58 }
 0x2ce   : > { %3216 = vrot.lane.b32.xlu0 %v11303_v57, %s11265_s23  ;;  %v8738_v33 = vadd.f32 %v3260_v38, %v3257_v62  ;;  %v11305_v57 = vld [vmem:[#allocation135_spill] sm:$0xff]  ;;  %v3313_v26 = vmul.f32 %v8485_v51, %v11308_v29  ;;  %v3501_v62 = vadd.f32 %v8711_v50, %v8703_v55  ;;  %v8759_v38 = vld [vmem:[%s8654_s15 + $0x30] sm:$0xff]  ;;  %v3987_v21 = vadd.f32 %v8579_v42, %v3971_v32  ;;  %v8800_v42 = vld [vmem:[%s8654_s15 + $0x18] sm:$0xff] }
 0x2cf   : > { %v4005_v28 = vadd.f32 %v3995_v36, %v3991_v31  ;;  %v3505_v36 = vadd.f32 %v8759_v38, %v8752_v52  ;;  %v8805_v31 = vld [vmem:[%s8654_s15 + $0x38] sm:$0xff]  ;;  %v4462_v32 = vadd.f32 %v8772_v25, %v8769_v19  ;;  %v4474_v46 = vadd.f32 %v8777_v40, %v4458_v22 }
 0x2d0   : > { %3245 = vrot.lane.b32.xlu1 %v3242_v41, %s11304_s25  ;;  %v8742_v41 = vmul.f32 %v8456_v43, %v11305_v57  ;;  %v8745_v6 = vpop.permute.xlu1 %2696  ;;  %v8747_v12 = vpop.permute.xlu0 %2667  ;;  %v3269_v1 = vrot.slane %v8738_v33, 2  ;;  %v3511_v33 = vadd.f32 %v3501_v62, %v3497_v20  ;;  %v8848_v22 = vld [vmem:[%s8614_s26 + $0x58] sm:$0xff]  ;;  %v4486_v20 = vadd.f32 %v8787_v37, %v4470_v13 }
 0x2d1   : > { %11306 = vst [vmem:[#allocation167_spill] sm:$0xff] %v8745_v6  ;;  %11307 = vst [vmem:[#allocation107_spill] sm:$0xff] %v8747_v12  ;;  %v11309_v12 = vrot.slane %v8641_v24, 2  ;;  %v3960_v62 = vmax.f32 %v8576_v7, %v8591_v16  ;;  %v11314_v13 = vrot.slane %v8684_v59, 6  ;;  %v11315_v7 = vrot.slane %v8641_v24, 2 }
 0x2d2   : > { %3220 = vrot.lane.b32.xlu0 %v3215_v61, %s11265_s23  ;;  %v3972_v59 = vmax.f32 %v8646_v54, %v8663_v45  ;;  %v11318_v45 = vld [vmem:[#allocation139_spill] sm:$0xff] }
 0x2d3   : > { %v3273_v6 = vsel %vm1033_vm2, %v11309_v12, %v3272_v5  ;;  %v3999_v12 = vadd.f32 %v5421_v30, %v3983_v11  ;;  %v11312_v11 = vmov 0.0   ;;  %v4482_v30 = vadd.f32 %v8784_v27, %v4466_v3 }
 0x2d4   : > { %3249 = vrot.lane.b32.xlu1 %v3243_v9, %s11304_s25  ;;  %v3287_v9 = vmul.f32 %v8450_v63, %v11296_v23  ;;  %v8795_v61 = vpop.permute.xlu1 %2723  ;;  %v8797_v5 = vpop.permute.xlu0 %2694  ;;  %3942 = vst.msk [vmem:[#allocation5 + $0x10] sm:$0xff] %vm3477_vm12, %v11312_v11  ;;  %3479 = vst.msk [vmem:[#allocation4 + $0x8] sm:$0xff] %vm3477_vm12, %v11312_v11  ;;  %v4000_v23 = vmax.f32 %v5422_v44, %v8766_v56  ;;  %v11313_v3 = vrot.slane %v8697_v47, 6 }
 0x2d5   : > { %11310 = vst [vmem:[#allocation194_spill] sm:$0xff] %v8795_v61  ;;  %11311 = vst [vmem:[#allocation144_spill] sm:$0xff] %v8797_v5  ;;  %v8858_v5 = vadd.f32 %v3313_v26, %v8742_v41  ;;  %v4007_v56 = vadd.f32 %v4005_v28, %v3999_v12  ;;  %v8861_v61 = vld [vmem:[%s8614_s26 + $0x70] sm:$0xff]  ;;  %v3513_v28 = vadd.f32 %v3511_v33, %v3505_v36 }
 0x2d6   : > { %3480 = vst.msk [vmem:[#allocation4 + $0x10] sm:$0xff] %vm3477_vm12, %v11312_v11  ;;  %3481 = vst.msk [vmem:[#allocation4 + $0x18] sm:$0xff] %vm3477_vm12, %v11312_v11  ;;  %3247 = vrot.lane.b32.xlu0 %v8735_v35, %s11304_s25  ;;  %v3296_v43 = vsel %vm1092_vm7, %v11314_v13, %v11313_v3  ;;  %v3271_v35 = vsel %vm1033_vm2, %v3269_v1, %v11315_v7  ;;  %v3290_v16 = vadd.f32 %v3287_v9, %v3284_v49  ;;  %v8884_v1 = vld [vmem:[%s8614_s26 + $0x78] sm:$0xff]  ;;  %s5851_s26 = smov [#allocation12]  }
 0x2d7   : > { %3484 = vst.msk [vmem:[#allocation4 + $0x30] sm:$0xff] %vm3477_vm12, %v11312_v11  ;;  %3485 = vst.msk [vmem:[#allocation4 + $0x38] sm:$0xff] %vm3477_vm12, %v11312_v11  ;;  %v3314_v12 = vmul.f32 %v8450_v63, %v11308_v29  ;;  %v4490_v24 = vadd.f32 %v8861_v61, %v4474_v46  ;;  %v4496_v49 = vadd.f32 %v4486_v20, %v4482_v30  ;;  %v3319_v33 = vrot.slane %v8858_v5, 6  ;;  %s5658_s18 = sshll.u32 %s5851_s26, 4  ;;  %s5659_s18 = int_to_ptr.vmem [resolvable:$false] %s5658_s18 }
 0x2d8   : > { %3486 = vst.msk [vmem:[#allocation4 + $0x40] sm:$0xff] %vm3477_vm12, %v11312_v11  ;;  %3941 = vst.msk [vmem:[#allocation5 + $0x8] sm:$0xff] %vm3477_vm12, %v11312_v11  ;;  %3276 = vrot.lane.b32.xlu1 %v3273_v6, %s11304_s25  ;;  %v3509_v6 = vadd.f32 %v8805_v31, %v8800_v42  ;;  %v8873_v41 = vpop.permute.xlu1 %2750  ;;  %v8875_v26 = vpop.permute.xlu0 %2721  ;;  %v4004_v9 = vmax.f32 %v3960_v62, %v4000_v23  ;;  %v3964_v3 = vmax.f32 %v8588_v2, %v8594_v14  ;;  %s5660_s14 = scalar_lea.vmem %s5659_s18, 512 }
 0x2d9   : > { %3943 = vst.msk [vmem:[#allocation5 + $0x18] sm:$0xff] %vm3477_vm12, %v11312_v11  ;;  %3946 = vst.msk [vmem:[#allocation5 + $0x30] sm:$0xff] %vm3477_vm12, %v11312_v11  ;;  %v4455_v29 = vmax.f32 %v8669_v0, %v8681_v48  ;;  %v3968_v14 = vmax.f32 %v8632_v17, %v8635_v39  ;;  %v4498_v20 = vadd.f32 %v4496_v49, %v4490_v24  ;;  %v11316_v48 = vmov %v11314_v13 }
 0x2da   : > { %3947 = vst.msk [vmem:[#allocation5 + $0x38] sm:$0xff] %vm3477_vm12, %v11312_v11  ;;  %3948 = vst.msk [vmem:[#allocation5 + $0x40] sm:$0xff] %vm3477_vm12, %v11312_v11  ;;  %3274 = vrot.lane.b32.xlu0 %v3271_v35, %s11304_s25  ;;  %v3515_v30 = vadd.f32 %v3513_v28, %v3509_v6  ;;  %v3502_v0 = vmax.f32 %v8703_v55, %v8711_v50  ;;  %v4459_v62 = vmax.f32 %v8714_v10, %v8721_v4  ;;  %v11320_v28 = vld [vmem:[#allocation52_spill] sm:$0xff] }
 0x2db   : > { %4432 = vst.msk [vmem:[#allocation6 + $0x8] sm:$0xff] %vm3477_vm12, %v11312_v11  ;;  %4433 = vst.msk [vmem:[#allocation6 + $0x10] sm:$0xff] %vm3477_vm12, %v11312_v11  ;;  %v4471_v17 = vmax.f32 %v4455_v29, %v8732_v53  ;;  %v11317_v50 = vrot.slane %v8697_v47, 6  ;;  %v3506_v10 = vmax.f32 %v8752_v52, %v8759_v38  ;;  %v4463_v53 = vmax.f32 %v8769_v19, %v8772_v25  ;;  %v11319_v38 = vld [vmem:[#allocation140_spill] sm:$0xff]  ;;  %v11322_v29 = vld [vmem:[#allocation143_spill] sm:$0xff] }
 0x2dc   : > { %4434 = vst.msk [vmem:[#allocation6 + $0x18] sm:$0xff] %vm3477_vm12, %v11312_v11  ;;  %4437 = vst.msk [vmem:[#allocation6 + $0x30] sm:$0xff] %vm3477_vm12, %v11312_v11  ;;  %3301 = vrot.lane.b32.xlu1 %v3296_v43, %s11304_s25  ;;  %v8895_v46 = vpop.permute.xlu1 %2769  ;;  %v8897_v23 = vpop.permute.xlu0 %2725  ;;  %v3517_v47 = vmul.f32 0.125, %v3515_v30  ;;  %v4475_v13 = vmax.f32 %v4459_v62, %v8777_v40  ;;  %v3335_v52 = vmul.f32 %v8444_v18, %v11318_v45  ;;  %v11324_v62 = vld [vmem:[#allocation122_spill] sm:$0xff] }
 0x2dd   : > { %4438 = vst.msk [vmem:[#allocation6 + $0x38] sm:$0xff] %vm3477_vm12, %v11312_v11  ;;  %4439 = vst.msk [vmem:[#allocation6 + $0x40] sm:$0xff] %vm3477_vm12, %v11312_v11  ;;  %v4003_v11 = vadd.f32 %v5422_v44, %v3987_v21  ;;  %v3312_v21 = vmul.f32 %v8444_v18, %v11305_v57  ;;  %v4478_v44 = vadd.f32 %v8848_v22, %v4462_v32  ;;  %v3297_v32 = vrot.slane %v3290_v16, 6 }
 0x2de   : > { %v4451_v57 = vmax.f32 %v8666_v34, %v8678_v15  ;;  %v4006_v34 = vmax.f32 %v3964_v3, %v4004_v9  ;;  %v3498_v15 = vmax.f32 %v8700_v58, %v8706_v60  ;;  %3299 = vrot.lane.b32.xlu0 %v11316_v48, %s11304_s25  ;;  %v4487_v54 = vmax.f32 %v4471_v17, %v8787_v37  ;;  %v11323_v48 = vld [vmem:[#allocation187_spill] sm:$0xff] }
 0x2df   : > { %v4009_v36 = vadd.f32 %v4007_v56, %v4003_v11  ;;  %v8899_v2 = vadd.f32 %v3314_v12, %v3312_v21  ;;  %v4494_v43 = vadd.f32 %v8884_v1, %v4478_v44  ;;  %v3298_v55 = vsel %vm1092_vm7, %v11317_v50, %v3297_v32  ;;  %v11325_v50 = vld [vmem:[#allocation146_spill] sm:$0xff] }
 0x2e0   : > { %3322 = vrot.lane.b32.xlu1 %v3319_v33, %s11304_s25  ;;  %v4467_v39 = vmax.f32 %v4451_v57, %v8729_v8  ;;  %v8916_v11 = vpop.permute.xlu1 %2773  ;;  %v8918_v58 = vpop.permute.xlu0 %2752  ;;  %v4008_v8 = vmax.f32 %v4006_v34, %v3968_v14  ;;  %v3512_v56 = vmax.f32 %v3498_v15, %v3502_v0  ;;  %v3337_v35 = vmul.f32 %v8485_v51, %v11319_v38 }
 0x2e1   : > { %v4011_v5 = vmul.f32 0.0625, %v4009_v36  ;;  %v3320_v60 = vrot.slane %v8899_v2, 6  ;;  %v4500_v4 = vadd.f32 %v4498_v20, %v4494_v43  ;;  %v3338_v19 = vmul.f32 %v8450_v63, %v11319_v38 }
 0x2e2   : > { %3303 = vrot.lane.b32.xlu0 %v3298_v55, %s11304_s25  ;;  %v4483_v7 = vmax.f32 %v4467_v39, %v8784_v27  ;;  %v4010_v40 = vmax.f32 %v4008_v8, %v3972_v59  ;;  %v3510_v27 = vmax.f32 %v8800_v42, %v8805_v31  ;;  %v3514_v37 = vmax.f32 %v3512_v56, %v3506_v10  ;;  %v11321_v42 = vld [vmem:[#allocation142_spill] sm:$0xff]  ;;  %v8982_v59 = vld [vmem:[#allocation3 + $0x28] sm:$0xff] }
 0x2e3   : > { %v3321_v6 = vsel %vm1092_vm7, %v3319_v33, %v3320_v60  ;;  %v3334_v21 = vmul.f32 %v11320_v28, %v11318_v45  ;;  %v4502_v12 = vmul.f32 0.0625, %v4500_v4  ;;  %v4479_v44 = vmax.f32 %v4463_v53, %v8848_v22  ;;  %v8986_v4 = vld [vmem:[#allocation3 + $0x58] sm:$0xff]  ;;  %v11326_v8 = vld [vmem:[#allocation147_spill] sm:$0xff] }
 0x2e4   : > { %4013 = vrot.lane.b32.xlu1 %v4011_v5, %s11041_s13  ;;  %v8941_v25 = vpop.permute.xlu1 %2800  ;;  %v8943_v16 = vpop.permute.xlu0 %2771  ;;  %v4491_v24 = vmax.f32 %v4475_v13, %v8861_v61  ;;  %v4497_v49 = vmax.f32 %v4483_v7, %v4487_v54  ;;  %v3341_v3 = vadd.f32 %v3338_v19, %v3335_v52  ;;  %v3364_v31 = vmul.f32 %v8444_v18, %v11321_v42 }
 0x2e5   : > { %v3340_v9 = vadd.f32 %v3337_v35, %v3334_v21  ;;  %v3366_v33 = vmul.f32 %v8485_v51, %v11322_v29  ;;  %v3367_v32 = vmul.f32 %v8450_v63, %v11322_v29  ;;  %v3516_v30 = vmax.f32 %v3514_v37, %v3510_v27 }
 0x2e6   : > { %3324 = vrot.lane.b32.xlu0 %v3321_v6, %s11304_s25  ;;  %v4495_v61 = vmax.f32 %v4479_v44, %v8884_v1  ;;  %v4499_v22 = vmax.f32 %v4497_v49, %v4491_v24  ;;  %v3363_v2 = vmul.f32 %v11320_v28, %v11321_v42  ;;  %v3347_v14 = vrot.slane %v3341_v3, 6 }
 0x2e7   : > { %v3346_v43 = vrot.slane %v3340_v9, 6  ;;  %v3370_v0 = vadd.f32 %v3367_v32, %v3364_v31  ;;  %v3336_v5 = vmul.f32 %v11323_v48, %v11318_v45  ;;  %v3339_v39 = vmul.f32 %v11324_v62, %v11319_v38 }
 0x2e8   : > { %3519 = vrot.lane.b32.xlu1 %v3517_v47, %s11041_s13  ;;  %v8954_v36 = vpop.permute.xlu1 %2827  ;;  %v8956_v57 = vpop.permute.xlu0 %2798  ;;  %v3369_v15 = vadd.f32 %v3366_v33, %v3363_v2  ;;  %v4501_v1 = vmax.f32 %v4499_v22, %v4495_v61  ;;  %v3388_v55 = vmul.f32 %v8444_v18, %v11325_v50  ;;  %v3390_v10 = vmul.f32 %v8982_v59, %v11325_v50 }
 0x2e9   : > { %v3348_v17 = vsel %vm1092_vm7, %v3346_v43, %v3347_v14  ;;  %v3393_v56 = vmul.f32 %v8986_v4, %v11326_v8  ;;  %v3376_v13 = vrot.slane %v3370_v0, 6  ;;  %v3391_v7 = vmul.f32 %v8450_v63, %v11326_v8  ;;  %v11333_v0 = vld [vmem:[#allocation76_spill] sm:$0xff] }
 0x2ea   : > { %4018 = vrot.lane.b32.xlu0 %v4010_v40, %s11041_s13  ;;  %v3375_v47 = vrot.slane %v3369_v15, 6  ;;  %v3389_v54 = vmul.f32 %v11323_v48, %v11325_v50  ;;  %v3342_v45 = vadd.f32 %v3339_v39, %v3336_v5  ;;  %v3392_v52 = vmul.f32 %v11324_v62, %v11326_v8  ;;  %v9036_v15 = vld [vmem:[#allocation4 + $0x30] sm:$0xff]  ;;  %v11334_v39 = vld [vmem:[#allocation77_spill] sm:$0xff] }
 0x2eb   : > { %v3365_v38 = vmul.f32 %v11323_v48, %v11321_v42  ;;  %v3368_v35 = vmul.f32 %v11324_v62, %v11322_v29  ;;  %v3396_v19 = vadd.f32 %v3393_v56, %v3390_v10  ;;  %v3394_v27 = vadd.f32 %v3391_v7, %v3388_v55  ;;  %11332 = vst [vmem:[#allocation161_spill] sm:$0xff] %v9036_v15 }
 0x2ec   : > { %4504 = vrot.lane.b32.xlu1 %v4502_v12, %s11041_s13  ;;  %v8969_v20 = vpop.permute.xlu1 %2831  ;;  %v8971_v34 = vpop.permute.xlu0 %2802  ;;  %v3377_v37 = vsel %vm1092_vm7, %v3375_v47, %v3376_v13  ;;  %v3349_v21 = vrot.slane %v3342_v45, 6  ;;  %v3395_v12 = vadd.f32 %v3392_v52, %v3389_v54 }
 0x2ed   : > { %v3371_v44 = vadd.f32 %v3368_v35, %v3365_v38  ;;  %v3403_v24 = vrot.slane %v3396_v19, 2  ;;  %v3400_v3 = vrot.slane %v3394_v27, 2 }
 0x2ee   : > { %3525 = vrot.lane.b32.xlu0 %v3516_v30, %s11041_s13  ;;  %v3350_v42 = vsel %vm1092_vm7, %v3347_v14, %v3349_v21  ;;  %v3401_v31 = vrot.slane %v3395_v12, 2  ;;  %v9034_v14 = vld [vmem:[#allocation4 + $0x8] sm:$0xff] }
 0x2ef   : > { %v3378_v29 = vrot.slane %v3371_v44, 6  ;;  %11331 = vst [vmem:[#allocation152_spill] sm:$0xff] %v9034_v14  ;;  %v3578_v5 = vmul.f32 %v9034_v14, %v11333_v0  ;;  %v11362_v0 = vld [vmem:[#allocation190_spill] sm:$0xff] }
 0x2f0   : > { %3326 = vrot.lane.b32.xlu1 %v3320_v60, %s11304_s25  ;;  %v8990_v53 = vpop.permute.xlu1 %2858  ;;  %v8992_v60 = vpop.permute.xlu0 %2829  ;;  %v3404_v33 = vsel %vm1033_vm2, %v3401_v31, %v3403_v24 }
 0x2f1   : > { %v3379_v61 = vsel %vm1092_vm7, %v3376_v13, %v3378_v29  ;;  %v5617_v29 = vld [vmem:[#allocation3] sm:$0xff] }
 0x2f2   : > { %4509 = vrot.lane.b32.xlu0 %v4501_v1, %s11041_s13  ;;  %v3580_v1 = vmul.f32 %v9036_v15, %v11334_v39  ;;  %s9547_s13 = scalar_lea.vmem [#allocation12], %s5261_s21  ;;  %s5461_s21 = sshll.u32 %s5942_s1, 8 }
 0x2f3   : > { %s10290_s23 = scalar_lea.hbm %s10514_s8, %s5461_s21  ;;  %s4972_s16 = sshll.u32 %s9547_s13, 4  ;;  %s10295_s16 = int_to_ptr.vmem [resolvable:$true] %s4972_s16 }
 0x2f4   : > { %3353 = vrot.lane.b32.xlu1 %v3348_v17, %s11304_s25  ;;  %v9006_v6 = vpop.permute.xlu1 %2878  ;;  %v9008_v40 = vpop.permute.xlu0 %2856  ;;  %v9046_v55 = vadd.f32 %v3580_v1, %v3578_v5  ;;  %v11359_v5 = vld [vmem:[#allocation183_spill] sm:$0xff]  ;;  %s5654_s12 = scalar_lea.vmem %s10295_s16, 256  ;;  %p5661_p13 = scmp.lt.s32.totalorder %s10295_s16, %s5659_s18 }
 0x2f5   : > { %p5655_p9 = scmp.ne.s32.totalorder %s10295_s16, %s5654_s12  ;;  %p5662_p0 = scmp.lt.s32.totalorder %s5660_s14, %s5654_s12 }
 0x2f6   : > { %3351 = vrot.lane.b32.xlu0 %v3346_v43, %s11304_s25  ;;  %v3402_v43 = vsel %vm1033_vm2, %v3400_v3, %v3401_v31  ;;  %11337 = vst [vmem:[#allocation201_spill] sm:$0xff] %v9046_v55  ;;  %v10833_v10 = vrot.slane %v9046_v55, 5 }
 0x2f7   : > { %p5656_p10 = pnand %p5655_p9, %p5961_p5  ;;  %p5663_p1 = por %p5662_p0, %p5661_p13 }
 0x2f8   : > { %3380 = vrot.lane.b32.xlu1 %v3377_v37, %s11304_s25  ;;  %v9013_v49 = vpop.permute.xlu1 %2900  ;;  %v9015_v9 = vpop.permute.xlu0 %2876 }
 0x2f9   : > { %p5657_p12 = pneg %p5656_p10 }
 0x2fa   : > { %3355 = vrot.lane.b32.xlu0 %v3350_v42, %s11304_s25 }
 0x2fb   : > { %p5664_p2 = pnand %p5663_p1, %p5657_p12 }
 0x2fc   : > { %3405 = vrot.lane.b32.xlu1 %v3400_v3, %s11304_s25  ;;  %v9021_v32 = vpop.permute.xlu1 %2904  ;;  %v9023_v30 = vpop.permute.xlu0 %2880 }
 0x2fd   : > { %11327 = vst [vmem:[#allocation155_spill] sm:$0xff] %v9021_v32  ;;  %11328 = vst [vmem:[#allocation165_spill] sm:$0xff] %v9023_v30 }
 0x2fe   : > { %3382 = vrot.lane.b32.xlu0 %v3379_v61, %s11304_s25 }
 0x300   : > { %3409 = vrot.lane.b32.xlu1 %v3404_v33, %s11304_s25  ;;  %v9028_v22 = vpop.permute.xlu1 %2926  ;;  %v9030_v2 = vpop.permute.xlu0 %2902  ;;  %v11358_v33 = vld [vmem:[#allocation182_spill] sm:$0xff] }
 0x301   : > { %11329 = vst [vmem:[#allocation101_spill] sm:$0xff] %v9028_v22  ;;  %11330 = vst [vmem:[#allocation175_spill] sm:$0xff] %v9030_v2  ;;  %v2184_v61 = vmul.f32 %v5617_v29, %v11358_v33  ;;  %v2189_v2 = vmul.f32 %v8485_v51, %v11359_v5 }
 0x302   : > { %3407 = vrot.lane.b32.xlu0 %v3402_v43, %s11304_s25  ;;  %v5618_v43 = vld [vmem:[#allocation3 + $0x30] sm:$0xff] }
 0x303   : > { %v2187_v1 = vmul.f32 %v5618_v43, %v11359_v5 }
 0x304   : > { %v9042_v17 = vpop.permute.xlu1 %2944  ;;  %v9044_v50 = vpop.permute.xlu0 %2924 }
 0x305   : > { %11335 = vst [vmem:[#allocation170_spill] sm:$0xff] %v9042_v17  ;;  %11336 = vst [vmem:[#allocation104_spill] sm:$0xff] %v9044_v50  ;;  %v2190_v39 = vadd.f32 %v2187_v1, %v2184_v61  ;;  %v11368_v1 = vld [vmem:[#allocation192_spill] sm:$0xff] }
 0x306   : > { %3589 = vrot.lane.b32.xlu0 %v10833_v10, %s10880_s2 }
 0x308   : > { %v9049_v8 = vpop.permute.xlu1 %2969  ;;  %v9051_v56 = vpop.permute.xlu0 %2928 }
 0x309   : > { %11338 = vst [vmem:[#allocation123_spill] sm:$0xff] %v9049_v8  ;;  %11339 = vst [vmem:[#allocation95_spill] sm:$0xff] %v9051_v56 }
 0x30c   : > { %v9056_v47 = vpop.permute.xlu1 %2973  ;;  %v9058_v13 = vpop.permute.xlu0 %2946 }
 0x30d   : > { %11340 = vst [vmem:[#allocation174_spill] sm:$0xff] %v9056_v47  ;;  %11341 = vst [vmem:[#allocation184_spill] sm:$0xff] %v9058_v13 }
 0x310   : > { %v9060_v7 = vpop.permute.xlu1 %3000  ;;  %v9062_v54 = vpop.permute.xlu0 %2971 }
 0x311   : > { %11342 = vst [vmem:[#allocation87_spill] sm:$0xff] %v9060_v7  ;;  %11343 = vst [vmem:[#allocation169_spill] sm:$0xff] %v9062_v54 }
 0x314   : > { %v9064_v45 = vpop.permute.xlu1 %3027  ;;  %v9066_v52 = vpop.permute.xlu0 %2998 }
 0x315   : > { %11344 = vst [vmem:[#allocation185_spill] sm:$0xff] %v9064_v45  ;;  %11345 = vst [vmem:[#allocation84_spill] sm:$0xff] %v9066_v52 }
 0x318   : > { %v9068_v38 = vpop.permute.xlu1 %3031  ;;  %v9070_v35 = vpop.permute.xlu0 %3002 }
 0x319   : > { %11346 = vst [vmem:[#allocation206_spill] sm:$0xff] %v9068_v38  ;;  %11347 = vst [vmem:[#allocation88_spill] sm:$0xff] %v9070_v35  ;;  %v11370_v38 = vld [vmem:[#allocation196_spill] sm:$0xff] }
 0x31a   : > { %v2278_v52 = vmul.f32 %v11324_v62, %v11370_v38  ;;  %v2277_v50 = vmul.f32 %v8450_v63, %v11370_v38 }
 0x31c   : > { %v9072_v19 = vpop.permute.xlu1 %3058  ;;  %v9074_v27 = vpop.permute.xlu0 %3029 }
 0x31d   : > { %11348 = vst [vmem:[#allocation177_spill] sm:$0xff] %v9072_v19  ;;  %11349 = vst [vmem:[#allocation103_spill] sm:$0xff] %v9074_v27  ;;  %v2193_v27 = vadd.f32 %v2190_v39, %v11368_v1  ;;  %v11369_v19 = vld [vmem:[#allocation195_spill] sm:$0xff] }
 0x31e   : > { %v2275_v35 = vmul.f32 %v11323_v48, %v11369_v19 }
 0x320   : > { %v9076_v37 = vpop.permute.xlu1 %3083  ;;  %v9078_v21 = vpop.permute.xlu0 %3056  ;;  %v2281_v17 = vadd.f32 %v2278_v52, %v2275_v35  ;;  %v2186_v52 = vmul.f32 %v11320_v28, %v11358_v33 }
 0x321   : > { %11350 = vst [vmem:[#allocation205_spill] sm:$0xff] %v9076_v37  ;;  %11351 = vst [vmem:[#allocation129_spill] sm:$0xff] %v9078_v21  ;;  %v5619_v21 = vld [vmem:[#allocation3 + $0x8] sm:$0xff]  ;;  %v5620_v37 = vld [vmem:[#allocation3 + $0x38] sm:$0xff] }
 0x322   : > { %v2185_v43 = vmul.f32 %v5619_v21, %v11358_v33 }
 0x324   : > { %v9080_v12 = vpop.permute.xlu1 %3110  ;;  %v9082_v44 = vpop.permute.xlu0 %3081 }
 0x325   : > { %11352 = vst [vmem:[#allocation102_spill] sm:$0xff] %v9080_v12  ;;  %11353 = vst [vmem:[#allocation173_spill] sm:$0xff] %v9082_v44  ;;  %v11363_v44 = vld [vmem:[#allocation191_spill] sm:$0xff]  ;;  %v11365_v12 = vld [vmem:[#allocation189_spill] sm:$0xff] }
 0x326   : > { %v2256_v29 = vmul.f32 %v11324_v62, %v11365_v12  ;;  %v2231_v45 = vmul.f32 %v8485_v51, %v11363_v44  ;;  %v2232_v39 = vmul.f32 %v8450_v63, %v11363_v44 }
 0x328   : > { %v9084_v24 = vpop.permute.xlu1 %3114  ;;  %v9086_v3 = vpop.permute.xlu0 %3085 }
 0x329   : > { %11354 = vst [vmem:[#allocation172_spill] sm:$0xff] %v9084_v24  ;;  %11355 = vst [vmem:[#allocation193_spill] sm:$0xff] %v9086_v3  ;;  %v2230_v24 = vmul.f32 %v11323_v48, %v11362_v0  ;;  %v2233_v3 = vmul.f32 %v11324_v62, %v11363_v44  ;;  %v2279_v62 = vmul.f32 %v8986_v4, %v11370_v38  ;;  %v11374_v44 = vld [vmem:[#allocation204_spill] sm:$0xff] }
 0x32a   : > { %v11376_v4 = vld [vmem:[#allocation200_spill] sm:$0xff] }
 0x32b   : > { %v9119_v54 = vadd.f32 %v2233_v3, %v2230_v24  ;;  %v2228_v24 = vmul.f32 %v11320_v28, %v11362_v0  ;;  %v2255_v3 = vmul.f32 %v8450_v63, %v11365_v12  ;;  %v2199_v8 = vmul.f32 %v5620_v37, %v11376_v4 }
 0x32c   : > { %v9088_v42 = vpop.permute.xlu1 %3135  ;;  %v9090_v31 = vpop.permute.xlu0 %3112 }
 0x32d   : > { %11356 = vst [vmem:[#allocation98_spill] sm:$0xff] %v9088_v42  ;;  %11357 = vst [vmem:[#allocation181_spill] sm:$0xff] %v9090_v31  ;;  %v11364_v42 = vld [vmem:[#allocation188_spill] sm:$0xff] }
 0x32e   : > { %v2253_v31 = vmul.f32 %v11323_v48, %v11364_v42 }
 0x330   : > { %v9094_v10 = vpop.permute.xlu1 %3162  ;;  %v9096_v55 = vpop.permute.xlu0 %3133  ;;  %v9121_v7 = vadd.f32 %v2256_v29, %v2253_v31  ;;  %v11373_v31 = vld [vmem:[#allocation203_spill] sm:$0xff] }
 0x331   : > { %11360 = vst [vmem:[#allocation168_spill] sm:$0xff] %v9094_v10  ;;  %11361 = vst [vmem:[#allocation180_spill] sm:$0xff] %v9096_v55  ;;  %v2188_v10 = vmul.f32 %v5620_v37, %v11359_v5  ;;  %v2208_v29 = vmul.f32 %v5619_v21, %v11373_v31 }
 0x333   : > { %v2191_v48 = vadd.f32 %v2188_v10, %v2185_v43  ;;  %v2211_v10 = vmul.f32 %v5620_v37, %v11374_v44  ;;  %v11375_v43 = vld [vmem:[#allocation199_spill] sm:$0xff] }
 0x334   : > { %v9108_v55 = vpop.permute.xlu1 %3187  ;;  %v9110_v61 = vpop.permute.xlu0 %3137  ;;  %v2196_v56 = vmul.f32 %v5619_v21, %v11375_v43  ;;  %v2251_v21 = vmul.f32 %v11320_v28, %v11364_v42 }
 0x335   : > { %11366 = vst [vmem:[#allocation202_spill] sm:$0xff] %v9108_v55  ;;  %11367 = vst [vmem:[#allocation156_spill] sm:$0xff] %v9110_v61  ;;  %v2276_v55 = vmul.f32 %v8982_v59, %v11369_v19  ;;  %v2229_v61 = vmul.f32 %v8444_v18, %v11362_v0  ;;  %v2252_v59 = vmul.f32 %v8444_v18, %v11364_v42 }
 0x336   : > { %v2274_v0 = vmul.f32 %v8444_v18, %v11369_v19  ;;  %v2266_v19 = vrot.slane %v9121_v7, 4  ;;  %v2194_v38 = vadd.f32 %v2191_v48, %v11368_v1  ;;  %v2214_v35 = vadd.f32 %v2211_v10, %v2208_v29 }
 0x337   : > { %v2235_v22 = vadd.f32 %v2232_v39, %v2229_v61  ;;  %v2282_v30 = vadd.f32 %v2279_v62, %v2276_v55  ;;  %v2202_v5 = vadd.f32 %v2199_v8, %v2196_v56  ;;  %v11379_v39 = vld [vmem:[#allocation198_spill] sm:$0xff]  ;;  %v2200_v8 = vmul.f32 %v8485_v51, %v11376_v4 }
 0x338   : > { %v9131_v13 = vpop.permute.xlu1 %3191  ;;  %v9133_v47 = vpop.permute.xlu0 %3164  ;;  %v2222_v55 = vmul.f32 %v8485_v51, %v11379_v39  ;;  %v2280_v62 = vadd.f32 %v2277_v50, %v2274_v0  ;;  %v2197_v29 = vmul.f32 %v11320_v28, %v11375_v43 }
 0x339   : > { %11371 = vst [vmem:[#allocation158_spill] sm:$0xff] %v9131_v13  ;;  %11372 = vst [vmem:[#allocation28_spill] sm:$0xff] %v9133_v47  ;;  %v2254_v47 = vmul.f32 %v8485_v51, %v11365_v12  ;;  %v2234_v13 = vadd.f32 %v2231_v45, %v2228_v24  ;;  %v2243_v45 = vrot.slane %v9119_v54, 4  ;;  %v2258_v12 = vadd.f32 %v2255_v3, %v2252_v59 }
 0x33a   : > { %v2287_v24 = vrot.slane %v2281_v17, 4  ;;  %v2241_v7 = vrot.slane %v2235_v22, 4  ;;  %v2289_v59 = vrot.slane %v2282_v30, 4  ;;  %v2213_v17 = vmul.f32 %v8450_v63, %v11374_v44 }
 0x33b   : > { %v2257_v61 = vadd.f32 %v2254_v47, %v2251_v21  ;;  %v2240_v42 = vrot.slane %v2234_v13, 4  ;;  %v2264_v56 = vrot.slane %v2258_v12, 4  ;;  %v2210_v47 = vmul.f32 %v8444_v18, %v11373_v31 }
 0x33c   : > { %v9157_v32 = vpop.permute.xlu0 %3189  ;;  %v2201_v30 = vmul.f32 %v8450_v63, %v11376_v4  ;;  %v2212_v22 = vmul.f32 %v8485_v51, %v11374_v44  ;;  %v2286_v10 = vrot.slane %v2280_v62, 4  ;;  %v2223_v12 = vmul.f32 %v8450_v63, %v11379_v39  ;;  %v11382_v62 = vld [vmem:[#allocation128_spill] sm:$0xff] }
 0x33d   : > { %11378 = vst [vmem:[#allocation160_spill] sm:$0xff] %v9157_v32  ;;  %v11380_v32 = vld [vmem:[#allocation197_spill] sm:$0xff]  ;;  %v2263_v50 = vrot.slane %v2257_v61, 4  ;;  %v2248_v33 = vadd.f32 %v2240_v42, %v2193_v27  ;;  %v2209_v4 = vmul.f32 %v11320_v28, %v11373_v31  ;;  %v2244_v27 = vsel %vm752_vm8, %v2241_v7, %v2243_v45  ;;  %v11381_v31 = vld [vmem:[#allocation120_spill] sm:$0xff] }
 0x33e   : > { %v9155_v37 = vpop.permute.xlu1 %3218  ;;  %v2220_v54 = vmul.f32 %v11320_v28, %v11380_v32  ;;  %v2221_v21 = vmul.f32 %v8444_v18, %v11380_v32  ;;  %v2203_v44 = vadd.f32 %v2200_v8, %v2197_v29  ;;  %v2290_v63 = vsel %vm752_vm8, %v2287_v24, %v2289_v59 }
 0x33f   : > { %11377 = vst [vmem:[#allocation29_spill] sm:$0xff] %v9155_v37  ;;  %v2192_v37 = vadd.f32 %v2189_v2, %v2186_v52  ;;  %v2198_v2 = vmul.f32 %v8444_v18, %v11375_v43  ;;  %v2267_v43 = vsel %vm752_vm8, %v2264_v56, %v2266_v19  ;;  %v2265_v61 = vsel %vm752_vm8, %v2263_v50, %v2264_v56 }
 0x340   : > { %v9170_v48 = vpop.permute.xlu0 %3216  ;;  %v2224_v13 = vadd.f32 %v2222_v55, %v2220_v54  ;;  %v2216_v18 = vadd.f32 %v2213_v17, %v2210_v47  ;;  %v2215_v55 = vadd.f32 %v2212_v22, %v2209_v4  ;;  %v2288_v28 = vsel %vm752_vm8, %v2286_v10, %v2287_v24  ;;  %v11383_v17 = vld [vmem:[#allocation83_spill] sm:$0xff]  ;;  %v11384_v24 = vld [vmem:[#allocation121_spill] sm:$0xff] }
 0x341   : > { %v2195_v0 = vadd.f32 %v2192_v37, %v11368_v1  ;;  %v2242_v37 = vsel %vm752_vm8, %v2240_v42, %v2241_v7  ;;  %v2204_v32 = vadd.f32 %v2201_v30, %v2198_v2  ;;  %v2348_v54 = vadd.f32 %v11382_v62, %v2248_v33  ;;  %v11386_v33 = vld [vmem:[#allocation124_spill] sm:$0xff]  ;;  %v11389_v62 = vld [vmem:[#allocation109_spill] sm:$0xff] }
 0x342   : > { %v9168_v3 = vpop.permute.xlu1 %3245  ;;  %v2320_v39 = vadd.f32 %v11381_v31, %v2224_v13  ;;  %v2225_v45 = vadd.f32 %v2223_v12, %v2221_v21  ;;  %v2272_v42 = vadd.f32 %v2267_v43, %v2203_v44  ;;  %v2249_v7 = vadd.f32 %v2242_v37, %v2194_v38  ;;  %v11385_v13 = vld [vmem:[#allocation141_spill] sm:$0xff]  ;;  %v11387_v21 = vld [vmem:[#allocation150_spill] sm:$0xff] }
 0x343   : > { %v2250_v1 = vadd.f32 %v2244_v27, %v2195_v0  ;;  %v2294_v56 = vadd.f32 %v2286_v10, %v2214_v35  ;;  %v2271_v47 = vadd.f32 %v2265_v61, %v2202_v5  ;;  %v2296_v2 = vadd.f32 %v2290_v63, %v2216_v18  ;;  %v11388_v27 = vld [vmem:[#allocation85_spill] sm:$0xff]  ;;  %v11390_v38 = vld [vmem:[#allocation86_spill] sm:$0xff]  ;;  %v11393_v61 = vld [vmem:[#allocation112_spill] sm:$0xff] }
 0x344   : > { %v9195_v51 = vpop.permute.xlu0 %3220  ;;  %v2321_v50 = vadd.f32 %v11383_v17, %v2225_v45  ;;  %v2273_v59 = vadd.f32 %v2266_v19, %v2204_v32  ;;  %v2295_v30 = vadd.f32 %v2288_v28, %v2215_v55  ;;  %v2378_v4 = vadd.f32 %v11385_v13, %v2272_v42  ;;  %v11391_v5 = vld [vmem:[#allocation138_spill] sm:$0xff]  ;;  %v11392_v37 = vld [vmem:[#allocation125_spill] sm:$0xff]  ;;  %v11395_v63 = vld [vmem:[#allocation148_spill] sm:$0xff] }
 0x345   : > { %v2350_v22 = vadd.f32 %v11384_v24, %v2250_v1  ;;  %v2349_v0 = vadd.f32 %v11386_v33, %v2249_v7  ;;  %v2377_v12 = vadd.f32 %v11387_v21, %v2271_v47  ;;  %v2400_v31 = vadd.f32 %v11388_v27, %v2294_v56  ;;  %v11394_v32 = vld [vmem:[#allocation137_spill] sm:$0xff]  ;;  %v11396_v45 = vld [vmem:[#allocation80_spill] sm:$0xff]  ;;  %v11402_v21 = vld [vmem:[#allocation91_spill] sm:$0xff] }
 0x346   : > { %v9193_v52 = vpop.permute.xlu1 %3249  ;;  %v2402_v44 = vadd.f32 %v11389_v62, %v2296_v2  ;;  %v2379_v35 = vadd.f32 %v11390_v38, %v2273_v59  ;;  %v2427_v10 = vadd.f32 %v11391_v5, %v2321_v50  ;;  %v2401_v1 = vadd.f32 %v11392_v37, %v2295_v30  ;;  %v11397_v7 = vld [vmem:[#allocation73_spill] sm:$0xff]  ;;  %v11398_v47 = vld [vmem:[#allocation108_spill] sm:$0xff]  ;;  %v11406_v5 = vld [vmem:[#allocation159_spill] sm:$0xff] }
 0x347   : > { %v2455_v18 = vadd.f32 %v11393_v61, %v2349_v0  ;;  %v2426_v55 = vadd.f32 %v11394_v32, %v2320_v39  ;;  %v2483_v28 = vadd.f32 %v11395_v63, %v2377_v12  ;;  %v2454_v42 = vadd.f32 %v11396_v45, %v2348_v54  ;;  %v11399_v2 = vld [vmem:[#allocation132_spill] sm:$0xff]  ;;  %v11400_v59 = vld [vmem:[#allocation117_spill] sm:$0xff]  ;;  %v11407_v37 = vld [vmem:[#allocation47_spill] sm:$0xff] }
 0x348   : > { %v9207_v29 = vpop.permute.xlu0 %3247  ;;  %v2485_v56 = vadd.f32 %v11397_v7, %v2379_v35  ;;  %v2456_v17 = vadd.f32 %v11398_v47, %v2350_v22  ;;  %v2484_v50 = vadd.f32 %v11399_v2, %v2378_v4  ;;  %v2513_v24 = vadd.f32 %v11400_v59, %v2401_v1  ;;  %v11401_v13 = vld [vmem:[#allocation149_spill] sm:$0xff]  ;;  %v11404_v62 = vld [vmem:[#allocation176_spill] sm:$0xff]  ;;  %v11409_v32 = vld [vmem:[#allocation171_spill] sm:$0xff] }
 0x349   : > { %v2538_v33 = vadd.f32 %v11401_v13, %v2426_v55  ;;  %v2512_v30 = vadd.f32 %v11402_v21, %v2400_v31  ;;  %v11403_v27 = vld [vmem:[#allocation145_spill] sm:$0xff]  ;;  %v2566_v39 = vadd.f32 %v11404_v62, %v2454_v42  ;;  %v2539_v54 = vadd.f32 %v11406_v5, %v2427_v10  ;;  %v11410_v63 = vld [vmem:[#allocation179_spill] sm:$0xff]  ;;  %v11413_v47 = vld [vmem:[#allocation166_spill] sm:$0xff] }
 0x34a   : > { %v9205_v8 = vpop.permute.xlu1 %3276  ;;  %v2514_v0 = vadd.f32 %v11403_v27, %v2402_v44  ;;  %v11405_v38 = vld [vmem:[#allocation153_spill] sm:$0xff]  ;;  %v2590_v35 = vadd.f32 %v11407_v37, %v2484_v50  ;;  %v2589_v31 = vadd.f32 %v11410_v63, %v2483_v28  ;;  %v11411_v45 = vld [vmem:[#allocation151_spill] sm:$0xff]  ;;  %v11414_v2 = vld [vmem:[#allocation178_spill] sm:$0xff] }
 0x34b   : > { %v2568_v12 = vadd.f32 %v11405_v38, %v2456_v17  ;;  %v11408_v4 = vld [vmem:[#allocation133_spill] sm:$0xff]  ;;  %v2618_v55 = vadd.f32 %v11409_v32, %v2512_v30  ;;  %v11412_v7 = vld [vmem:[#allocation163_spill] sm:$0xff]  ;;  %v2645_v17 = vadd.f32 %v11413_v47, %v2539_v54  ;;  %v2619_v10 = vadd.f32 %v11414_v2, %v2513_v24  ;;  %v11415_v50 = vld [vmem:[#allocation186_spill] sm:$0xff] }
 0x34c   : > { %v9220_v19 = vpop.permute.xlu0 %3274  ;;  %v2567_v1 = vadd.f32 %v11408_v4, %v2455_v18  ;;  %v2620_v44 = vadd.f32 %v11411_v45, %v2514_v0  ;;  %v2591_v42 = vadd.f32 %v11412_v7, %v2485_v56  ;;  %v11416_v13 = vld [vmem:[#allocation207_spill] sm:$0xff]  ;;  %v11417_v27 = vld [vmem:[#allocation134_spill] sm:$0xff]  ;;  %v11422_v56 = vld [vmem:[#allocation144_spill] sm:$0xff] }
 0x34d   : > { %v2644_v21 = vadd.f32 %v11416_v13, %v2538_v33  ;;  %v2701_v62 = vadd.f32 %v11417_v27, %v2589_v31  ;;  %v11418_v18 = vld [vmem:[#allocation162_spill] sm:$0xff]  ;;  %v11419_v30 = vld [vmem:[#allocation167_spill] sm:$0xff]  ;;  %v2702_v32 = vadd.f32 %v11422_v56, %v2590_v35  ;;  %v11423_v33 = vld [vmem:[#allocation36_spill] sm:$0xff] }
 0x34e   : > { %v9218_v43 = vpop.permute.xlu1 %3301  ;;  %v2673_v59 = vadd.f32 %v11415_v50, %v2567_v1  ;;  %v2672_v38 = vadd.f32 %v11418_v18, %v2566_v39  ;;  %v2703_v5 = vadd.f32 %v11419_v30, %v2591_v42  ;;  %v11420_v28 = vld [vmem:[#allocation107_spill] sm:$0xff]  ;;  %v11421_v0 = vld [vmem:[#allocation194_spill] sm:$0xff]  ;;  %v2730_v1 = vadd.f32 %v8875_v26, %v2618_v55  ;;  %v11424_v31 = vld [vmem:[#allocation37_spill] sm:$0xff] }
 0x34f   : > { %v2674_v37 = vadd.f32 %v11420_v28, %v2568_v12  ;;  %v2731_v4 = vadd.f32 %v11421_v0, %v2619_v10  ;;  %v2756_v24 = vadd.f32 %v8873_v41, %v2644_v21  ;;  %v3597_v39 = vmul.f32 %v9034_v14, %v11423_v33  ;;  %v9266_v12 = vld [vmem:[#allocation4 + $0x18] sm:$0xff]  ;;  %v9268_v7 = vld [vmem:[#allocation4 + $0x40] sm:$0xff]  ;;  %v11429_v28 = vld [vmem:[#allocation155_spill] sm:$0xff] }
 0x350   : > { %v9240_v22 = vpop.permute.xlu0 %3299  ;;  %v3599_v45 = vmul.f32 %v9036_v15, %v11424_v31  ;;  %v2778_v35 = vadd.f32 %v8895_v46, %v2672_v38  ;;  %v2732_v42 = vadd.f32 %v8897_v23, %v2620_v44  ;;  %v2757_v26 = vadd.f32 %v8918_v58, %v2645_v17  ;;  %v11425_v21 = vld [vmem:[#allocation65_spill] sm:$0xff]  ;;  %v11426_v27 = vld [vmem:[#allocation66_spill] sm:$0xff]  ;;  %v11428_v44 = vld [vmem:[#allocation79_spill] sm:$0xff] }
 0x351   : > { %v2780_v41 = vadd.f32 %v8916_v11, %v2674_v37  ;;  %v2808_v55 = vadd.f32 %v8941_v25, %v2702_v32  ;;  %v2779_v47 = vadd.f32 %v8943_v16, %v2673_v59  ;;  %v2836_v2 = vadd.f32 %v8954_v36, %v2730_v1  ;;  %v11427_v11 = vld [vmem:[#allocation78_spill] sm:$0xff]  ;;  %v11432_v0 = vld [vmem:[#allocation165_spill] sm:$0xff] }
 0x352   : > { %v9238_v61 = vpop.permute.xlu1 %3322  ;;  %v2807_v10 = vadd.f32 %v8956_v57, %v2701_v62  ;;  %v3623_v46 = vmul.f32 %v9266_v12, %v11425_v21  ;;  %v3625_v23 = vmul.f32 %v9268_v7, %v11426_v27  ;;  %v3642_v58 = vmul.f32 %v9266_v12, %v11427_v11  ;;  %v11430_v37 = vld [vmem:[#allocation38_spill] sm:$0xff]  ;;  %v11433_v32 = vld [vmem:[#allocation101_spill] sm:$0xff] }
 0x353   : > { %v3644_v25 = vmul.f32 %v9268_v7, %v11428_v44  ;;  %v2838_v16 = vadd.f32 %v8969_v20, %v2732_v42  ;;  %v2809_v36 = vadd.f32 %v8971_v34, %v2703_v5  ;;  %v2863_v57 = vadd.f32 %v8990_v53, %v2757_v26  ;;  %v11431_v53 = vld [vmem:[#allocation39_spill] sm:$0xff] }
 0x354   : > { %v9257_v63 = vpop.permute.xlu0 %3303  ;;  %v9292_v17 = vadd.f32 %v3599_v45, %v3597_v39  ;;  %v2837_v59 = vadd.f32 %v8992_v60, %v2731_v4  ;;  %v2886_v62 = vadd.f32 %v9006_v6, %v2779_v47  ;;  %v2862_v18 = vadd.f32 %v9008_v40, %v2756_v24  ;;  %v11435_v24 = vld [vmem:[#allocation170_spill] sm:$0xff]  ;;  %v11436_v39 = vld [vmem:[#allocation104_spill] sm:$0xff]  ;;  %v11437_v42 = vld [vmem:[#allocation123_spill] sm:$0xff] }
 0x355   : > { %v2909_v38 = vadd.f32 %v9013_v49, %v2807_v10  ;;  %v2885_v30 = vadd.f32 %v9015_v9, %v2778_v35  ;;  %v2911_v20 = vadd.f32 %v11429_v28, %v2809_v36  ;;  %v3660_v34 = vmul.f32 %v9034_v14, %v11430_v37  ;;  %v11434_v49 = vld [vmem:[#allocation175_spill] sm:$0xff]  ;;  %v11439_v10 = vld [vmem:[#allocation174_spill] sm:$0xff]  ;;  %v11446_v28 = vld [vmem:[#allocation169_spill] sm:$0xff] }
 0x356   : > { %v4014_v54 = vpop.permute.xlu1 %4013  ;;  %v3662_v5 = vmul.f32 %v9036_v15, %v11431_v53  ;;  %v2887_v56 = vadd.f32 %v11432_v0, %v2780_v41  ;;  %v2934_v60 = vadd.f32 %v11433_v32, %v2837_v59  ;;  %v9308_v40 = vadd.f32 %v3644_v25, %v3642_v58  ;;  %v11438_v26 = vld [vmem:[#allocation95_spill] sm:$0xff]  ;;  %v11443_v59 = vld [vmem:[#allocation44_spill] sm:$0xff]  ;;  %v11447_v32 = vld [vmem:[#allocation185_spill] sm:$0xff] }
 0x357   : > { %4016 = vst.msk [vmem:[#allocation5 + $0x10] sm:$0xff] %vm3522_vm13, %v4014_v54  ;;  %v9306_v54 = vadd.f32 %v3625_v23, %v3623_v46  ;;  %v2910_v9 = vadd.f32 %v11434_v49, %v2808_v55  ;;  %v2950_v1 = vadd.f32 %v11435_v24, %v2862_v18  ;;  %v2933_v45 = vadd.f32 %v11436_v39, %v2836_v2  ;;  %v11440_v46 = vld [vmem:[#allocation184_spill] sm:$0xff]  ;;  %v11441_v55 = vld [vmem:[#allocation81_spill] sm:$0xff]  ;;  %v11442_v2 = vld [vmem:[#allocation82_spill] sm:$0xff] }
 0x358   : > { %v9278_v13 = vpop.permute.xlu0 %3324  ;;  %v2978_v41 = vadd.f32 %v11437_v42, %v2885_v30  ;;  %v2935_v47 = vadd.f32 %v11438_v26, %v2838_v16  ;;  %v2951_v23 = vadd.f32 %v11440_v46, %v2863_v57  ;;  %v9320_v58 = vadd.f32 %v3662_v5, %v3660_v34  ;;  %v11445_v30 = vld [vmem:[#allocation87_spill] sm:$0xff]  ;;  %v11449_v24 = vld [vmem:[#allocation206_spill] sm:$0xff]  ;;  %v11450_v42 = vld [vmem:[#allocation88_spill] sm:$0xff] }
 0x359   : > { %v9324_v25 = vmul.f32 %v9034_v14, %v11441_v55  ;;  %v9328_v36 = vmul.f32 %v9036_v15, %v11442_v2  ;;  %v9332_v18 = vmul.f32 %v9266_v12, %v11443_v59  ;;  %v3008_v16 = vadd.f32 %v11445_v30, %v2910_v9  ;;  %v11451_v9 = vld [vmem:[#allocation177_spill] sm:$0xff]  ;;  %v11455_v15 = vld [vmem:[#allocation102_spill] sm:$0xff] }
 0x35a   : > { %v3520_v50 = vpop.permute.xlu1 %3519  ;;  %v2979_v0 = vadd.f32 %v11446_v28, %v2886_v62  ;;  %v3038_v39 = vadd.f32 %v11449_v24, %v2935_v47  ;;  %v3009_v26 = vadd.f32 %v11450_v42, %v2911_v20  ;;  %v11452_v62 = vld [vmem:[#allocation103_spill] sm:$0xff]  ;;  %v11453_v30 = vld [vmem:[#allocation205_spill] sm:$0xff]  ;;  %v11459_v24 = vld [vmem:[#allocation98_spill] sm:$0xff] }
 0x35b   : > { %3523 = vst.msk [vmem:[#allocation4 + $0x10] sm:$0xff] %vm3522_vm13, %v3520_v50  ;;  %v2980_v50 = vadd.f32 %v11439_v10, %v2887_v56  ;;  %11444 = vst [vmem:[#allocation164_spill] sm:$0xff] %v9332_v18  ;;  %v3063_v10 = vadd.f32 %v11451_v9, %v2951_v23  ;;  %v3037_v46 = vadd.f32 %v11452_v62, %v2934_v60  ;;  %v11454_v35 = vld [vmem:[#allocation129_spill] sm:$0xff]  ;;  %v11461_v18 = vld [vmem:[#allocation168_spill] sm:$0xff] }
 0x35c   : > { %v4019_v6 = vpop.permute.xlu0 %4018  ;;  %v3091_v28 = vadd.f32 %v11453_v30, %v2979_v0  ;;  %v3062_v34 = vadd.f32 %v11454_v35, %v2950_v1  ;;  %v11456_v14 = vld [vmem:[#allocation173_spill] sm:$0xff]  ;;  %v11462_v9 = vld [vmem:[#allocation180_spill] sm:$0xff] }
 0x35d   : > { %4021 = vst.msk [vmem:[#allocation5 + $0x38] sm:$0xff] %vm3522_vm13, %v4019_v6  ;;  %v11448_v6 = vld [vmem:[#allocation84_spill] sm:$0xff]  ;;  %v3143_v20 = vadd.f32 %v11459_v24, %v3037_v46  ;;  %v11460_v42 = vld [vmem:[#allocation181_spill] sm:$0xff] }
 0x35e   : > { %v4505_v4 = vpop.permute.xlu1 %4504  ;;  %v3007_v49 = vadd.f32 %v11448_v6, %v2909_v38  ;;  %v11458_v6 = vld [vmem:[#allocation193_spill] sm:$0xff]  ;;  %v3168_v23 = vadd.f32 %v11461_v18, %v3062_v34  ;;  %v11468_v18 = vld [vmem:[#allocation160_spill] sm:$0xff] }
 0x35f   : > { %4507 = vst.msk [vmem:[#allocation6 + $0x10] sm:$0xff] %vm3522_vm13, %v4505_v4  ;;  %v3036_v4 = vadd.f32 %v11447_v32, %v2933_v45  ;;  %v3090_v45 = vadd.f32 %v11456_v14, %v2978_v41  ;;  %v11457_v32 = vld [vmem:[#allocation172_spill] sm:$0xff]  ;;  %v3092_v47 = vadd.f32 %v11458_v6, %v2980_v50  ;;  %v3197_v34 = vadd.f32 %v11468_v18, %v3091_v28 }
 0x360   : > { %v3526_v57 = vpop.permute.xlu0 %3525  ;;  %v3119_v5 = vadd.f32 %v11455_v15, %v3007_v49  ;;  %v3121_v38 = vadd.f32 %v11457_v32, %v3009_v26  ;;  %v11463_v15 = vld [vmem:[#allocation202_spill] sm:$0xff]  ;;  %v11464_v14 = vld [vmem:[#allocation156_spill] sm:$0xff] }
 0x361   : > { %3528 = vst.msk [vmem:[#allocation4 + $0x38] sm:$0xff] %vm3522_vm13, %v3526_v57  ;;  %v3120_v57 = vadd.f32 %v11460_v42, %v3008_v16  ;;  %v3142_v60 = vadd.f32 %v11462_v9, %v3036_v4  ;;  %v3196_v35 = vadd.f32 %v11463_v15, %v3090_v45  ;;  %v3144_v41 = vadd.f32 %v11464_v14, %v3038_v39  ;;  %v11465_v49 = vld [vmem:[#allocation158_spill] sm:$0xff]  ;;  %v11466_v50 = vld [vmem:[#allocation28_spill] sm:$0xff]  ;;  %v11467_v16 = vld [vmem:[#allocation29_spill] sm:$0xff] }
 0x362   : > { %v9336_v56 = vpop.permute.xlu1 %3326  ;;  %v9357_v62 = vld [vmem:[#allocation4 + $0x10] sm:$0xff]  ;;  %v3198_v26 = vadd.f32 %v11465_v49, %v3092_v47  ;;  %v3169_v30 = vadd.f32 %v11466_v50, %v3063_v10  ;;  %v3225_v32 = vadd.f32 %v9170_v48, %v3119_v5  ;;  %v3280_v45 = vadd.f32 %v9220_v19, %v3168_v23  ;;  %v11470_v23 = vld [vmem:[#allocation77_spill] sm:$0xff] }
 0x363   : > { %v3226_v46 = vadd.f32 %v11467_v16, %v3120_v57  ;;  %v3254_v4 = vadd.f32 %v9168_v3, %v3142_v60  ;;  %v3256_v6 = vadd.f32 %v9193_v52, %v3144_v41  ;;  %v3598_v39 = vmul.f32 %v9357_v62, %v11423_v33  ;;  %v11469_v47 = vld [vmem:[#allocation76_spill] sm:$0xff] }
 0x364   : > { %v4510_v1 = vpop.permute.xlu0 %4509  ;;  %v3579_v10 = vmul.f32 %v9357_v62, %v11469_v47  ;;  %v3227_v24 = vadd.f32 %v9195_v51, %v3121_v38  ;;  %v9378_v42 = vadd.f32 %v9238_v61, %v3225_v32  ;;  %v3308_v28 = vadd.f32 %v9240_v22, %v3196_v35  ;;  %v11471_v51 = vld [vmem:[#allocation67_spill] sm:$0xff]  ;;  %v11472_v38 = vld [vmem:[#allocation68_spill] sm:$0xff] }
 0x365   : > { %4512 = vst.msk [vmem:[#allocation6 + $0x38] sm:$0xff] %vm3522_vm13, %v4510_v1  ;;  %v3622_v52 = vmul.f32 %v9357_v62, %v11425_v21  ;;  %v3612_v61 = vmul.f32 %v9357_v62, %v11471_v51  ;;  %v3641_v1 = vmul.f32 %v9357_v62, %v11427_v11  ;;  %v3281_v50 = vadd.f32 %v9205_v8, %v3169_v30 }
 0x366   : > { %v9359_v0 = vpop.permute.xlu1 %3353  ;;  %v3420_v16 = vrot.slane %v9378_v42, 3  ;;  %v3332_v18 = vadd.f32 %v9278_v13, %v3226_v46  ;;  %v11473_v13 = vrot.slane %v9292_v17, 5 }
 0x368   : > { %v9381_v3 = vld [vmem:[#allocation4 + $0x38] sm:$0xff]  ;;  %v3352_v5 = vpop.permute.xlu0 %3351 }
 0x369   : > { %v3600_v57 = vmul.f32 %v9381_v3, %v11424_v31  ;;  %v3581_v9 = vmul.f32 %v9381_v3, %v11470_v23  ;;  %v3624_v22 = vmul.f32 %v9381_v3, %v11426_v27  ;;  %v3613_v60 = vmul.f32 %v9381_v3, %v11472_v38 }
 0x36a   : > { %v3381_v48 = vpop.permute.xlu1 %3380  ;;  %v3643_v15 = vmul.f32 %v9381_v3, %v11428_v44  ;;  %v3360_v14 = vadd.f32 %v3352_v5, %v3254_v4  ;;  %v3661_v44 = vmul.f32 %v9357_v62, %v11430_v37  ;;  %v3663_v8 = vmul.f32 %v9381_v3, %v11431_v53 }
 0x36b   : > { %v3386_v19 = vadd.f32 %v3381_v48, %v3280_v45  ;;  %v3602_v41 = vadd.f32 %v3600_v57, %v3598_v39  ;;  %v3583_v49 = vadd.f32 %v3581_v9, %v3579_v10  ;;  %v3626_v48 = vadd.f32 %v3624_v22, %v3622_v52  ;;  %v11474_v57 = vld [vmem:[#allocation201_spill] sm:$0xff] }
 0x36c   : > { %v3356_v45 = vpop.permute.xlu0 %3355  ;;  %v3614_v4 = vadd.f32 %v3613_v60, %v3612_v61  ;;  %v3645_v39 = vadd.f32 %v3643_v15, %v3641_v1  ;;  %v3309_v5 = vadd.f32 %v9218_v43, %v3197_v34  ;;  %v3333_v52 = vadd.f32 %v9336_v56, %v3227_v24 }
 0x36d   : > { %v3433_v35 = vrot.slane %v3386_v19, 3  ;;  %v3606_v11 = vrot.slane %v3602_v41, 5  ;;  %v3587_v19 = vrot.slane %v3583_v49, 5  ;;  %v3630_v42 = vrot.slane %v3626_v48, 1 }
 0x36e   : > { %v3406_v32 = vpop.permute.xlu1 %3405  ;;  %v11475_v9 = vrot.slane %v11474_v57, 5  ;;  %v3665_v43 = vadd.f32 %v3663_v8, %v3661_v44  ;;  %v3676_v56 = vmul.f32 %v9357_v62, %v11441_v55  ;;  %v11476_v1 = vrot.slane %v9306_v54, 1  ;;  %v11481_v57 = vld [vmem:[#allocation69_spill] sm:$0xff] }
 0x36f   : > { %v9402_v27 = vadd.f32 %v3433_v35, %v3360_v14  ;;  %v3414_v21 = vadd.f32 %v3406_v32, %v3308_v28  ;;  %v3607_v46 = vsel %vm1238_vm3, %v11473_v13, %v3606_v11  ;;  %v3255_v28 = vadd.f32 %v9207_v29, %v3143_v20 }
 0x370   : > { %3608 = vrot.lane.b32.xlu0 %v3607_v46, %s10880_s2  ;;  %v3588_v61 = vsel %vm1238_vm3, %v11475_v9, %v3587_v19  ;;  %v3383_v22 = vpop.permute.xlu0 %3382  ;;  %v3362_v29 = vadd.f32 %v3356_v45, %v3256_v6  ;;  %v3616_v20 = vrot.slane %v3614_v4, 5  ;;  %v3632_v15 = vsel %vm1324_vm4, %v3630_v42, %v11476_v1  ;;  %v11477_v19 = vld [vmem:[#allocation45_spill] sm:$0xff]  ;;  %v11479_v42 = vld [vmem:[#allocation42_spill] sm:$0xff] }
 0x371   : > { %v3445_v30 = vrot.slane %v9402_v27, 6  ;;  %v3428_v10 = vadd.f32 %v3420_v16, %v3414_v21  ;;  %v3310_v21 = vadd.f32 %v9257_v63, %v3198_v26  ;;  %v3421_v27 = vrot.slane %v3332_v18, 3  ;;  %3591 = vrot.lane.b32.xlu1 %v3588_v61, %s10880_s2 }
 0x372   : > { %v3410_v60 = vpop.permute.xlu1 %3409  ;;  %v3387_v11 = vadd.f32 %v3383_v22, %v3281_v50  ;;  %v3649_v14 = vrot.slane %v3645_v39, 1  ;;  %v3423_v63 = vrot.slane %v3333_v52, 3  ;;  %v3361_v26 = vadd.f32 %v9359_v0, %v3255_v28 }
 0x373   : > { %v3453_v17 = vadd.f32 %v3445_v30, %v3428_v10  ;;  %v3416_v41 = vadd.f32 %v3410_v60, %v3310_v21  ;;  %v3678_v44 = vmul.f32 %v9381_v3, %v11442_v2  ;;  %v3668_v45 = vrot.slane %v9320_v58, 2  ;;  %v11482_v21 = vld [vmem:[#allocation43_spill] sm:$0xff] }
 0x374   : > { %v3434_v24 = vrot.slane %v3387_v11, 3  ;;  %3633 = vrot.lane.b32.xlu0 %v3632_v15, %s10880_s2  ;;  %v3408_v49 = vpop.permute.xlu0 %3407  ;;  %v3669_v48 = vrot.slane %v3665_v43, 2  ;;  %v3726_v0 = vmul.f32 %v9268_v7, %v11477_v19  ;;  %v3422_v39 = vsel %vm856_vm6, %v3420_v16, %v3421_v27  ;;  %v11483_v11 = vld [vmem:[#allocation70_spill] sm:$0xff]  ;;  %v11485_v15 = vld [vmem:[#allocation164_spill] sm:$0xff] }
 0x375   : > { %v5396_v34 = vmul.f32 -1.442695, %v3453_v17  ;;  %3617 = vrot.lane.b32.xlu1 %v3616_v20, %s10880_s2  ;;  %v3415_v18 = vadd.f32 %v3408_v49, %v3309_v5  ;;  %v11478_v8 = vrot.slane %v9308_v40, 1  ;;  %v3424_v13 = vsel %vm856_vm6, %v3421_v27, %v3423_v63 }
 0x376   : > { %v3435_v6 = vsel %vm856_vm6, %v3433_v35, %v3434_v24  ;;  %v3441_v50 = vadd.f32 %v3434_v24, %v3362_v29  ;;  %v3679_v35 = vadd.f32 %v9328_v36, %v9324_v25  ;;  %v3680_v58 = vadd.f32 %v3678_v44, %v3676_v56 }
 0x377   : > { %5555 = vpow2.f32 %v5396_v34  ;;  %v3440_v32 = vadd.f32 %v3435_v6, %v3361_v26  ;;  %v3651_v10 = vsel %vm1324_vm4, %v3649_v14, %v11478_v8  ;;  %v3704_v28 = vmul.f32 %v9357_v62, %v11479_v42  ;;  %v11486_v26 = vld [vmem:[#allocation55_spill] sm:$0xff]  ;;  %v11488_v6 = vld [vmem:[#allocation56_spill] sm:$0xff] }
 0x378   : > { %v3448_v4 = vrot.slane %v3441_v50, 6  ;;  %3652 = vrot.lane.b32.xlu0 %v3651_v10, %s10880_s2  ;;  %v3430_v5 = vadd.f32 %v3424_v13, %v3416_v41  ;;  %v3429_v52 = vadd.f32 %v3422_v39, %v3415_v18  ;;  %v11480_v16 = vmov %v11476_v1  ;;  %v11487_v41 = vld [vmem:[#allocation152_spill] sm:$0xff]  ;;  %v11489_v50 = vld [vmem:[#allocation161_spill] sm:$0xff] }
 0x379   : > { %v3446_v46 = vrot.slane %v3440_v32, 6  ;;  %3635 = vrot.lane.b32.xlu1 %v11480_v16, %s10880_s2  ;;  %v3694_v9 = vmul.f32 %v9357_v62, %v11481_v57  ;;  %v3723_v25 = vmul.f32 %v9357_v62, %v11443_v59  ;;  %v3670_v22 = vsel %vm1033_vm2, %v3668_v45, %v3669_v48 }
 0x37a   : > { %v3706_v27 = vmul.f32 %v9381_v3, %v11482_v21  ;;  %v3695_v54 = vmul.f32 %v9381_v3, %v11483_v11  ;;  %v3725_v29 = vmul.f32 %v9381_v3, %v11477_v19  ;;  %v3684_v20 = vrot.slane %v3680_v58, 2 }
 0x37b   : > { %v3449_v36 = vsel %vm1092_vm7, %v3446_v46, %v3448_v4  ;;  %v3447_v61 = vsel %vm1092_vm7, %v3445_v30, %v3446_v46  ;;  %v3683_v43 = vrot.slane %v3679_v35, 2  ;;  %v3705_v30 = vmul.f32 %v9266_v12, %v11479_v42  ;;  %v11490_v35 = vld [vmem:[#allocation53_spill] sm:$0xff]  ;;  %v11491_v46 = vld [vmem:[#allocation54_spill] sm:$0xff] }
 0x37c   : > { %v3455_v17 = vadd.f32 %v3449_v36, %v3430_v5  ;;  %v3454_v60 = vadd.f32 %v3447_v61, %v3429_v52  ;;  %3671 = vrot.lane.b32.xlu0 %v3670_v22, %s10882_s30  ;;  %v3707_v56 = vmul.f32 %v9268_v7, %v11482_v21  ;;  %v11484_v1 = vmov %v11478_v8  ;;  %v11492_v61 = vld [vmem:[#allocation71_spill] sm:$0xff] }
 0x37d   : > { %3654 = vrot.lane.b32.xlu1 %v11484_v1, %s10880_s2  ;;  %v3728_v14 = vadd.f32 %v3726_v0, %v11485_v15  ;;  %v3708_v63 = vadd.f32 %v3706_v27, %v3704_v28  ;;  %v3738_v49 = vmul.f32 %v11487_v41, %v11486_v26  ;;  %v3739_v44 = vmul.f32 %v9357_v62, %v11486_v26  ;;  %v11493_v27 = vld [vmem:[#allocation72_spill] sm:$0xff]  ;;  %v9504_v15 = vld [vmem:[#allocation6 + $0x38] sm:$0xff] }
 0x37e   : > { %v5398_v34 = vmul.f32 -1.442695, %v3455_v17  ;;  %v5397_v24 = vmul.f32 -1.442695, %v3454_v60  ;;  %v3740_v18 = vmul.f32 %v11489_v50, %v11488_v6  ;;  %v3696_v45 = vadd.f32 %v3695_v54, %v3694_v9  ;;  %v9502_v1 = vld [vmem:[#allocation6 + $0x10] sm:$0xff] }
 0x37f   : > { %v3727_v48 = vadd.f32 %v3725_v29, %v3723_v25  ;;  %v3741_v40 = vmul.f32 %v9381_v3, %v11488_v6  ;;  %v3685_v0 = vsel %vm1033_vm2, %v3683_v43, %v3684_v20  ;;  %v3709_v4 = vadd.f32 %v3707_v56, %v3705_v30 }
 0x380   : > { %5557 = vpow2.f32 %v5398_v34  ;;  %3688 = vrot.lane.b32.xlu0 %v3684_v20, %s10882_s30  ;;  %v3712_v8 = vrot.slane %v3708_v63, 6  ;;  %v3742_v10 = vadd.f32 %v3740_v18, %v3738_v49  ;;  %v3757_v13 = vmul.f32 %v11487_v41, %v11490_v35  ;;  %v9509_v18 = vld [vmem:[#allocation5 + $0x10] sm:$0xff] }
 0x381   : > { %v5556_v32 = vpop.eup %5555  ;;  %5559 = vpow2.f32 %v5397_v24  ;;  %3686 = vrot.lane.b32.xlu1 %v3685_v0, %s10882_s30  ;;  %v3759_v58 = vmul.f32 %v11489_v50, %v11491_v46  ;;  %v3698_v28 = vrot.slane %v3696_v45, 6  ;;  %v3731_v5 = vrot.slane %v3727_v48, 6 }
 0x382   : > { %v3465_v39 = vadd.f32 1.0, %v5556_v32  ;;  %v3732_v52 = vrot.slane %v3728_v14, 6  ;;  %v3743_v16 = vadd.f32 %v3741_v40, %v3739_v44  ;;  %v3713_v9 = vrot.slane %v3709_v4, 6  ;;  %v11494_v44 = vld [vmem:[#allocation57_spill] sm:$0xff]  ;;  %v11495_v40 = vld [vmem:[#allocation58_spill] sm:$0xff] }
 0x383   : > { %v3758_v25 = vmul.f32 %v9357_v62, %v11490_v35  ;;  %v3760_v36 = vmul.f32 %v9381_v3, %v11491_v46  ;;  %v3787_v22 = vmul.f32 %v9266_v12, %v11492_v61  ;;  %v3789_v17 = vmul.f32 %v9268_v7, %v11493_v27  ;;  %v9514_v4 = vld [vmem:[#allocation5 + $0x8] sm:$0xff] }
 0x384   : > { %3715 = vrot.lane.b32.xlu0 %v3712_v8, %s10882_s30  ;;  %5561 = vrcp.f32 %v3465_v39  ;;  %v3746_v60 = vrot.slane %v3742_v10, 7  ;;  %v3761_v54 = vadd.f32 %v3759_v58, %v3757_v13  ;;  %v3733_v29 = vsel %vm1092_vm7, %v3731_v5, %v3732_v52  ;;  %v9516_v39 = vld [vmem:[#allocation5 + $0x30] sm:$0xff] }
 0x385   : > { %3699 = vrot.lane.b32.xlu1 %v3698_v28, %s10882_s30  ;;  %v3747_v20 = vrot.slane %v3743_v16, 7  ;;  %v3786_v43 = vmul.f32 %v9357_v62, %v11492_v61  ;;  %v3788_v30 = vmul.f32 %v9381_v3, %v11493_v27  ;;  %v3714_v56 = vsel %vm1092_vm7, %v3712_v8, %v3713_v9  ;;  %v9518_v8 = vld [vmem:[#allocation5 + $0x38] sm:$0xff] }
 0x386   : > { %v3762_v34 = vadd.f32 %v3760_v36, %v3758_v25  ;;  %v3791_v14 = vadd.f32 %v3789_v17, %v3787_v22  ;;  %v3765_v49 = vrot.slane %v3761_v54, 3  ;;  %v3776_v50 = vmul.f32 %v9357_v62, %v11494_v44 }
 0x387   : > { %v3748_v45 = vsel %vm828_vm1, %v3746_v60, %v3747_v20  ;;  %v3790_v48 = vadd.f32 %v3788_v30, %v3786_v43  ;;  %v3777_v0 = vmul.f32 %v9381_v3, %v11495_v40  ;;  %v4596_v13 = vmul.f32 %v9502_v1, %v11471_v51 }
 0x388   : > { %3734 = vrot.lane.b32.xlu0 %v3733_v29, %s10882_s30  ;;  %v3766_v10 = vrot.slane %v3762_v34, 3  ;;  %v4597_v58 = vmul.f32 %v9504_v15, %v11472_v38  ;;  %v3795_v28 = vrot.slane %v3791_v14, 3  ;;  %v4105_v5 = vmul.f32 %v9509_v18, %v11471_v51 }
 0x389   : > { %3717 = vrot.lane.b32.xlu1 %v3714_v56, %s10882_s30  ;;  %v4071_v52 = vmul.f32 %v9514_v4, %v11469_v47  ;;  %v4073_v16 = vmul.f32 %v9516_v39, %v11470_v23  ;;  %v4072_v9 = vmul.f32 %v9509_v18, %v11469_v47  ;;  %v3794_v36 = vrot.slane %v3790_v48, 3 }
 0x38a   : > { %v5558_v24 = vpop.eup %5557  ;;  %v3778_v22 = vadd.f32 %v3777_v0, %v3776_v50  ;;  %v4106_v17 = vmul.f32 %v9518_v8, %v11472_v38  ;;  %v3767_v51 = vsel %vm856_vm6, %v3765_v49, %v3766_v10  ;;  %v4598_v54 = vadd.f32 %v4597_v58, %v4596_v13  ;;  %v9562_v13 = vld [vmem:[#allocation6 + $0x8] sm:$0xff]  ;;  %v9564_v58 = vld [vmem:[#allocation6 + $0x30] sm:$0xff] }
 0x38b   : > { %v5560_v63 = vpop.eup %5559  ;;  %v3467_v41 = vadd.f32 1.0, %v5558_v24  ;;  %v4168_v29 = vmul.f32 %v9514_v4, %v11441_v55  ;;  %v4170_v20 = vmul.f32 %v9516_v39, %v11442_v2  ;;  %v4075_v43 = vadd.f32 %v4073_v16, %v4071_v52 }
 0x38c   : > { %v3466_v32 = vadd.f32 1.0, %v5560_v63  ;;  %3751 = vrot.lane.b32.xlu0 %v3748_v45, %s11215_s27  ;;  %v3796_v38 = vsel %vm856_vm6, %v3794_v36, %v3795_v28  ;;  %v3780_v30 = vrot.slane %v3778_v22, 3  ;;  %v4107_v56 = vadd.f32 %v4106_v17, %v4105_v5 }
 0x38d   : > { %5563 = vrcp.f32 %v3467_v41  ;;  %3749 = vrot.lane.b32.xlu1 %v3746_v60, %s11215_s27  ;;  %v4074_v60 = vmul.f32 %v9518_v8, %v11470_v23  ;;  %v4600_v24 = vrot.slane %v4598_v54, 5  ;;  %v4169_v14 = vmul.f32 %v9509_v18, %v11441_v55 }
 0x38e   : > { %5565 = vrcp.f32 %v3466_v32  ;;  %v5562_v25 = vpop.eup %5561  ;;  %v4171_v63 = vmul.f32 %v9518_v8, %v11442_v2  ;;  %v4172_v41 = vadd.f32 %v4170_v20, %v4168_v29  ;;  %v4090_v50 = vmul.f32 %v9514_v4, %v11423_v33  ;;  %v9589_v29 = vld [vmem:[#allocation5 + $0x18] sm:$0xff]  ;;  %v9591_v20 = vld [vmem:[#allocation5 + $0x40] sm:$0xff] }
 0x38f   : > { %3474 = vst.msk [vmem:[%s9547_s13 - $0x7] sm:$0x80] %vm2081_vm9, %v5562_v25  ;;  %v4076_v34 = vadd.f32 %v4074_v60, %v4072_v9  ;;  %v4092_v32 = vmul.f32 %v9516_v39, %v11424_v31  ;;  %v4109_v48 = vrot.slane %v4107_v56, 5  ;;  %v4079_v0 = vrot.slane %v4075_v43, 5  ;;  %11496 = vst [vmem:[#allocation32_spill] sm:$0xff] %v9591_v20 }
 0x390   : > { %3770 = vrot.lane.b32.xlu0 %v3766_v10, %s11215_s27  ;;  %v4173_v28 = vadd.f32 %v4171_v63, %v4169_v14  ;;  %v4091_v5 = vmul.f32 %v9509_v18, %v11423_v33  ;;  %v4093_v52 = vmul.f32 %v9518_v8, %v11424_v31  ;;  %v4176_v16 = vrot.slane %v4172_v41, 2 }
 0x391   : > { %3768 = vrot.lane.b32.xlu1 %v3767_v51, %s11215_s27  ;;  %v4080_v10 = vrot.slane %v4076_v34, 5  ;;  %v4094_v9 = vadd.f32 %v4092_v32, %v4090_v50  ;;  %v4562_v25 = vmul.f32 %v9562_v13, %v11469_v47  ;;  %v4564_v36 = vmul.f32 %v9564_v58, %v11470_v23  ;;  %v11497_v34 = vld [vmem:[#allocation78_spill] sm:$0xff] }
 0x392   : > { %v4659_v22 = vmul.f32 %v9562_v13, %v11441_v55  ;;  %v4660_v60 = vmul.f32 %v9502_v1, %v11441_v55  ;;  %v4661_v51 = vmul.f32 %v9564_v58, %v11442_v2  ;;  %v4662_v54 = vmul.f32 %v9504_v15, %v11442_v2 }
 0x393   : > { %v4081_v17 = vsel %vm1238_vm3, %v4079_v0, %v4080_v10  ;;  %v4177_v43 = vrot.slane %v4173_v28, 2  ;;  %v4565_v55 = vmul.f32 %v9504_v15, %v11470_v23  ;;  %v4566_v56 = vadd.f32 %v4564_v36, %v4562_v25 }
 0x394   : > { %3797 = vrot.lane.b32.xlu0 %v3796_v38, %s11215_s27  ;;  %v4095_v38 = vadd.f32 %v4093_v52, %v4091_v5  ;;  %v4135_v2 = vmul.f32 %v9589_v29, %v11497_v34  ;;  %v4663_v63 = vadd.f32 %v4661_v51, %v4659_v22  ;;  %v4664_v41 = vadd.f32 %v4662_v54, %v4660_v60 }
 0x395   : > { %3781 = vrot.lane.b32.xlu1 %v3780_v30, %s11215_s27  ;;  %v4563_v30 = vmul.f32 %v9502_v1, %v11469_v47  ;;  %v4178_v50 = vsel %vm1033_vm2, %v4176_v16, %v4177_v43  ;;  %v4098_v23 = vrot.slane %v4094_v9, 5  ;;  %v4231_v16 = vmul.f32 %v9514_v4, %v11486_v26 }
 0x396   : > { %v4099_v32 = vrot.slane %v4095_v38, 5  ;;  %v4667_v10 = vrot.slane %v4663_v63, 2  ;;  %v4668_v28 = vrot.slane %v4664_v41, 2  ;;  %v4233_v9 = vmul.f32 %v9516_v39, %v11488_v6  ;;  %v11500_v63 = vld [vmem:[#allocation66_spill] sm:$0xff] }
 0x397   : > { %v5564_v49 = vpop.eup %5563  ;;  %v4581_v36 = vmul.f32 %v9562_v13, %v11423_v33  ;;  %v4583_v22 = vmul.f32 %v9564_v58, %v11424_v31  ;;  %v4582_v54 = vmul.f32 %v9502_v1, %v11423_v33 }
 0x398   : > { %v5566_v45 = vpop.eup %5565  ;;  %3476 = vst.msk [vmem:[%s9547_s13 + $0x9] sm:$0x7f] %vm2085_vm11, %v5564_v49  ;;  %4601 = vrot.lane.b32.xlu0 %v4600_v24, %s10880_s2  ;;  %v11498_v24 = vld [vmem:[#allocation79_spill] sm:$0xff]  ;;  %v4134_v49 = vmul.f32 %v9509_v18, %v11497_v34  ;;  %v4100_v52 = vsel %vm1238_vm3, %v4098_v23, %v4099_v32  ;;  %v4669_v60 = vsel %vm1033_vm2, %v4667_v10, %v4668_v28 }
 0x399   : > { %3475 = vst.msk [vmem:[%s9547_s13 + $0x1] sm:$0xff] %vm2083_vm10, %v5566_v45  ;;  %4110 = vrot.lane.b32.xlu1 %v4109_v48, %s10880_s2  ;;  %v4137_v14 = vmul.f32 %v9591_v20, %v11498_v24  ;;  %v4136_v47 = vmul.f32 %v9518_v8, %v11498_v24  ;;  %v4567_v45 = vadd.f32 %v4565_v55, %v4563_v30  ;;  %v4570_v48 = vrot.slane %v4566_v56, 5 }
 0x39a   : > { %v4232_v30 = vmul.f32 %v9509_v18, %v11486_v26  ;;  %v4234_v55 = vmul.f32 %v9518_v8, %v11488_v6  ;;  %v4235_v56 = vadd.f32 %v4233_v9, %v4231_v16  ;;  %v4625_v9 = vmul.f32 %v9502_v1, %v11497_v34 }
 0x39b   : > { %v4138_v5 = vadd.f32 %v4136_v47, %v4134_v49  ;;  %v4571_v25 = vrot.slane %v4567_v45, 5  ;;  %v9638_v47 = vld [vmem:[#allocation6 + $0x18] sm:$0xff]  ;;  %v4117_v45 = vmul.f32 %v9518_v8, %v11500_v63 }
 0x39c   : > { %4084 = vrot.lane.b32.xlu0 %v4081_v17, %s10880_s2  ;;  %v4236_v23 = vadd.f32 %v4234_v55, %v4232_v30 }
 0x39d   : > { %4082 = vrot.lane.b32.xlu1 %v4079_v0, %s10880_s2  ;;  %v4139_v0 = vadd.f32 %v4137_v14, %v4135_v2  ;;  %v4142_v51 = vrot.slane %v4138_v5, 1  ;;  %v4572_v38 = vsel %vm1238_vm3, %v4570_v48, %v4571_v25  ;;  %v4585_v2 = vadd.f32 %v4583_v22, %v4581_v36  ;;  %v11499_v14 = vld [vmem:[#allocation65_spill] sm:$0xff] }
 0x39e   : > { %v4116_v33 = vmul.f32 %v9589_v29, %v11499_v14  ;;  %v4115_v32 = vmul.f32 %v9509_v18, %v11499_v14  ;;  %v4626_v5 = vmul.f32 %v9638_v47, %v11497_v34  ;;  %v4153_v25 = vmul.f32 %v9514_v4, %v11430_v37 }
 0x39f   : > { %v4143_v17 = vrot.slane %v4139_v0, 1  ;;  %v4589_v0 = vrot.slane %v4585_v2, 5  ;;  %v4627_v36 = vmul.f32 %v9504_v15, %v11498_v24  ;;  %v4240_v22 = vrot.slane %v4236_v23, 7 }
 0x3a0   : > { %4181 = vrot.lane.b32.xlu0 %v4177_v43, %s10882_s30  ;;  %v4584_v43 = vmul.f32 %v9504_v15, %v11424_v31  ;;  %v4118_v31 = vmul.f32 %v9591_v20, %v11500_v63 }
 0x3a1   : > { %4179 = vrot.lane.b32.xlu1 %v4178_v50, %s10882_s30  ;;  %v4144_v41 = vsel %vm1324_vm4, %v4142_v51, %v4143_v17  ;;  %v9640_v50 = vld [vmem:[#allocation6 + $0x40] sm:$0xff]  ;;  %v4154_v51 = vmul.f32 %v9509_v18, %v11430_v37 }
 0x3a2   : > { %v4586_v49 = vadd.f32 %v4584_v43, %v4582_v54  ;;  %v4120_v10 = vadd.f32 %v4118_v31, %v4116_v33  ;;  %v4156_v54 = vmul.f32 %v9518_v8, %v11431_v53  ;;  %v4629_v43 = vadd.f32 %v4627_v36, %v4625_v9 }
 0x3a3   : > { %v4722_v33 = vmul.f32 %v9562_v13, %v11486_v26  ;;  %v4199_v9 = vmul.f32 %v9518_v8, %v11482_v21 }
 0x3a4   : > { %4573 = vrot.lane.b32.xlu0 %v4570_v48, %s10880_s2  ;;  %v4239_v48 = vrot.slane %v4235_v56, 7  ;;  %v4590_v16 = vrot.slane %v4586_v49, 5  ;;  %v4124_v55 = vrot.slane %v4120_v10, 1  ;;  %v4158_v2 = vadd.f32 %v4156_v54, %v4154_v51 }
 0x3a5   : > { %4101 = vrot.lane.b32.xlu1 %v4100_v52, %s10880_s2  ;;  %v4628_v52 = vmul.f32 %v9640_v50, %v11498_v24  ;;  %v4633_v31 = vrot.slane %v4629_v43, 1  ;;  %v4200_v51 = vmul.f32 %v9591_v20, %v11482_v21 }
 0x3a6   : > { %v4591_v34 = vsel %vm1238_vm3, %v4589_v0, %v4590_v16  ;;  %v4241_v30 = vsel %vm828_vm1, %v4239_v48, %v4240_v22  ;;  %v11501_v0 = vld [vmem:[#allocation89_spill] sm:$0xff]  ;;  %v4197_v16 = vmul.f32 %v9509_v18, %v11479_v42 }
 0x3a7   : > { %v4295_v10 = vmul.f32 %v9589_v29, %v11501_v0 }
 0x3a8   : > { %4670 = vrot.lane.b32.xlu0 %v4669_v60, %s10882_s30  ;;  %v4119_v60 = vadd.f32 %v4117_v45, %v4115_v32  ;;  %v4162_v32 = vrot.slane %v4158_v2, 2  ;;  %v4723_v45 = vmul.f32 %v9502_v1, %v11486_v26  ;;  %v4201_v43 = vadd.f32 %v4199_v9, %v4197_v16 }
 0x3a9   : > { %4575 = vrot.lane.b32.xlu1 %v4572_v38, %s10880_s2  ;;  %v4630_v38 = vadd.f32 %v4628_v52, %v4626_v5  ;;  %v11502_v5 = vld [vmem:[#allocation90_spill] sm:$0xff] }
 0x3aa   : > { %v4123_v56 = vrot.slane %v4119_v60, 1  ;;  %v4297_v52 = vmul.f32 %v9591_v20, %v11502_v5  ;;  %v4296_v36 = vmul.f32 %v9518_v8, %v11502_v5  ;;  %v4198_v60 = vmul.f32 %v9589_v29, %v11479_v42 }
 0x3ac   : > { %4145 = vrot.lane.b32.xlu0 %v4144_v41, %s10880_s2  ;;  %v4634_v41 = vrot.slane %v4630_v38, 1  ;;  %v4125_v23 = vsel %vm1324_vm4, %v4123_v56, %v4124_v55  ;;  %v4299_v54 = vadd.f32 %v4297_v52, %v4295_v10  ;;  %v4607_v38 = vmul.f32 %v9638_v47, %v11499_v14 }
 0x3ad   : > { %4672 = vrot.lane.b32.xlu1 %v4668_v28, %s10882_s30  ;;  %v4155_v28 = vmul.f32 %v9516_v39, %v11431_v53  ;;  %v4608_v56 = vmul.f32 %v9504_v15, %v11500_v63 }
 0x3ae   : > { %v4635_v26 = vsel %vm1324_vm4, %v4633_v31, %v4634_v41  ;;  %v4205_v31 = vrot.slane %v4201_v43, 6 }
 0x3af   : > { %v4157_v24 = vadd.f32 %v4155_v28, %v4153_v25 }
 0x3b0   : > { %4242 = vrot.lane.b32.xlu0 %v4239_v48, %s11215_s27  ;;  %v4725_v48 = vmul.f32 %v9504_v15, %v11488_v6 }
 0x3b1   : > { %4147 = vrot.lane.b32.xlu1 %v4143_v17, %s10880_s2  ;;  %v4724_v17 = vmul.f32 %v9564_v58, %v11488_v6  ;;  %v4161_v49 = vrot.slane %v4157_v24, 2  ;;  %v4294_v6 = vmul.f32 %v9509_v18, %v11501_v0  ;;  %v4609_v24 = vmul.f32 %v9640_v50, %v11500_v63 }
 0x3b2   : > { %v4727_v22 = vadd.f32 %v4725_v48, %v4723_v45  ;;  %v4645_v63 = vmul.f32 %v9502_v1, %v11430_v37  ;;  %v4647_v48 = vmul.f32 %v9504_v15, %v11431_v53 }
 0x3b3   : > { %v4726_v25 = vadd.f32 %v4724_v17, %v4722_v33  ;;  %v4163_v28 = vsel %vm1033_vm2, %v4161_v49, %v4162_v32  ;;  %v4202_v33 = vadd.f32 %v4200_v51, %v4198_v60  ;;  %v4303_v17 = vrot.slane %v4299_v54, 3 }
 0x3b4   : > { %4592 = vrot.lane.b32.xlu0 %v4591_v34, %s10880_s2  ;;  %v4731_v2 = vrot.slane %v4727_v22, 7  ;;  %v4611_v49 = vadd.f32 %v4609_v24, %v4607_v38  ;;  %v4646_v32 = vmul.f32 %v9564_v58, %v11431_v53  ;;  %v3804_v53 = vmul.f32 %v9268_v7, %v11502_v5 }
 0x3b5   : > { %4244 = vrot.lane.b32.xlu1 %v4241_v30, %s11215_s27  ;;  %v4730_v34 = vrot.slane %v4726_v25, 7  ;;  %v4298_v30 = vadd.f32 %v4296_v36, %v4294_v6  ;;  %v4206_v10 = vrot.slane %v4202_v33, 6  ;;  %v3802_v6 = vmul.f32 %v9266_v12, %v11501_v0 }
 0x3b6   : > { %v4615_v52 = vrot.slane %v4611_v49, 1  ;;  %v3801_v36 = vmul.f32 %v9357_v62, %v11501_v0  ;;  %v4217_v22 = vmul.f32 %v9589_v29, %v11443_v59  ;;  %v4219_v12 = vmul.f32 %v9591_v20, %v11477_v19 }
 0x3b7   : > { %v4302_v45 = vrot.slane %v4298_v30, 3  ;;  %v4216_v7 = vmul.f32 %v9509_v18, %v11443_v59  ;;  %v3806_v43 = vadd.f32 %v3804_v53, %v3802_v6  ;;  %v4187_v30 = vmul.f32 %v9509_v18, %v11481_v57 }
 0x3b8   : > { %4128 = vrot.lane.b32.xlu0 %v4124_v55, %s10880_s2  ;;  %v4606_v55 = vmul.f32 %v9502_v1, %v11499_v14  ;;  %v4221_v24 = vadd.f32 %v4219_v12, %v4217_v22  ;;  %v4688_v49 = vmul.f32 %v9502_v1, %v11479_v42  ;;  %v9780_v12 = vpop.permute.xlu0 %3589 }
 0x3b9   : > { %4126 = vrot.lane.b32.xlu1 %v4125_v23, %s10880_s2  ;;  %v4644_v23 = vmul.f32 %v9562_v13, %v11430_v37  ;;  %v4304_v16 = vsel %vm856_vm6, %v4302_v45, %v4303_v17  ;;  %v4207_v37 = vsel %vm1092_vm7, %v4205_v31, %v4206_v10 }
 0x3ba   : > { %v4610_v14 = vadd.f32 %v4608_v56, %v4606_v55  ;;  %v4188_v55 = vmul.f32 %v9518_v8, %v11483_v11  ;;  %v4689_v56 = vmul.f32 %v9638_v47, %v11479_v42  ;;  %v4225_v45 = vrot.slane %v4221_v24, 6  ;;  %v11505_v24 = vld [vmem:[#allocation61_spill] sm:$0xff] }
 0x3bb   : > { %v4648_v25 = vadd.f32 %v4646_v32, %v4644_v23  ;;  %v3810_v23 = vrot.slane %v3806_v43, 3  ;;  %v4679_v43 = vmul.f32 %v9504_v15, %v11483_v11  ;;  %v9804_v11 = vld [vmem:[#allocation4 + $0x40] sm:$0xff] }
 0x3bc   : > { %4636 = vrot.lane.b32.xlu0 %v4635_v26, %s10880_s2  ;;  %v4614_v9 = vrot.slane %v4610_v14, 1  ;;  %v4649_v26 = vadd.f32 %v4647_v48, %v4645_v63  ;;  %v4189_v14 = vadd.f32 %v4188_v55, %v4187_v30  ;;  %v4786_v48 = vmul.f32 %v9638_v47, %v11501_v0  ;;  %11508 = vst [vmem:[#allocation33_spill] sm:$0xff] %v9804_v11 }
 0x3bd   : > { %4164 = vrot.lane.b32.xlu1 %v4163_v28, %s10882_s30  ;;  %v3803_v28 = vmul.f32 %v9381_v3, %v11502_v5  ;;  %v4652_v60 = vrot.slane %v4648_v25, 2  ;;  %v4787_v25 = vmul.f32 %v9504_v15, %v11502_v5 }
 0x3be   : > { %v4616_v51 = vsel %vm1324_vm4, %v4614_v9, %v4615_v52  ;;  %v4653_v54 = vrot.slane %v4649_v26, 2 }
 0x3bf   : > { %v3805_v38 = vadd.f32 %v3803_v28, %v3801_v36 }
 0x3c0   : > { %4733 = vrot.lane.b32.xlu0 %v4730_v34, %s11215_s27  ;;  %v4654_v33 = vsel %vm1033_vm2, %v4652_v60, %v4653_v54  ;;  %v11503_v60 = vld [vmem:[#allocation110_spill] sm:$0xff]  ;;  %v11504_v54 = vld [vmem:[#allocation111_spill] sm:$0xff] }
 0x3c1   : > { %4638 = vrot.lane.b32.xlu1 %v4634_v41, %s10880_s2  ;;  %v4732_v41 = vsel %vm828_vm1, %v4730_v34, %v4731_v2  ;;  %v4218_v34 = vmul.f32 %v9518_v8, %v11477_v19  ;;  %v4691_v2 = vmul.f32 %v9640_v50, %v11482_v21  ;;  %v3809_v32 = vrot.slane %v3805_v38, 3  ;;  %v9791_v38 = vld [vmem:[#allocation4 + $0x8] sm:$0xff] }
 0x3c2   : > { %v3543_v30 = vmul.f32 %v9791_v38, %v11505_v24 }
 0x3c3   : > { %v4693_v63 = vadd.f32 %v4691_v2, %v4689_v56  ;;  %v11506_v56 = vld [vmem:[#allocation63_spill] sm:$0xff] }
 0x3c4   : > { %4208 = vrot.lane.b32.xlu0 %v4205_v31, %s10882_s30  ;;  %v4220_v31 = vadd.f32 %v4218_v34, %v4216_v7  ;;  %v4355_v7 = vmul.f32 %v9518_v8, %v11504_v54  ;;  %v4678_v34 = vmul.f32 %v9502_v1, %v11481_v57  ;;  %v3563_v2 = vmul.f32 %v9357_v62, %v11506_v56  ;;  %v11507_v57 = vld [vmem:[#allocation64_spill] sm:$0xff] }
 0x3c5   : > { %4735 = vrot.lane.b32.xlu1 %v4732_v41, %s11215_s27  ;;  %v4788_v41 = vmul.f32 %v9640_v50, %v11502_v5  ;;  %v4697_v9 = vrot.slane %v4693_v63, 6  ;;  %v4270_v5 = vmul.f32 %v9518_v8, %v11495_v40  ;;  %v4710_v63 = vmul.f32 %v9640_v50, %v11477_v19 }
 0x3c6   : > { %v4224_v10 = vrot.slane %v4220_v31, 6  ;;  %v9798_v31 = vld [vmem:[#allocation4 + $0x18] sm:$0xff] }
 0x3c8   : > { %4305 = vrot.lane.b32.xlu0 %v4304_v16, %s11215_s27  ;;  %v4191_v16 = vrot.slane %v4189_v14, 6  ;;  %v4226_v26 = vsel %vm1092_vm7, %v4224_v10, %v4225_v45  ;;  %v4708_v45 = vmul.f32 %v9638_v47, %v11443_v59  ;;  %v4709_v14 = vmul.f32 %v9504_v15, %v11477_v19 }
 0x3c9   : > { %4210 = vrot.lane.b32.xlu1 %v4207_v37, %s10882_s30  ;;  %v4790_v37 = vadd.f32 %v4788_v41, %v4786_v48  ;;  %v4680_v41 = vadd.f32 %v4679_v43, %v4678_v34  ;;  %v4354_v10 = vmul.f32 %v9589_v29, %v11503_v60  ;;  %v4252_v19 = vmul.f32 %v9516_v39, %v11491_v46 }
 0x3cb   : > { %v4794_v28 = vrot.slane %v4790_v37, 3 }
 0x3cc   : > { %4617 = vrot.lane.b32.xlu0 %v4616_v51, %s10880_s2  ;;  %v4353_v51 = vmul.f32 %v9509_v18, %v11503_v60 }
 0x3cd   : > { %4307 = vrot.lane.b32.xlu1 %v4303_v17, %s11215_s27  ;;  %v4690_v17 = vmul.f32 %v9504_v15, %v11482_v21  ;;  %v4785_v21 = vmul.f32 %v9502_v1, %v11501_v0  ;;  %v4269_v0 = vmul.f32 %v9509_v18, %v11494_v44 }
 0x3ce   : > { %v4357_v48 = vadd.f32 %v4355_v7, %v4353_v51  ;;  %v4712_v7 = vadd.f32 %v4710_v63, %v4708_v45  ;;  %v4280_v45 = vmul.f32 %v9589_v29, %v11492_v61  ;;  %v4282_v63 = vmul.f32 %v9591_v20, %v11493_v27 }
 0x3cf   : > { %v4692_v42 = vadd.f32 %v4690_v17, %v4688_v49  ;;  %v4789_v53 = vadd.f32 %v4787_v25, %v4785_v21  ;;  %v4271_v55 = vadd.f32 %v4270_v5, %v4269_v0  ;;  %v3564_v49 = vmul.f32 %v9798_v31, %v11506_v56  ;;  %v11511_v5 = vld [vmem:[#allocation27_spill] sm:$0xff] }
 0x3d0   : > { %4655 = vrot.lane.b32.xlu0 %v4654_v33, %s10882_s30  ;;  %v3565_v17 = vmul.f32 %v9381_v3, %v11507_v57  ;;  %v4251_v25 = vmul.f32 %v9509_v18, %v11490_v35 }
 0x3d1   : > { %4619 = vrot.lane.b32.xlu1 %v4615_v52, %s10880_s2  ;;  %v3811_v52 = vsel %vm856_vm6, %v3809_v32, %v3810_v23  ;;  %v4696_v6 = vrot.slane %v4692_v42, 6  ;;  %v4793_v22 = vrot.slane %v4789_v53, 3  ;;  %v4707_v32 = vmul.f32 %v9502_v1, %v11443_v59  ;;  %v11510_v53 = vld [vmem:[#allocation26_spill] sm:$0xff] }
 0x3d2   : > { %v4356_v42 = vmul.f32 %v9591_v20, %v11504_v54  ;;  %v4250_v59 = vmul.f32 %v9514_v4, %v11490_v35  ;;  %v4273_v37 = vrot.slane %v4271_v55, 3  ;;  %v3535_v0 = vmul.f32 %v9791_v38, %v11510_v53  ;;  %v11513_v20 = vld [vmem:[#allocation60_spill] sm:$0xff] }
 0x3d3   : > { %v4698_v36 = vsel %vm1092_vm7, %v4696_v6, %v4697_v9  ;;  %v4795_v33 = vsel %vm856_vm6, %v4793_v22, %v4794_v28  ;;  %v11509_v9 = vld [vmem:[#allocation62_spill] sm:$0xff]  ;;  %v4711_v51 = vadd.f32 %v4709_v14, %v4707_v32  ;;  %v3536_v43 = vmul.f32 %v9357_v62, %v11510_v53 }
 0x3d4   : > { %3814 = vrot.lane.b32.xlu0 %v3810_v23, %s11215_s27  ;;  %v3566_v23 = vmul.f32 %v9804_v11, %v11507_v57  ;;  %v4358_v34 = vadd.f32 %v4356_v42, %v4354_v10  ;;  %v3538_v55 = vmul.f32 %v9381_v3, %v11511_v5  ;;  %v4279_v32 = vmul.f32 %v9509_v18, %v11492_v61 }
 0x3d5   : > { %3812 = vrot.lane.b32.xlu1 %v3811_v52, %s11215_s27  ;;  %v4253_v52 = vmul.f32 %v9518_v8, %v11491_v46  ;;  %v4281_v14 = vmul.f32 %v9518_v8, %v11493_v27  ;;  %v4715_v10 = vrot.slane %v4711_v51, 6  ;;  %v4716_v42 = vrot.slane %v4712_v7, 6 }
 0x3d6   : > { %v9843_v22 = vadd.f32 %v3566_v23, %v3564_v49  ;;  %v4254_v49 = vadd.f32 %v4252_v19, %v4250_v59  ;;  %v3544_v59 = vmul.f32 %v9357_v62, %v11505_v24  ;;  %v3861_v19 = vmul.f32 %v9798_v31, %v11503_v60 }
 0x3d7   : > { %v4283_v56 = vadd.f32 %v4281_v14, %v4279_v32 }
 0x3d8   : > { %4227 = vrot.lane.b32.xlu0 %v4226_v26, %s10882_s30  ;;  %v4258_v7 = vrot.slane %v4254_v49, 3  ;;  %v4761_v49 = vmul.f32 %v9504_v15, %v11495_v40 }
 0x3d9   : > { %4192 = vrot.lane.b32.xlu1 %v4191_v16, %s10882_s30  ;;  %v9832_v16 = vld [vmem:[#allocation4 + $0x30] sm:$0xff] }
 0x3da   : > { %v3545_v26 = vmul.f32 %v9832_v16, %v11509_v9 }
 0x3dc   : > { %4701 = vrot.lane.b32.xlu0 %v4698_v36, %s10882_s30  ;;  %v3537_v36 = vmul.f32 %v9832_v16, %v11511_v5  ;;  %v3572_v5 = vrot.slane %v9843_v22, 4  ;;  %v4717_v22 = vsel %vm1092_vm7, %v4715_v10, %v4716_v42  ;;  %v11516_v42 = vld [vmem:[#allocation75_spill] sm:$0xff] }
 0x3dd   : > { %4699 = vrot.lane.b32.xlu1 %v4696_v6, %s10882_s30 }
 0x3e0   : > { %4798 = vrot.lane.b32.xlu0 %v4794_v28, %s11215_s27  ;;  %v3567_v28 = vadd.f32 %v3565_v17, %v3563_v2  ;;  %v3862_v2 = vmul.f32 %v9381_v3, %v11504_v54  ;;  %v9856_v17 = vadd.f32 %v4253_v52, %v4251_v25  ;;  %v3539_v25 = vadd.f32 %v3537_v36, %v3535_v0 }
 0x3e1   : > { %4796 = vrot.lane.b32.xlu1 %v4795_v33, %s11215_s27  ;;  %v3860_v33 = vmul.f32 %v9357_v62, %v11503_v60  ;;  %v3863_v52 = vmul.f32 %v9804_v11, %v11504_v54  ;;  %v4284_v0 = vadd.f32 %v4282_v63, %v4280_v45  ;;  %v3546_v36 = vmul.f32 %v9381_v3, %v11509_v9  ;;  %v11515_v45 = vld [vmem:[#allocation74_spill] sm:$0xff] }
 0x3e2   : > { %v9822_v21 = vpop.permute.xlu0 %3608  ;;  %v4259_v53 = vrot.slane %v9856_v17, 3  ;;  %v3556_v14 = vmul.f32 %v9798_v31, %v11515_v45 }
 0x3e3   : > { %v9836_v6 = vpop.permute.xlu1 %3591 }
 0x3e4   : > { %4361 = vrot.lane.b32.xlu0 %v4357_v48, %s11229_s29  ;;  %v4682_v48 = vrot.slane %v4680_v41, 6  ;;  %v3547_v41 = vadd.f32 %v3545_v26, %v3543_v30  ;;  %v3540_v30 = vadd.f32 %v3538_v55, %v3536_v43  ;;  %v11514_v43 = vld [vmem:[#allocation192_spill] sm:$0xff]  ;;  %v4260_v10 = vsel %vm856_vm6, %v4258_v7, %v4259_v53 }
 0x3e5   : > { %4274 = vrot.lane.b32.xlu1 %v4273_v37, %s11215_s27  ;;  %v3571_v37 = vrot.slane %v3567_v28, 4  ;;  %v3552_v28 = vmul.f32 %v9381_v3, %v11513_v20  ;;  %v3541_v55 = vadd.f32 %v3539_v25, %v11514_v43  ;;  %v3558_v25 = vmul.f32 %v9804_v11, %v11516_v42 }
 0x3e6   : > { %v9852_v57 = vpop.permute.xlu0 %3633  ;;  %v3542_v3 = vadd.f32 %v3540_v30, %v11514_v43  ;;  %v4847_v43 = vmul.f32 %v9640_v50, %v11504_v54 }
 0x3e7   : > { %v9858_v23 = vpop.permute.xlu1 %3617  ;;  %v3573_v17 = vsel %vm752_vm8, %v3571_v37, %v3572_v5 }
 0x3e8   : > { %4683 = vrot.lane.b32.xlu0 %v4682_v48, %s10882_s30  ;;  %v3864_v48 = vadd.f32 %v3862_v2, %v3860_v33  ;;  %v3865_v33 = vadd.f32 %v3863_v52, %v3861_v19  ;;  %v4760_v2 = vmul.f32 %v9502_v1, %v11494_v44  ;;  %v4287_v44 = vrot.slane %v4283_v56, 3 }
 0x3e9   : > { %4363 = vrot.lane.b32.xlu1 %v4358_v34, %s11229_s29  ;;  %v11512_v34 = vld [vmem:[#allocation59_spill] sm:$0xff]  ;;  %v4288_v19 = vrot.slane %v4284_v0, 3  ;;  %v3548_v52 = vadd.f32 %v3546_v36, %v3544_v59  ;;  %v3576_v37 = vadd.f32 %v3573_v17, %v3541_v55  ;;  %v4743_v56 = vmul.f32 %v9564_v58, %v11491_v46  ;;  %v9918_v55 = vld [vmem:[#allocation4 + $0x38] sm:$0xff] }
 0x3ea   : > { %v3653_v26 = vpop.permute.xlu0 %3652  ;;  %v3551_v24 = vmul.f32 %v9357_v62, %v11512_v34  ;;  %v3595_v62 = vadd.f32 %v9780_v12, %v3547_v41  ;;  %v4844_v12 = vmul.f32 %v9502_v1, %v11503_v60  ;;  %v4846_v41 = vmul.f32 %v9504_v15, %v11504_v54 }
 0x3eb   : > { %v3636_v51 = vpop.permute.xlu1 %3635  ;;  %v4762_v30 = vadd.f32 %v4761_v49, %v4760_v2  ;;  %v3577_v59 = vadd.f32 %v3572_v5, %v3542_v3  ;;  %v4742_v36 = vmul.f32 %v9502_v1, %v11490_v35  ;;  %v3560_v2 = vadd.f32 %v3558_v25, %v3556_v14  ;;  %v11517_v49 = vld [vmem:[#allocation99_spill] sm:$0xff] }
 0x3ec   : > { %3868 = vrot.lane.b32.xlu0 %v3864_v48, %s11229_s29  ;;  %v3553_v40 = vadd.f32 %v3552_v28, %v3551_v24  ;;  %v4741_v48 = vmul.f32 %v9562_v13, %v11490_v35  ;;  %v9910_v24 = vld [vmem:[#allocation4 + $0x10] sm:$0xff]  ;;  %v4744_v28 = vmul.f32 %v9504_v15, %v11491_v46  ;;  %v4289_v5 = vsel %vm856_vm6, %v4287_v44, %v4288_v19 }
 0x3ed   : > { %4718 = vrot.lane.b32.xlu1 %v4717_v22, %s10882_s30  ;;  %v3555_v7 = vmul.f32 %v9910_v24, %v11515_v45  ;;  %v4329_v17 = vmul.f32 %v9514_v4, %v11517_v49  ;;  %v4848_v3 = vadd.f32 %v4846_v41, %v4844_v12  ;;  %v4845_v46 = vmul.f32 %v9638_v47, %v11503_v60  ;;  %s4927_s30 = sand.u32 1, %s5942_s1  }
 0x3ee   : > { %v3672_v32 = vpop.permute.xlu0 %3671  ;;  %v3658_v20 = vadd.f32 %v3653_v26, %v3595_v62  ;;  %v4764_v14 = vrot.slane %v4762_v30, 3  ;;  %v4745_v25 = vadd.f32 %v4743_v56, %v4741_v48  ;;  %v4770_v44 = vmul.f32 %v9502_v1, %v11492_v61  ;;  %s10299_s0 = scalar_lea.sflag [#allocation13], %s4927_s30 }
 0x3ef   : > { %v3655_v63 = vpop.permute.xlu1 %3654  ;;  %v3639_v19 = vadd.f32 %v9852_v57, %v3576_v37  ;;  %v3640_v12 = vadd.f32 %v3636_v51, %v3577_v59  ;;  %v4771_v34 = vmul.f32 %v9638_v47, %v11492_v61  ;;  %v3611_v60 = vadd.f32 %v9822_v21, %v3553_v40 }
 0x3f0   : > { %4261 = vrot.lane.b32.xlu0 %v4260_v10, %s11215_s27  ;;  %v11518_v10 = vld [vmem:[#allocation100_spill] sm:$0xff]  ;;  %v4773_v26 = vmul.f32 %v9640_v50, %v11493_v27  ;;  %v3596_v62 = vadd.f32 %v9836_v6, %v3548_v52  ;;  %v4849_v61 = vadd.f32 %v4847_v43, %v4845_v46  ;;  %v4749_v56 = vrot.slane %v4745_v25, 3 }
 0x3f1   : > { %3870 = vrot.lane.b32.xlu1 %v3865_v33, %s11229_s29  ;;  %v3557_v33 = vmul.f32 %v9918_v55, %v11516_v42  ;;  %v4331_v35 = vmul.f32 %v9516_v39, %v11518_v10  ;;  %v3674_v37 = vadd.f32 %v3672_v32, %v3611_v60 }
 0x3f2   : > { %v3689_v0 = vpop.permute.xlu0 %3688  ;;  %v3659_v21 = vadd.f32 %v3655_v63, %v3596_v62  ;;  %v4775_v32 = vadd.f32 %v4773_v26, %v4771_v34  ;;  %v3838_v34 = vmul.f32 %v9832_v16, %v11518_v10  ;;  %v11520_v62 = vld [vmem:[#allocation97_spill] sm:$0xff] }
 0x3f3   : > { %v3687_v22 = vpop.permute.xlu1 %3686  ;;  %v4333_v51 = vadd.f32 %v4331_v35, %v4329_v17  ;;  %v3559_v48 = vadd.f32 %v3557_v33, %v3555_v7 }
 0x3f4   : > { %4290 = vrot.lane.b32.xlu0 %v4289_v5, %s11215_s27  ;;  %v4746_v5 = vadd.f32 %v4744_v28, %v4742_v36 }
 0x3f5   : > { %4263 = vrot.lane.b32.xlu1 %v4259_v53, %s11215_s27  ;;  %v4772_v53 = vmul.f32 %v9504_v15, %v11493_v27  ;;  %v4332_v27 = vmul.f32 %v9518_v8, %v11518_v10  ;;  %v3620_v7 = vadd.f32 %v9858_v23, %v3559_v48 }
 0x3f6   : > { %v3716_v41 = vpop.permute.xlu0 %3715  ;;  %v4750_v59 = vrot.slane %v4746_v5, 3 }
 0x3f7   : > { %v3700_v11 = vpop.permute.xlu1 %3699  ;;  %v3721_v54 = vadd.f32 %v3716_v41, %v3658_v20  ;;  %v4330_v20 = vmul.f32 %v9509_v18, %v11517_v49  ;;  %v4774_v36 = vadd.f32 %v4772_v53, %v4770_v44  ;;  %v3692_v63 = vadd.f32 %v3687_v22, %v3620_v7  ;;  %v11519_v53 = vld [vmem:[#allocation96_spill] sm:$0xff] }
 0x3f8   : > { %v3702_v30 = vadd.f32 %v3700_v11, %v3639_v19  ;;  %v3703_v57 = vadd.f32 %v3700_v11, %v3640_v12  ;;  %4852 = vrot.lane.b32.xlu0 %v4848_v3, %s11229_s29  ;;  %v3621_v11 = vadd.f32 %v9858_v23, %v3560_v2  ;;  %v4751_v2 = vsel %vm856_vm6, %v4749_v56, %v4750_v59 }
 0x3f9   : > { %4765 = vrot.lane.b32.xlu1 %v4764_v14, %s11215_s27  ;;  %v4334_v17 = vadd.f32 %v4332_v27, %v4330_v20  ;;  %v4778_v46 = vrot.slane %v4774_v36, 3  ;;  %v4779_v14 = vrot.slane %v4775_v32, 3  ;;  %v3836_v23 = vmul.f32 %v9791_v38, %v11517_v49 }
 0x3fa   : > { %v3735_v40 = vpop.permute.xlu0 %3734  ;;  %v3693_v43 = vadd.f32 %v3689_v0, %v3621_v11  ;;  %v3837_v22 = vmul.f32 %v9910_v24, %v11517_v49  ;;  %v3839_v44 = vmul.f32 %v9918_v55, %v11518_v10  ;;  %v4313_v26 = vmul.f32 %v9514_v4, %v11519_v53  ;;  %v11521_v11 = vld [vmem:[#allocation32_spill] sm:$0xff] }
 0x3fb   : > { %v3718_v6 = vpop.permute.xlu1 %3717  ;;  %v3737_v52 = vadd.f32 %v3735_v40, %v3674_v37  ;;  %v4780_v41 = vsel %vm856_vm6, %v4778_v46, %v4779_v14  ;;  %v3840_v60 = vadd.f32 %v3838_v34, %v3836_v23  ;;  %v4820_v56 = vmul.f32 %v9562_v13, %v11517_v49 }
 0x3fc   : > { %v3722_v28 = vadd.f32 %v3718_v6, %v3659_v21  ;;  %4337 = vrot.lane.b32.xlu0 %v4333_v51, %s11229_s29  ;;  %v4315_v51 = vmul.f32 %v9516_v39, %v11520_v62  ;;  %v3841_v48 = vadd.f32 %v3839_v44, %v3837_v22  ;;  %v4049_v27 = vmul.f32 %v9589_v29, %v11515_v45 }
 0x3fd   : > { %4854 = vrot.lane.b32.xlu1 %v4849_v61, %s11229_s29  ;;  %v4051_v6 = vmul.f32 %v11521_v11, %v11516_v42  ;;  %v4048_v32 = vmul.f32 %v9509_v18, %v11515_v45  ;;  %v4050_v7 = vmul.f32 %v9518_v8, %v11516_v42  ;;  %v3822_v46 = vmul.f32 %v9832_v16, %v11520_v62 }
 0x3fe   : > { %v3752_v33 = vpop.permute.xlu0 %3751  ;;  %v4821_v23 = vmul.f32 %v9502_v1, %v11517_v49  ;;  %v4823_v34 = vmul.f32 %v9504_v15, %v11518_v10  ;;  %v4539_v44 = vmul.f32 %v9502_v1, %v11515_v45  ;;  %v4542_v1 = vmul.f32 %v9640_v50, %v11516_v42 }
 0x3ff   : > { %v3750_v3 = vpop.permute.xlu1 %3749  ;;  %v9954_v35 = vadd.f32 %v3752_v33, %v3693_v43  ;;  %v11522_v43 = vld [vmem:[#allocation105_spill] sm:$0xff]  ;;  %v11523_v33 = vld [vmem:[#allocation106_spill] sm:$0xff]  ;;  %v4053_v14 = vadd.f32 %v4051_v6, %v4049_v27  ;;  %v4052_v22 = vadd.f32 %v4050_v7, %v4048_v32 }
 0x400   : > { %v9957_v25 = vadd.f32 %v3750_v3, %v3692_v63  ;;  %4752 = vrot.lane.b32.xlu0 %v4751_v2, %s11215_s27  ;;  %v4345_v63 = vmul.f32 %v9509_v18, %v11522_v43  ;;  %v3820_v2 = vmul.f32 %v9791_v38, %v11519_v53  ;;  %v4540_v38 = vmul.f32 %v9638_v47, %v11515_v45  ;;  %v11524_v45 = vld [vmem:[#allocation61_spill] sm:$0xff] }
 0x401   : > { %4339 = vrot.lane.b32.xlu1 %v4334_v17, %s11229_s29  ;;  %v4346_v17 = vmul.f32 %v9518_v8, %v11523_v33 }
 0x402   : > { %v3771_v0 = vpop.permute.xlu0 %3770  ;;  %v3824_v49 = vadd.f32 %v3822_v46, %v3820_v2 }
 0x403   : > { %v3769_v19 = vpop.permute.xlu1 %3768  ;;  %v9969_v12 = vadd.f32 %v3771_v0, %v3703_v57  ;;  %v4314_v57 = vmul.f32 %v9509_v18, %v11519_v53  ;;  %v4347_v16 = vadd.f32 %v4346_v17, %v4345_v63 }
 0x404   : > { %v9972_v5 = vadd.f32 %v3769_v19, %v3702_v30  ;;  %4781 = vrot.lane.b32.xlu0 %v4780_v41, %s11215_s27  ;;  %v4316_v30 = vmul.f32 %v9518_v8, %v11520_v62  ;;  %v4541_v41 = vmul.f32 %v9504_v15, %v11516_v42 }
 0x405   : > { %4754 = vrot.lane.b32.xlu1 %v4750_v59, %s11215_s27  ;;  %v4822_v59 = vmul.f32 %v9564_v58, %v11518_v10  ;;  %v3852_v10 = vmul.f32 %v9910_v24, %v11522_v43 }
 0x406   : > { %v3798_v37 = vpop.permute.xlu0 %3797  ;;  %v4318_v36 = vadd.f32 %v4316_v30, %v4314_v57  ;;  %v3821_v57 = vmul.f32 %v9910_v24, %v11519_v53  ;;  %v11525_v30 = vld [vmem:[#allocation113_spill] sm:$0xff] }
 0x407   : > { %v3782_v61 = vpop.permute.xlu1 %3781  ;;  %v9984_v20 = vadd.f32 %v3798_v37, %v3737_v52  ;;  %v4824_v3 = vadd.f32 %v4822_v59, %v4820_v56  ;;  %v4825_v37 = vadd.f32 %v4823_v34, %v4821_v23  ;;  %v11526_v56 = vld [vmem:[#allocation114_spill] sm:$0xff]  ;;  %v4370_v42 = vmul.f32 %v9589_v29, %v11525_v30 }
 0x408   : > { %v9986_v21 = vadd.f32 %v3782_v61, %v3721_v54  ;;  %v9988_v40 = vadd.f32 %v3782_v61, %v3722_v28  ;;  %3846 = vrot.lane.b32.xlu0 %v3841_v48, %s11229_s29  ;;  %v4317_v54 = vadd.f32 %v4315_v51, %v4313_v26  ;;  %v4036_v51 = vmul.f32 %v9514_v4, %v11524_v45 }
 0x409   : > { %3844 = vrot.lane.b32.xlu1 %v3840_v60, %s11229_s29  ;;  %v3853_v60 = vmul.f32 %v9918_v55, %v11523_v33  ;;  %v4369_v61 = vmul.f32 %v9509_v18, %v11525_v30  ;;  %v4371_v59 = vmul.f32 %v9518_v8, %v11526_v56  ;;  %v3823_v4 = vmul.f32 %v9918_v55, %v11520_v62  ;;  %v10059_v8 = vld [vmem:[#allocation6 + $0x10] sm:$0xff] }
 0x40a   : > { %v10000_v52 = vpop.permute.xlu0 %4601  ;;  %v4805_v7 = vmul.f32 %v10059_v8, %v11519_v53  ;;  %v3876_v63 = vmul.f32 %v9910_v24, %v11525_v30  ;;  %v3877_v2 = vmul.f32 %v9798_v31, %v11525_v30  ;;  %v3878_v46 = vmul.f32 %v9918_v55, %v11526_v56 }
 0x40b   : > { %v4111_v28 = vpop.permute.xlu1 %4110  ;;  %v3854_v18 = vadd.f32 %v3853_v60, %v3852_v10  ;;  %v4543_v34 = vadd.f32 %v4541_v41, %v4539_v44  ;;  %v4836_v24 = vmul.f32 %v10059_v8, %v11522_v43  ;;  %v4860_v41 = vmul.f32 %v10059_v8, %v11525_v30 }
 0x40c   : > { %4323 = vrot.lane.b32.xlu0 %v4318_v36, %s11229_s29  ;;  %v4114_v26 = vadd.f32 %v4111_v28, %v4053_v14  ;;  %v4113_v15 = vadd.f32 %v4111_v28, %v4052_v22  ;;  %v4038_v36 = vmul.f32 %v9516_v39, %v11509_v9  ;;  %v10064_v28 = vld [vmem:[#allocation6 + $0x38] sm:$0xff]  ;;  %v4804_v39 = vmul.f32 %v9562_v13, %v11519_v53 }
 0x40d   : > { %4321 = vrot.lane.b32.xlu1 %v4317_v54, %s11229_s29  ;;  %v4372_v54 = vmul.f32 %v11521_v11, %v11526_v56  ;;  %v4807_v29 = vmul.f32 %v10064_v28, %v11520_v62  ;;  %v4806_v11 = vmul.f32 %v9564_v58, %v11520_v62  ;;  %v11527_v14 = vld [vmem:[#allocation33_spill] sm:$0xff]  ;;  %v3825_v53 = vadd.f32 %v3823_v4, %v3821_v57  ;;  %v10105_v57 = vld [vmem:[#allocation5 + $0x38] sm:$0xff] }
 0x40e   : > { %v10020_v0 = vpop.permute.xlu0 %4084  ;;  %v3879_v23 = vmul.f32 %v11527_v14, %v11526_v56  ;;  %v4544_v62 = vadd.f32 %v4542_v1, %v4540_v38  ;;  %v4040_v22 = vadd.f32 %v4038_v36, %v4036_v51  ;;  %v4837_v31 = vmul.f32 %v10064_v28, %v11523_v33  ;;  %v10120_v14 = vld [vmem:[#allocation6 + $0x8] sm:$0xff] }
 0x40f   : > { %v10026_v19 = vpop.permute.xlu1 %4082  ;;  %v4374_v58 = vadd.f32 %v4372_v54, %v4370_v42  ;;  %v4604_v55 = vadd.f32 %v10000_v52, %v4543_v34  ;;  %v4808_v44 = vadd.f32 %v4806_v11, %v4804_v39  ;;  %v3880_v10 = vadd.f32 %v3878_v46, %v3876_v63  ;;  %v10124_v34 = vld [vmem:[#allocation6 + $0x30] sm:$0xff] }
 0x410   : > { %4828 = vrot.lane.b32.xlu0 %v4824_v3, %s11229_s29  ;;  %v4373_v3 = vadd.f32 %v4371_v59, %v4369_v61  ;;  %v3881_v60 = vadd.f32 %v3879_v23, %v3877_v2  ;;  %v4862_v51 = vmul.f32 %v10064_v28, %v11526_v56  ;;  %v4605_v61 = vadd.f32 %v10000_v52, %v4544_v62  ;;  %v11528_v62 = vld [vmem:[#allocation59_spill] sm:$0xff] }
 0x411   : > { %4349 = vrot.lane.b32.xlu1 %v4347_v16, %s11229_s29  ;;  %v4809_v16 = vadd.f32 %v4807_v29, %v4805_v7  ;;  %v4378_v33 = vrot.slane %v4374_v58, 4  ;;  %v4527_v23 = vmul.f32 %v10120_v14, %v11524_v45 }
 0x412   : > { %v4182_v48 = vpop.permute.xlu0 %4181  ;;  %v4377_v38 = vrot.slane %v4373_v3, 4  ;;  %v4864_v36 = vadd.f32 %v4862_v51, %v4860_v41 }
 0x413   : > { %v4180_v27 = vpop.permute.xlu1 %4179  ;;  %v10046_v6 = vadd.f32 %v4182_v48, %v4114_v26  ;;  %v4861_v26 = vmul.f32 %v9638_v47, %v11525_v30  ;;  %v4039_v47 = vmul.f32 %v10105_v57, %v11509_v9  ;;  %v4088_v30 = vadd.f32 %v10026_v19, %v4040_v22 }
 0x414   : > { %v10056_v32 = vadd.f32 %v4180_v27, %v4113_v15  ;;  %3828 = vrot.lane.b32.xlu0 %v3824_v49, %s11229_s29  ;;  %v10101_v15 = vld [vmem:[#allocation5 + $0x10] sm:$0xff]  ;;  %v3885_v27 = vrot.slane %v3881_v60, 4  ;;  %v4379_v54 = vsel %vm752_vm8, %v4377_v38, %v4378_v33  ;;  %v4868_v3 = vrot.slane %v4864_v36, 4 }
 0x415   : > { %4830 = vrot.lane.b32.xlu1 %v4825_v37, %s11229_s29  ;;  %v4863_v37 = vmul.f32 %v9640_v50, %v11526_v56  ;;  %v4037_v48 = vmul.f32 %v10101_v15, %v11524_v45  ;;  %v4838_v50 = vadd.f32 %v4837_v31, %v4836_v24  ;;  %v3884_v56 = vrot.slane %v3880_v10, 4  ;;  %v11529_v24 = vld [vmem:[#allocation60_spill] sm:$0xff] }
 0x416   : > { %v10074_v17 = vpop.permute.xlu0 %4573  ;;  %v4044_v22 = vmul.f32 %v10101_v15, %v11528_v62  ;;  %v4045_v31 = vmul.f32 %v10105_v57, %v11529_v24  ;;  %v4528_v38 = vmul.f32 %v10059_v8, %v11524_v45  ;;  %v4530_v10 = vmul.f32 %v10064_v28, %v11509_v9 }
 0x417   : > { %v10082_v13 = vpop.permute.xlu1 %4101  ;;  %v4041_v7 = vadd.f32 %v4039_v47, %v4037_v48  ;;  %v3886_v63 = vsel %vm752_vm8, %v3884_v56, %v3885_v27 }
 0x418   : > { %3856 = vrot.lane.b32.xlu0 %v3854_v18, %s11229_s29  ;;  %v4865_v18 = vadd.f32 %v4863_v37, %v4861_v26  ;;  %v4532_v37 = vadd.f32 %v4530_v10, %v4528_v38 }
 0x419   : > { %3830 = vrot.lane.b32.xlu1 %v3825_v53, %s11229_s29  ;;  %v4089_v19 = vadd.f32 %v10020_v0, %v4041_v7  ;;  %v4529_v0 = vmul.f32 %v10124_v34, %v11509_v9 }
 0x41a   : > { %v4671_v49 = vpop.permute.xlu0 %4670  ;;  %v4869_v2 = vrot.slane %v4865_v18, 4  ;;  %v5634_v18 = vld [vmem:[#allocation5 + $0x40] sm:$0xff] }
 0x41b   : > { %v4576_v43 = vpop.permute.xlu1 %4575  ;;  %v10095_v1 = vadd.f32 %v4671_v49, %v4604_v55  ;;  %v4046_v49 = vadd.f32 %v4045_v31, %v4044_v22 }
 0x41c   : > { %4814 = vrot.lane.b32.xlu0 %v4809_v16, %s11229_s29  ;;  %v4870_v58 = vsel %vm752_vm8, %v4868_v3, %v4869_v2  ;;  %v4531_v16 = vadd.f32 %v4529_v0, %v4527_v23  ;;  %v4580_v47 = vadd.f32 %v4576_v43, %v4532_v37  ;;  %v11531_v43 = vld [vmem:[#allocation64_spill] sm:$0xff]  ;;  %v11533_v23 = vld [vmem:[#allocation27_spill] sm:$0xff] }
 0x41d   : > { %4812 = vrot.lane.b32.xlu1 %v4808_v44, %s11229_s29  ;;  %v4058_v36 = vmul.f32 %v10105_v57, %v11531_v43 }
 0x41e   : > { %v4146_v59 = vpop.permute.xlu0 %4145  ;;  %v4579_v60 = vadd.f32 %v10074_v17, %v4531_v16 }
 0x41f   : > { %v4673_v4 = vpop.permute.xlu1 %4672  ;;  %v4151_v42 = vadd.f32 %v4146_v59, %v4088_v30 }
 0x420   : > { %v4677_v29 = vadd.f32 %v4673_v4, %v4605_v61  ;;  %4380 = vrot.lane.b32.xlu0 %v4379_v54, %s11229_s29  ;;  %v5633_v4 = vld [vmem:[#allocation5 + $0x18] sm:$0xff] }
 0x421   : > { %4840 = vrot.lane.b32.xlu1 %v4838_v50, %s11229_s29 }
 0x422   : > { %v4243_v39 = vpop.permute.xlu0 %4242 }
 0x423   : > { %v4148_v52 = vpop.permute.xlu1 %4147  ;;  %v4248_v11 = vadd.f32 %v4243_v39, %v10056_v32  ;;  %v11532_v39 = vld [vmem:[#allocation26_spill] sm:$0xff] }
 0x424   : > { %v4152_v46 = vadd.f32 %v4148_v52, %v4089_v19  ;;  %3887 = vrot.lane.b32.xlu0 %v3886_v63, %s11229_s29  ;;  %v4535_v19 = vmul.f32 %v10059_v8, %v11528_v62 }
 0x425   : > { %4382 = vrot.lane.b32.xlu1 %v4378_v33, %s11229_s29 }
 0x426   : > { %v4593_v32 = vpop.permute.xlu0 %4592 }
 0x427   : > { %v4245_v53 = vpop.permute.xlu1 %4244 }
 0x428   : > { %v4249_v55 = vadd.f32 %v4245_v53, %v10046_v6  ;;  %4871 = vrot.lane.b32.xlu0 %v4870_v58, %s11229_s29  ;;  %v4104_v6 = vadd.f32 %v10082_v13, %v4046_v49  ;;  %v11530_v13 = vld [vmem:[#allocation63_spill] sm:$0xff]  ;;  %v4029_v53 = vmul.f32 %v10101_v15, %v11532_v39  ;;  %v4031_v58 = vmul.f32 %v10105_v57, %v11533_v23 }
 0x429   : > { %3889 = vrot.lane.b32.xlu1 %v3885_v27, %s11229_s29  ;;  %v4056_v27 = vmul.f32 %v10101_v15, %v11530_v13  ;;  %v4057_v54 = vmul.f32 %v5633_v4, %v11530_v13 }
 0x42a   : > { %v10137_v44 = vpop.permute.xlu0 %4128  ;;  %v4033_v10 = vadd.f32 %v4031_v58, %v4029_v53 }
 0x42b   : > { %v4127_v41 = vpop.permute.xlu1 %4126  ;;  %v4060_v62 = vadd.f32 %v4058_v36, %v4056_v27  ;;  %v5637_v36 = vld [vmem:[#allocation6 + $0x18] sm:$0xff] }
 0x42d   : > { %4873 = vrot.lane.b32.xlu1 %v4869_v2, %s11229_s29  ;;  %v5636_v2 = vld [vmem:[#allocation5 + $0x30] sm:$0xff] }
 0x42e   : > { %v4637_v26 = vpop.permute.xlu0 %4636  ;;  %v4030_v0 = vmul.f32 %v5636_v2, %v11533_v23 }
 0x42f   : > { %v4165_v33 = vpop.permute.xlu1 %4164  ;;  %v10146_v51 = vadd.f32 %v4637_v26, %v4579_v60 }
 0x430   : > { %v4167_v48 = vadd.f32 %v4165_v33, %v4104_v6  ;;  %v4064_v6 = vrot.slane %v4060_v62, 4 }
 0x432   : > { %v4734_v30 = vpop.permute.xlu0 %4733 }
 0x433   : > { %v4639_v61 = vpop.permute.xlu1 %4638  ;;  %v10149_v45 = vadd.f32 %v4734_v30, %v10095_v1  ;;  %v4059_v1 = vmul.f32 %v5634_v18, %v11531_v43  ;;  %v4548_v18 = vmul.f32 %v5637_v36, %v11530_v13 }
 0x434   : > { %v10151_v59 = vadd.f32 %v4639_v61, %v4580_v47  ;;  %v11534_v47 = vld [vmem:[#allocation192_spill] sm:$0xff] }
 0x435   : > { %v4061_v31 = vadd.f32 %v4059_v1, %v4057_v54 }
 0x436   : > { %v4209_v9 = vpop.permute.xlu0 %4208 }
 0x437   : > { %v4736_v17 = vpop.permute.xlu1 %4735  ;;  %v10153_v50 = vadd.f32 %v4209_v9, %v4151_v42  ;;  %v4536_v42 = vmul.f32 %v10064_v28, %v11529_v24  ;;  %v4065_v26 = vrot.slane %v4061_v31, 4 }
 0x438   : > { %v10155_v56 = vadd.f32 %v4736_v17, %v4677_v29  ;;  %v5635_v29 = vld [vmem:[#allocation5 + $0x8] sm:$0xff] }
 0x439   : > { %v4028_v52 = vmul.f32 %v5635_v29, %v11532_v39  ;;  %v4537_v24 = vadd.f32 %v4536_v42, %v4535_v19  ;;  %v4066_v30 = vsel %vm752_vm8, %v4064_v6, %v4065_v26  ;;  %v4520_v42 = vmul.f32 %v10059_v8, %v11532_v39 }
 0x43a   : > { %v4306_v7 = vpop.permute.xlu0 %4305 }
 0x43b   : > { %v4211_v63 = vpop.permute.xlu1 %4210  ;;  %v4311_v3 = vadd.f32 %v4306_v7, %v4248_v11  ;;  %v4032_v38 = vadd.f32 %v4030_v0, %v4028_v52  ;;  %v4595_v60 = vadd.f32 %v4593_v32, %v4537_v24  ;;  %v5638_v7 = vld [vmem:[#allocation6 + $0x40] sm:$0xff] }
 0x43c   : > { %v10173_v22 = vadd.f32 %v4211_v63, %v4152_v46  ;;  %v4035_v46 = vadd.f32 %v4033_v10, %v11534_v47  ;;  %v4550_v19 = vmul.f32 %v5638_v7, %v11531_v43 }
 0x43d   : > { %v4034_v57 = vadd.f32 %v4032_v38, %v11534_v47 }
 0x43e   : > { %v10175_v16 = vpop.permute.xlu0 %4617  ;;  %v4070_v4 = vadd.f32 %v4065_v26, %v4035_v46  ;;  %v10197_v63 = vadd.f32 %v4550_v19, %v4548_v18 }
 0x43f   : > { %v4308_v49 = vpop.permute.xlu1 %4307  ;;  %v4069_v27 = vadd.f32 %v4066_v30, %v4034_v57 }
 0x440   : > { %v4312_v11 = vadd.f32 %v4308_v49, %v4249_v55  ;;  %v4133_v54 = vadd.f32 %v10137_v44, %v4070_v4  ;;  %v4556_v31 = vrot.slane %v10197_v63, 4 }
 0x441   : > { %v4132_v55 = vadd.f32 %v4127_v41, %v4069_v27 }
 0x442   : > { %v4656_v33 = vpop.permute.xlu0 %4655 }
 0x443   : > { %v4620_v37 = vpop.permute.xlu1 %4619  ;;  %v10177_v15 = vadd.f32 %v4656_v33, %v4595_v60 }
 0x446   : > { %v3815_v61 = vpop.permute.xlu0 %3814 }
 0x447   : > { %v3813_v9 = vpop.permute.xlu1 %3812  ;;  %v3819_v17 = vadd.f32 %v3815_v61, %v9954_v35  ;;  %v4522_v35 = vmul.f32 %v10064_v28, %v11533_v23 }
 0x448   : > { %v3818_v32 = vadd.f32 %v3813_v9, %v9957_v25 }
 0x449   : > { %v4524_v2 = vadd.f32 %v4522_v35, %v4520_v42 }
 0x44a   : > { %v4228_v1 = vpop.permute.xlu0 %4227 }
 0x44b   : > { %v4193_v29 = vpop.permute.xlu1 %4192  ;;  %v10191_v52 = vadd.f32 %v4228_v1, %v4167_v48  ;;  %v4526_v48 = vadd.f32 %v4524_v2, %v11534_v47 }
 0x44c   : > { %v10193_v25 = vadd.f32 %v4193_v29, %v4132_v55  ;;  %v10195_v41 = vadd.f32 %v4193_v29, %v4133_v54 }
 0x44d   : > { %v4561_v60 = vadd.f32 %v4556_v31, %v4526_v48 }
 0x44e   : > { %v4702_v44 = vpop.permute.xlu0 %4701 }
 0x44f   : > { %v4700_v0 = vpop.permute.xlu1 %4699  ;;  %v10200_v53 = vadd.f32 %v4702_v44, %v10151_v59  ;;  %v4624_v59 = vadd.f32 %v4620_v37, %v4561_v60 }
 0x450   : > { %v10203_v58 = vadd.f32 %v4700_v0, %v10146_v51 }
 0x452   : > { %v4799_v62 = vpop.permute.xlu0 %4798 }
 0x453   : > { %v4797_v24 = vpop.permute.xlu1 %4796  ;;  %v4803_v49 = vadd.f32 %v4799_v62, %v10155_v56 }
 0x454   : > { %v4802_v38 = vadd.f32 %v4797_v24, %v10149_v45 }
 0x456   : > { %v4362_v10 = vpop.permute.xlu0 %4361 }
 0x457   : > { %v4275_v6 = vpop.permute.xlu1 %4274  ;;  %v4367_v26 = vadd.f32 %v4362_v10, %v4311_v3 }
 0x458   : > { %v4277_v29 = vadd.f32 %v4275_v6, %v10153_v50 }
 0x459   : > { %v4399_v30 = vrot.slane %v4367_v26, 3 }
 0x45a   : > { %v10211_v33 = vpop.permute.xlu0 %4683 }
 0x45b   : > { %v4364_v51 = vpop.permute.xlu1 %4363  ;;  %v10214_v57 = vadd.f32 %v10211_v33, %v4624_v59 }
 0x45c   : > { %v4368_v46 = vadd.f32 %v4364_v51, %v4312_v11 }
 0x45e   : > { %v4400_v61 = vrot.slane %v4368_v46, 3  ;;  %v3869_v9 = vpop.permute.xlu0 %3868 }
 0x45f   : > { %v10216_v56 = vpop.permute.xlu1 %4718  ;;  %v3874_v27 = vadd.f32 %v3869_v9, %v3818_v32  ;;  %v4278_v32 = vadd.f32 %v4275_v6, %v10173_v22 }
 0x460   : > { %v4401_v45 = vsel %vm856_vm6, %v4399_v30, %v4400_v61 }
 0x461   : > { %v3906_v3 = vrot.slane %v3874_v27, 3 }
 0x462   : > { %v10219_v4 = vpop.permute.xlu0 %4261 }
 0x463   : > { %v3871_v55 = vpop.permute.xlu1 %3870 }
 0x464   : > { %v3875_v37 = vadd.f32 %v3871_v55, %v3819_v17  ;;  %v4547_v55 = vmul.f32 %v10059_v8, %v11530_v13 }
 0x466   : > { %v3907_v54 = vrot.slane %v3875_v37, 3  ;;  %v4291_v36 = vpop.permute.xlu0 %4290  ;;  %v4549_v37 = vmul.f32 %v10064_v28, %v11531_v43 }
 0x467   : > { %v10221_v18 = vpop.permute.xlu1 %4263 }
 0x468   : > { %v3908_v1 = vsel %vm856_vm6, %v3906_v3, %v3907_v54  ;;  %v4268_v63 = vadd.f32 %v10221_v18, %v10195_v41 }
 0x46a   : > { %v4853_v11 = vpop.permute.xlu0 %4852 }
 0x46b   : > { %v4766_v7 = vpop.permute.xlu1 %4765  ;;  %v4858_v19 = vadd.f32 %v4853_v11, %v4802_v38 }
 0x46d   : > { %v4890_v2 = vrot.slane %v4858_v19, 3  ;;  %v4519_v19 = vmul.f32 %v10120_v14, %v11532_v39 }
 0x46e   : > { %v4338_v42 = vpop.permute.xlu0 %4337 }
 0x46f   : > { %v4855_v35 = vpop.permute.xlu1 %4854  ;;  %v4343_v17 = vadd.f32 %v4338_v42, %v4277_v29  ;;  %v4521_v42 = vmul.f32 %v10124_v34, %v11533_v23  ;;  %v4769_v29 = vadd.f32 %v4766_v7, %v10200_v53 }
 0x470   : > { %v4859_v44 = vadd.f32 %v4855_v35, %v4803_v49  ;;  %v4551_v35 = vadd.f32 %v4549_v37, %v4547_v55 }
 0x471   : > { %v4390_v60 = vrot.slane %v4343_v17, 3 }
 0x472   : > { %v4891_v0 = vrot.slane %v4859_v44, 3  ;;  %v10226_v62 = vpop.permute.xlu0 %4752 }
 0x473   : > { %v4340_v48 = vpop.permute.xlu1 %4339 }
 0x474   : > { %v10228_v24 = vadd.f32 %v4340_v48, %v4278_v32  ;;  %v4892_v10 = vsel %vm856_vm6, %v4890_v2, %v4891_v0  ;;  %v4721_v48 = vadd.f32 %v10216_v56, %v10177_v15 }
 0x476   : > { %v4391_v38 = vrot.slane %v10228_v24, 3  ;;  %v4782_v59 = vpop.permute.xlu0 %4781 }
 0x477   : > { %v10232_v26 = vpop.permute.xlu1 %4754 }
 0x478   : > { %v4392_v50 = vsel %vm856_vm6, %v4390_v60, %v4391_v38 }
 0x47a   : > { %v3847_v22 = vpop.permute.xlu0 %3846 }
 0x47b   : > { %v3845_v49 = vpop.permute.xlu1 %3844  ;;  %v10238_v6 = vadd.f32 %v3847_v22, %v9988_v40  ;;  %v4293_v40 = vadd.f32 %v4291_v36, %v10191_v52  ;;  %v4523_v52 = vadd.f32 %v4521_v42, %v4519_v19  ;;  %v4555_v36 = vrot.slane %v4551_v35, 4 }
 0x47c   : > { %v3850_v51 = vadd.f32 %v3845_v49, %v9986_v21  ;;  %v4768_v21 = vadd.f32 %v4766_v7, %v10203_v58  ;;  %v4267_v7 = vadd.f32 %v10219_v4, %v10193_v25 }
 0x47d   : > { %v3898_v46 = vrot.slane %v10238_v6, 3  ;;  %v4525_v39 = vadd.f32 %v4523_v52, %v11534_v47  ;;  %v4557_v53 = vsel %vm752_vm8, %v4555_v36, %v4556_v31 }
 0x47e   : > { %v3897_v30 = vrot.slane %v3850_v51, 3  ;;  %v4324_v61 = vpop.permute.xlu0 %4323 }
 0x47f   : > { %v4322_v9 = vpop.permute.xlu1 %4321  ;;  %v4560_v60 = vadd.f32 %v4557_v53, %v4525_v39  ;;  %v4328_v37 = vadd.f32 %v4324_v61, %v4268_v63 }
 0x480   : > { %v3899_v27 = vsel %vm856_vm6, %v3897_v30, %v3898_v46  ;;  %v4327_v22 = vadd.f32 %v4322_v9, %v4267_v7 }
 0x481   : > { %v4623_v51 = vadd.f32 %v10175_v16, %v4560_v60 }
 0x482   : > { %v4829_v3 = vpop.permute.xlu0 %4828 }
 0x483   : > { %v4350_v54 = vpop.permute.xlu1 %4349  ;;  %v4834_v13 = vadd.f32 %v4829_v3, %v4768_v21  ;;  %v4686_v30 = vadd.f32 %v10211_v33, %v4623_v51 }
 0x484   : > { %v4352_v11 = vadd.f32 %v4350_v54, %v4293_v40 }
 0x485   : > { %v4881_v32 = vrot.slane %v4834_v13, 3 }
 0x486   : > { %v4403_v8 = vadd.f32 %v4401_v45, %v4352_v11  ;;  %v3829_v44 = vpop.permute.xlu0 %3828 }
 0x487   : > { %v4831_v28 = vpop.permute.xlu1 %4830  ;;  %v3834_v25 = vadd.f32 %v3829_v44, %v9972_v5 }
 0x488   : > { %v10256_v43 = vadd.f32 %v4831_v28, %v4769_v29  ;;  %v4405_v55 = vrot.slane %v4403_v8, 6 }
 0x48a   : > { %v4882_v58 = vrot.slane %v10256_v43, 3  ;;  %v3857_v2 = vpop.permute.xlu0 %3856 }
 0x48b   : > { %v3831_v0 = vpop.permute.xlu1 %3830  ;;  %v3859_v14 = vadd.f32 %v3857_v2, %v9984_v20  ;;  %v4784_v20 = vadd.f32 %v4782_v59, %v4721_v48  ;;  %v4758_v59 = vadd.f32 %v10226_v62, %v4686_v30  ;;  %v4759_v62 = vadd.f32 %v10232_v26, %v10214_v57 }
 0x48c   : > { %v4883_v34 = vsel %vm856_vm6, %v4881_v32, %v4882_v58  ;;  %v3835_v18 = vadd.f32 %v3831_v0, %v9969_v12 }
 0x48d   : > { %v3910_v23 = vadd.f32 %v3908_v1, %v3859_v14 }
 0x48e   : > { %v4815_v45 = vpop.permute.xlu0 %4814 }
 0x48f   : > { %v4813_v17 = vpop.permute.xlu1 %4812  ;;  %v3912_v54 = vrot.slane %v3910_v23, 6  ;;  %v4819_v13 = vadd.f32 %v4815_v45, %v4759_v62 }
 0x490   : > { %v4818_v21 = vadd.f32 %v4813_v17, %v4758_v59 }
 0x492   : > { %v4381_v49 = vpop.permute.xlu0 %4380 }
 0x493   : > { %v4841_v47 = vpop.permute.xlu1 %4840  ;;  %v4386_v1 = vadd.f32 %v4381_v49, %v4327_v22 }
 0x494   : > { %v4843_v31 = vadd.f32 %v4841_v47, %v4784_v20 }
 0x495   : > { %v4395_v4 = vadd.f32 %v4392_v50, %v4386_v1 }
 0x496   : > { %v4894_v15 = vadd.f32 %v4892_v10, %v4843_v31  ;;  %v3888_v56 = vpop.permute.xlu0 %3887 }
 0x497   : > { %v4407_v9 = vadd.f32 %v4405_v55, %v4395_v4  ;;  %v4383_v40 = vpop.permute.xlu1 %4382  ;;  %v3893_v16 = vadd.f32 %v3888_v56, %v3834_v25 }
 0x498   : > { %v4387_v3 = vadd.f32 %v4383_v40, %v4328_v37  ;;  %v4896_v35 = vrot.slane %v4894_v15, 6 }
 0x499   : > { %v5423_v11 = vmul.f32 -1.442695, %v4407_v9  ;;  %v3902_v41 = vadd.f32 %v3899_v27, %v3893_v16 }
 0x49a   : > { %v4396_v33 = vadd.f32 %v4391_v38, %v4387_v3  ;;  %v4872_v5 = vpop.permute.xlu0 %4871 }
 0x49b   : > { %5567 = vpow2.f32 %v5423_v11  ;;  %v3914_v50 = vadd.f32 %v3912_v54, %v3902_v41  ;;  %v3890_v10 = vpop.permute.xlu1 %3889  ;;  %v4877_v61 = vadd.f32 %v4872_v5, %v4818_v21 }
 0x49c   : > { %v4408_v19 = vadd.f32 %v4405_v55, %v4396_v33  ;;  %v3894_v42 = vadd.f32 %v3890_v10, %v3835_v18 }
 0x49d   : > { %v5406_v29 = vmul.f32 -1.442695, %v3914_v50  ;;  %v4886_v8 = vadd.f32 %v4883_v34, %v4877_v61 }
 0x49e   : > { %v5424_v27 = vmul.f32 -1.442695, %v4408_v19  ;;  %v3903_v12 = vadd.f32 %v3898_v46, %v3894_v42 }
 0x49f   : > { %5569 = vpow2.f32 %v5406_v29  ;;  %v4898_v24 = vadd.f32 %v4896_v35, %v4886_v8  ;;  %v4874_v38 = vpop.permute.xlu1 %4873 }
 0x4a0   : > { %5571 = vpow2.f32 %v5424_v27  ;;  %v3915_v44 = vadd.f32 %v3912_v54, %v3903_v12  ;;  %v4878_v28 = vadd.f32 %v4874_v38, %v4819_v13 }
 0x4a1   : > { %v5440_v43 = vmul.f32 -1.442695, %v4898_v24 }
 0x4a2   : > { %v5407_v52 = vmul.f32 -1.442695, %v3915_v44  ;;  %v4887_v36 = vadd.f32 %v4882_v58, %v4878_v28 }
 0x4a3   : > { %5573 = vpow2.f32 %v5440_v43 }
 0x4a4   : > { %5575 = vpow2.f32 %v5407_v52  ;;  %v4899_v57 = vadd.f32 %v4896_v35, %v4887_v36 }
 0x4a5   : > { %v5568_v26 = vpop.eup %5567 }
 0x4a6   : > { %v4415_v32 = vadd.f32 1.0, %v5568_v26  ;;  %v5441_v2 = vmul.f32 -1.442695, %v4899_v57 }
 0x4a8   : > { %5577 = vrcp.f32 %v4415_v32 }
 0x4a9   : > { %v5570_v0 = vpop.eup %5569  ;;  %5579 = vpow2.f32 %v5441_v2 }
 0x4aa   : > { %v5572_v6 = vpop.eup %5571  ;;  %v3922_v46 = vadd.f32 1.0, %v5570_v0 }
 0x4ab   : > { %v4416_v14 = vadd.f32 1.0, %v5572_v6 }
 0x4ac   : > { %5581 = vrcp.f32 %v3922_v46 }
 0x4ad   : > { %v5574_v34 = vpop.eup %5573  ;;  %5583 = vrcp.f32 %v4416_v14 }
 0x4ae   : > { %v5576_v39 = vpop.eup %5575  ;;  %v4906_v58 = vadd.f32 1.0, %v5574_v34 }
 0x4af   : > { %v3923_v23 = vadd.f32 1.0, %v5576_v39 }
 0x4b0   : > { %5585 = vrcp.f32 %v4906_v58 }
 0x4b1   : > { %5587 = vrcp.f32 %v3923_v23 }
 0x4b2   : > { %v5578_v53 = vpop.eup %5577 }
 0x4b3   : > { %v5580_v45 = vpop.eup %5579  ;;  %4423 = vrot.lane.b32.xlu0 %v5578_v53, %s10880_s2 }
 0x4b4   : > { %v4907_v7 = vadd.f32 1.0, %v5580_v45 }
 0x4b6   : > { %v5582_v17 = vpop.eup %5581  ;;  %5589 = vrcp.f32 %v4907_v7 }
 0x4b7   : > { %v5584_v48 = vpop.eup %5583  ;;  %3930 = vrot.lane.b32.xlu0 %v5582_v17, %s10880_s2 }
 0x4b8   : > { %4425 = vrot.lane.b32.xlu1 %v5584_v48, %s10880_s2 }
 0x4b9   : > { %5667 = shalt.err (!%p5664_p2)
}
 0x4ba   : > { %s5668_s17 = scalar_lea.hbm %s10290_s23, 256  ;;  %s5672_s13 = scalar_lea.hbm %s10514_s8, 512 }
 0x4bb   : > { %p5669_p3 = scmp.ne.s32.totalorder %s10290_s23, %s5668_s17  ;;  %p5673_p8 = scmp.lt.u32.totalorder %s10290_s23, %s10514_s8 }
 0x4bc   : > { %p5674_p11 = scmp.lt.u32.totalorder %s5672_s13, %s5668_s17  ;;  %p5676_p10 = scmp.lt.u32.totalorder %s5668_s17, %s10290_s23 }
 0x4bd   : > { %p5670_p4 = pnand %p5669_p3, %p5961_p5 }
 0x4be   : > { %p5675_p9 = por %p5674_p11, %p5673_p8 }
 0x4bf   : > { %p5671_p7 = pneg %p5670_p4 }
 0x4c0   : > { %p5677_p12 = por %p5676_p10, %p5675_p9 }
 0x4c2   : > { %p5678_p13 = pnand %p5677_p12, %p5671_p7 }
 0x4c4   : > { %5681 = shalt.err (!%p5678_p13)
}
 0x4c5   : > { %s5852_s12 = smov 128   ;;  %s5853_s26 = smov 8   ;;  %v5586_v60 = vpop.eup %5585 }
 0x4c6   : > { %5468 = dma.vmem_to_hbm [thread:$0]  (%p5961_p5), %s10295_s16, 256, %s10290_s23, %s10299_s0, %s5852_s12, %s5852_s12, %s5853_s26   ;;  %v5588_v22 = vpop.eup %5587 }
 0x4c7   : > { %4914 = vrot.lane.b32.xlu0 %v5586_v60, %s10880_s2  ;;  %s10332_s17 = scalar_lea.hbm %s10513_s7, %s5461_s21  ;;  %3932 = vrot.lane.b32.xlu1 %v5588_v22, %s10880_s2  ;;  %s4956_s15 = sshll.u32 %s7976_s24, 4  ;;  %s10336_s15 = int_to_ptr.vmem [resolvable:$true] %s4956_s15 }
 0x4c8   : > { %s4923_s25 = scalar_lea.sflag [#allocation9], %s7950_s3  ;;  %s5682_s23 = scalar_lea.vmem %s10336_s15, 256 }
 0x4c9   : > { %p5683_p0 = scmp.ne.s32.totalorder %s10336_s15, %s5682_s23  ;;  %s5854_s16 = smov [#allocation11]  }
 0x4ca   : > { %s5686_s13 = sshll.u32 %s5854_s16, 4  ;;  %s5687_s13 = int_to_ptr.vmem [resolvable:$false] %s5686_s13 }
 0x4cb   : > { %p5684_p1 = pnand %p5683_p0, %p5961_p5  ;;  %s5688_s27 = scalar_lea.vmem %s5687_s13, 512 }
 0x4cc   : > { %p5689_p3 = scmp.lt.s32.totalorder %s10336_s15, %s5687_s13  ;;  %p5690_p4 = scmp.lt.s32.totalorder %s5688_s27, %s5682_s23 }
 0x4cd   : > { %p5685_p2 = pneg %p5684_p1 }
 0x4ce   : > { %p5691_p7 = por %p5690_p4, %p5689_p3 }
 0x4d0   : > { %p5692_p8 = pnand %p5691_p7, %p5685_p2 }
 0x4d2   : > { %5695 = shalt.err (!%p5692_p8)
}
 0x4d3   : > { %s5696_s24 = scalar_lea.hbm %s10332_s17, 256  ;;  %s5700_s18 = scalar_lea.hbm %s10513_s7, 512 }
 0x4d4   : > { %p5697_p11 = scmp.ne.s32.totalorder %s10332_s17, %s5696_s24  ;;  %p5701_p12 = scmp.lt.u32.totalorder %s10332_s17, %s10513_s7 }
 0x4d5   : > { %p5702_p13 = scmp.lt.u32.totalorder %s5700_s18, %s5696_s24  ;;  %p5704_p1 = scmp.lt.u32.totalorder %s5696_s24, %s10332_s17 }
 0x4d6   : > { %p5698_p9 = pnand %p5697_p11, %p5961_p5 }
 0x4d7   : > { %p5703_p0 = por %p5702_p13, %p5701_p12 }
 0x4d8   : > { %p5699_p10 = pneg %p5698_p9 }
 0x4d9   : > { %p5705_p2 = por %p5704_p1, %p5703_p0 }
 0x4db   : > { %p5706_p3 = pnand %p5705_p2, %p5699_p10 }
 0x4dd   : > { %5709 = shalt.err (!%p5706_p3)
}
 0x4de   : > { %5467 = dma.vmem_to_hbm [thread:$0]  (%p5961_p5), %s10336_s15, 256, %s10332_s17, %s4923_s25, %s5852_s12, %s5852_s12, %s5853_s26   ;;  %v5590_v20 = vpop.eup %5589  ;;  %vm3936_vm14 = vcmask 64514   ;;  %vm3938_vm15 = vcmask 58368  }
 0x4df   : > { %4916 = vrot.lane.b32.xlu1 %v5590_v20, %s10880_s2  ;;  %s10367_s23 = sshll.u32 %s7950_s3, 3  ;;  %s10372_s27 = sshll.u32 %s5942_s1, 7 }
 0x4e0   : > { %s482_s13 = scalar_lea.vmem [#allocation15], %s10367_s23  ;;  %s10378_s2 = scalar_lea.hbm %s10516_s10, %s10372_s27 }
 0x4e1   : > { %s5001_s24 = sshll.u32 %s482_s13, 4  ;;  %s10383_s3 = scalar_lea.vmem [#allocation14], %s10367_s23  ;;  %s10380_s24 = int_to_ptr.vmem [resolvable:$true] %s5001_s24 }
 0x4e2   : > { %s4988_s17 = sshll.u32 %s10383_s3, 4  ;;  %s10391_s15 = scalar_lea.sflag [#allocation16], %s4927_s30  ;;  %s10417_s17 = int_to_ptr.vmem [resolvable:$true] %s4988_s17 }
 0x4e3   : > { %s5710_s25 = scalar_lea.vmem %s10380_s24, 128  ;;  %s5855_s21 = smov [#allocation15]  }
 0x4e4   : > { %p5711_p4 = scmp.ne.s32.totalorder %s10380_s24, %s5710_s25  ;;  %s5714_s29 = sshll.u32 %s5855_s21, 4  ;;  %s5715_s29 = int_to_ptr.vmem [resolvable:$false] %s5714_s29 }
 0x4e5   : > { %s5716_s18 = scalar_lea.vmem %s5715_s29, 256  ;;  %p5717_p11 = scmp.lt.s32.totalorder %s10380_s24, %s5715_s29 }
 0x4e6   : > { %p5712_p7 = pnand %p5711_p4, %p5961_p5  ;;  %p5718_p9 = scmp.lt.s32.totalorder %s5716_s18, %s5710_s25 }
 0x4e8   : > { %p5713_p8 = pneg %p5712_p7  ;;  %p5719_p10 = por %p5718_p9, %p5717_p11 }
 0x4ea   : > { %p5720_p12 = pnand %p5719_p10, %p5713_p8 }
 0x525   : > { %v4424_v49 = vpop.permute.xlu0 %4423 }
 0x526   : > { %4429 = vst.msk [vmem:[%s482_s13 - $0x2] sm:$0xfc] %vm3936_vm14, %v4424_v49 }
 0x529   : > { %v3931_v51 = vpop.permute.xlu0 %3930 }
 0x52a   : > { %v4426_v47 = vpop.permute.xlu1 %4425  ;;  %3937 = vst.msk [vmem:[%s10383_s3 - $0x2] sm:$0xfc] %vm3936_vm14, %v3931_v51 }
 0x52b   : > { %4430 = vst.msk [vmem:[%s482_s13 + $0x6] sm:$0x3] %vm3938_vm15, %v4426_v47 }
 0x52c   : > { %5723 = shalt.err (!%p5720_p12)
}
 0x52d   : > { %s5724_s1 = scalar_lea.hbm %s10378_s2, 128  ;;  %s5728_s16 = scalar_lea.hbm %s10516_s10, 256 }
 0x52e   : > { %p5725_p13 = scmp.ne.s32.totalorder %s10378_s2, %s5724_s1  ;;  %p5729_p2 = scmp.lt.u32.totalorder %s10378_s2, %s10516_s10 }
 0x52f   : > { %p5730_p3 = scmp.lt.u32.totalorder %s5728_s16, %s5724_s1  ;;  %p5732_p7 = scmp.lt.u32.totalorder %s5724_s1, %s10378_s2 }
 0x530   : > { %p5726_p0 = pnand %p5725_p13, %p5961_p5 }
 0x531   : > { %p5731_p4 = por %p5730_p3, %p5729_p2 }
 0x532   : > { %p5727_p1 = pneg %p5726_p0 }
 0x533   : > { %p5733_p8 = por %p5732_p7, %p5731_p4 }
 0x535   : > { %p5734_p11 = pnand %p5733_p8, %p5727_p1 }
 0x537   : > { %5737 = shalt.err (!%p5734_p11)
}
 0x538   : > { %5470 = dma.vmem_to_hbm [thread:$0]  (%p5961_p5), %s10380_s24, 128, %s10378_s2, %s10391_s15  }
 0x539   : > { %v4915_v1 = vpop.permute.xlu0 %4914  ;;  %s10423_s21 = scalar_lea.hbm %s10515_s9, %s10372_s27  ;;  %v3933_v63 = vpop.permute.xlu1 %3932  ;;  %s10426_s29 = scalar_lea.vmem [#allocation17], %s10367_s23 }
 0x53a   : > { %4920 = vst.msk [vmem:[%s10426_s29 - $0x2] sm:$0xfc] %vm3936_vm14, %v4915_v1  ;;  %s5014_s24 = sshll.u32 %s10426_s29, 4  ;;  %s5738_s2 = scalar_lea.vmem %s10417_s17, 128  ;;  %s10455_s24 = int_to_ptr.vmem [resolvable:$true] %s5014_s24 }
 0x53b   : > { %3939 = vst.msk [vmem:[%s10383_s3 + $0x6] sm:$0x3] %vm3938_vm15, %v3933_v63  ;;  %p5739_p9 = scmp.ne.s32.totalorder %s10417_s17, %s5738_s2  ;;  %s5856_s18 = smov [#allocation14]  }
 0x53c   : > { %s5742_s1 = sshll.u32 %s5856_s18, 4  ;;  %s5743_s1 = int_to_ptr.vmem [resolvable:$false] %s5742_s1 }
 0x53d   : > { %p5740_p10 = pnand %p5739_p9, %p5961_p5  ;;  %s5744_s30 = scalar_lea.vmem %s5743_s1, 256 }
 0x53e   : > { %p5745_p13 = scmp.lt.s32.totalorder %s10417_s17, %s5743_s1  ;;  %p5746_p0 = scmp.lt.s32.totalorder %s5744_s30, %s5738_s2 }
 0x53f   : > { %p5741_p12 = pneg %p5740_p10 }
 0x540   : > { %p5747_p1 = por %p5746_p0, %p5745_p13 }
 0x542   : > { %p5748_p2 = pnand %p5747_p1, %p5741_p12 }
 0x544   : > { %5751 = shalt.err (!%p5748_p2)
}
 0x545   : > { %s5752_s23 = scalar_lea.hbm %s10423_s21, 128  ;;  %s5756_s16 = scalar_lea.hbm %s10515_s9, 256 }
 0x546   : > { %p5753_p3 = scmp.ne.s32.totalorder %s10423_s21, %s5752_s23  ;;  %p5757_p8 = scmp.lt.u32.totalorder %s10423_s21, %s10515_s9 }
 0x547   : > { %p5758_p11 = scmp.lt.u32.totalorder %s5756_s16, %s5752_s23  ;;  %p5760_p10 = scmp.lt.u32.totalorder %s5752_s23, %s10423_s21 }
 0x548   : > { %p5754_p4 = pnand %p5753_p3, %p5961_p5 }
 0x549   : > { %p5759_p9 = por %p5758_p11, %p5757_p8 }
 0x54a   : > { %p5755_p7 = pneg %p5754_p4 }
 0x54b   : > { %p5761_p12 = por %p5760_p10, %p5759_p9 }
 0x54d   : > { %p5762_p13 = pnand %p5761_p12, %p5755_p7 }
 0x54f   : > { %5765 = shalt.err (!%p5762_p13)
}
 0x550   : > { %5469 = dma.vmem_to_hbm [thread:$0]  (%p5961_p5), %s10417_s17, 128, %s10423_s21, %s10299_s0  }
 0x551   : > { %s10461_s2 = scalar_lea.hbm %s10517_s11, %s10372_s27  ;;  %v4917_v31 = vpop.permute.xlu1 %4916  ;;  %s5766_s18 = scalar_lea.vmem %s10455_s24, 128 }
 0x552   : > { %4921 = vst.msk [vmem:[%s10426_s29 + $0x6] sm:$0x3] %vm3938_vm15, %v4917_v31  ;;  %p5767_p0 = scmp.ne.s32.totalorder %s10455_s24, %s5766_s18  ;;  %s5857_s1 = smov [#allocation17]  }
 0x553   : > { %s5770_s0 = sshll.u32 %s5857_s1, 4  ;;  %s5771_s0 = int_to_ptr.vmem [resolvable:$false] %s5770_s0 }
 0x554   : > { %p5768_p1 = pnand %p5767_p0, %p5961_p5  ;;  %s5772_s17 = scalar_lea.vmem %s5771_s0, 256 }
 0x555   : > { %p5773_p3 = scmp.lt.s32.totalorder %s10455_s24, %s5771_s0  ;;  %p5774_p4 = scmp.lt.s32.totalorder %s5772_s17, %s5766_s18 }
 0x556   : > { %p5769_p2 = pneg %p5768_p1 }
 0x557   : > { %p5775_p7 = por %p5774_p4, %p5773_p3 }
 0x559   : > { %p5776_p8 = pnand %p5775_p7, %p5769_p2 }
 0x55b   : > { %5779 = shalt.err (!%p5776_p8)
}
 0x55c   : > { %s5780_s27 = scalar_lea.hbm %s10461_s2, 128  ;;  %s5784_s30 = scalar_lea.hbm %s10517_s11, 256 }
 0x55d   : > { %p5781_p11 = scmp.ne.s32.totalorder %s10461_s2, %s5780_s27  ;;  %p5785_p12 = scmp.lt.u32.totalorder %s10461_s2, %s10517_s11 }
 0x55e   : > { %p5786_p13 = scmp.lt.u32.totalorder %s5784_s30, %s5780_s27  ;;  %p5788_p1 = scmp.lt.u32.totalorder %s5780_s27, %s10461_s2 }
 0x55f   : > { %p5782_p9 = pnand %p5781_p11, %p5961_p5 }
 0x560   : > { %p5787_p0 = por %p5786_p13, %p5785_p12 }
 0x561   : > { %p5783_p10 = pneg %p5782_p9 }
 0x562   : > { %p5789_p2 = por %p5788_p1, %p5787_p0 }
 0x564   : > { %p5790_p3 = pnand %p5789_p2, %p5783_p10 }
 0x566   : > { %5793 = shalt.err (!%p5790_p3)
}
 0x567   : > { %5471 = dma.vmem_to_hbm [thread:$0]  (%p5961_p5), %s10455_s24, 128, %s10461_s2, %s10391_s15  }
 0x568 PF: > { %p5499_p4 = scmp.ge.s32.totalorder %s5840_s22, 2  ;;  %s5026_s16 = sand.u32 1, %s5828_s19  }
 0x569   : > { %s5027_s13 = scalar_lea.sflag [#allocation9], %s5026_s16 }
 0x56a   : > { %p5482_p7 = pnand %p5499_p4, %p5965_p6 }
 0x56c   : > { %5815 = dma.done.wait (!%p5482_p7), %s5027_s13, 256  }
 0x56d   : > { %5817 = vsyncadd (!%p5482_p7), %s5027_s13, 4294967040  ;;  %s11536_s12 = sadd.s32 4294967294, %s5840_s22  }
 0x56e   : > { %s5035_s26 = sand.u32 1, %s11536_s12  }
 0x56f   : > { %s5036_s25 = scalar_lea.sflag [#allocation13], %s5035_s26 }
 0x570   : > { %5819 = dma.done.wait (!%p5482_p7), %s5036_s25, 384  }
 0x571   : > { %5821 = vsyncadd (!%p5482_p7), %s5036_s25, 4294966912  ;;  %s5054_s28 = scalar_lea.sflag [#allocation16], %s5035_s26 }
 0x572   : > { %5823 = dma.done.wait (!%p5482_p7), %s5054_s28, 256  }
 0x573   : > { %5825 = vsyncadd (!%p5482_p7), %s5054_s28, 4294967040  ;;  %s11537_s22 = sld [smem:[#allocation23_spill]]  ;;  %s11538_s15 = sld [smem:[#allocation22_spill]] }
 0x574   : > { %s11539_s21 = sld [smem:[#allocation24_spill]]  ;;  %s11540_s19 = smov %s5832_s20 }
 0x579   : > { %p30_p5 = scmp.ge.s32.totalorder %s11537_s22, 4   ;;  %s11541_s20 = smov %s11538_s15 }
 0x57b   :  { %32 = sbr.rel (!%p30_p5) target bundleno = 13 (0xd), region = 211 }
 0x582   :  { %5068 = vsyncpa [#allocation9], 1 }
 0x583   :  { %5070 = vsyncpa [#allocation9 + $0x1], 1 }
 0x584   :  { %5071 = vsyncpa [#allocation13], 1 }
 0x585   :  { %5073 = vsyncpa [#allocation13 + $0x1], 1 }
 0x586   :  { %5074 = vsyncpa [#allocation16], 1 }
 0x587   :  { %5076 = vsyncpa [#allocation16 + $0x1], 1 }
 0x588   :  { %5077 = vsyncpa [#allocation10], 1 }
 0x589   :  { %5079 = vsyncpa [#allocation10 + $0x1], 1 }

</bundles_post_ra>
